<compile_context>
chip_gen: v7x
topology: tpu7x:2x2x1
jax: 0.10.0
libtpu: 0.0.40
codegen_flags: <defaults>
</compile_context>

<pallas_src>
import functools

import numpy as np
import jax
import jax.numpy as jnp
from jax.experimental import pallas as pl
from jax.experimental.pallas import tpu as pltpu


# dtype of the packed feature stream / weight table fed to the MXU.
# TODO(synk): on v6e/v7x split the table into a bf16 conv part and an f32
# window-statistics part (sum x / sum x^2 / count must stay f32) for ~2x
# HBM + MXU throughput; epilogue stays f32.
_MATMUL_DTYPE = jnp.float32

# Rows of the flattened padded output processed per grid step (multiple of 128).
# Per-step VMEM (2x halo'd input + im2col slab + result + 2x output blocks) is
# only a few MiB at these channel counts, so 2048 keeps the ~0.35us/step grid
# overhead and the redundant halo DMA small.
# TODO(synk): for very large H*W the flat halo (~(K-1)*Hp*Wp rows) dominates;
# tile H/W as well and/or keep a rolling halo buffer instead of re-DMAing it.
_CHUNK = 2048


def _round_up(x, m):
    return (x + m - 1) // m * m


def _vmem_limit_bytes():
    """Generation-aware scoped-VMEM limit (v7x only has 64 MiB per core)."""
    cap = 64 * 1024 * 1024                       # conservative default (v7x)
    try:
        cap = int(pltpu.get_tpu_info().vmem_capacity_bytes)
    except Exception:
        pass
    return min(cap * 3 // 5, 100 * 1024 * 1024)


# --------------------------------------------------------------------------
# Kernel 1: tiled per-channel moment reduction (used twice -> two-pass,
# numerically stable batch-norm mean / unbiased variance).
# --------------------------------------------------------------------------
def _col_moments_kernel(x_ref, shift_ref, s_ref, ss_ref):
    @pl.when(pl.program_id(0) == 0)
    def _init():
        s_ref[...] = jnp.zeros_like(s_ref)
        ss_ref[...] = jnp.zeros_like(ss_ref)

    xc = x_ref[...].astype(jnp.float32) - shift_ref[...]
    s_ref[...] += jnp.sum(xc, axis=0, keepdims=True)
    ss_ref[...] += jnp.sum(xc * xc, axis=0, keepdims=True)


def _col_moments(x2d, shift):
    n, c = x2d.shape
    tile = min(2048, _round_up(n, 8))
    n_pad = _round_up(n, tile)
    if n_pad != n:
        # Pad with `shift`-valued rows: they contribute exactly zero to both
        # centered sums, so no mask / count correction is needed.
        x2d = jnp.concatenate(
            [x2d, jnp.broadcast_to(shift, (n_pad - n, c))], axis=0)
    return pl.pallas_call(
        _col_moments_kernel,
        out_shape=(jax.ShapeDtypeStruct((1, c), jnp.float32),
                   jax.ShapeDtypeStruct((1, c), jnp.float32)),
        grid=(n_pad // tile,),
        in_specs=[pl.BlockSpec((tile, c), lambda i: (i, 0)),
                  pl.BlockSpec((1, c), lambda i: (0, 0))],
        out_specs=(pl.BlockSpec((1, c), lambda i: (0, 0)),
                   pl.BlockSpec((1, c), lambda i: (0, 0))),
        compiler_params=pltpu.CompilerParams(
            dimension_semantics=("arbitrary",)),
    )(x2d, shift)


def bn_moments(x2d):
    """Per-channel mean and unbiased variance (two-pass / centered)."""
    n, c = x2d.shape
    s, _ = _col_moments(x2d, jnp.zeros((1, c), jnp.float32))
    mean = s[0] / n
    ds, dss = _col_moments(x2d, mean[None, :])          # centered second pass
    var = (dss[0] - ds[0] * ds[0] / n) / max(n - 1, 1)
    return mean, var


# --------------------------------------------------------------------------
# Kernel 2: fused transposed conv + local/batch "half" normalization.
#
# Channel-major stream xT[cpp, s_in] = [x_0..x_{cin-1}, sum_c x, sum_c x^2,
# occ, 0-pad] packed into sublanes, flat padded volume in lanes.  For a chunk
# of output rows, each kernel offset m contributes one lane-rolled window
# which is stored into a tile-aligned sublane block of an im2col slab; ONE
# deep matmul  W_big[n_out_p, K^3*cpp] @ slab[K^3*cpp, chunk]  then yields the
# three BN-affine'd conv terms and the window statistics at once.  The
# epilogue computes the window std and the half-norm combination on the
# lane-dense [*, chunk] layout.
# --------------------------------------------------------------------------
def _fused_kernel(a2o_ref, x_hbm, w_ref, o_ref, xbuf, slab_ref, acc_ref, sem,
                  *, K, Hp, Wp, chunk, chunk_h, cpp, cin, cout, eps):
    b = pl.program_id(0)
    j = pl.program_id(1)
    n_chunks = pl.num_programs(1)
    slot = j % 2
    row0 = pl.multiple_of(j * chunk, 128)

    def _start(row, buf_slot):
        pltpu.make_async_copy(
            x_hbm.at[b, :, pl.ds(row, chunk_h)],
            xbuf.at[buf_slot],
            sem.at[buf_slot],
        ).start()

    # Manual double buffering (P4): the first chunk of each batch is fetched
    # synchronously; afterwards every step waits on the copy issued by the
    # previous step and prefetches the next chunk into the other buffer.
    # TODO(synk): make the chunk axis self-priming so it can be marked
    # megacore-parallel on v7x (B=1 workloads currently use one core only).
    @pl.when(j == 0)
    def _prime():
        _start(row0, slot)

    pltpu.make_async_copy(
        x_hbm.at[b, :, pl.ds(row0, chunk_h)],
        xbuf.at[slot],
        sem.at[slot],
    ).wait()

    @pl.when(j + 1 < n_chunks)
    def _prefetch():
        _start(pl.multiple_of((j + 1) * chunk, 128), 1 - slot)

    # ---- im2col: one lane roll (XLU) + one tile-aligned sublane store per
    # kernel offset (channels live in sublanes, so every store is dense). ----
    full = xbuf[slot]                                   # [cpp, chunk_h]
    idx = 0
    for kd in range(K):
        for kh in range(K):
            for kw in range(K):
                off = kd * Hp * Wp + kh * Wp + kw
                if off == 0:
                    win = full[:, :chunk]
                else:
                    win = pltpu.roll(full, shift=chunk_h - off, axis=1)[:, :chunk]
                slab_ref[pl.ds(idx * cpp, cpp), :] = win
                idx += 1

    # ---- single deep matmul: [n_out_p, K^3*cpp] x [K^3*cpp, chunk] --------
    acc_ref[...] = jnp.dot(w_ref[...], slab_ref[...],
                           preferred_element_type=jnp.float32)

    # ---- epilogue: window statistics + half-norm combination --------------
    t1 = acc_ref[pl.ds(0, cout), :]            # conv((x - a1*bn_mean)*gamma/bn_std^a2)
    t2 = acc_ref[pl.ds(cout, cout), :]         # (1-a1) * conv(ones*gamma/bn_std^a2)
    t3 = acc_ref[pl.ds(2 * cout, cout), :]     # conv(ones*beta)
    wsx = acc_ref[pl.ds(3 * cout, 1), :]       # window sum of x (channels+window)
    wsxx = acc_ref[pl.ds(3 * cout + 1, 1), :]  # window sum of x*x
    wcnt = acc_ref[pl.ds(3 * cout + 2, 1), :]  # window occupancy count

    voxels = wcnt * float(cin)
    denom = jnp.maximum(voxels, 1.0)           # guards only discarded padded rows
    means = wsx / denom
    sq_means = wsxx / denom
    vc = jnp.maximum(voxels, 2.0)
    stds = jnp.sqrt(vc / (vc - 1.0) * jnp.maximum(sq_means - means * means, 0.0)
                    + eps)

    a2o = a2o_ref[0]                           # 1 - std_att (SMEM scalar)
    inv = jnp.exp(-a2o * jnp.log(stds))        # stds ** -(1 - std_att)

    o_ref[0] = ((t1 - means * t2) * inv + t3).astype(o_ref.dtype)


# --------------------------------------------------------------------------
# Wrapper-side constant folding: one [n_out_p, K^3 * cpp] matmul table.
# Channel rows (sublanes of the stream): 0..cin-1 = x, cin = sum_c x,
# cin+1 = sum_c x^2, cin+2 = occupancy, rest = zero padding.
# --------------------------------------------------------------------------
def _build_weight_table(weight, beta, gamma, bn_mean, bn_std, a1, a2,
                        cpp, n_out_p):
    K = weight.shape[0]
    cin, cout = weight.shape[3], weight.shape[4]
    k3 = K * K * K

    wflip = jnp.flip(weight, axis=(0, 1, 2)).astype(jnp.float32)   # gather form
    scale = gamma.astype(jnp.float32) * jnp.power(bn_std, -a2)     # gamma / bn_std**a2
    a1o = 1.0 - a1

    wx = wflip * scale[None, None, None, :, None]                  # x-channel rows
    ub = -a1 * jnp.einsum("c,dhwco->dhwo", bn_mean * scale, wflip)  # -a1*bn_mean*scale
    u2 = a1o * jnp.einsum("c,dhwco->dhwo", scale, wflip)            # (1-a1) folded in
    u3 = jnp.einsum("c,dhwco->dhwo", beta.astype(jnp.float32), wflip)

    tbl = jnp.zeros((K, K, K, cpp, n_out_p), jnp.float32)
    tbl = tbl.at[..., :cin, 0:cout].set(wx)
    tbl = tbl.at[..., cin + 2, 0:cout].set(ub)              # occupancy-gated constants
    tbl = tbl.at[..., cin + 2, cout:2 * cout].set(u2)
    tbl = tbl.at[..., cin + 2, 2 * cout:3 * cout].set(u3)
    tbl = tbl.at[..., cin, 3 * cout].set(1.0)               # window sum(x)
    tbl = tbl.at[..., cin + 1, 3 * cout + 1].set(1.0)       # window sum(x*x)
    tbl = tbl.at[..., cin + 2, 3 * cout + 2].set(1.0)       # window count
    tbl = tbl.reshape(k3, cpp, n_out_p)
    # transposed orientation: out^T = W_big @ slab, W_big[o, m*cpp + c] = tbl[m, c, o]
    return jnp.transpose(tbl, (2, 0, 1)).reshape(n_out_p, k3 * cpp)


# --------------------------------------------------------------------------
# Forward wrapper (padding, flattening, chunking, block specs).
# --------------------------------------------------------------------------
def bnhn_conv3d_transpose(x, weight, beta, gamma, mean_att, std_att,
                          moving_avg, moving_var, *, stride=1, dilation=1,
                          epsilon=1e-5, bn_momentum=0.05, training=True,
                          chunk=_CHUNK):
    # TODO(synk): only stride=1 / dilation=1 (the module defaults) are implemented.
    assert stride == 1 and dilation == 1
    B, D, H, Wd, cin = x.shape
    K = weight.shape[0]
    cout = weight.shape[-1]
    N = B * D * H * Wd
    x = x.astype(jnp.float32)

    # ---- batch-norm statistics (tiled two-pass Pallas reduction) ----------
    if training:
        bn_mean, bn_var = bn_moments(x.reshape(N, cin))
        new_moving_avg = moving_avg * (1.0 - bn_momentum) + bn_mean * bn_momentum
        new_moving_var = moving_var * (1.0 - bn_momentum) + bn_var * bn_momentum
    else:
        bn_mean = moving_avg.astype(jnp.float32)
        bn_var = moving_var.astype(jnp.float32)
        new_moving_avg, new_moving_var = moving_avg, moving_var
    bn_std = jnp.sqrt(bn_var + epsilon)

    a1 = mean_att[0, 0]                  # traced -> jit / grad safe (no float())
    a2 = std_att[0, 0]
    a2o = jnp.reshape(1.0 - a2, (1,)).astype(jnp.float32)

    # ---- geometry ----------------------------------------------------------
    cpp = _round_up(cin + 3, 8)          # packed channels, padded to a sublane tile
    n_out = 3 * cout + 3
    n_out_p = _round_up(n_out, 8)
    k3 = K * K * K

    pad = K - 1
    Dp, Hp, Wp = D + 2 * pad, H + 2 * pad, Wd + 2 * pad
    S = Dp * Hp * Wp
    off_max = pad * (Hp * Wp + Wp + 1)

    chunk = max(128, _round_up(chunk, 128))
    nc = (S + chunk - 1) // chunk
    s_pad = nc * chunk
    chunk_h = _round_up(chunk + off_max, 128)     # chunk + halo rows, lane aligned
    s_in = (nc - 1) * chunk + chunk_h

    # ---- packed, channel-major feature stream [B, cpp, s_in] --------------
    # TODO(synk): fuse this packing + padding + transpose into one Pallas prep
    # kernel (and fold s1/s2 into bn_moments) to cut HBM passes on v5e.
    s1 = jnp.sum(x, axis=-1, keepdims=True)
    s2 = jnp.sum(x * x, axis=-1, keepdims=True)
    occ = jnp.ones_like(s1)
    feats = [x, s1, s2, occ]
    if cpp > cin + 3:
        feats.append(jnp.zeros((B, D, H, Wd, cpp - (cin + 3)), jnp.float32))
    xp = jnp.concatenate(feats, axis=-1)
    xp = jnp.pad(xp, ((0, 0), (pad, pad), (pad, pad), (pad, pad), (0, 0)))
    xT = jnp.transpose(xp.reshape(B, S, cpp), (0, 2, 1))            # [B, cpp, S]
    xT = jnp.pad(xT, ((0, 0), (0, 0), (0, s_in - S))).astype(_MATMUL_DTYPE)

    wtab = _build_weight_table(weight, beta, gamma, bn_mean, bn_std, a1, a2,
                               cpp, n_out_p).astype(_MATMUL_DTYPE)

    kernel = functools.partial(
        _fused_kernel, K=K, Hp=Hp, Wp=Wp, chunk=chunk, chunk_h=chunk_h,
        cpp=cpp, cin=cin, cout=cout, eps=float(epsilon))

    out_flat = pl.pallas_call(
        kernel,
        out_shape=jax.ShapeDtypeStruct((B, cout, s_pad), jnp.float32),
        grid=(B, nc),
        in_specs=[
            pl.BlockSpec(memory_space=pltpu.MemorySpace.SMEM),       # 1 - std_att
            pl.BlockSpec(memory_space=pl.ANY),                       # packed stream (HBM)
            pl.BlockSpec((n_out_p, k3 * cpp), lambda b, j: (0, 0)),  # weight table
        ],
        out_specs=pl.BlockSpec((1, cout, chunk), lambda b, j: (b, 0, j)),
        scratch_shapes=[
            pltpu.VMEM((2, cpp, chunk_h), _MATMUL_DTYPE),   # double-buffered halo'd input
            pltpu.VMEM((k3 * cpp, chunk), _MATMUL_DTYPE),   # im2col slab
            pltpu.VMEM((n_out_p, chunk), jnp.float32),      # matmul result (1 write)
            pltpu.SemaphoreType.DMA((2,)),
        ],
        compiler_params=pltpu.CompilerParams(
            # Batch axis feeds both v7x TensorCores; the chunk axis stays
            # "arbitrary" because of the cross-step DMA prefetch chain.
            dimension_semantics=("parallel", "arbitrary"),
            vmem_limit_bytes=_vmem_limit_bytes()),
    )(a2o, xT, wtab)

    Do, Ho, Wo = D + pad, H + pad, Wd + pad
    y = out_flat[:, :, :S].reshape(B, cout, Dp, Hp, Wp)[:, :, :Do, :Ho, :Wo]
    y = jnp.transpose(y, (0, 2, 3, 4, 1))          # back to NDHWC
    return y, (new_moving_avg, new_moving_var)


# --------------------------------------------------------------------------
# Pure numpy reference (dense equivalent of the PyTorch / Minkowski forward)
# --------------------------------------------------------------------------
def reference_forward(x, weight, beta, gamma, a1, a2, eps, training=True,
                      moving_avg=None, moving_var=None):
    x = np.asarray(x, np.float64)
    W = np.asarray(weight, np.float64)
    beta = np.asarray(beta, np.float64)
    gamma = np.asarray(gamma, np.float64)
    B, D, H, Wd, Cin = x.shape
    K = W.shape[0]
    Do, Ho, Wo = D + K - 1, H + K - 1, Wd + K - 1

    def convT(inp, w):
        out = np.zeros((B, Do, Ho, Wo, w.shape[-1]), np.float64)
        for kd in range(K):
            for kh in range(K):
                for kw in range(K):
                    out[:, kd:kd + D, kh:kh + H, kw:kw + Wd, :] += inp @ w[kd, kh, kw]
        return out

    xf = x.reshape(-1, Cin)
    if training:
        bn_mean = xf.mean(0)
        bn_var = xf.var(0, ddof=1)
    else:
        bn_mean, bn_var = np.asarray(moving_avg), np.asarray(moving_var)
    bn_std = np.sqrt(bn_var + eps)

    ones = np.ones_like(x)
    window = np.ones((K, K, K, Cin, 1), np.float64)
    voxels = convT(ones, window)
    means = convT(x, window) / voxels
    sq_means = convT(x * x, window) / voxels
    vc = np.maximum(voxels, 2.0)
    stds = np.sqrt(vc / (vc - 1.0) * np.maximum(sq_means - means ** 2, 0.0) + eps)

    a1o, a2o = 1.0 - a1, 1.0 - a2
    beta_term = convT(ones * beta, W)
    gamma_term_2 = convT(ones * gamma / bn_std ** a2, W) * (means * -a1o / stds ** a2o)
    g1x = convT((x - bn_mean * a1) * (gamma / bn_std ** a2), W) * (1.0 / stds ** a2o)
    return g1x + gamma_term_2 + beta_term


if __name__ == "__main__":
    key = jax.random.PRNGKey(0)
    B, D, H, Wd = 2, 8, 8, 8
    Cin, Cout, K = 4, 8, 3

    k1, k2 = jax.random.split(key)
    x = jax.random.normal(k1, (B, D, H, Wd, Cin), jnp.float32)
    weight = jax.random.normal(k2, (K, K, K, Cin, Cout), jnp.float32) * 0.1

    # deterministic, non-trivial parameters (module init would be beta=0,
    # gamma=1, att=0.5; varied values exercise every folded term).
    beta = jnp.linspace(-0.3, 0.4, Cin).astype(jnp.float32)
    gamma = jnp.linspace(0.8, 1.3, Cin).astype(jnp.float32)
    a1_val, a2_val = 0.4, 0.65
    mean_att = a1_val * jnp.ones((1, 1), jnp.float32)
    std_att = a2_val * jnp.ones((1, 1), jnp.float32)
    moving_avg = jnp.zeros((Cin,), jnp.float32)
    moving_var = jnp.ones((Cin,), jnp.float32)

    fwd = jax.jit(functools.partial(
        bnhn_conv3d_transpose, stride=1, dilation=1, epsilon=1e-5,
        bn_momentum=0.05, training=True))
    y, (mv_avg, mv_var) = fwd(x, weight, beta, gamma, mean_att, std_att,
                              moving_avg, moving_var)
    y = jax.block_until_ready(y)

    y_ref = reference_forward(x, weight, beta, gamma, a1_val, a2_val, 1e-5,
                              training=True)
    np.testing.assert_allclose(np.asarray(y), y_ref, rtol=5e-3, atol=5e-3)
    print("KERNEL_OK")
</pallas_src>

<mosaic_0001>
module attributes {stable_mosaic.version = 11 : i64} {
  func.func @_col_moments_kernel(%arg0: i32, %arg1: memref<1024x4xf32, #tpu.memory_space<vmem>>, %arg2: memref<1x4xf32, #tpu.memory_space<vmem>>, %arg3: memref<1x4xf32, #tpu.memory_space<vmem>>, %arg4: memref<1x4xf32, #tpu.memory_space<vmem>>) attributes {dimension_semantics = [#tpu.dimension_semantics<arbitrary>], iteration_bounds = array<i64: 1>, scalar_prefetch = 0 : i64, scratch_operands = 0 : i64, tpu.core_type = #tpu.core_type<tc>, window_params = [{transform_indices = @transform_0, window_bounds = array<i64: 1024, 4>}, {pipeline_mode = #tpu.pipeline_mode<synchronous>, transform_indices = @transform_1, window_bounds = array<i64: 1, 4>}, {pipeline_mode = #tpu.pipeline_mode<synchronous>, transform_indices = @transform_2, window_bounds = array<i64: 1, 4>}, {pipeline_mode = #tpu.pipeline_mode<synchronous>, transform_indices = @transform_3, window_bounds = array<i64: 1, 4>}]} {
    %c0_i32 = arith.constant 0 : i32
    %0 = arith.cmpi eq, %arg0, %c0_i32 : i32
    %1 = arith.extui %0 : i1 to i32
    %c0_i32_0 = arith.constant 0 : i32
    %2 = arith.cmpi ne, %1, %c0_i32_0 : i32
    scf.if %2 {
      %cst_13 = arith.constant 0.000000e+00 : f32
      %18 = vector.broadcast %cst_13 : f32 to vector<1x4xf32>
      %c0_14 = arith.constant 0 : index
      %c0_15 = arith.constant 0 : index
      %19 = vector.load %arg3[%c0_14, %c0_15] : memref<1x4xf32, #tpu.memory_space<vmem>>, vector<1x4xf32>
      tpu.vector_store %arg3[%c0_14, %c0_15], %18 {strides = array<i32>} : memref<1x4xf32, #tpu.memory_space<vmem>>, vector<1x4xf32>,
      %cst_16 = arith.constant 0.000000e+00 : f32
      %20 = vector.broadcast %cst_16 : f32 to vector<1x4xf32>
      %c0_17 = arith.constant 0 : index
      %c0_18 = arith.constant 0 : index
      %21 = vector.load %arg4[%c0_17, %c0_18] : memref<1x4xf32, #tpu.memory_space<vmem>>, vector<1x4xf32>
      tpu.vector_store %arg4[%c0_17, %c0_18], %20 {strides = array<i32>} : memref<1x4xf32, #tpu.memory_space<vmem>>, vector<1x4xf32>,
    } else {
    }
    %c0 = arith.constant 0 : index
    %c0_1 = arith.constant 0 : index
    %3 = vector.load %arg1[%c0, %c0_1] : memref<1024x4xf32, #tpu.memory_space<vmem>>, vector<1024x4xf32>
    %c0_2 = arith.constant 0 : index
    %c0_3 = arith.constant 0 : index
    %4 = vector.load %arg2[%c0_2, %c0_3] : memref<1x4xf32, #tpu.memory_space<vmem>>, vector<1x4xf32>
    %5 = vector.broadcast %4 : vector<1x4xf32> to vector<1024x4xf32>
    %6 = arith.subf %3, %5 : vector<1024x4xf32>
    %c0_4 = arith.constant 0 : index
    %c0_5 = arith.constant 0 : index
    %7 = vector.load %arg3[%c0_4, %c0_5] : memref<1x4xf32, #tpu.memory_space<vmem>>, vector<1x4xf32>
    %cst = arith.constant dense<0.000000e+00> : vector<4xf32>
    %8 = vector.multi_reduction <add>, %6, %cst [0] : vector<1024x4xf32> to vector<4xf32>
    %9 = vector.shape_cast %8 : vector<4xf32> to vector<1x4xf32>
    %10 = arith.addf %7, %9 : vector<1x4xf32>
    %c0_6 = arith.constant 0 : index
    %c0_7 = arith.constant 0 : index
    %11 = vector.load %arg3[%c0_6, %c0_7] : memref<1x4xf32, #tpu.memory_space<vmem>>, vector<1x4xf32>
    tpu.vector_store %arg3[%c0_6, %c0_7], %10 {strides = array<i32>} : memref<1x4xf32, #tpu.memory_space<vmem>>, vector<1x4xf32>,
    %c0_8 = arith.constant 0 : index
    %c0_9 = arith.constant 0 : index
    %12 = vector.load %arg4[%c0_8, %c0_9] : memref<1x4xf32, #tpu.memory_space<vmem>>, vector<1x4xf32>
    %13 = arith.mulf %6, %6 : vector<1024x4xf32>
    %cst_10 = arith.constant dense<0.000000e+00> : vector<4xf32>
    %14 = vector.multi_reduction <add>, %13, %cst_10 [0] : vector<1024x4xf32> to vector<4xf32>
    %15 = vector.shape_cast %14 : vector<4xf32> to vector<1x4xf32>
    %16 = arith.addf %12, %15 : vector<1x4xf32>
    %c0_11 = arith.constant 0 : index
    %c0_12 = arith.constant 0 : index
    %17 = vector.load %arg4[%c0_11, %c0_12] : memref<1x4xf32, #tpu.memory_space<vmem>>, vector<1x4xf32>
    tpu.vector_store %arg4[%c0_11, %c0_12], %16 {strides = array<i32>} : memref<1x4xf32, #tpu.memory_space<vmem>>, vector<1x4xf32>,
    return
  }
  func.func @transform_0(%arg0: i32) -> (i32, i32) {
    %c0_i32 = arith.constant 0 : i32
    %c0_i32_0 = arith.constant 0 : i32
    return %arg0, %c0_i32 : i32, i32
  }
  func.func @transform_1(%arg0: i32) -> (i32, i32) {
    %c0_i32 = arith.constant 0 : i32
    %c0_i32_0 = arith.constant 0 : i32
    %c0_i32_1 = arith.constant 0 : i32
    return %c0_i32, %c0_i32_0 : i32, i32
  }
  func.func @transform_2(%arg0: i32) -> (i32, i32) {
    %c0_i32 = arith.constant 0 : i32
    %c0_i32_0 = arith.constant 0 : i32
    %c0_i32_1 = arith.constant 0 : i32
    return %c0_i32, %c0_i32_0 : i32, i32
  }
  func.func @transform_3(%arg0: i32) -> (i32, i32) {
    %c0_i32 = arith.constant 0 : i32
    %c0_i32_0 = arith.constant 0 : i32
    %c0_i32_1 = arith.constant 0 : i32
    return %c0_i32, %c0_i32_0 : i32, i32
  }
}

module attributes {stable_mosaic.version = 11 : i64} {
  func.func @_col_moments_kernel(%arg0: i32, %arg1: memref<1024x4xf32, #tpu.memory_space<vmem>>, %arg2: memref<1x4xf32, #tpu.memory_space<vmem>>, %arg3: memref<1x4xf32, #tpu.memory_space<vmem>>, %arg4: memref<1x4xf32, #tpu.memory_space<vmem>>) attributes {dimension_semantics = [#tpu.dimension_semantics<arbitrary>], iteration_bounds = array<i64: 1>, scalar_prefetch = 0 : i64, scratch_operands = 0 : i64, tpu.core_type = #tpu.core_type<tc>, window_params = [{transform_indices = @transform_0, window_bounds = array<i64: 1024, 4>}, {pipeline_mode = #tpu.pipeline_mode<synchronous>, transform_indices = @transform_1, window_bounds = array<i64: 1, 4>}, {pipeline_mode = #tpu.pipeline_mode<synchronous>, transform_indices = @transform_2, window_bounds = array<i64: 1, 4>}, {pipeline_mode = #tpu.pipeline_mode<synchronous>, transform_indices = @transform_3, window_bounds = array<i64: 1, 4>}]} {
    %c0_i32 = arith.constant 0 : i32
    %0 = arith.cmpi eq, %arg0, %c0_i32 : i32
    %1 = arith.extui %0 : i1 to i32
    %c0_i32_0 = arith.constant 0 : i32
    %2 = arith.cmpi ne, %1, %c0_i32_0 : i32
    scf.if %2 {
      %cst_13 = arith.constant 0.000000e+00 : f32
      %18 = vector.broadcast %cst_13 : f32 to vector<1x4xf32>
      %c0_14 = arith.constant 0 : index
      %c0_15 = arith.constant 0 : index
      %19 = vector.load %arg3[%c0_14, %c0_15] : memref<1x4xf32, #tpu.memory_space<vmem>>, vector<1x4xf32>
      tpu.vector_store %arg3[%c0_14, %c0_15], %18 {strides = array<i32>} : memref<1x4xf32, #tpu.memory_space<vmem>>, vector<1x4xf32>,
      %cst_16 = arith.constant 0.000000e+00 : f32
      %20 = vector.broadcast %cst_16 : f32 to vector<1x4xf32>
      %c0_17 = arith.constant 0 : index
      %c0_18 = arith.constant 0 : index
      %21 = vector.load %arg4[%c0_17, %c0_18] : memref<1x4xf32, #tpu.memory_space<vmem>>, vector<1x4xf32>
      tpu.vector_store %arg4[%c0_17, %c0_18], %20 {strides = array<i32>} : memref<1x4xf32, #tpu.memory_space<vmem>>, vector<1x4xf32>,
    } else {
    }
    %c0 = arith.constant 0 : index
    %c0_1 = arith.constant 0 : index
    %3 = vector.load %arg1[%c0, %c0_1] : memref<1024x4xf32, #tpu.memory_space<vmem>>, vector<1024x4xf32>
    %c0_2 = arith.constant 0 : index
    %c0_3 = arith.constant 0 : index
    %4 = vector.load %arg2[%c0_2, %c0_3] : memref<1x4xf32, #tpu.memory_space<vmem>>, vector<1x4xf32>
    %5 = vector.broadcast %4 : vector<1x4xf32> to vector<1024x4xf32>
    %6 = arith.subf %3, %5 : vector<1024x4xf32>
    %c0_4 = arith.constant 0 : index
    %c0_5 = arith.constant 0 : index
    %7 = vector.load %arg3[%c0_4, %c0_5] : memref<1x4xf32, #tpu.memory_space<vmem>>, vector<1x4xf32>
    %cst = arith.constant dense<0.000000e+00> : vector<4xf32>
    %8 = vector.multi_reduction <add>, %6, %cst [0] : vector<1024x4xf32> to vector<4xf32>
    %9 = vector.shape_cast %8 : vector<4xf32> to vector<1x4xf32>
    %10 = arith.addf %7, %9 : vector<1x4xf32>
    %c0_6 = arith.constant 0 : index
    %c0_7 = arith.constant 0 : index
    %11 = vector.load %arg3[%c0_6, %c0_7] : memref<1x4xf32, #tpu.memory_space<vmem>>, vector<1x4xf32>
    tpu.vector_store %arg3[%c0_6, %c0_7], %10 {strides = array<i32>} : memref<1x4xf32, #tpu.memory_space<vmem>>, vector<1x4xf32>,
    %c0_8 = arith.constant 0 : index
    %c0_9 = arith.constant 0 : index
    %12 = vector.load %arg4[%c0_8, %c0_9] : memref<1x4xf32, #tpu.memory_space<vmem>>, vector<1x4xf32>
    %13 = arith.mulf %6, %6 : vector<1024x4xf32>
    %cst_10 = arith.constant dense<0.000000e+00> : vector<4xf32>
    %14 = vector.multi_reduction <add>, %13, %cst_10 [0] : vector<1024x4xf32> to vector<4xf32>
    %15 = vector.shape_cast %14 : vector<4xf32> to vector<1x4xf32>
    %16 = arith.addf %12, %15 : vector<1x4xf32>
    %c0_11 = arith.constant 0 : index
    %c0_12 = arith.constant 0 : index
    %17 = vector.load %arg4[%c0_11, %c0_12] : memref<1x4xf32, #tpu.memory_space<vmem>>, vector<1x4xf32>
    tpu.vector_store %arg4[%c0_11, %c0_12], %16 {strides = array<i32>} : memref<1x4xf32, #tpu.memory_space<vmem>>, vector<1x4xf32>,
    return
  }
  func.func @transform_0(%arg0: i32) -> (i32, i32) {
    %c0_i32 = arith.constant 0 : i32
    %c0_i32_0 = arith.constant 0 : i32
    return %arg0, %c0_i32 : i32, i32
  }
  func.func @transform_1(%arg0: i32) -> (i32, i32) {
    %c0_i32 = arith.constant 0 : i32
    %c0_i32_0 = arith.constant 0 : i32
    %c0_i32_1 = arith.constant 0 : i32
    return %c0_i32, %c0_i32_0 : i32, i32
  }
  func.func @transform_2(%arg0: i32) -> (i32, i32) {
    %c0_i32 = arith.constant 0 : i32
    %c0_i32_0 = arith.constant 0 : i32
    %c0_i32_1 = arith.constant 0 : i32
    return %c0_i32, %c0_i32_0 : i32, i32
  }
  func.func @transform_3(%arg0: i32) -> (i32, i32) {
    %c0_i32 = arith.constant 0 : i32
    %c0_i32_0 = arith.constant 0 : i32
    %c0_i32_1 = arith.constant 0 : i32
    return %c0_i32, %c0_i32_0 : i32, i32
  }
}

module attributes {stable_mosaic.version = 11 : i64} {
  func.func @_fused_kernel(%arg0: i32, %arg1: i32, %arg2: memref<1xf32, #tpu.memory_space<smem>>, %arg3: memref<2x8x2432xf32, #tpu.memory_space<any>>, %arg4: memref<32x216xf32, #tpu.memory_space<vmem>>, %arg5: memref<1x8x2048xf32, #tpu.memory_space<vmem>>, %arg6: memref<2x8x2432xf32, #tpu.memory_space<vmem>>, %arg7: memref<216x2048xf32, #tpu.memory_space<vmem>>, %arg8: memref<32x2048xf32, #tpu.memory_space<vmem>>, %arg9: memref<2x!tpu.dma_semaphore, #tpu.memory_space<semaphore_mem>>) attributes {dimension_semantics = [#tpu.dimension_semantics<parallel>, #tpu.dimension_semantics<arbitrary>], iteration_bounds = array<i64: 2, 1>, scalar_prefetch = 0 : i64, scratch_operands = 4 : i64, tpu.core_type = #tpu.core_type<tc>, window_params = [{transform_indices = @transform_0, window_bounds = array<i64: 1>}, {}, {pipeline_mode = #tpu.pipeline_mode<synchronous>, transform_indices = @transform_2, window_bounds = array<i64: 32, 216>}, {transform_indices = @transform_3, window_bounds = array<i64: 1, 8, 2048>}]} {
    %c2_i32 = arith.constant 2 : i32
    %c0_i32 = arith.constant 0 : i32
    %0 = arith.cmpi eq, %c2_i32, %c0_i32 : i32
    %c1_i32 = arith.constant 1 : i32
    %1 = arith.select %0, %c1_i32, %c2_i32 : i32
    %2 = arith.remsi %arg1, %1 : i32
    %c0_i32_0 = arith.constant 0 : i32
    %3 = arith.cmpi ne, %2, %c0_i32_0 : i32
    %c0_i32_1 = arith.constant 0 : i32
    %4 = arith.cmpi slt, %2, %c0_i32_1 : i32
    %c0_i32_2 = arith.constant 0 : i32
    %5 = arith.cmpi slt, %1, %c0_i32_2 : i32
    %6 = arith.xori %4, %5 : i1
    %7 = arith.andi %6, %3 : i1
    %8 = arith.addi %2, %1 : i32
    %9 = arith.select %7, %8, %2 : i32
    %c2048_i32 = arith.constant 2048 : i32
    %10 = arith.muli %arg1, %c2048_i32 : i32
    %11 = tpu.assume_multiple %10, 128 : i32
    %c0_i32_3 = arith.constant 0 : i32
    %12 = arith.cmpi eq, %arg1, %c0_i32_3 : i32
    %13 = arith.extui %12 : i1 to i32
    %c0_i32_4 = arith.constant 0 : i32
    %14 = arith.cmpi ne, %13, %c0_i32_4 : i32
    scf.if %14 {
      %c0_i32_67 = arith.constant 0 : i32
      %152 = tpu.memref_slice %arg3[%arg0, %c0_i32_67, %11] : memref<2x8x2432xf32, #tpu.memory_space<any>> -> memref<1x8x2432xf32, #tpu.memory_space<any>>
      %153 = tpu.memref_squeeze %152 : memref<1x8x2432xf32, #tpu.memory_space<any>> -> memref<8x2432xf32, #tpu.memory_space<any>>
      %c0_i32_68 = arith.constant 0 : i32
      %c0_i32_69 = arith.constant 0 : i32
      %154 = tpu.memref_slice %arg6[%9, %c0_i32_68, %c0_i32_69] : memref<2x8x2432xf32, #tpu.memory_space<vmem>> -> memref<1x8x2432xf32, #tpu.memory_space<vmem>>
      %155 = tpu.memref_squeeze %154 : memref<1x8x2432xf32, #tpu.memory_space<vmem>> -> memref<8x2432xf32, #tpu.memory_space<vmem>>
      %156 = tpu.memref_slice %arg9[%9] : memref<2x!tpu.dma_semaphore, #tpu.memory_space<semaphore_mem>> -> memref<1x!tpu.dma_semaphore, #tpu.memory_space<semaphore_mem>>
      %157 = tpu.memref_squeeze %156 : memref<1x!tpu.dma_semaphore, #tpu.memory_space<semaphore_mem>> -> memref<!tpu.dma_semaphore, #tpu.memory_space<semaphore_mem>>
      tpu.enqueue_dma source(%153 : memref<8x2432xf32, #tpu.memory_space<any>>) target(%155 : memref<8x2432xf32, #tpu.memory_space<vmem>>) target_semaphore(%157 : memref<!tpu.dma_semaphore, #tpu.memory_space<semaphore_mem>>)
    } else {
    }
    %c0_i32_5 = arith.constant 0 : i32
    %15 = tpu.memref_slice %arg3[%arg0, %c0_i32_5, %11] : memref<2x8x2432xf32, #tpu.memory_space<any>> -> memref<1x8x2432xf32, #tpu.memory_space<any>>
    %16 = tpu.memref_squeeze %15 : memref<1x8x2432xf32, #tpu.memory_space<any>> -> memref<8x2432xf32, #tpu.memory_space<any>>
    %c0_i32_6 = arith.constant 0 : i32
    %c0_i32_7 = arith.constant 0 : i32
    %17 = tpu.memref_slice %arg6[%9, %c0_i32_6, %c0_i32_7] : memref<2x8x2432xf32, #tpu.memory_space<vmem>> -> memref<1x8x2432xf32, #tpu.memory_space<vmem>>
    %18 = tpu.memref_squeeze %17 : memref<1x8x2432xf32, #tpu.memory_space<vmem>> -> memref<8x2432xf32, #tpu.memory_space<vmem>>
    %19 = tpu.memref_slice %arg9[%9] : memref<2x!tpu.dma_semaphore, #tpu.memory_space<semaphore_mem>> -> memref<1x!tpu.dma_semaphore, #tpu.memory_space<semaphore_mem>>
    %20 = tpu.memref_squeeze %19 : memref<1x!tpu.dma_semaphore, #tpu.memory_space<semaphore_mem>> -> memref<!tpu.dma_semaphore, #tpu.memory_space<semaphore_mem>>
    tpu.wait_dma2 semaphore(%20 : memref<!tpu.dma_semaphore, #tpu.memory_space<semaphore_mem>>) src(%16 : memref<8x2432xf32, #tpu.memory_space<any>>) dst(%18 : memref<8x2432xf32, #tpu.memory_space<vmem>>)
    %c1_i32_8 = arith.constant 1 : i32
    %21 = arith.addi %arg1, %c1_i32_8 : i32
    %c1_i32_9 = arith.constant 1 : i32
    %22 = arith.cmpi slt, %21, %c1_i32_9 : i32
    %23 = arith.extui %22 : i1 to i32
    %c0_i32_10 = arith.constant 0 : i32
    %24 = arith.cmpi ne, %23, %c0_i32_10 : i32
    scf.if %24 {
      %c1_i32_67 = arith.constant 1 : i32
      %152 = arith.addi %arg1, %c1_i32_67 : i32
      %c2048_i32_68 = arith.constant 2048 : i32
      %153 = arith.muli %152, %c2048_i32_68 : i32
      %154 = tpu.assume_multiple %153, 128 : i32
      %c1_i32_69 = arith.constant 1 : i32
      %155 = arith.subi %c1_i32_69, %9 : i32
      %c0_i32_70 = arith.constant 0 : i32
      %156 = tpu.memref_slice %arg3[%arg0, %c0_i32_70, %154] : memref<2x8x2432xf32, #tpu.memory_space<any>> -> memref<1x8x2432xf32, #tpu.memory_space<any>>
      %157 = tpu.memref_squeeze %156 : memref<1x8x2432xf32, #tpu.memory_space<any>> -> memref<8x2432xf32, #tpu.memory_space<any>>
      %c0_i32_71 = arith.constant 0 : i32
      %c0_i32_72 = arith.constant 0 : i32
      %158 = tpu.memref_slice %arg6[%155, %c0_i32_71, %c0_i32_72] : memref<2x8x2432xf32, #tpu.memory_space<vmem>> -> memref<1x8x2432xf32, #tpu.memory_space<vmem>>
      %159 = tpu.memref_squeeze %158 : memref<1x8x2432xf32, #tpu.memory_space<vmem>> -> memref<8x2432xf32, #tpu.memory_space<vmem>>
      %160 = tpu.memref_slice %arg9[%155] : memref<2x!tpu.dma_semaphore, #tpu.memory_space<semaphore_mem>> -> memref<1x!tpu.dma_semaphore, #tpu.memory_space<semaphore_mem>>
      %161 = tpu.memref_squeeze %160 : memref<1x!tpu.dma_semaphore, #tpu.memory_space<semaphore_mem>> -> memref<!tpu.dma_semaphore, #tpu.memory_space<semaphore_mem>>
      tpu.enqueue_dma source(%157 : memref<8x2432xf32, #tpu.memory_space<any>>) target(%159 : memref<8x2432xf32, #tpu.memory_space<vmem>>) target_semaphore(%161 : memref<!tpu.dma_semaphore, #tpu.memory_space<semaphore_mem>>)
    } else {
    }
    %25 = arith.index_cast %9 : i32 to index
    %c0 = arith.constant 0 : index
    %c0_11 = arith.constant 0 : index
    %26 = vector.load %arg6[%25, %c0, %c0_11] : memref<2x8x2432xf32, #tpu.memory_space<vmem>>, vector<1x8x2432xf32>
    %27 = vector.shape_cast %26 : vector<1x8x2432xf32> to vector<8x2432xf32>
    %28 = vector.extract_strided_slice %27 {offsets = [0, 0], sizes = [8, 2048], strides = [1, 1]} : vector<8x2432xf32> to vector<8x2048xf32>
    %c0_12 = arith.constant 0 : index
    %c0_13 = arith.constant 0 : index
    %29 = vector.load %arg7[%c0_12, %c0_13] : memref<216x2048xf32, #tpu.memory_space<vmem>>, vector<8x2048xf32>
    tpu.vector_store %arg7[%c0_12, %c0_13], %28 {strides = array<i32>} : memref<216x2048xf32, #tpu.memory_space<vmem>>, vector<8x2048xf32>,
    %c2431_i32 = arith.constant 2431 : i32
    %30 = tpu.dynamic_rotate %27 by %c2431_i32 dim 1 : vector<8x2432xf32>, i32 -> vector<8x2432xf32>
    %31 = vector.extract_strided_slice %30 {offsets = [0, 0], sizes = [8, 2048], strides = [1, 1]} : vector<8x2432xf32> to vector<8x2048xf32>
    %c8 = arith.constant 8 : index
    %c0_14 = arith.constant 0 : index
    %32 = vector.load %arg7[%c8, %c0_14] : memref<216x2048xf32, #tpu.memory_space<vmem>>, vector<8x2048xf32>
    tpu.vector_store %arg7[%c8, %c0_14], %31 {strides = array<i32>} : memref<216x2048xf32, #tpu.memory_space<vmem>>, vector<8x2048xf32>,
    %c2430_i32 = arith.constant 2430 : i32
    %33 = tpu.dynamic_rotate %27 by %c2430_i32 dim 1 : vector<8x2432xf32>, i32 -> vector<8x2432xf32>
    %34 = vector.extract_strided_slice %33 {offsets = [0, 0], sizes = [8, 2048], strides = [1, 1]} : vector<8x2432xf32> to vector<8x2048xf32>
    %c16 = arith.constant 16 : index
    %c0_15 = arith.constant 0 : index
    %35 = vector.load %arg7[%c16, %c0_15] : memref<216x2048xf32, #tpu.memory_space<vmem>>, vector<8x2048xf32>
    tpu.vector_store %arg7[%c16, %c0_15], %34 {strides = array<i32>} : memref<216x2048xf32, #tpu.memory_space<vmem>>, vector<8x2048xf32>,
    %c2420_i32 = arith.constant 2420 : i32
    %36 = tpu.dynamic_rotate %27 by %c2420_i32 dim 1 : vector<8x2432xf32>, i32 -> vector<8x2432xf32>
    %37 = vector.extract_strided_slice %36 {offsets = [0, 0], sizes = [8, 2048], strides = [1, 1]} : vector<8x2432xf32> to vector<8x2048xf32>
    %c24 = arith.constant 24 : index
    %c0_16 = arith.constant 0 : index
    %38 = vector.load %arg7[%c24, %c0_16] : memref<216x2048xf32, #tpu.memory_space<vmem>>, vector<8x2048xf32>
    tpu.vector_store %arg7[%c24, %c0_16], %37 {strides = array<i32>} : memref<216x2048xf32, #tpu.memory_space<vmem>>, vector<8x2048xf32>,
    %c2419_i32 = arith.constant 2419 : i32
    %39 = tpu.dynamic_rotate %27 by %c2419_i32 dim 1 : vector<8x2432xf32>, i32 -> vector<8x2432xf32>
    %40 = vector.extract_strided_slice %39 {offsets = [0, 0], sizes = [8, 2048], strides = [1, 1]} : vector<8x2432xf32> to vector<8x2048xf32>
    %c32 = arith.constant 32 : index
    %c0_17 = arith.constant 0 : index
    %41 = vector.load %arg7[%c32, %c0_17] : memref<216x2048xf32, #tpu.memory_space<vmem>>, vector<8x2048xf32>
    tpu.vector_store %arg7[%c32, %c0_17], %40 {strides = array<i32>} : memref<216x2048xf32, #tpu.memory_space<vmem>>, vector<8x2048xf32>,
    %c2418_i32 = arith.constant 2418 : i32
    %42 = tpu.dynamic_rotate %27 by %c2418_i32 dim 1 : vector<8x2432xf32>, i32 -> vector<8x2432xf32>
    %43 = vector.extract_strided_slice %42 {offsets = [0, 0], sizes = [8, 2048], strides = [1, 1]} : vector<8x2432xf32> to vector<8x2048xf32>
    %c40 = arith.constant 40 : index
    %c0_18 = arith.constant 0 : index
    %44 = vector.load %arg7[%c40, %c0_18] : memref<216x2048xf32, #tpu.memory_space<vmem>>, vector<8x2048xf32>
    tpu.vector_store %arg7[%c40, %c0_18], %43 {strides = array<i32>} : memref<216x2048xf32, #tpu.memory_space<vmem>>, vector<8x2048xf32>,
    %c2408_i32 = arith.constant 2408 : i32
    %45 = tpu.dynamic_rotate %27 by %c2408_i32 dim 1 : vector<8x2432xf32>, i32 -> vector<8x2432xf32>
    %46 = vector.extract_strided_slice %45 {offsets = [0, 0], sizes = [8, 2048], strides = [1, 1]} : vector<8x2432xf32> to vector<8x2048xf32>
    %c48 = arith.constant 48 : index
    %c0_19 = arith.constant 0 : index
    %47 = vector.load %arg7[%c48, %c0_19] : memref<216x2048xf32, #tpu.memory_space<vmem>>, vector<8x2048xf32>
    tpu.vector_store %arg7[%c48, %c0_19], %46 {strides = array<i32>} : memref<216x2048xf32, #tpu.memory_space<vmem>>, vector<8x2048xf32>,
    %c2407_i32 = arith.constant 2407 : i32
    %48 = tpu.dynamic_rotate %27 by %c2407_i32 dim 1 : vector<8x2432xf32>, i32 -> vector<8x2432xf32>
    %49 = vector.extract_strided_slice %48 {offsets = [0, 0], sizes = [8, 2048], strides = [1, 1]} : vector<8x2432xf32> to vector<8x2048xf32>
    %c56 = arith.constant 56 : index
    %c0_20 = arith.constant 0 : index
    %50 = vector.load %arg7[%c56, %c0_20] : memref<216x2048xf32, #tpu.memory_space<vmem>>, vector<8x2048xf32>
    tpu.vector_store %arg7[%c56, %c0_20], %49 {strides = array<i32>} : memref<216x2048xf32, #tpu.memory_space<vmem>>, vector<8x2048xf32>,
    %c2406_i32 = arith.constant 2406 : i32
    %51 = tpu.dynamic_rotate %27 by %c2406_i32 dim 1 : vector<8x2432xf32>, i32 -> vector<8x2432xf32>
    %52 = vector.extract_strided_slice %51 {offsets = [0, 0], sizes = [8, 2048], strides = [1, 1]} : vector<8x2432xf32> to vector<8x2048xf32>
    %c64 = arith.constant 64 : index
    %c0_21 = arith.constant 0 : index
    %53 = vector.load %arg7[%c64, %c0_21] : memref<216x2048xf32, #tpu.memory_space<vmem>>, vector<8x2048xf32>
    tpu.vector_store %arg7[%c64, %c0_21], %52 {strides = array<i32>} : memref<216x2048xf32, #tpu.memory_space<vmem>>, vector<8x2048xf32>,
    %c2288_i32 = arith.constant 2288 : i32
    %54 = tpu.dynamic_rotate %27 by %c2288_i32 dim 1 : vector<8x2432xf32>, i32 -> vector<8x2432xf32>
    %55 = vector.extract_strided_slice %54 {offsets = [0, 0], sizes = [8, 2048], strides = [1, 1]} : vector<8x2432xf32> to vector<8x2048xf32>
    %c72 = arith.constant 72 : index
    %c0_22 = arith.constant 0 : index
    %56 = vector.load %arg7[%c72, %c0_22] : memref<216x2048xf32, #tpu.memory_space<vmem>>, vector<8x2048xf32>
    tpu.vector_store %arg7[%c72, %c0_22], %55 {strides = array<i32>} : memref<216x2048xf32, #tpu.memory_space<vmem>>, vector<8x2048xf32>,
    %c2287_i32 = arith.constant 2287 : i32
    %57 = tpu.dynamic_rotate %27 by %c2287_i32 dim 1 : vector<8x2432xf32>, i32 -> vector<8x2432xf32>
    %58 = vector.extract_strided_slice %57 {offsets = [0, 0], sizes = [8, 2048], strides = [1, 1]} : vector<8x2432xf32> to vector<8x2048xf32>
    %c80 = arith.constant 80 : index
    %c0_23 = arith.constant 0 : index
    %59 = vector.load %arg7[%c80, %c0_23] : memref<216x2048xf32, #tpu.memory_space<vmem>>, vector<8x2048xf32>
    tpu.vector_store %arg7[%c80, %c0_23], %58 {strides = array<i32>} : memref<216x2048xf32, #tpu.memory_space<vmem>>, vector<8x2048xf32>,
    %c2286_i32 = arith.constant 2286 : i32
    %60 = tpu.dynamic_rotate %27 by %c2286_i32 dim 1 : vector<8x2432xf32>, i32 -> vector<8x2432xf32>
    %61 = vector.extract_strided_slice %60 {offsets = [0, 0], sizes = [8, 2048], strides = [1, 1]} : vector<8x2432xf32> to vector<8x2048xf32>
    %c88 = arith.constant 88 : index
    %c0_24 = arith.constant 0 : index
    %62 = vector.load %arg7[%c88, %c0_24] : memref<216x2048xf32, #tpu.memory_space<vmem>>, vector<8x2048xf32>
    tpu.vector_store %arg7[%c88, %c0_24], %61 {strides = array<i32>} : memref<216x2048xf32, #tpu.memory_space<vmem>>, vector<8x2048xf32>,
    %c2276_i32 = arith.constant 2276 : i32
    %63 = tpu.dynamic_rotate %27 by %c2276_i32 dim 1 : vector<8x2432xf32>, i32 -> vector<8x2432xf32>
    %64 = vector.extract_strided_slice %63 {offsets = [0, 0], sizes = [8, 2048], strides = [1, 1]} : vector<8x2432xf32> to vector<8x2048xf32>
    %c96 = arith.constant 96 : index
    %c0_25 = arith.constant 0 : index
    %65 = vector.load %arg7[%c96, %c0_25] : memref<216x2048xf32, #tpu.memory_space<vmem>>, vector<8x2048xf32>
    tpu.vector_store %arg7[%c96, %c0_25], %64 {strides = array<i32>} : memref<216x2048xf32, #tpu.memory_space<vmem>>, vector<8x2048xf32>,
    %c2275_i32 = arith.constant 2275 : i32
    %66 = tpu.dynamic_rotate %27 by %c2275_i32 dim 1 : vector<8x2432xf32>, i32 -> vector<8x2432xf32>
    %67 = vector.extract_strided_slice %66 {offsets = [0, 0], sizes = [8, 2048], strides = [1, 1]} : vector<8x2432xf32> to vector<8x2048xf32>
    %c104 = arith.constant 104 : index
    %c0_26 = arith.constant 0 : index
    %68 = vector.load %arg7[%c104, %c0_26] : memref<216x2048xf32, #tpu.memory_space<vmem>>, vector<8x2048xf32>
    tpu.vector_store %arg7[%c104, %c0_26], %67 {strides = array<i32>} : memref<216x2048xf32, #tpu.memory_space<vmem>>, vector<8x2048xf32>,
    %c2274_i32 = arith.constant 2274 : i32
    %69 = tpu.dynamic_rotate %27 by %c2274_i32 dim 1 : vector<8x2432xf32>, i32 -> vector<8x2432xf32>
    %70 = vector.extract_strided_slice %69 {offsets = [0, 0], sizes = [8, 2048], strides = [1, 1]} : vector<8x2432xf32> to vector<8x2048xf32>
    %c112 = arith.constant 112 : index
    %c0_27 = arith.constant 0 : index
    %71 = vector.load %arg7[%c112, %c0_27] : memref<216x2048xf32, #tpu.memory_space<vmem>>, vector<8x2048xf32>
    tpu.vector_store %arg7[%c112, %c0_27], %70 {strides = array<i32>} : memref<216x2048xf32, #tpu.memory_space<vmem>>, vector<8x2048xf32>,
    %c2264_i32 = arith.constant 2264 : i32
    %72 = tpu.dynamic_rotate %27 by %c2264_i32 dim 1 : vector<8x2432xf32>, i32 -> vector<8x2432xf32>
    %73 = vector.extract_strided_slice %72 {offsets = [0, 0], sizes = [8, 2048], strides = [1, 1]} : vector<8x2432xf32> to vector<8x2048xf32>
    %c120 = arith.constant 120 : index
    %c0_28 = arith.constant 0 : index
    %74 = vector.load %arg7[%c120, %c0_28] : memref<216x2048xf32, #tpu.memory_space<vmem>>, vector<8x2048xf32>
    tpu.vector_store %arg7[%c120, %c0_28], %73 {strides = array<i32>} : memref<216x2048xf32, #tpu.memory_space<vmem>>, vector<8x2048xf32>,
    %c2263_i32 = arith.constant 2263 : i32
    %75 = tpu.dynamic_rotate %27 by %c2263_i32 dim 1 : vector<8x2432xf32>, i32 -> vector<8x2432xf32>
    %76 = vector.extract_strided_slice %75 {offsets = [0, 0], sizes = [8, 2048], strides = [1, 1]} : vector<8x2432xf32> to vector<8x2048xf32>
    %c128 = arith.constant 128 : index
    %c0_29 = arith.constant 0 : index
    %77 = vector.load %arg7[%c128, %c0_29] : memref<216x2048xf32, #tpu.memory_space<vmem>>, vector<8x2048xf32>
    tpu.vector_store %arg7[%c128, %c0_29], %76 {strides = array<i32>} : memref<216x2048xf32, #tpu.memory_space<vmem>>, vector<8x2048xf32>,
    %c2262_i32 = arith.constant 2262 : i32
    %78 = tpu.dynamic_rotate %27 by %c2262_i32 dim 1 : vector<8x2432xf32>, i32 -> vector<8x2432xf32>
    %79 = vector.extract_strided_slice %78 {offsets = [0, 0], sizes = [8, 2048], strides = [1, 1]} : vector<8x2432xf32> to vector<8x2048xf32>
    %c136 = arith.constant 136 : index
    %c0_30 = arith.constant 0 : index
    %80 = vector.load %arg7[%c136, %c0_30] : memref<216x2048xf32, #tpu.memory_space<vmem>>, vector<8x2048xf32>
    tpu.vector_store %arg7[%c136, %c0_30], %79 {strides = array<i32>} : memref<216x2048xf32, #tpu.memory_space<vmem>>, vector<8x2048xf32>,
    %c2144_i32 = arith.constant 2144 : i32
    %81 = tpu.dynamic_rotate %27 by %c2144_i32 dim 1 : vector<8x2432xf32>, i32 -> vector<8x2432xf32>
    %82 = vector.extract_strided_slice %81 {offsets = [0, 0], sizes = [8, 2048], strides = [1, 1]} : vector<8x2432xf32> to vector<8x2048xf32>
    %c144 = arith.constant 144 : index
    %c0_31 = arith.constant 0 : index
    %83 = vector.load %arg7[%c144, %c0_31] : memref<216x2048xf32, #tpu.memory_space<vmem>>, vector<8x2048xf32>
    tpu.vector_store %arg7[%c144, %c0_31], %82 {strides = array<i32>} : memref<216x2048xf32, #tpu.memory_space<vmem>>, vector<8x2048xf32>,
    %c2143_i32 = arith.constant 2143 : i32
    %84 = tpu.dynamic_rotate %27 by %c2143_i32 dim 1 : vector<8x2432xf32>, i32 -> vector<8x2432xf32>
    %85 = vector.extract_strided_slice %84 {offsets = [0, 0], sizes = [8, 2048], strides = [1, 1]} : vector<8x2432xf32> to vector<8x2048xf32>
    %c152 = arith.constant 152 : index
    %c0_32 = arith.constant 0 : index
    %86 = vector.load %arg7[%c152, %c0_32] : memref<216x2048xf32, #tpu.memory_space<vmem>>, vector<8x2048xf32>
    tpu.vector_store %arg7[%c152, %c0_32], %85 {strides = array<i32>} : memref<216x2048xf32, #tpu.memory_space<vmem>>, vector<8x2048xf32>,
    %c2142_i32 = arith.constant 2142 : i32
    %87 = tpu.dynamic_rotate %27 by %c2142_i32 dim 1 : vector<8x2432xf32>, i32 -> vector<8x2432xf32>
    %88 = vector.extract_strided_slice %87 {offsets = [0, 0], sizes = [8, 2048], strides = [1, 1]} : vector<8x2432xf32> to vector<8x2048xf32>
    %c160 = arith.constant 160 : index
    %c0_33 = arith.constant 0 : index
    %89 = vector.load %arg7[%c160, %c0_33] : memref<216x2048xf32, #tpu.memory_space<vmem>>, vector<8x2048xf32>
    tpu.vector_store %arg7[%c160, %c0_33], %88 {strides = array<i32>} : memref<216x2048xf32, #tpu.memory_space<vmem>>, vector<8x2048xf32>,
    %c2132_i32 = arith.constant 2132 : i32
    %90 = tpu.dynamic_rotate %27 by %c2132_i32 dim 1 : vector<8x2432xf32>, i32 -> vector<8x2432xf32>
    %91 = vector.extract_strided_slice %90 {offsets = [0, 0], sizes = [8, 2048], strides = [1, 1]} : vector<8x2432xf32> to vector<8x2048xf32>
    %c168 = arith.constant 168 : index
    %c0_34 = arith.constant 0 : index
    %92 = vector.load %arg7[%c168, %c0_34] : memref<216x2048xf32, #tpu.memory_space<vmem>>, vector<8x2048xf32>
    tpu.vector_store %arg7[%c168, %c0_34], %91 {strides = array<i32>} : memref<216x2048xf32, #tpu.memory_space<vmem>>, vector<8x2048xf32>,
    %c2131_i32 = arith.constant 2131 : i32
    %93 = tpu.dynamic_rotate %27 by %c2131_i32 dim 1 : vector<8x2432xf32>, i32 -> vector<8x2432xf32>
    %94 = vector.extract_strided_slice %93 {offsets = [0, 0], sizes = [8, 2048], strides = [1, 1]} : vector<8x2432xf32> to vector<8x2048xf32>
    %c176 = arith.constant 176 : index
    %c0_35 = arith.constant 0 : index
    %95 = vector.load %arg7[%c176, %c0_35] : memref<216x2048xf32, #tpu.memory_space<vmem>>, vector<8x2048xf32>
    tpu.vector_store %arg7[%c176, %c0_35], %94 {strides = array<i32>} : memref<216x2048xf32, #tpu.memory_space<vmem>>, vector<8x2048xf32>,
    %c2130_i32 = arith.constant 2130 : i32
    %96 = tpu.dynamic_rotate %27 by %c2130_i32 dim 1 : vector<8x2432xf32>, i32 -> vector<8x2432xf32>
    %97 = vector.extract_strided_slice %96 {offsets = [0, 0], sizes = [8, 2048], strides = [1, 1]} : vector<8x2432xf32> to vector<8x2048xf32>
    %c184 = arith.constant 184 : index
    %c0_36 = arith.constant 0 : index
    %98 = vector.load %arg7[%c184, %c0_36] : memref<216x2048xf32, #tpu.memory_space<vmem>>, vector<8x2048xf32>
    tpu.vector_store %arg7[%c184, %c0_36], %97 {strides = array<i32>} : memref<216x2048xf32, #tpu.memory_space<vmem>>, vector<8x2048xf32>,
    %c2120_i32 = arith.constant 2120 : i32
    %99 = tpu.dynamic_rotate %27 by %c2120_i32 dim 1 : vector<8x2432xf32>, i32 -> vector<8x2432xf32>
    %100 = vector.extract_strided_slice %99 {offsets = [0, 0], sizes = [8, 2048], strides = [1, 1]} : vector<8x2432xf32> to vector<8x2048xf32>
    %c192 = arith.constant 192 : index
    %c0_37 = arith.constant 0 : index
    %101 = vector.load %arg7[%c192, %c0_37] : memref<216x2048xf32, #tpu.memory_space<vmem>>, vector<8x2048xf32>
    tpu.vector_store %arg7[%c192, %c0_37], %100 {strides = array<i32>} : memref<216x2048xf32, #tpu.memory_space<vmem>>, vector<8x2048xf32>,
    %c2119_i32 = arith.constant 2119 : i32
    %102 = tpu.dynamic_rotate %27 by %c2119_i32 dim 1 : vector<8x2432xf32>, i32 -> vector<8x2432xf32>
    %103 = vector.extract_strided_slice %102 {offsets = [0, 0], sizes = [8, 2048], strides = [1, 1]} : vector<8x2432xf32> to vector<8x2048xf32>
    %c200 = arith.constant 200 : index
    %c0_38 = arith.constant 0 : index
    %104 = vector.load %arg7[%c200, %c0_38] : memref<216x2048xf32, #tpu.memory_space<vmem>>, vector<8x2048xf32>
    tpu.vector_store %arg7[%c200, %c0_38], %103 {strides = array<i32>} : memref<216x2048xf32, #tpu.memory_space<vmem>>, vector<8x2048xf32>,
    %c2118_i32 = arith.constant 2118 : i32
    %105 = tpu.dynamic_rotate %27 by %c2118_i32 dim 1 : vector<8x2432xf32>, i32 -> vector<8x2432xf32>
    %106 = vector.extract_strided_slice %105 {offsets = [0, 0], sizes = [8, 2048], strides = [1, 1]} : vector<8x2432xf32> to vector<8x2048xf32>
    %c208 = arith.constant 208 : index
    %c0_39 = arith.constant 0 : index
    %107 = vector.load %arg7[%c208, %c0_39] : memref<216x2048xf32, #tpu.memory_space<vmem>>, vector<8x2048xf32>
    tpu.vector_store %arg7[%c208, %c0_39], %106 {strides = array<i32>} : memref<216x2048xf32, #tpu.memory_space<vmem>>, vector<8x2048xf32>,
    %c0_40 = arith.constant 0 : index
    %c0_41 = arith.constant 0 : index
    %108 = vector.load %arg4[%c0_40, %c0_41] : memref<32x216xf32, #tpu.memory_space<vmem>>, vector<32x216xf32>
    %c0_42 = arith.constant 0 : index
    %c0_43 = arith.constant 0 : index
    %109 = vector.load %arg7[%c0_42, %c0_43] : memref<216x2048xf32, #tpu.memory_space<vmem>>, vector<216x2048xf32>
    %cst = arith.constant dense<0.000000e+00> : vector<32x2048xf32>
    %110 = tpu.matmul %108, %109, %cst {dimension_numbers = #tpu.dot_dimension_numbers<[1], [0], [0], [1], [0, 0, 1, 1], [], []>} : vector<32x216xf32>, vector<216x2048xf32>, vector<32x2048xf32> -> vector<32x2048xf32>
    %c0_44 = arith.constant 0 : index
    %c0_45 = arith.constant 0 : index
    %111 = vector.load %arg8[%c0_44, %c0_45] : memref<32x2048xf32, #tpu.memory_space<vmem>>, vector<32x2048xf32>
    tpu.vector_store %arg8[%c0_44, %c0_45], %110 {strides = array<i32>} : memref<32x2048xf32, #tpu.memory_space<vmem>>, vector<32x2048xf32>,
    %c0_46 = arith.constant 0 : index
    %c0_47 = arith.constant 0 : index
    %112 = vector.load %arg8[%c0_46, %c0_47] : memref<32x2048xf32, #tpu.memory_space<vmem>>, vector<8x2048xf32>
    %c8_48 = arith.constant 8 : index
    %c0_49 = arith.constant 0 : index
    %113 = vector.load %arg8[%c8_48, %c0_49] : memref<32x2048xf32, #tpu.memory_space<vmem>>, vector<8x2048xf32>
    %c16_50 = arith.constant 16 : index
    %c0_51 = arith.constant 0 : index
    %114 = vector.load %arg8[%c16_50, %c0_51] : memref<32x2048xf32, #tpu.memory_space<vmem>>, vector<8x2048xf32>
    %c24_52 = arith.constant 24 : index
    %c0_53 = arith.constant 0 : index
    %115 = vector.load %arg8[%c24_52, %c0_53] : memref<32x2048xf32, #tpu.memory_space<vmem>>, vector<1x2048xf32>
    %c25 = arith.constant 25 : index
    %c0_54 = arith.constant 0 : index
    %116 = vector.load %arg8[%c25, %c0_54] : memref<32x2048xf32, #tpu.memory_space<vmem>>, vector<1x2048xf32>
    %c26 = arith.constant 26 : index
    %c0_55 = arith.constant 0 : index
    %117 = vector.load %arg8[%c26, %c0_55] : memref<32x2048xf32, #tpu.memory_space<vmem>>, vector<1x2048xf32>
    %cst_56 = arith.constant 4.000000e+00 : f32
    %118 = vector.broadcast %cst_56 : f32 to vector<1x2048xf32>
    %119 = arith.mulf %117, %118 : vector<1x2048xf32>
    %cst_57 = arith.constant 1.000000e+00 : f32
    %120 = vector.broadcast %cst_57 : f32 to vector<1x2048xf32>
    %121 = arith.maximumf %119, %120 : vector<1x2048xf32>
    %122 = arith.divf %115, %121 : vector<1x2048xf32>
    %123 = arith.divf %116, %121 : vector<1x2048xf32>
    %cst_58 = arith.constant 2.000000e+00 : f32
    %124 = vector.broadcast %cst_58 : f32 to vector<1x2048xf32>
    %125 = arith.maximumf %119, %124 : vector<1x2048xf32>
    %cst_59 = arith.constant 1.000000e+00 : f32
    %126 = vector.broadcast %cst_59 : f32 to vector<1x2048xf32>
    %127 = arith.subf %125, %126 : vector<1x2048xf32>
    %128 = arith.divf %125, %127 : vector<1x2048xf32>
    %129 = arith.mulf %122, %122 : vector<1x2048xf32>
    %130 = arith.subf %123, %129 : vector<1x2048xf32>
    %cst_60 = arith.constant 0.000000e+00 : f32
    %131 = vector.broadcast %cst_60 : f32 to vector<1x2048xf32>
    %132 = arith.maximumf %130, %131 : vector<1x2048xf32>
    %133 = arith.mulf %128, %132 : vector<1x2048xf32>
    %cst_61 = arith.constant 9.99999974E-6 : f32
    %134 = vector.broadcast %cst_61 : f32 to vector<1x2048xf32>
    %135 = arith.addf %133, %134 : vector<1x2048xf32>
    %136 = math.sqrt %135 : vector<1x2048xf32>
    %c0_62 = arith.constant 0 : index
    %137 = memref.load %arg2[%c0_62] : memref<1xf32, #tpu.memory_space<smem>>
    %cst_63 = arith.constant 0.000000e+00 : f32
    %138 = arith.subf %cst_63, %137 : f32
    %139 = math.log %136 : vector<1x2048xf32>
    %140 = vector.broadcast %138 : f32 to vector<1x2048xf32>
    %141 = arith.mulf %140, %139 : vector<1x2048xf32>
    %142 = math.exp %141 : vector<1x2048xf32>
    %143 = vector.broadcast %122 : vector<1x2048xf32> to vector<8x2048xf32>
    %144 = arith.mulf %143, %113 : vector<8x2048xf32>
    %145 = arith.subf %112, %144 : vector<8x2048xf32>
    %146 = vector.broadcast %142 : vector<1x2048xf32> to vector<8x2048xf32>
    %147 = arith.mulf %145, %146 : vector<8x2048xf32>
    %148 = arith.addf %147, %114 : vector<8x2048xf32>
    %c0_64 = arith.constant 0 : index
    %c0_65 = arith.constant 0 : index
    %c0_66 = arith.constant 0 : index
    %149 = vector.load %arg5[%c0_64, %c0_65, %c0_66] : memref<1x8x2048xf32, #tpu.memory_space<vmem>>, vector<1x8x2048xf32>
    %150 = vector.shape_cast %149 : vector<1x8x2048xf32> to vector<8x2048xf32>
    %151 = vector.shape_cast %148 : vector<8x2048xf32> to vector<1x8x2048xf32>
    tpu.vector_store %arg5[%c0_64, %c0_65, %c0_66], %151 {strides = array<i32>} : memref<1x8x2048xf32, #tpu.memory_space<vmem>>, vector<1x8x2048xf32>,
    return
  }
  func.func @transform_0(%arg0: i32, %arg1: i32) -> i32 {
    %c0_i32 = arith.constant 0 : i32
    %c0_i32_0 = arith.constant 0 : i32
    return %c0_i32 : i32
  }
  func.func @transform_2(%arg0: i32, %arg1: i32) -> (i32, i32) {
    %c0_i32 = arith.constant 0 : i32
    %c0_i32_0 = arith.constant 0 : i32
    %c0_i32_1 = arith.constant 0 : i32
    return %c0_i32, %c0_i32_0 : i32, i32
  }
  func.func @transform_3(%arg0: i32, %arg1: i32) -> (i32, i32, i32) {
    %c0_i32 = arith.constant 0 : i32
    %c0_i32_0 = arith.constant 0 : i32
    return %arg0, %c0_i32, %arg1 : i32, i32, i32
  }
}

</mosaic_0001>

<bundles_post_ra>
// kernel: bnhn_conv3d_transpose.3
= control target key start
LH: loop header
LB: loop body
LE: loop exit
PB: predicated region body
PF: predicated region fallthrough
CT: control target
= control target key end

     0   :  { %vm18_vm0 = vcmask 24576   ;;  %s2453_s0 = inlined_call_operand.vmem [shape: f32[1024,4], index: 0, kind: input, shape index: {}]   ;;  %s2454_s1 = inlined_call_operand.vmem [shape: f32[1,4], index: 1, kind: input, shape index: {}]   ;;  %s2455_s2 = inlined_call_operand.vmem [shape: f32[1,4], index: 2, kind: output, shape index: {0}]   ;;  %s2456_s3 = inlined_call_operand.hbm [shape: f32[1,4], index: 3, kind: output, shape index: {1}]  }
   0x1   :  { %9 = vsyncpa [#allocation3], 0  ;;  %v988_v0 = vmov 0.0   ;;  %v21_v1 = vld [vmem:[%s2453_s0] sm:$0xff]  ;;  %v22_v2 = vld [vmem:[%s2453_s0 + $0x8] sm:$0xff]  ;;  %vm285_vm1 = vcmask 31744  }
   0x2   :  { %20 = vst.msk [vmem:[#allocation2] sm:$0x1] %vm18_vm0, %v988_v0  ;;  %19 = vst.msk [vmem:[%s2455_s2] sm:$0x1] %vm18_vm0, %v988_v0  ;;  %v23_v3 = vld [vmem:[%s2453_s0 + $0x10] sm:$0xff]  ;;  %v24_v5 = vld [vmem:[%s2453_s0 + $0x18] sm:$0xff] }
   0x3   :  { %v1027_v4 = vld [vmem:[%s2454_s1] ss:$0 sm:$0xff]  ;;  %v26_v14 = vld [vmem:[%s2453_s0 + $0x28] sm:$0xff]  ;;  %v27_v18 = vld [vmem:[%s2453_s0 + $0x30] sm:$0xff] }
   0x4   :  { %v1033_v6 = vsub.f32 %v21_v1, %v1027_v4  ;;  %v1036_v7 = vsub.f32 %v22_v2, %v1027_v4  ;;  %v1039_v8 = vsub.f32 %v23_v3, %v1027_v4  ;;  %v25_v9 = vld [vmem:[%s2453_s0 + $0x20] sm:$0xff]  ;;  %v1045_v10 = vsub.f32 %v24_v5, %v1027_v4  ;;  %v28_v22 = vld [vmem:[%s2453_s0 + $0x38] sm:$0xff]  ;;  %v30_v30 = vld [vmem:[%s2453_s0 + $0x48] sm:$0xff] }
   0x5   :  { %v1057_v16 = vsub.f32 %v25_v9, %v1027_v4  ;;  %v1065_v20 = vsub.f32 %v26_v14, %v1027_v4  ;;  %v1073_v24 = vsub.f32 %v27_v18, %v1027_v4  ;;  %v29_v26 = vld [vmem:[%s2453_s0 + $0x40] sm:$0xff]  ;;  %v1081_v28 = vsub.f32 %v28_v22, %v1027_v4  ;;  %v31_v34 = vld [vmem:[%s2453_s0 + $0x50] sm:$0xff]  ;;  %v32_v38 = vld [vmem:[%s2453_s0 + $0x58] sm:$0xff] }
   0x6   :  { %v286_v11 = vsel %vm285_vm1, %v1033_v6, 0.0  ;;  %v287_v12 = vsel %vm285_vm1, %v1036_v7, 0.0  ;;  %v289_v13 = vsel %vm285_vm1, %v1039_v8, 0.0  ;;  %v291_v17 = vsel %vm285_vm1, %v1045_v10, 0.0  ;;  %v33_v42 = vld [vmem:[%s2453_s0 + $0x60] sm:$0xff]  ;;  %v34_v46 = vld [vmem:[%s2453_s0 + $0x68] sm:$0xff] }
   0x7   :  { %v288_v15 = vadd.f32 %v287_v12, %v286_v11  ;;  %v293_v21 = vsel %vm285_vm1, %v1057_v16, 0.0  ;;  %v295_v25 = vsel %vm285_vm1, %v1065_v20, 0.0  ;;  %v297_v29 = vsel %vm285_vm1, %v1073_v24, 0.0  ;;  %v35_v50 = vld [vmem:[%s2453_s0 + $0x70] sm:$0xff]  ;;  %v36_v54 = vld [vmem:[%s2453_s0 + $0x78] sm:$0xff]  ;;  %v37_v58 = vld [vmem:[%s2453_s0 + $0x80] sm:$0xff] }
   0x8   :  { %v1089_v32 = vsub.f32 %v29_v26, %v1027_v4  ;;  %v299_v33 = vsel %vm285_vm1, %v1081_v28, 0.0  ;;  %v1097_v36 = vsub.f32 %v30_v30, %v1027_v4  ;;  %v1105_v40 = vsub.f32 %v31_v34, %v1027_v4  ;;  %v38_v62 = vld [vmem:[%s2453_s0 + $0x88] sm:$0xff]  ;;  %v39_v2 = vld [vmem:[%s2453_s0 + $0x90] sm:$0xff]  ;;  %v40_v11 = vld [vmem:[%s2453_s0 + $0x98] sm:$0xff] }
   0x9   :  { %v290_v19 = vadd.f32 %v289_v13, %v288_v15  ;;  %v1113_v44 = vsub.f32 %v32_v38, %v1027_v4  ;;  %v1121_v48 = vsub.f32 %v33_v42, %v1027_v4  ;;  %v1129_v52 = vsub.f32 %v34_v46, %v1027_v4  ;;  %v41_v15 = vld [vmem:[%s2453_s0 + $0xa0] sm:$0xff]  ;;  %v43_v26 = vld [vmem:[%s2453_s0 + $0xb0] sm:$0xff] }
   0xa   :  { %v301_v37 = vsel %vm285_vm1, %v1089_v32, 0.0  ;;  %v303_v41 = vsel %vm285_vm1, %v1097_v36, 0.0  ;;  %v305_v45 = vsel %vm285_vm1, %v1105_v40, 0.0  ;;  %v1137_v56 = vsub.f32 %v35_v50, %v1027_v4 }
   0xb   :  { %v292_v23 = vadd.f32 %v291_v17, %v290_v19  ;;  %v307_v49 = vsel %vm285_vm1, %v1113_v44, 0.0  ;;  %v309_v53 = vsel %vm285_vm1, %v1121_v48, 0.0  ;;  %v311_v57 = vsel %vm285_vm1, %v1129_v52, 0.0 }
   0xc   :  { %v1145_v60 = vsub.f32 %v36_v54, %v1027_v4  ;;  %v313_v61 = vsel %vm285_vm1, %v1137_v56, 0.0  ;;  %v1153_v0 = vsub.f32 %v37_v58, %v1027_v4  ;;  %v1161_v5 = vsub.f32 %v38_v62, %v1027_v4 }
   0xd   :  { %v294_v27 = vadd.f32 %v293_v21, %v292_v23  ;;  %v1169_v13 = vsub.f32 %v39_v2, %v1027_v4  ;;  %v1177_v18 = vsub.f32 %v40_v11, %v1027_v4  ;;  %v42_v21 = vld [vmem:[%s2453_s0 + $0xa8] sm:$0xff]  ;;  %v1185_v23 = vsub.f32 %v41_v15, %v1027_v4 }
   0xe   :  { %v315_v1 = vsel %vm285_vm1, %v1145_v60, 0.0  ;;  %v317_v9 = vsel %vm285_vm1, %v1153_v0, 0.0  ;;  %v319_v14 = vsel %vm285_vm1, %v1161_v5, 0.0  ;;  %v1201_v34 = vsub.f32 %v43_v26, %v1027_v4 }
   0xf   :  { %v296_v31 = vadd.f32 %v295_v25, %v294_v27  ;;  %v321_v19 = vsel %vm285_vm1, %v1169_v13, 0.0  ;;  %v323_v25 = vsel %vm285_vm1, %v1177_v18, 0.0  ;;  %v325_v30 = vsel %vm285_vm1, %v1185_v23, 0.0 }
  0x10   :  { %v329_v42 = vsel %vm285_vm1, %v1201_v34, 0.0  ;;  %v551_v54 = vmul.f32 %v1033_v6, %v1033_v6  ;;  %v554_v62 = vmul.f32 %v1045_v10, %v1045_v10  ;;  %v49_v6 = vld [vmem:[%s2453_s0 + $0xe0] sm:$0xff] }
  0x11   :  { %v298_v35 = vadd.f32 %v297_v29, %v296_v31  ;;  %v1193_v29 = vsub.f32 %v42_v21, %v1027_v4  ;;  %v44_v31 = vld [vmem:[%s2453_s0 + $0xb8] sm:$0xff] }
  0x12   :  { %v679_v2 = vsel %vm285_vm1, %v551_v54, 0.0 }
  0x13   :  { %v300_v39 = vadd.f32 %v299_v33, %v298_v35  ;;  %v327_v35 = vsel %vm285_vm1, %v1193_v29, 0.0 }
  0x15   :  { %v302_v43 = vadd.f32 %v301_v37, %v300_v39  ;;  %v45_v37 = vld [vmem:[%s2453_s0 + $0xc0] sm:$0xff]  ;;  %v46_v39 = vld [vmem:[%s2453_s0 + $0xc8] sm:$0xff] }
  0x16   :  { %v1220_v46 = vsub.f32 %v45_v37, %v1027_v4 }
  0x17   :  { %v304_v47 = vadd.f32 %v303_v41, %v302_v43  ;;  %v1212_v41 = vsub.f32 %v44_v31, %v1027_v4 }
  0x19   :  { %v306_v51 = vadd.f32 %v305_v45, %v304_v47  ;;  %v47_v45 = vld [vmem:[%s2453_s0 + $0xd0] sm:$0xff]  ;;  %v331_v47 = vsel %vm285_vm1, %v1212_v41, 0.0 }
  0x1a   :  { %v1239_v58 = vsub.f32 %v47_v45, %v1027_v4 }
  0x1b   :  { %v308_v55 = vadd.f32 %v307_v49, %v306_v51  ;;  %v1225_v49 = vsub.f32 %v46_v39, %v1027_v4  ;;  %v48_v51 = vld [vmem:[%s2453_s0 + $0xd8] sm:$0xff] }
  0x1d   :  { %v310_v59 = vadd.f32 %v309_v53, %v308_v55  ;;  %v333_v53 = vsel %vm285_vm1, %v1220_v46, 0.0  ;;  %v552_v55 = vmul.f32 %v1036_v7, %v1036_v7 }
  0x1f   :  { %v312_v63 = vadd.f32 %v311_v57, %v310_v59  ;;  %v553_v57 = vmul.f32 %v1039_v8, %v1039_v8  ;;  %v337_v8 = vsel %vm285_vm1, %v1239_v58, 0.0 }
  0x21   :  { %v314_v3 = vadd.f32 %v313_v61, %v312_v63  ;;  %v335_v61 = vsel %vm285_vm1, %v1225_v49, 0.0  ;;  %v1249_v63 = vsub.f32 %v48_v51, %v1027_v4  ;;  %v682_v10 = vsel %vm285_vm1, %v553_v57, 0.0 }
  0x23   :  { %v316_v12 = vadd.f32 %v315_v1, %v314_v3  ;;  %v555_v1 = vmul.f32 %v1057_v16, %v1057_v16  ;;  %v680_v3 = vsel %vm285_vm1, %v552_v55, 0.0  ;;  %v339_v15 = vsel %vm285_vm1, %v1249_v63, 0.0 }
  0x24   :  { %v556_v16 = vmul.f32 %v1065_v20, %v1065_v20  ;;  %v52_v20 = vld [vmem:[%s2453_s0 + $0xf8] sm:$0xff] }
  0x25   :  { %v318_v17 = vadd.f32 %v317_v9, %v316_v12  ;;  %v50_v9 = vld [vmem:[%s2453_s0 + $0xe8] sm:$0xff]  ;;  %v681_v12 = vadd.f32 %v680_v3, %v679_v2  ;;  %v1295_v45 = vsub.f32 %v52_v20, %v1027_v4 }
  0x26   :  { %v688_v39 = vsel %vm285_vm1, %v556_v16, 0.0 }
  0x27   :  { %v320_v22 = vadd.f32 %v319_v14, %v318_v17  ;;  %v1262_v14 = vsub.f32 %v49_v6, %v1027_v4  ;;  %v684_v17 = vsel %vm285_vm1, %v554_v62, 0.0  ;;  %v347_v57 = vsel %vm285_vm1, %v1295_v45, 0.0 }
  0x29   :  { %v322_v27 = vadd.f32 %v321_v19, %v320_v22  ;;  %v51_v19 = vld [vmem:[%s2453_s0 + $0xf0] sm:$0xff]  ;;  %v683_v22 = vadd.f32 %v682_v10, %v681_v12  ;;  %v341_v26 = vsel %vm285_vm1, %v1262_v14, 0.0  ;;  %v562_v12 = vmul.f32 %v1113_v44, %v1113_v44  ;;  %v58_v44 = vld [vmem:[%s2453_s0 + $0x128] sm:$0xff] }
  0x2b   :  { %v324_v33 = vadd.f32 %v323_v25, %v322_v27  ;;  %v1273_v25 = vsub.f32 %v50_v9, %v1027_v4  ;;  %v557_v27 = vmul.f32 %v1073_v24, %v1073_v24  ;;  %v53_v24 = vld [vmem:[%s2453_s0 + $0x100] sm:$0xff] }
  0x2c   :  { %v1306_v55 = vsub.f32 %v53_v24, %v1027_v4  ;;  %v1361_v24 = vsub.f32 %v58_v44, %v1027_v4 }
  0x2d   :  { %v326_v38 = vadd.f32 %v325_v30, %v324_v33  ;;  %v686_v30 = vsel %vm285_vm1, %v555_v1, 0.0  ;;  %v685_v33 = vadd.f32 %v684_v17, %v683_v22  ;;  %v343_v37 = vsel %vm285_vm1, %v1273_v25, 0.0 }
  0x2e   :  { %v690_v51 = vsel %vm285_vm1, %v557_v27, 0.0  ;;  %v561_v1 = vmul.f32 %v1105_v40, %v1105_v40  ;;  %v57_v40 = vld [vmem:[%s2453_s0 + $0x120] sm:$0xff]  ;;  %v563_v22 = vmul.f32 %v1121_v48, %v1121_v48  ;;  %v59_v48 = vld [vmem:[%s2453_s0 + $0x130] sm:$0xff] }
  0x2f   :  { %v328_v43 = vadd.f32 %v327_v35, %v326_v38  ;;  %v1284_v35 = vsub.f32 %v51_v19, %v1027_v4  ;;  %v558_v38 = vmul.f32 %v1081_v28, %v1081_v28  ;;  %v54_v28 = vld [vmem:[%s2453_s0 + $0x108] sm:$0xff]  ;;  %v1350_v20 = vsub.f32 %v57_v40, %v1027_v4 }
  0x31   :  { %v330_v50 = vadd.f32 %v329_v42, %v328_v43  ;;  %v687_v43 = vadd.f32 %v686_v30, %v685_v33  ;;  %v564_v33 = vmul.f32 %v1129_v52, %v1129_v52  ;;  %v60_v52 = vld [vmem:[%s2453_s0 + $0x138] sm:$0xff] }
  0x33   :  { %v332_v59 = vadd.f32 %v331_v47, %v330_v50  ;;  %v345_v47 = vsel %vm285_vm1, %v1284_v35, 0.0  ;;  %v559_v50 = vmul.f32 %v1089_v32, %v1089_v32  ;;  %v689_v54 = vadd.f32 %v688_v39, %v687_v43  ;;  %v55_v32 = vld [vmem:[%s2453_s0 + $0x110] sm:$0xff] }
  0x34   :  { %v1328_v9 = vsub.f32 %v55_v32, %v1027_v4  ;;  %v565_v43 = vmul.f32 %v1137_v56, %v1137_v56  ;;  %v61_v56 = vld [vmem:[%s2453_s0 + $0x140] sm:$0xff]  ;;  %v1383_v32 = vsub.f32 %v60_v52, %v1027_v4 }
  0x35   :  { %v334_v7 = vadd.f32 %v333_v53, %v332_v59  ;;  %v560_v59 = vmul.f32 %v1097_v36, %v1097_v36  ;;  %v691_v6 = vadd.f32 %v690_v51, %v689_v54  ;;  %v694_v2 = vsel %vm285_vm1, %v559_v50, 0.0  ;;  %v56_v36 = vld [vmem:[%s2453_s0 + $0x118] sm:$0xff] }
  0x36   :  { %v1339_v19 = vsub.f32 %v56_v36, %v1027_v4  ;;  %v566_v54 = vmul.f32 %v1145_v60, %v1145_v60  ;;  %v62_v60 = vld [vmem:[%s2453_s0 + $0x148] sm:$0xff]  ;;  %v1394_v36 = vsub.f32 %v61_v56, %v1027_v4 }
  0x37   :  { %v336_v11 = vadd.f32 %v335_v61, %v334_v7  ;;  %v692_v61 = vsel %vm285_vm1, %v558_v38, 0.0  ;;  %v1317_v7 = vsub.f32 %v54_v28, %v1027_v4  ;;  %v1372_v28 = vsub.f32 %v59_v48, %v1027_v4 }
  0x38   :  { %v693_v10 = vadd.f32 %v692_v61, %v691_v6  ;;  %v567_v6 = vmul.f32 %v1153_v0, %v1153_v0  ;;  %v63_v0 = vld [vmem:[%s2453_s0 + $0x150] sm:$0xff]  ;;  %v1405_v40 = vsub.f32 %v62_v60, %v1027_v4 }
  0x39   :  { %v338_v21 = vadd.f32 %v337_v8, %v336_v11  ;;  %v349_v8 = vsel %vm285_vm1, %v1306_v55, 0.0  ;;  %v351_v11 = vsel %vm285_vm1, %v1317_v7, 0.0  ;;  %v1416_v44 = vsub.f32 %v63_v0, %v1027_v4 }
  0x3a   :  { %v695_v17 = vadd.f32 %v694_v2, %v693_v10  ;;  %v568_v10 = vmul.f32 %v1161_v5, %v1161_v5  ;;  %v64_v5 = vld [vmem:[%s2453_s0 + $0x158] sm:$0xff] }
  0x3b   :  { %v340_v31 = vadd.f32 %v339_v15, %v338_v21  ;;  %v696_v15 = vsel %vm285_vm1, %v560_v59, 0.0  ;;  %v353_v21 = vsel %vm285_vm1, %v1328_v9, 0.0  ;;  %v1427_v48 = vsub.f32 %v64_v5, %v1027_v4 }
  0x3c   :  { %v697_v30 = vadd.f32 %v696_v15, %v695_v17  ;;  %v569_v17 = vmul.f32 %v1169_v13, %v1169_v13  ;;  %v65_v13 = vld [vmem:[%s2453_s0 + $0x160] sm:$0xff] }
  0x3d   :  { %v342_v42 = vadd.f32 %v341_v26, %v340_v31  ;;  %v698_v26 = vsel %vm285_vm1, %v561_v1, 0.0  ;;  %v355_v31 = vsel %vm285_vm1, %v1339_v19, 0.0  ;;  %v1438_v52 = vsub.f32 %v65_v13, %v1027_v4 }
  0x3e   :  { %v699_v39 = vadd.f32 %v698_v26, %v697_v30  ;;  %v570_v30 = vmul.f32 %v1177_v18, %v1177_v18  ;;  %v66_v18 = vld [vmem:[%s2453_s0 + $0x168] sm:$0xff] }
  0x3f   :  { %v344_v53 = vadd.f32 %v343_v37, %v342_v42  ;;  %v700_v37 = vsel %vm285_vm1, %v562_v12, 0.0  ;;  %v357_v42 = vsel %vm285_vm1, %v1350_v20, 0.0  ;;  %v1449_v56 = vsub.f32 %v66_v18, %v1027_v4 }
  0x40   :  { %v701_v51 = vadd.f32 %v700_v37, %v699_v39  ;;  %v571_v39 = vmul.f32 %v1185_v23, %v1185_v23  ;;  %v67_v23 = vld [vmem:[%s2453_s0 + $0x170] sm:$0xff] }
  0x41   :  { %v346_v62 = vadd.f32 %v345_v47, %v344_v53  ;;  %v702_v47 = vsel %vm285_vm1, %v563_v22, 0.0  ;;  %v359_v53 = vsel %vm285_vm1, %v1361_v24, 0.0  ;;  %v1460_v60 = vsub.f32 %v67_v23, %v1027_v4 }
  0x42   :  { %v703_v61 = vadd.f32 %v702_v47, %v701_v51  ;;  %v572_v51 = vmul.f32 %v1193_v29, %v1193_v29  ;;  %v68_v29 = vld [vmem:[%s2453_s0 + $0x178] sm:$0xff] }
  0x43   :  { %v348_v3 = vadd.f32 %v347_v57, %v346_v62  ;;  %v704_v57 = vsel %vm285_vm1, %v564_v33, 0.0  ;;  %v361_v62 = vsel %vm285_vm1, %v1372_v28, 0.0  ;;  %v1471_v0 = vsub.f32 %v68_v29, %v1027_v4 }
  0x44   :  { %v705_v2 = vadd.f32 %v704_v57, %v703_v61  ;;  %v573_v61 = vmul.f32 %v1201_v34, %v1201_v34  ;;  %v69_v34 = vld [vmem:[%s2453_s0 + $0x180] sm:$0xff] }
  0x45   :  { %v350_v16 = vadd.f32 %v349_v8, %v348_v3  ;;  %v706_v8 = vsel %vm285_vm1, %v565_v43, 0.0  ;;  %v363_v3 = vsel %vm285_vm1, %v1383_v32, 0.0  ;;  %v1482_v5 = vsub.f32 %v69_v34, %v1027_v4 }
  0x46   :  { %v707_v15 = vadd.f32 %v706_v8, %v705_v2  ;;  %v574_v2 = vmul.f32 %v1212_v41, %v1212_v41  ;;  %v70_v41 = vld [vmem:[%s2453_s0 + $0x188] sm:$0xff] }
  0x47   :  { %v352_v27 = vadd.f32 %v351_v11, %v350_v16  ;;  %v708_v11 = vsel %vm285_vm1, %v566_v54, 0.0  ;;  %v365_v16 = vsel %vm285_vm1, %v1394_v36, 0.0  ;;  %v1493_v13 = vsub.f32 %v70_v41, %v1027_v4 }
  0x48   :  { %v709_v26 = vadd.f32 %v708_v11, %v707_v15  ;;  %v575_v15 = vmul.f32 %v1220_v46, %v1220_v46  ;;  %v71_v46 = vld [vmem:[%s2453_s0 + $0x190] sm:$0xff] }
  0x49   :  { %v354_v38 = vadd.f32 %v353_v21, %v352_v27  ;;  %v710_v21 = vsel %vm285_vm1, %v567_v6, 0.0  ;;  %v367_v27 = vsel %vm285_vm1, %v1405_v40, 0.0  ;;  %v1504_v18 = vsub.f32 %v71_v46, %v1027_v4 }
  0x4a   :  { %v711_v37 = vadd.f32 %v710_v21, %v709_v26  ;;  %v576_v26 = vmul.f32 %v1225_v49, %v1225_v49  ;;  %v72_v49 = vld [vmem:[%s2453_s0 + $0x198] sm:$0xff] }
  0x4b   :  { %v356_v50 = vadd.f32 %v355_v31, %v354_v38  ;;  %v712_v31 = vsel %vm285_vm1, %v568_v10, 0.0  ;;  %v369_v38 = vsel %vm285_vm1, %v1416_v44, 0.0  ;;  %v1515_v23 = vsub.f32 %v72_v49, %v1027_v4 }
  0x4c   :  { %v713_v47 = vadd.f32 %v712_v31, %v711_v37  ;;  %v577_v37 = vmul.f32 %v1239_v58, %v1239_v58  ;;  %v73_v58 = vld [vmem:[%s2453_s0 + $0x1a0] sm:$0xff] }
  0x4d   :  { %v358_v59 = vadd.f32 %v357_v42, %v356_v50  ;;  %v714_v42 = vsel %vm285_vm1, %v569_v17, 0.0  ;;  %v371_v50 = vsel %vm285_vm1, %v1427_v48, 0.0  ;;  %v1526_v29 = vsub.f32 %v73_v58, %v1027_v4 }
  0x4e   :  { %v715_v57 = vadd.f32 %v714_v42, %v713_v47  ;;  %v578_v47 = vmul.f32 %v1249_v63, %v1249_v63  ;;  %v74_v63 = vld [vmem:[%s2453_s0 + $0x1a8] sm:$0xff] }
  0x4f   :  { %v360_v1 = vadd.f32 %v359_v53, %v358_v59  ;;  %v716_v53 = vsel %vm285_vm1, %v570_v30, 0.0  ;;  %v373_v59 = vsel %vm285_vm1, %v1438_v52, 0.0  ;;  %v1537_v34 = vsub.f32 %v74_v63, %v1027_v4 }
  0x50   :  { %v717_v8 = vadd.f32 %v716_v53, %v715_v57  ;;  %v579_v57 = vmul.f32 %v1262_v14, %v1262_v14  ;;  %v75_v14 = vld [vmem:[%s2453_s0 + $0x1b0] sm:$0xff] }
  0x51   :  { %v362_v12 = vadd.f32 %v361_v62, %v360_v1  ;;  %v718_v62 = vsel %vm285_vm1, %v571_v39, 0.0  ;;  %v375_v1 = vsel %vm285_vm1, %v1449_v56, 0.0  ;;  %v1548_v41 = vsub.f32 %v75_v14, %v1027_v4 }
  0x52   :  { %v719_v11 = vadd.f32 %v718_v62, %v717_v8  ;;  %v580_v8 = vmul.f32 %v1273_v25, %v1273_v25  ;;  %v76_v25 = vld [vmem:[%s2453_s0 + $0x1b8] sm:$0xff] }
  0x53   :  { %v364_v22 = vadd.f32 %v363_v3, %v362_v12  ;;  %v720_v3 = vsel %vm285_vm1, %v572_v51, 0.0  ;;  %v377_v12 = vsel %vm285_vm1, %v1460_v60, 0.0  ;;  %v1559_v46 = vsub.f32 %v76_v25, %v1027_v4 }
  0x54   :  { %v721_v21 = vadd.f32 %v720_v3, %v719_v11  ;;  %v581_v11 = vmul.f32 %v1284_v35, %v1284_v35  ;;  %v77_v35 = vld [vmem:[%s2453_s0 + $0x1c0] sm:$0xff] }
  0x55   :  { %v366_v33 = vadd.f32 %v365_v16, %v364_v22  ;;  %v722_v16 = vsel %vm285_vm1, %v573_v61, 0.0  ;;  %v379_v22 = vsel %vm285_vm1, %v1471_v0, 0.0  ;;  %v1570_v49 = vsub.f32 %v77_v35, %v1027_v4 }
  0x56   :  { %v723_v31 = vadd.f32 %v722_v16, %v721_v21  ;;  %v582_v21 = vmul.f32 %v1295_v45, %v1295_v45  ;;  %v78_v45 = vld [vmem:[%s2453_s0 + $0x1c8] sm:$0xff] }
  0x57   :  { %v368_v43 = vadd.f32 %v367_v27, %v366_v33  ;;  %v724_v27 = vsel %vm285_vm1, %v574_v2, 0.0  ;;  %v381_v33 = vsel %vm285_vm1, %v1482_v5, 0.0  ;;  %v1581_v58 = vsub.f32 %v78_v45, %v1027_v4 }
  0x58   :  { %v725_v42 = vadd.f32 %v724_v27, %v723_v31  ;;  %v583_v31 = vmul.f32 %v1306_v55, %v1306_v55  ;;  %v79_v55 = vld [vmem:[%s2453_s0 + $0x1d0] sm:$0xff] }
  0x59   :  { %v370_v54 = vadd.f32 %v369_v38, %v368_v43  ;;  %v726_v38 = vsel %vm285_vm1, %v575_v15, 0.0  ;;  %v383_v43 = vsel %vm285_vm1, %v1493_v13, 0.0  ;;  %v1592_v63 = vsub.f32 %v79_v55, %v1027_v4 }
  0x5a   :  { %v727_v53 = vadd.f32 %v726_v38, %v725_v42  ;;  %v584_v42 = vmul.f32 %v1317_v7, %v1317_v7  ;;  %v80_v7 = vld [vmem:[%s2453_s0 + $0x1d8] sm:$0xff] }
  0x5b   :  { %v372_v6 = vadd.f32 %v371_v50, %v370_v54  ;;  %v728_v50 = vsel %vm285_vm1, %v576_v26, 0.0  ;;  %v385_v54 = vsel %vm285_vm1, %v1504_v18, 0.0  ;;  %v1603_v14 = vsub.f32 %v80_v7, %v1027_v4 }
  0x5c   :  { %v729_v62 = vadd.f32 %v728_v50, %v727_v53  ;;  %v585_v53 = vmul.f32 %v1328_v9, %v1328_v9  ;;  %v81_v9 = vld [vmem:[%s2453_s0 + $0x1e0] sm:$0xff] }
  0x5d   :  { %v374_v10 = vadd.f32 %v373_v59, %v372_v6  ;;  %v730_v59 = vsel %vm285_vm1, %v577_v37, 0.0  ;;  %v387_v6 = vsel %vm285_vm1, %v1515_v23, 0.0  ;;  %v1614_v25 = vsub.f32 %v81_v9, %v1027_v4 }
  0x5e   :  { %v731_v3 = vadd.f32 %v730_v59, %v729_v62  ;;  %v586_v62 = vmul.f32 %v1339_v19, %v1339_v19  ;;  %v82_v19 = vld [vmem:[%s2453_s0 + $0x1e8] sm:$0xff] }
  0x5f   :  { %v376_v17 = vadd.f32 %v375_v1, %v374_v10  ;;  %v732_v1 = vsel %vm285_vm1, %v578_v47, 0.0  ;;  %v389_v10 = vsel %vm285_vm1, %v1526_v29, 0.0  ;;  %v1625_v35 = vsub.f32 %v82_v19, %v1027_v4 }
  0x60   :  { %v733_v16 = vadd.f32 %v732_v1, %v731_v3  ;;  %v587_v3 = vmul.f32 %v1350_v20, %v1350_v20  ;;  %v83_v20 = vld [vmem:[%s2453_s0 + $0x1f0] sm:$0xff] }
  0x61   :  { %v378_v30 = vadd.f32 %v377_v12, %v376_v17  ;;  %v734_v12 = vsel %vm285_vm1, %v579_v57, 0.0  ;;  %v391_v17 = vsel %vm285_vm1, %v1537_v34, 0.0  ;;  %v1636_v45 = vsub.f32 %v83_v20, %v1027_v4 }
  0x62   :  { %v735_v27 = vadd.f32 %v734_v12, %v733_v16  ;;  %v588_v16 = vmul.f32 %v1361_v24, %v1361_v24  ;;  %v84_v24 = vld [vmem:[%s2453_s0 + $0x1f8] sm:$0xff] }
  0x63   :  { %v380_v39 = vadd.f32 %v379_v22, %v378_v30  ;;  %v736_v22 = vsel %vm285_vm1, %v580_v8, 0.0  ;;  %v393_v30 = vsel %vm285_vm1, %v1548_v41, 0.0  ;;  %v1647_v55 = vsub.f32 %v84_v24, %v1027_v4 }
  0x64   :  { %v737_v38 = vadd.f32 %v736_v22, %v735_v27  ;;  %v589_v27 = vmul.f32 %v1372_v28, %v1372_v28  ;;  %v85_v28 = vld [vmem:[%s2453_s0 + $0x200] sm:$0xff] }
  0x65   :  { %v382_v51 = vadd.f32 %v381_v33, %v380_v39  ;;  %v738_v33 = vsel %vm285_vm1, %v581_v11, 0.0  ;;  %v395_v39 = vsel %vm285_vm1, %v1559_v46, 0.0  ;;  %v1658_v7 = vsub.f32 %v85_v28, %v1027_v4 }
  0x66   :  { %v739_v50 = vadd.f32 %v738_v33, %v737_v38  ;;  %v590_v38 = vmul.f32 %v1383_v32, %v1383_v32  ;;  %v86_v32 = vld [vmem:[%s2453_s0 + $0x208] sm:$0xff] }
  0x67   :  { %v384_v61 = vadd.f32 %v383_v43, %v382_v51  ;;  %v740_v43 = vsel %vm285_vm1, %v582_v21, 0.0  ;;  %v397_v51 = vsel %vm285_vm1, %v1570_v49, 0.0  ;;  %v1669_v9 = vsub.f32 %v86_v32, %v1027_v4 }
  0x68   :  { %v741_v59 = vadd.f32 %v740_v43, %v739_v50  ;;  %v591_v50 = vmul.f32 %v1394_v36, %v1394_v36  ;;  %v87_v36 = vld [vmem:[%s2453_s0 + $0x210] sm:$0xff] }
  0x69   :  { %v386_v2 = vadd.f32 %v385_v54, %v384_v61  ;;  %v742_v54 = vsel %vm285_vm1, %v583_v31, 0.0  ;;  %v399_v61 = vsel %vm285_vm1, %v1581_v58, 0.0  ;;  %v1680_v19 = vsub.f32 %v87_v36, %v1027_v4 }
  0x6a   :  { %v743_v1 = vadd.f32 %v742_v54, %v741_v59  ;;  %v592_v59 = vmul.f32 %v1405_v40, %v1405_v40  ;;  %v88_v40 = vld [vmem:[%s2453_s0 + $0x218] sm:$0xff] }
  0x6b   :  { %v388_v15 = vadd.f32 %v387_v6, %v386_v2  ;;  %v744_v6 = vsel %vm285_vm1, %v584_v42, 0.0  ;;  %v401_v2 = vsel %vm285_vm1, %v1592_v63, 0.0  ;;  %v1691_v20 = vsub.f32 %v88_v40, %v1027_v4 }
  0x6c   :  { %v745_v12 = vadd.f32 %v744_v6, %v743_v1  ;;  %v593_v1 = vmul.f32 %v1416_v44, %v1416_v44  ;;  %v89_v44 = vld [vmem:[%s2453_s0 + $0x220] sm:$0xff] }
  0x6d   :  { %v390_v26 = vadd.f32 %v389_v10, %v388_v15  ;;  %v746_v10 = vsel %vm285_vm1, %v585_v53, 0.0  ;;  %v403_v15 = vsel %vm285_vm1, %v1603_v14, 0.0  ;;  %v1702_v24 = vsub.f32 %v89_v44, %v1027_v4 }
  0x6e   :  { %v747_v22 = vadd.f32 %v746_v10, %v745_v12  ;;  %v594_v12 = vmul.f32 %v1427_v48, %v1427_v48  ;;  %v90_v48 = vld [vmem:[%s2453_s0 + $0x228] sm:$0xff] }
  0x6f   :  { %v392_v37 = vadd.f32 %v391_v17, %v390_v26  ;;  %v748_v17 = vsel %vm285_vm1, %v586_v62, 0.0  ;;  %v405_v26 = vsel %vm285_vm1, %v1614_v25, 0.0  ;;  %v1713_v28 = vsub.f32 %v90_v48, %v1027_v4 }
  0x70   :  { %v749_v33 = vadd.f32 %v748_v17, %v747_v22  ;;  %v595_v22 = vmul.f32 %v1438_v52, %v1438_v52  ;;  %v91_v52 = vld [vmem:[%s2453_s0 + $0x230] sm:$0xff] }
  0x71   :  { %v394_v47 = vadd.f32 %v393_v30, %v392_v37  ;;  %v750_v30 = vsel %vm285_vm1, %v587_v3, 0.0  ;;  %v407_v37 = vsel %vm285_vm1, %v1625_v35, 0.0  ;;  %v1724_v32 = vsub.f32 %v91_v52, %v1027_v4 }
  0x72   :  { %v751_v43 = vadd.f32 %v750_v30, %v749_v33  ;;  %v596_v33 = vmul.f32 %v1449_v56, %v1449_v56  ;;  %v92_v56 = vld [vmem:[%s2453_s0 + $0x238] sm:$0xff] }
  0x73   :  { %v396_v57 = vadd.f32 %v395_v39, %v394_v47  ;;  %v752_v39 = vsel %vm285_vm1, %v588_v16, 0.0  ;;  %v409_v47 = vsel %vm285_vm1, %v1636_v45, 0.0  ;;  %v1735_v36 = vsub.f32 %v92_v56, %v1027_v4 }
  0x74   :  { %v753_v54 = vadd.f32 %v752_v39, %v751_v43  ;;  %v597_v43 = vmul.f32 %v1460_v60, %v1460_v60  ;;  %v93_v60 = vld [vmem:[%s2453_s0 + $0x240] sm:$0xff] }
  0x75   :  { %v398_v8 = vadd.f32 %v397_v51, %v396_v57  ;;  %v754_v51 = vsel %vm285_vm1, %v589_v27, 0.0  ;;  %v411_v57 = vsel %vm285_vm1, %v1647_v55, 0.0 }
  0x76   :  { %v755_v6 = vadd.f32 %v754_v51, %v753_v54  ;;  %v768_v54 = vsel %vm285_vm1, %v596_v33, 0.0  ;;  %v602_v33 = vmul.f32 %v1515_v23, %v1515_v23 }
  0x77   :  { %v400_v11 = vadd.f32 %v399_v61, %v398_v8  ;;  %v756_v61 = vsel %vm285_vm1, %v590_v38, 0.0  ;;  %v413_v8 = vsel %vm285_vm1, %v1658_v7, 0.0 }
  0x78   :  { %v757_v10 = vadd.f32 %v756_v61, %v755_v6  ;;  %v770_v6 = vsel %vm285_vm1, %v597_v43, 0.0  ;;  %v603_v43 = vmul.f32 %v1526_v29, %v1526_v29 }
  0x79   :  { %v402_v21 = vadd.f32 %v401_v2, %v400_v11  ;;  %v758_v2 = vsel %vm285_vm1, %v591_v50, 0.0  ;;  %v415_v11 = vsel %vm285_vm1, %v1669_v9, 0.0 }
  0x7a   :  { %v759_v17 = vadd.f32 %v758_v2, %v757_v10  ;;  %v599_v2 = vmul.f32 %v1482_v5, %v1482_v5  ;;  %v95_v10 = vld [vmem:[%s2453_s0 + $0x250] sm:$0xff] }
  0x7b   :  { %v404_v31 = vadd.f32 %v403_v15, %v402_v21  ;;  %v760_v15 = vsel %vm285_vm1, %v592_v59, 0.0  ;;  %v417_v21 = vsel %vm285_vm1, %v1680_v19, 0.0  ;;  %v598_v59 = vmul.f32 %v1471_v0, %v1471_v0 }
  0x7c   :  { %v761_v30 = vadd.f32 %v760_v15, %v759_v17  ;;  %v1746_v0 = vsub.f32 %v93_v60, %v1027_v4  ;;  %v96_v17 = vld [vmem:[%s2453_s0 + $0x258] sm:$0xff]  ;;  %v780_v60 = vsel %vm285_vm1, %v602_v33, 0.0 }
  0x7d   :  { %v406_v42 = vadd.f32 %v405_v26, %v404_v31  ;;  %v762_v26 = vsel %vm285_vm1, %v593_v1, 0.0  ;;  %v419_v31 = vsel %vm285_vm1, %v1691_v20, 0.0  ;;  %v772_v44 = vsel %vm285_vm1, %v598_v59, 0.0 }
  0x7e   :  { %v763_v39 = vadd.f32 %v762_v26, %v761_v30  ;;  %v774_v26 = vsel %vm285_vm1, %v599_v2, 0.0  ;;  %v97_v30 = vld [vmem:[%s2453_s0 + $0x260] sm:$0xff] }
  0x7f   :  { %v408_v53 = vadd.f32 %v407_v37, %v406_v42  ;;  %v764_v37 = vsel %vm285_vm1, %v594_v12, 0.0  ;;  %v421_v42 = vsel %vm285_vm1, %v1702_v24, 0.0  ;;  %v600_v12 = vmul.f32 %v1493_v13, %v1493_v13 }
  0x80   :  { %v765_v51 = vadd.f32 %v764_v37, %v763_v39  ;;  %v1768_v13 = vsub.f32 %v95_v10, %v1027_v4  ;;  %v98_v39 = vld [vmem:[%s2453_s0 + $0x268] sm:$0xff]  ;;  %v1790_v23 = vsub.f32 %v97_v30, %v1027_v4  ;;  %v606_v10 = vmul.f32 %v1559_v46, %v1559_v46 }
  0x81   :  { %v410_v62 = vadd.f32 %v409_v47, %v408_v53  ;;  %v766_v47 = vsel %vm285_vm1, %v595_v22, 0.0  ;;  %v423_v53 = vsel %vm285_vm1, %v1713_v28, 0.0  ;;  %v601_v22 = vmul.f32 %v1504_v18, %v1504_v18 }
  0x82   :  { %v767_v61 = vadd.f32 %v766_v47, %v765_v51  ;;  %v776_v37 = vsel %vm285_vm1, %v600_v12, 0.0  ;;  %v1779_v18 = vsub.f32 %v96_v17, %v1027_v4  ;;  %v433_v52 = vsel %vm285_vm1, %v1768_v13, 0.0  ;;  %v99_v51 = vld [vmem:[%s2453_s0 + $0x270] sm:$0xff] }
  0x83   :  { %v412_v3 = vadd.f32 %v411_v57, %v410_v62  ;;  %v425_v62 = vsel %vm285_vm1, %v1724_v32, 0.0  ;;  %v778_v47 = vsel %vm285_vm1, %v601_v22, 0.0  ;;  %v1801_v29 = vsub.f32 %v98_v39, %v1027_v4 }
  0x84   :  { %v769_v40 = vadd.f32 %v768_v54, %v767_v61  ;;  %v435_v56 = vsel %vm285_vm1, %v1779_v18, 0.0  ;;  %v604_v54 = vmul.f32 %v1537_v34, %v1537_v34  ;;  %v100_v61 = vld [vmem:[%s2453_s0 + $0x278] sm:$0xff]  ;;  %v1812_v34 = vsub.f32 %v99_v51, %v1027_v4 }
  0x85   :  { %v414_v16 = vadd.f32 %v413_v8, %v412_v3  ;;  %v94_v8 = vld [vmem:[%s2453_s0 + $0x248] sm:$0xff]  ;;  %v427_v3 = vsel %vm285_vm1, %v1735_v36, 0.0  ;;  %v607_v17 = vmul.f32 %v1570_v49, %v1570_v49  ;;  %v608_v30 = vmul.f32 %v1581_v58, %v1581_v58 }
  0x86   :  { %v771_v15 = vadd.f32 %v770_v6, %v769_v40  ;;  %v1757_v5 = vsub.f32 %v94_v8, %v1027_v4  ;;  %v605_v6 = vmul.f32 %v1548_v41, %v1548_v41  ;;  %v782_v8 = vsel %vm285_vm1, %v603_v43, 0.0  ;;  %v101_v40 = vld [vmem:[%s2453_s0 + $0x280] sm:$0xff] }
  0x87   :  { %v416_v27 = vadd.f32 %v415_v11, %v414_v16  ;;  %v429_v16 = vsel %vm285_vm1, %v1746_v0, 0.0  ;;  %v1823_v41 = vsub.f32 %v100_v61, %v1027_v4  ;;  %v441_v12 = vsel %vm285_vm1, %v1812_v34, 0.0 }
  0x88   :  { %v431_v48 = vsel %vm285_vm1, %v1757_v5, 0.0  ;;  %v1834_v46 = vsub.f32 %v101_v40, %v1027_v4  ;;  %v609_v39 = vmul.f32 %v1592_v63, %v1592_v63  ;;  %v610_v51 = vmul.f32 %v1603_v14, %v1603_v14 }
  0x89   :  { %v418_v38 = vadd.f32 %v417_v21, %v416_v27  ;;  %v773_v27 = vadd.f32 %v772_v44, %v771_v15  ;;  %v102_v44 = vld [vmem:[%s2453_s0 + $0x288] sm:$0xff]  ;;  %v443_v22 = vsel %vm285_vm1, %v1823_v41, 0.0  ;;  %v611_v61 = vmul.f32 %v1614_v25, %v1614_v25  ;;  %v1891_v25 = vld [vmem:[%s2454_s1] ss:$0 sm:$0xff] }
  0x8a   :  { %v1845_v49 = vsub.f32 %v102_v44, %v1027_v4  ;;  %v445_v33 = vsel %vm285_vm1, %v1834_v46, 0.0  ;;  %v612_v40 = vmul.f32 %v1625_v35, %v1625_v35  ;;  %v613_v35 = vmul.f32 %v1636_v45, %v1636_v45 }
  0x8b   :  { %v420_v50 = vadd.f32 %v419_v31, %v418_v38  ;;  %v775_v38 = vadd.f32 %v774_v26, %v773_v27  ;;  %v798_v44 = vsel %vm285_vm1, %v611_v61, 0.0 }
  0x8c   :  { %v447_v43 = vsel %vm285_vm1, %v1845_v49, 0.0 }
  0x8d   :  { %v422_v57 = vadd.f32 %v421_v42, %v420_v50  ;;  %v777_v50 = vadd.f32 %v776_v37, %v775_v38 }
  0x8f   :  { %v424_v1 = vadd.f32 %v423_v53, %v422_v57  ;;  %v437_v57 = vsel %vm285_vm1, %v1790_v23, 0.0  ;;  %v779_v59 = vadd.f32 %v778_v47, %v777_v50 }
  0x91   :  { %v426_v11 = vadd.f32 %v425_v62, %v424_v1  ;;  %v439_v1 = vsel %vm285_vm1, %v1801_v29, 0.0  ;;  %v781_v2 = vadd.f32 %v780_v60, %v779_v59 }
  0x93   :  { %v428_v21 = vadd.f32 %v427_v3, %v426_v11  ;;  %v784_v11 = vsel %vm285_vm1, %v604_v54, 0.0  ;;  %v783_v15 = vadd.f32 %v782_v8, %v781_v2 }
  0x95   :  { %v430_v31 = vadd.f32 %v429_v16, %v428_v21  ;;  %v786_v21 = vsel %vm285_vm1, %v605_v6, 0.0  ;;  %v785_v26 = vadd.f32 %v784_v11, %v783_v15 }
  0x97   :  { %v432_v42 = vadd.f32 %v431_v48, %v430_v31  ;;  %v103_v48 = vld [vmem:[%s2453_s0 + $0x290] sm:$0xff]  ;;  %v788_v31 = vsel %vm285_vm1, %v606_v10, 0.0  ;;  %v787_v37 = vadd.f32 %v786_v21, %v785_v26 }
  0x98   :  { %v1856_v58 = vsub.f32 %v103_v48, %v1027_v4  ;;  %v614_v48 = vmul.f32 %v1647_v55, %v1647_v55 }
  0x99   :  { %v434_v53 = vadd.f32 %v433_v52, %v432_v42  ;;  %v104_v52 = vld [vmem:[%s2453_s0 + $0x298] sm:$0xff]  ;;  %v790_v42 = vsel %vm285_vm1, %v607_v17, 0.0  ;;  %v789_v47 = vadd.f32 %v788_v31, %v787_v37 }
  0x9a   :  { %v1867_v63 = vsub.f32 %v104_v52, %v1027_v4  ;;  %v449_v54 = vsel %vm285_vm1, %v1856_v58, 0.0  ;;  %v615_v52 = vmul.f32 %v1658_v7, %v1658_v7 }
  0x9b   :  { %v436_v62 = vadd.f32 %v435_v56, %v434_v53  ;;  %v105_v56 = vld [vmem:[%s2453_s0 + $0x2a0] sm:$0xff]  ;;  %v792_v53 = vsel %vm285_vm1, %v608_v30, 0.0  ;;  %v791_v60 = vadd.f32 %v790_v42, %v789_v47 }
  0x9c   :  { %v1878_v14 = vsub.f32 %v105_v56, %v1027_v4  ;;  %v451_v6 = vsel %vm285_vm1, %v1867_v63, 0.0  ;;  %v616_v56 = vmul.f32 %v1669_v9, %v1669_v9 }
  0x9d   :  { %v438_v3 = vadd.f32 %v437_v57, %v436_v62  ;;  %v106_v57 = vld [vmem:[%s2453_s0 + $0x2a8] sm:$0xff]  ;;  %v794_v62 = vsel %vm285_vm1, %v609_v39, 0.0  ;;  %v793_v8 = vadd.f32 %v792_v53, %v791_v60 }
  0x9e   :  { %v1894_v4 = vsub.f32 %v106_v57, %v1891_v25  ;;  %v453_v10 = vsel %vm285_vm1, %v1878_v14, 0.0  ;;  %v617_v57 = vmul.f32 %v1680_v19, %v1680_v19 }
  0x9f   :  { %v440_v16 = vadd.f32 %v439_v1, %v438_v3  ;;  %v107_v1 = vld [vmem:[%s2453_s0 + $0x2b0] sm:$0xff]  ;;  %v796_v3 = vsel %vm285_vm1, %v610_v51, 0.0  ;;  %v795_v11 = vadd.f32 %v794_v62, %v793_v8 }
  0xa0   :  { %v455_v17 = vsel %vm285_vm1, %v1894_v4, 0.0 }
  0xa1   :  { %v442_v27 = vadd.f32 %v441_v12, %v440_v16  ;;  %v108_v12 = vld [vmem:[%s2453_s0 + $0x2b8] sm:$0xff]  ;;  %v1905_v16 = vsub.f32 %v107_v1, %v1891_v25  ;;  %v797_v21 = vadd.f32 %v796_v3, %v795_v11  ;;  %v618_v1 = vmul.f32 %v1691_v20, %v1691_v20 }
  0xa2   :  { %v1916_v45 = vsub.f32 %v108_v12, %v1891_v25  ;;  %v619_v12 = vmul.f32 %v1702_v24, %v1702_v24 }
  0xa3   :  { %v444_v38 = vadd.f32 %v443_v22, %v442_v27  ;;  %v109_v22 = vld [vmem:[%s2453_s0 + $0x2c0] sm:$0xff]  ;;  %v800_v27 = vsel %vm285_vm1, %v612_v40, 0.0  ;;  %v457_v30 = vsel %vm285_vm1, %v1905_v16, 0.0  ;;  %v799_v31 = vadd.f32 %v798_v44, %v797_v21 }
  0xa4   :  { %v1927_v55 = vsub.f32 %v109_v22, %v1891_v25  ;;  %v459_v39 = vsel %vm285_vm1, %v1916_v45, 0.0  ;;  %v620_v22 = vmul.f32 %v1713_v28, %v1713_v28 }
  0xa5   :  { %v446_v50 = vadd.f32 %v445_v33, %v444_v38  ;;  %v110_v33 = vld [vmem:[%s2453_s0 + $0x2c8] sm:$0xff]  ;;  %v802_v38 = vsel %vm285_vm1, %v613_v35, 0.0  ;;  %v801_v42 = vadd.f32 %v800_v27, %v799_v31 }
  0xa6   :  { %v1938_v7 = vsub.f32 %v110_v33, %v1891_v25  ;;  %v461_v51 = vsel %vm285_vm1, %v1927_v55, 0.0  ;;  %v621_v33 = vmul.f32 %v1724_v32, %v1724_v32 }
  0xa7   :  { %v448_v59 = vadd.f32 %v447_v43, %v446_v50  ;;  %v111_v43 = vld [vmem:[%s2453_s0 + $0x2d0] sm:$0xff]  ;;  %v804_v50 = vsel %vm285_vm1, %v614_v48, 0.0  ;;  %v803_v53 = vadd.f32 %v802_v38, %v801_v42 }
  0xa8   :  { %v1949_v9 = vsub.f32 %v111_v43, %v1891_v25  ;;  %v463_v61 = vsel %vm285_vm1, %v1938_v7, 0.0  ;;  %v622_v43 = vmul.f32 %v1735_v36, %v1735_v36 }
  0xa9   :  { %v450_v2 = vadd.f32 %v449_v54, %v448_v59  ;;  %v112_v54 = vld [vmem:[%s2453_s0 + $0x2d8] sm:$0xff]  ;;  %v806_v59 = vsel %vm285_vm1, %v615_v52, 0.0  ;;  %v805_v62 = vadd.f32 %v804_v50, %v803_v53 }
  0xaa   :  { %v1960_v19 = vsub.f32 %v112_v54, %v1891_v25  ;;  %v465_v40 = vsel %vm285_vm1, %v1949_v9, 0.0  ;;  %v623_v54 = vmul.f32 %v1746_v0, %v1746_v0 }
  0xab   :  { %v452_v15 = vadd.f32 %v451_v6, %v450_v2  ;;  %v113_v6 = vld [vmem:[%s2453_s0 + $0x2e0] sm:$0xff]  ;;  %v808_v2 = vsel %vm285_vm1, %v616_v56, 0.0  ;;  %v807_v3 = vadd.f32 %v806_v59, %v805_v62 }
  0xac   :  { %v1971_v20 = vsub.f32 %v113_v6, %v1891_v25  ;;  %v467_v35 = vsel %vm285_vm1, %v1960_v19, 0.0  ;;  %v624_v6 = vmul.f32 %v1757_v5, %v1757_v5 }
  0xad   :  { %v454_v26 = vadd.f32 %v453_v10, %v452_v15  ;;  %v114_v10 = vld [vmem:[%s2453_s0 + $0x2e8] sm:$0xff]  ;;  %v810_v15 = vsel %vm285_vm1, %v617_v57, 0.0  ;;  %v809_v44 = vadd.f32 %v808_v2, %v807_v3 }
  0xae   :  { %v1982_v24 = vsub.f32 %v114_v10, %v1891_v25  ;;  %v469_v48 = vsel %vm285_vm1, %v1971_v20, 0.0  ;;  %v625_v10 = vmul.f32 %v1768_v13, %v1768_v13 }
  0xaf   :  { %v456_v37 = vadd.f32 %v455_v17, %v454_v26  ;;  %v115_v17 = vld [vmem:[%s2453_s0 + $0x2f0] sm:$0xff]  ;;  %v812_v26 = vsel %vm285_vm1, %v618_v1, 0.0  ;;  %v811_v27 = vadd.f32 %v810_v15, %v809_v44 }
  0xb0   :  { %v1993_v28 = vsub.f32 %v115_v17, %v1891_v25  ;;  %v471_v52 = vsel %vm285_vm1, %v1982_v24, 0.0  ;;  %v626_v17 = vmul.f32 %v1779_v18, %v1779_v18 }
  0xb1   :  { %v458_v47 = vadd.f32 %v457_v30, %v456_v37  ;;  %v116_v30 = vld [vmem:[%s2453_s0 + $0x2f8] sm:$0xff]  ;;  %v814_v37 = vsel %vm285_vm1, %v619_v12, 0.0  ;;  %v813_v38 = vadd.f32 %v812_v26, %v811_v27 }
  0xb2   :  { %v2004_v32 = vsub.f32 %v116_v30, %v1891_v25  ;;  %v473_v56 = vsel %vm285_vm1, %v1993_v28, 0.0  ;;  %v627_v30 = vmul.f32 %v1790_v23, %v1790_v23 }
  0xb3   :  { %v460_v60 = vadd.f32 %v459_v39, %v458_v47  ;;  %v117_v39 = vld [vmem:[%s2453_s0 + $0x300] sm:$0xff]  ;;  %v816_v47 = vsel %vm285_vm1, %v620_v22, 0.0  ;;  %v815_v50 = vadd.f32 %v814_v37, %v813_v38 }
  0xb4   :  { %v2015_v36 = vsub.f32 %v117_v39, %v1891_v25  ;;  %v475_v57 = vsel %vm285_vm1, %v2004_v32, 0.0  ;;  %v628_v39 = vmul.f32 %v1801_v29, %v1801_v29 }
  0xb5   :  { %v462_v8 = vadd.f32 %v461_v51, %v460_v60  ;;  %v118_v51 = vld [vmem:[%s2453_s0 + $0x308] sm:$0xff]  ;;  %v818_v60 = vsel %vm285_vm1, %v621_v33, 0.0  ;;  %v817_v59 = vadd.f32 %v816_v47, %v815_v50 }
  0xb6   :  { %v2026_v0 = vsub.f32 %v118_v51, %v1891_v25  ;;  %v477_v1 = vsel %vm285_vm1, %v2015_v36, 0.0  ;;  %v629_v51 = vmul.f32 %v1812_v34, %v1812_v34 }
  0xb7   :  { %v464_v11 = vadd.f32 %v463_v61, %v462_v8  ;;  %v119_v61 = vld [vmem:[%s2453_s0 + $0x310] sm:$0xff]  ;;  %v820_v8 = vsel %vm285_vm1, %v622_v43, 0.0  ;;  %v819_v2 = vadd.f32 %v818_v60, %v817_v59 }
  0xb8   :  { %v2037_v5 = vsub.f32 %v119_v61, %v1891_v25  ;;  %v479_v12 = vsel %vm285_vm1, %v2026_v0, 0.0  ;;  %v630_v61 = vmul.f32 %v1823_v41, %v1823_v41 }
  0xb9   :  { %v466_v21 = vadd.f32 %v465_v40, %v464_v11  ;;  %v120_v40 = vld [vmem:[%s2453_s0 + $0x318] sm:$0xff]  ;;  %v822_v11 = vsel %vm285_vm1, %v623_v54, 0.0  ;;  %v821_v15 = vadd.f32 %v820_v8, %v819_v2 }
  0xba   :  { %v2048_v13 = vsub.f32 %v120_v40, %v1891_v25  ;;  %v481_v22 = vsel %vm285_vm1, %v2037_v5, 0.0  ;;  %v631_v40 = vmul.f32 %v1834_v46, %v1834_v46 }
  0xbb   :  { %v468_v31 = vadd.f32 %v467_v35, %v466_v21  ;;  %v121_v35 = vld [vmem:[%s2453_s0 + $0x320] sm:$0xff]  ;;  %v824_v21 = vsel %vm285_vm1, %v624_v6, 0.0  ;;  %v823_v26 = vadd.f32 %v822_v11, %v821_v15 }
  0xbc   :  { %v2059_v18 = vsub.f32 %v121_v35, %v1891_v25  ;;  %v483_v33 = vsel %vm285_vm1, %v2048_v13, 0.0  ;;  %v632_v35 = vmul.f32 %v1845_v49, %v1845_v49 }
  0xbd   :  { %v470_v42 = vadd.f32 %v469_v48, %v468_v31  ;;  %v122_v48 = vld [vmem:[%s2453_s0 + $0x328] sm:$0xff]  ;;  %v826_v31 = vsel %vm285_vm1, %v625_v10, 0.0  ;;  %v825_v37 = vadd.f32 %v824_v21, %v823_v26 }
  0xbe   :  { %v2070_v23 = vsub.f32 %v122_v48, %v1891_v25  ;;  %v485_v43 = vsel %vm285_vm1, %v2059_v18, 0.0  ;;  %v633_v48 = vmul.f32 %v1856_v58, %v1856_v58 }
  0xbf   :  { %v472_v53 = vadd.f32 %v471_v52, %v470_v42  ;;  %v123_v52 = vld [vmem:[%s2453_s0 + $0x330] sm:$0xff]  ;;  %v828_v42 = vsel %vm285_vm1, %v626_v17, 0.0  ;;  %v827_v47 = vadd.f32 %v826_v31, %v825_v37 }
  0xc0   :  { %v2081_v29 = vsub.f32 %v123_v52, %v1891_v25  ;;  %v487_v54 = vsel %vm285_vm1, %v2070_v23, 0.0  ;;  %v634_v52 = vmul.f32 %v1867_v63, %v1867_v63 }
  0xc1   :  { %v474_v62 = vadd.f32 %v473_v56, %v472_v53  ;;  %v124_v56 = vld [vmem:[%s2453_s0 + $0x338] sm:$0xff]  ;;  %v830_v53 = vsel %vm285_vm1, %v627_v30, 0.0  ;;  %v829_v60 = vadd.f32 %v828_v42, %v827_v47 }
  0xc2   :  { %v2092_v34 = vsub.f32 %v124_v56, %v1891_v25  ;;  %v489_v6 = vsel %vm285_vm1, %v2081_v29, 0.0  ;;  %v635_v56 = vmul.f32 %v1878_v14, %v1878_v14 }
  0xc3   :  { %v476_v3 = vadd.f32 %v475_v57, %v474_v62  ;;  %v125_v57 = vld [vmem:[%s2453_s0 + $0x340] sm:$0xff]  ;;  %v832_v62 = vsel %vm285_vm1, %v628_v39, 0.0  ;;  %v831_v8 = vadd.f32 %v830_v53, %v829_v60 }
  0xc4   :  { %v2103_v41 = vsub.f32 %v125_v57, %v1891_v25  ;;  %v491_v10 = vsel %vm285_vm1, %v2092_v34, 0.0  ;;  %v636_v57 = vmul.f32 %v1894_v4, %v1894_v4 }
  0xc5   :  { %v478_v44 = vadd.f32 %v477_v1, %v476_v3  ;;  %v126_v1 = vld [vmem:[%s2453_s0 + $0x348] sm:$0xff]  ;;  %v834_v3 = vsel %vm285_vm1, %v629_v51, 0.0  ;;  %v833_v11 = vadd.f32 %v832_v62, %v831_v8 }
  0xc6   :  { %v2114_v46 = vsub.f32 %v126_v1, %v1891_v25  ;;  %v493_v17 = vsel %vm285_vm1, %v2103_v41, 0.0  ;;  %v637_v1 = vmul.f32 %v1905_v16, %v1905_v16 }
  0xc7   :  { %v480_v27 = vadd.f32 %v479_v12, %v478_v44  ;;  %v127_v12 = vld [vmem:[%s2453_s0 + $0x350] sm:$0xff]  ;;  %v836_v44 = vsel %vm285_vm1, %v630_v61, 0.0  ;;  %v835_v21 = vadd.f32 %v834_v3, %v833_v11 }
  0xc8   :  { %v2125_v49 = vsub.f32 %v127_v12, %v1891_v25  ;;  %v495_v30 = vsel %vm285_vm1, %v2114_v46, 0.0  ;;  %v638_v12 = vmul.f32 %v1916_v45, %v1916_v45 }
  0xc9   :  { %v482_v38 = vadd.f32 %v481_v22, %v480_v27  ;;  %v128_v22 = vld [vmem:[%s2453_s0 + $0x358] sm:$0xff]  ;;  %v838_v27 = vsel %vm285_vm1, %v631_v40, 0.0  ;;  %v837_v31 = vadd.f32 %v836_v44, %v835_v21 }
  0xca   :  { %v2136_v58 = vsub.f32 %v128_v22, %v1891_v25  ;;  %v497_v39 = vsel %vm285_vm1, %v2125_v49, 0.0  ;;  %v639_v22 = vmul.f32 %v1927_v55, %v1927_v55 }
  0xcb   :  { %v484_v50 = vadd.f32 %v483_v33, %v482_v38  ;;  %v129_v33 = vld [vmem:[%s2453_s0 + $0x360] sm:$0xff]  ;;  %v840_v38 = vsel %vm285_vm1, %v632_v35, 0.0  ;;  %v839_v42 = vadd.f32 %v838_v27, %v837_v31 }
  0xcc   :  { %v2147_v63 = vsub.f32 %v129_v33, %v1891_v25  ;;  %v499_v51 = vsel %vm285_vm1, %v2136_v58, 0.0  ;;  %v640_v33 = vmul.f32 %v1938_v7, %v1938_v7 }
  0xcd   :  { %v486_v59 = vadd.f32 %v485_v43, %v484_v50  ;;  %v130_v43 = vld [vmem:[%s2453_s0 + $0x368] sm:$0xff]  ;;  %v842_v50 = vsel %vm285_vm1, %v633_v48, 0.0  ;;  %v841_v53 = vadd.f32 %v840_v38, %v839_v42 }
  0xce   :  { %v2158_v14 = vsub.f32 %v130_v43, %v1891_v25  ;;  %v501_v61 = vsel %vm285_vm1, %v2147_v63, 0.0  ;;  %v641_v43 = vmul.f32 %v1949_v9, %v1949_v9 }
  0xcf   :  { %v488_v2 = vadd.f32 %v487_v54, %v486_v59  ;;  %v131_v54 = vld [vmem:[%s2453_s0 + $0x370] sm:$0xff]  ;;  %v844_v59 = vsel %vm285_vm1, %v634_v52, 0.0  ;;  %v843_v62 = vadd.f32 %v842_v50, %v841_v53 }
  0xd0   :  { %v2169_v4 = vsub.f32 %v131_v54, %v1891_v25  ;;  %v503_v40 = vsel %vm285_vm1, %v2158_v14, 0.0  ;;  %v642_v54 = vmul.f32 %v1960_v19, %v1960_v19 }
  0xd1   :  { %v490_v15 = vadd.f32 %v489_v6, %v488_v2  ;;  %v132_v6 = vld [vmem:[%s2453_s0 + $0x378] sm:$0xff]  ;;  %v846_v2 = vsel %vm285_vm1, %v635_v56, 0.0  ;;  %v845_v3 = vadd.f32 %v844_v59, %v843_v62 }
  0xd2   :  { %v2180_v16 = vsub.f32 %v132_v6, %v1891_v25  ;;  %v505_v35 = vsel %vm285_vm1, %v2169_v4, 0.0  ;;  %v643_v6 = vmul.f32 %v1971_v20, %v1971_v20 }
  0xd3   :  { %v492_v26 = vadd.f32 %v491_v10, %v490_v15  ;;  %v133_v10 = vld [vmem:[%s2453_s0 + $0x380] sm:$0xff]  ;;  %v848_v15 = vsel %vm285_vm1, %v636_v57, 0.0  ;;  %v847_v44 = vadd.f32 %v846_v2, %v845_v3 }
  0xd4   :  { %v2191_v45 = vsub.f32 %v133_v10, %v1891_v25  ;;  %v507_v48 = vsel %vm285_vm1, %v2180_v16, 0.0  ;;  %v644_v10 = vmul.f32 %v1982_v24, %v1982_v24 }
  0xd5   :  { %v494_v37 = vadd.f32 %v493_v17, %v492_v26  ;;  %v134_v17 = vld [vmem:[%s2453_s0 + $0x388] sm:$0xff]  ;;  %v850_v26 = vsel %vm285_vm1, %v637_v1, 0.0  ;;  %v849_v27 = vadd.f32 %v848_v15, %v847_v44 }
  0xd6   :  { %v2202_v55 = vsub.f32 %v134_v17, %v1891_v25  ;;  %v509_v52 = vsel %vm285_vm1, %v2191_v45, 0.0  ;;  %v645_v17 = vmul.f32 %v1993_v28, %v1993_v28 }
  0xd7   :  { %v496_v47 = vadd.f32 %v495_v30, %v494_v37  ;;  %v135_v30 = vld [vmem:[%s2453_s0 + $0x390] sm:$0xff]  ;;  %v852_v37 = vsel %vm285_vm1, %v638_v12, 0.0  ;;  %v851_v38 = vadd.f32 %v850_v26, %v849_v27 }
  0xd8   :  { %v2213_v7 = vsub.f32 %v135_v30, %v1891_v25  ;;  %v511_v56 = vsel %vm285_vm1, %v2202_v55, 0.0  ;;  %v646_v30 = vmul.f32 %v2004_v32, %v2004_v32 }
  0xd9   :  { %v498_v60 = vadd.f32 %v497_v39, %v496_v47  ;;  %v136_v39 = vld [vmem:[%s2453_s0 + $0x398] sm:$0xff]  ;;  %v854_v47 = vsel %vm285_vm1, %v639_v22, 0.0  ;;  %v853_v50 = vadd.f32 %v852_v37, %v851_v38 }
  0xda   :  { %v2224_v9 = vsub.f32 %v136_v39, %v1891_v25  ;;  %v513_v57 = vsel %vm285_vm1, %v2213_v7, 0.0  ;;  %v647_v39 = vmul.f32 %v2015_v36, %v2015_v36 }
  0xdb   :  { %v500_v8 = vadd.f32 %v499_v51, %v498_v60  ;;  %v137_v51 = vld [vmem:[%s2453_s0 + $0x3a0] sm:$0xff]  ;;  %v856_v60 = vsel %vm285_vm1, %v640_v33, 0.0  ;;  %v855_v59 = vadd.f32 %v854_v47, %v853_v50 }
  0xdc   :  { %v2235_v19 = vsub.f32 %v137_v51, %v1891_v25  ;;  %v515_v1 = vsel %vm285_vm1, %v2224_v9, 0.0  ;;  %v648_v51 = vmul.f32 %v2026_v0, %v2026_v0 }
  0xdd   :  { %v502_v11 = vadd.f32 %v501_v61, %v500_v8  ;;  %v138_v61 = vld [vmem:[%s2453_s0 + $0x3a8] sm:$0xff]  ;;  %v858_v8 = vsel %vm285_vm1, %v641_v43, 0.0  ;;  %v857_v2 = vadd.f32 %v856_v60, %v855_v59 }
  0xde   :  { %v2246_v20 = vsub.f32 %v138_v61, %v1891_v25  ;;  %v517_v12 = vsel %vm285_vm1, %v2235_v19, 0.0  ;;  %v649_v61 = vmul.f32 %v2037_v5, %v2037_v5 }
  0xdf   :  { %v504_v21 = vadd.f32 %v503_v40, %v502_v11  ;;  %v139_v40 = vld [vmem:[%s2453_s0 + $0x3b0] sm:$0xff]  ;;  %v860_v11 = vsel %vm285_vm1, %v642_v54, 0.0  ;;  %v859_v15 = vadd.f32 %v858_v8, %v857_v2 }
  0xe0   :  { %v2257_v24 = vsub.f32 %v139_v40, %v1891_v25  ;;  %v519_v22 = vsel %vm285_vm1, %v2246_v20, 0.0  ;;  %v650_v40 = vmul.f32 %v2048_v13, %v2048_v13 }
  0xe1   :  { %v506_v31 = vadd.f32 %v505_v35, %v504_v21  ;;  %v140_v35 = vld [vmem:[%s2453_s0 + $0x3b8] sm:$0xff]  ;;  %v862_v21 = vsel %vm285_vm1, %v643_v6, 0.0  ;;  %v861_v26 = vadd.f32 %v860_v11, %v859_v15 }
  0xe2   :  { %v2268_v28 = vsub.f32 %v140_v35, %v1891_v25  ;;  %v521_v33 = vsel %vm285_vm1, %v2257_v24, 0.0  ;;  %v651_v35 = vmul.f32 %v2059_v18, %v2059_v18 }
  0xe3   :  { %v508_v42 = vadd.f32 %v507_v48, %v506_v31  ;;  %v141_v48 = vld [vmem:[%s2453_s0 + $0x3c0] sm:$0xff]  ;;  %v864_v31 = vsel %vm285_vm1, %v644_v10, 0.0  ;;  %v863_v37 = vadd.f32 %v862_v21, %v861_v26 }
  0xe4   :  { %v2279_v32 = vsub.f32 %v141_v48, %v1891_v25  ;;  %v523_v43 = vsel %vm285_vm1, %v2268_v28, 0.0  ;;  %v652_v48 = vmul.f32 %v2070_v23, %v2070_v23 }
  0xe5   :  { %v510_v53 = vadd.f32 %v509_v52, %v508_v42  ;;  %v142_v52 = vld [vmem:[%s2453_s0 + $0x3c8] sm:$0xff]  ;;  %v866_v42 = vsel %vm285_vm1, %v645_v17, 0.0  ;;  %v865_v47 = vadd.f32 %v864_v31, %v863_v37 }
  0xe6   :  { %v2290_v36 = vsub.f32 %v142_v52, %v1891_v25  ;;  %v525_v54 = vsel %vm285_vm1, %v2279_v32, 0.0  ;;  %v653_v52 = vmul.f32 %v2081_v29, %v2081_v29 }
  0xe7   :  { %v512_v62 = vadd.f32 %v511_v56, %v510_v53  ;;  %v143_v56 = vld [vmem:[%s2453_s0 + $0x3d0] sm:$0xff]  ;;  %v868_v53 = vsel %vm285_vm1, %v646_v30, 0.0  ;;  %v867_v60 = vadd.f32 %v866_v42, %v865_v47  ;;  %v654_v47 = vmul.f32 %v2092_v34, %v2092_v34 }
  0xe8   :  { %v2301_v0 = vsub.f32 %v143_v56, %v1891_v25  ;;  %v527_v6 = vsel %vm285_vm1, %v2290_v36, 0.0  ;;  %v880_v56 = vsel %vm285_vm1, %v652_v48, 0.0 }
  0xe9   :  { %v514_v3 = vadd.f32 %v513_v57, %v512_v62  ;;  %v144_v57 = vld [vmem:[%s2453_s0 + $0x3d8] sm:$0xff]  ;;  %v870_v62 = vsel %vm285_vm1, %v647_v39, 0.0  ;;  %v869_v8 = vadd.f32 %v868_v53, %v867_v60  ;;  %v882_v60 = vsel %vm285_vm1, %v653_v52, 0.0 }
  0xea   :  { %v2312_v5 = vsub.f32 %v144_v57, %v1891_v25  ;;  %v529_v10 = vsel %vm285_vm1, %v2301_v0, 0.0 }
  0xeb   :  { %v516_v44 = vadd.f32 %v515_v1, %v514_v3  ;;  %v145_v1 = vld [vmem:[%s2453_s0 + $0x3e0] sm:$0xff]  ;;  %v872_v3 = vsel %vm285_vm1, %v648_v51, 0.0  ;;  %v871_v11 = vadd.f32 %v870_v62, %v869_v8  ;;  %v657_v8 = vmul.f32 %v2125_v49, %v2125_v49 }
  0xec   :  { %v2323_v13 = vsub.f32 %v145_v1, %v1891_v25  ;;  %v531_v17 = vsel %vm285_vm1, %v2312_v5, 0.0  ;;  %v660_v49 = vmul.f32 %v2158_v14, %v2158_v14  ;;  %v284_v14 = vld [vmem:[%s2455_s2] sm:$0x1] }
  0xed   :  { %v518_v27 = vadd.f32 %v517_v12, %v516_v44  ;;  %v146_v12 = vld [vmem:[%s2453_s0 + $0x3e8] sm:$0xff]  ;;  %v874_v44 = vsel %vm285_vm1, %v649_v61, 0.0  ;;  %v873_v21 = vadd.f32 %v872_v3, %v871_v11  ;;  %v656_v61 = vmul.f32 %v2114_v46, %v2114_v46 }
  0xee   :  { %v2334_v18 = vsub.f32 %v146_v12, %v1891_v25  ;;  %v533_v30 = vsel %vm285_vm1, %v2323_v13, 0.0  ;;  %v659_v46 = vmul.f32 %v2147_v63, %v2147_v63  ;;  %v890_v12 = vsel %vm285_vm1, %v657_v8, 0.0 }
  0xef   :  { %v520_v38 = vadd.f32 %v519_v22, %v518_v27  ;;  %v147_v22 = vld [vmem:[%s2453_s0 + $0x3f0] sm:$0xff]  ;;  %v876_v27 = vsel %vm285_vm1, %v650_v40, 0.0  ;;  %v875_v31 = vadd.f32 %v874_v44, %v873_v21  ;;  %v658_v40 = vmul.f32 %v2136_v58, %v2136_v58 }
  0xf0   :  { %v2345_v23 = vsub.f32 %v147_v22, %v1891_v25  ;;  %v535_v39 = vsel %vm285_vm1, %v2334_v18, 0.0  ;;  %v888_v3 = vsel %vm285_vm1, %v656_v61, 0.0  ;;  %v661_v58 = vmul.f32 %v2169_v4, %v2169_v4 }
  0xf1   :  { %v522_v50 = vadd.f32 %v521_v33, %v520_v38  ;;  %v148_v33 = vld [vmem:[%s2453_s0 + $0x3f8] sm:$0xff]  ;;  %v878_v38 = vsel %vm285_vm1, %v651_v35, 0.0  ;;  %v877_v42 = vadd.f32 %v876_v27, %v875_v31  ;;  %v892_v44 = vsel %vm285_vm1, %v658_v40, 0.0 }
  0xf2   :  { %v537_v29 = vsel %vm285_vm1, %v2345_v23, 0.0  ;;  %v894_v22 = vsel %vm285_vm1, %v659_v46, 0.0  ;;  %v662_v63 = vmul.f32 %v2180_v16, %v2180_v16  ;;  %v896_v27 = vsel %vm285_vm1, %v660_v49, 0.0 }
  0xf3   :  { %v524_v59 = vadd.f32 %v523_v43, %v522_v50  ;;  %v2353_v50 = vsub.f32 %v148_v33, %v1891_v25  ;;  %v879_v51 = vadd.f32 %v878_v38, %v877_v42  ;;  %v884_v25 = vsel %vm285_vm1, %v654_v47, 0.0 }
  0xf4   :  { %v663_v33 = vmul.f32 %v2191_v45, %v2191_v45  ;;  %v898_v4 = vsel %vm285_vm1, %v661_v58, 0.0  ;;  %v664_v38 = vmul.f32 %v2202_v55, %v2202_v55  ;;  %v900_v16 = vsel %vm285_vm1, %v662_v63, 0.0 }
  0xf5   :  { %v526_v2 = vadd.f32 %v525_v54, %v524_v59  ;;  %v655_v54 = vmul.f32 %v2103_v41, %v2103_v41  ;;  %v539_v57 = vsel %vm285_vm1, %v2353_v50, 0.0  ;;  %v881_v59 = vadd.f32 %v880_v56, %v879_v51 }
  0xf6   :  { %v665_v42 = vmul.f32 %v2213_v7, %v2213_v7  ;;  %v902_v45 = vsel %vm285_vm1, %v663_v33, 0.0  ;;  %v666_v47 = vmul.f32 %v2224_v9, %v2224_v9  ;;  %v904_v56 = vsel %vm285_vm1, %v664_v38, 0.0 }
  0xf7   :  { %v528_v15 = vadd.f32 %v527_v6, %v526_v2  ;;  %v883_v62 = vadd.f32 %v882_v60, %v881_v59  ;;  %v886_v1 = vsel %vm285_vm1, %v655_v54, 0.0  ;;  %v668_v54 = vmul.f32 %v2246_v20, %v2246_v20 }
  0xf8   :  { %v906_v51 = vsel %vm285_vm1, %v665_v42, 0.0  ;;  %v908_v7 = vsel %vm285_vm1, %v666_v47, 0.0 }
  0xf9   :  { %v530_v26 = vadd.f32 %v529_v10, %v528_v15  ;;  %v885_v41 = vadd.f32 %v884_v25, %v883_v62  ;;  %v671_v25 = vmul.f32 %v2279_v32, %v2279_v32 }
  0xfb   :  { %v532_v37 = vadd.f32 %v531_v17, %v530_v26  ;;  %v887_v10 = vadd.f32 %v886_v1, %v885_v41  ;;  %v673_v1 = vmul.f32 %v2301_v0, %v2301_v0 }
  0xfd   :  { %v534_v43 = vadd.f32 %v533_v30, %v532_v37  ;;  %v889_v15 = vadd.f32 %v888_v3, %v887_v10  ;;  %v675_v3 = vmul.f32 %v2323_v13, %v2323_v13 }
  0xff   :  { %v536_v53 = vadd.f32 %v535_v39, %v534_v43  ;;  %v891_v17 = vadd.f32 %v890_v12, %v889_v15  ;;  %v677_v12 = vmul.f32 %v2345_v23, %v2345_v23 }
 0x101   :  { %v538_v34 = vadd.f32 %v537_v29, %v536_v53  ;;  %v893_v26 = vadd.f32 %v892_v44, %v891_v17  ;;  %v667_v29 = vmul.f32 %v2235_v19, %v2235_v19  ;;  %v912_v19 = vsel %vm285_vm1, %v668_v54, 0.0 }
 0x102   :  { %v930_v44 = vsel %vm285_vm1, %v677_v12, 0.0 }
 0x103   :  { %v540_v6 = vadd.f32 %v539_v57, %v538_v34  ;;  %v895_v30 = vadd.f32 %v894_v22, %v893_v26  ;;  %v669_v57 = vmul.f32 %v2257_v24, %v2257_v24  ;;  %v910_v9 = vsel %vm285_vm1, %v667_v29, 0.0 }
 0x104   :  { %v670_v34 = vmul.f32 %v2268_v28, %v2268_v28  ;;  %v918_v28 = vsel %vm285_vm1, %v671_v25, 0.0 }
 0x105   :  { %v541_v2 = vrot.slane %v540_v6, 4  ;;  %v897_v37 = vadd.f32 %v896_v27, %v895_v30  ;;  %v914_v20 = vsel %vm285_vm1, %v669_v57, 0.0  ;;  %v550_v27 = vld [vmem:[#allocation2] sm:$0x1] }
 0x106   :  { %v916_v24 = vsel %vm285_vm1, %v670_v34, 0.0 }
 0x107   :  { %v542_v11 = vadd.f32 %v541_v2, %v540_v6  ;;  %v899_v39 = vadd.f32 %v898_v4, %v897_v37  ;;  %v672_v6 = vmul.f32 %v2290_v36, %v2290_v36  ;;  %v674_v2 = vmul.f32 %v2312_v5, %v2312_v5 }
 0x108   :  { %v922_v36 = vsel %vm285_vm1, %v673_v1, 0.0  ;;  %v926_v5 = vsel %vm285_vm1, %v675_v3, 0.0 }
 0x109   :  { %v543_v35 = vrot.slane %v542_v11, 2  ;;  %v901_v43 = vadd.f32 %v900_v16, %v899_v39  ;;  %v920_v32 = vsel %vm285_vm1, %v672_v6, 0.0  ;;  %v924_v0 = vsel %vm285_vm1, %v674_v2, 0.0 }
 0x10b   :  { %v544_v21 = vadd.f32 %v543_v35, %v542_v11  ;;  %v903_v55 = vadd.f32 %v902_v45, %v901_v43  ;;  %v676_v11 = vmul.f32 %v2334_v18, %v2334_v18  ;;  %v678_v35 = vmul.f32 %v2353_v50, %v2353_v50 }
 0x10d   :  { %v545_v48 = vrot.slane %v544_v21, 1  ;;  %v905_v53 = vadd.f32 %v904_v56, %v903_v55  ;;  %v928_v13 = vsel %vm285_vm1, %v676_v11, 0.0  ;;  %v932_v18 = vsel %vm285_vm1, %v678_v35, 0.0 }
 0x10f   :  { %v546_v31 = vadd.f32 %v545_v48, %v544_v21  ;;  %v907_v60 = vadd.f32 %v906_v51, %v905_v53 }
 0x111   :  { %v547_v52 = vadd.f32 %v546_v31, %v284_v14  ;;  %v909_v59 = vadd.f32 %v908_v7, %v907_v60 }
 0x113   :  { %549 = vst.msk [vmem:[%s2455_s2] sm:$0x1] %vm18_vm0, %v547_v52  ;;  %v911_v61 = vadd.f32 %v910_v9, %v909_v59  ;;  %s989_s2 = smov [#allocation2]  }
 0x114   :  { %s950_s4 = sshll.u32 %s989_s2, 4  ;;  %s951_s4 = int_to_ptr.vmem [resolvable:$true] %s950_s4 }
 0x115   :  { %v913_v62 = vadd.f32 %v912_v19, %v911_v61  ;;  %s964_s1 = scalar_lea.vmem %s951_s4, 16  ;;  %s968_s5 = scalar_lea.vmem %s951_s4, 32 }
 0x116   :  { %p965_p0 = scmp.ne.s32.totalorder %s951_s4, %s964_s1  ;;  %p969_p1 = scmp.lt.s32.totalorder %s951_s4, %s951_s4 }
 0x117   :  { %v915_v8 = vadd.f32 %v914_v20, %v913_v62  ;;  %p970_p2 = scmp.lt.s32.totalorder %s968_s5, %s964_s1 }
 0x119   :  { %v917_v41 = vadd.f32 %v916_v24, %v915_v8  ;;  %p971_p3 = por %p970_p2, %p969_p1 }
 0x11b   :  { %v919_v40 = vadd.f32 %v918_v28, %v917_v41  ;;  %p972_p4 = pnand %p971_p3, %p965_p0 }
 0x11d   :  { %v921_v10 = vadd.f32 %v920_v32, %v919_v40 }
 0x11f   :  { %v923_v46 = vadd.f32 %v922_v36, %v921_v10 }
 0x121   :  { %v925_v15 = vadd.f32 %v924_v0, %v923_v46 }
 0x123   :  { %v927_v49 = vadd.f32 %v926_v5, %v925_v15 }
 0x125   :  { %v929_v17 = vadd.f32 %v928_v13, %v927_v49 }
 0x127   :  { %v931_v21 = vadd.f32 %v930_v44, %v929_v17 }
 0x129   :  { %v933_v58 = vadd.f32 %v932_v18, %v931_v21 }
 0x12b   :  { %v934_v22 = vrot.slane %v933_v58, 4 }
 0x12d   :  { %v935_v26 = vadd.f32 %v934_v22, %v933_v58 }
 0x12f   :  { %v936_v48 = vrot.slane %v935_v26, 2 }
 0x131   :  { %v937_v23 = vadd.f32 %v936_v48, %v935_v26 }
 0x133   :  { %v938_v63 = vrot.slane %v937_v23, 1 }
 0x135   :  { %v939_v14 = vadd.f32 %v938_v63, %v937_v23 }
 0x137   :  { %v940_v50 = vadd.f32 %v939_v14, %v550_v27 }
 0x139   :  { %941 = vst.msk [vmem:[#allocation2] sm:$0x1] %vm18_vm0, %v940_v50 }
 0x13a   :  { %975 = shalt.err (!%p972_p4)
}
 0x13b   :  { %s976_s8 = scalar_lea.hbm %s2456_s3, 16 }
 0x13c   :  { %p977_p5 = scmp.ne.s32.totalorder %s2456_s3, %s976_s8  ;;  %p980_p6 = scmp.lt.u32.totalorder %s976_s8, %s2456_s3 }
 0x13e   :  { %p982_p7 = pnand %p980_p6, %p977_p5 }
 0x140   :  { %985 = shalt.err (!%p982_p7)
}
 0x141   :  { %953 = dma.vmem_to_hbm [thread:$0]  %s951_s4, 16, %s2456_s3, [#allocation3]  }
 0x142   :  { %986 = dma.done.wait [#allocation3], 16  }
 0x143   :  { %987 = vsyncadd [#allocation3], 4294967280 }
 0x144   :  { %959 = vsyncpa [#allocation3], 1 }

// kernel: bnhn_conv3d_transpose.4
= control target key start
LH: loop header
LB: loop body
LE: loop exit
PB: predicated region body
PF: predicated region fallthrough
CT: control target
= control target key end

     0   :  { %vm17_vm0 = vcmask 24576   ;;  %v951_v0 = vmov 0.0   ;;  %vm284_vm1 = vcmask 31744   ;;  %s2407_s2 = inlined_call_operand.vmem [shape: f32[1,4], index: 2, kind: output, shape index: {0}]   ;;  %s2408_s3 = inlined_call_operand.vmem [shape: f32[1,4], index: 3, kind: output, shape index: {1}]   ;;  %s2409_s0 = inlined_call_operand.vmem [shape: f32[1024,4], index: 0, kind: input, shape index: {}]   ;;  %s2410_s1 = inlined_call_operand.vmem [shape: f32[1,4], index: 1, kind: input, shape index: {}]  }
   0x1   :  { %18 = vst.msk [vmem:[%s2407_s2] sm:$0x1] %vm17_vm0, %v951_v0  ;;  %19 = vst.msk [vmem:[%s2408_s3] sm:$0x1] %vm17_vm0, %v951_v0  ;;  %v20_v1 = vld [vmem:[%s2409_s0] sm:$0xff]  ;;  %v21_v2 = vld [vmem:[%s2409_s0 + $0x8] sm:$0xff] }
   0x2   :  { %v22_v3 = vld [vmem:[%s2409_s0 + $0x10] sm:$0xff]  ;;  %v53_v4 = vld [vmem:[%s2409_s0 + $0x108] sm:$0xff]  ;;  %v55_v6 = vld [vmem:[%s2409_s0 + $0x118] sm:$0xff] }
   0x3   :  { %v54_v5 = vld [vmem:[%s2409_s0 + $0x110] sm:$0xff]  ;;  %v56_v7 = vld [vmem:[%s2409_s0 + $0x120] sm:$0xff]  ;;  %v57_v8 = vld [vmem:[%s2409_s0 + $0x128] sm:$0xff] }
   0x4   :  { %v58_v9 = vld [vmem:[%s2409_s0 + $0x130] sm:$0xff]  ;;  %v59_v10 = vld [vmem:[%s2409_s0 + $0x138] sm:$0xff]  ;;  %v1013_v11 = vld [vmem:[%s2410_s1] ss:$0 sm:$0xff] }
   0x5   :  { %v60_v12 = vld [vmem:[%s2409_s0 + $0x140] sm:$0xff]  ;;  %v61_v13 = vld [vmem:[%s2409_s0 + $0x148] sm:$0xff]  ;;  %v62_v14 = vld [vmem:[%s2409_s0 + $0x150] sm:$0xff]  ;;  %v1052_v24 = vsub.f32 %v20_v1, %v1013_v11  ;;  %v1055_v25 = vsub.f32 %v21_v2, %v1013_v11  ;;  %v1070_v30 = vsub.f32 %v22_v3, %v1013_v11  ;;  %v1073_v31 = vsub.f32 %v53_v4, %v1013_v11 }
   0x6   :  { %v63_v15 = vld [vmem:[%s2409_s0 + $0x158] sm:$0xff]  ;;  %v64_v16 = vld [vmem:[%s2409_s0 + $0x160] sm:$0xff]  ;;  %v65_v17 = vld [vmem:[%s2409_s0 + $0x168] sm:$0xff]  ;;  %v1076_v32 = vsub.f32 %v54_v5, %v1013_v11  ;;  %v1079_v33 = vsub.f32 %v55_v6, %v1013_v11  ;;  %v1094_v38 = vsub.f32 %v56_v7, %v1013_v11  ;;  %v1097_v39 = vsub.f32 %v57_v8, %v1013_v11 }
   0x7   :  { %v66_v18 = vld [vmem:[%s2409_s0 + $0x170] sm:$0xff]  ;;  %v67_v19 = vld [vmem:[%s2409_s0 + $0x178] sm:$0xff]  ;;  %v68_v20 = vld [vmem:[%s2409_s0 + $0x180] sm:$0xff]  ;;  %v1100_v40 = vsub.f32 %v58_v9, %v1013_v11  ;;  %v1103_v41 = vsub.f32 %v59_v10, %v1013_v11  ;;  %v1118_v46 = vsub.f32 %v60_v12, %v1013_v11  ;;  %v1121_v47 = vsub.f32 %v61_v13, %v1013_v11 }
   0x8   :  { %v69_v21 = vld [vmem:[%s2409_s0 + $0x188] sm:$0xff]  ;;  %v70_v22 = vld [vmem:[%s2409_s0 + $0x190] sm:$0xff]  ;;  %v71_v23 = vld [vmem:[%s2409_s0 + $0x198] sm:$0xff]  ;;  %v1124_v48 = vsub.f32 %v62_v14, %v1013_v11  ;;  %v1127_v49 = vsub.f32 %v63_v15, %v1013_v11  ;;  %v1142_v54 = vsub.f32 %v64_v16, %v1013_v11  ;;  %v1145_v55 = vsub.f32 %v65_v17, %v1013_v11 }
   0x9   :  { %v72_v26 = vld [vmem:[%s2409_s0 + $0x1a0] sm:$0xff]  ;;  %v73_v27 = vld [vmem:[%s2409_s0 + $0x1a8] sm:$0xff]  ;;  %v74_v28 = vld [vmem:[%s2409_s0 + $0x1b0] sm:$0xff]  ;;  %v1148_v56 = vsub.f32 %v66_v18, %v1013_v11  ;;  %v1151_v57 = vsub.f32 %v67_v19, %v1013_v11  ;;  %v1166_v62 = vsub.f32 %v68_v20, %v1013_v11  ;;  %v1169_v63 = vsub.f32 %v69_v21, %v1013_v11 }
   0xa   :  { %v75_v29 = vld [vmem:[%s2409_s0 + $0x1b8] sm:$0xff]  ;;  %v76_v34 = vld [vmem:[%s2409_s0 + $0x1c0] sm:$0xff]  ;;  %v77_v35 = vld [vmem:[%s2409_s0 + $0x1c8] sm:$0xff]  ;;  %v1172_v0 = vsub.f32 %v70_v22, %v1013_v11  ;;  %v1175_v1 = vsub.f32 %v71_v23, %v1013_v11  ;;  %v1190_v6 = vsub.f32 %v72_v26, %v1013_v11  ;;  %v1193_v7 = vsub.f32 %v73_v27, %v1013_v11 }
   0xb   :  { %v78_v36 = vld [vmem:[%s2409_s0 + $0x1d0] sm:$0xff]  ;;  %v79_v37 = vld [vmem:[%s2409_s0 + $0x1d8] sm:$0xff]  ;;  %v80_v42 = vld [vmem:[%s2409_s0 + $0x1e0] sm:$0xff]  ;;  %v1196_v8 = vsub.f32 %v74_v28, %v1013_v11  ;;  %v1199_v9 = vsub.f32 %v75_v29, %v1013_v11  ;;  %v1214_v15 = vsub.f32 %v76_v34, %v1013_v11  ;;  %v1217_v16 = vsub.f32 %v77_v35, %v1013_v11 }
   0xc   :  { %v81_v43 = vld [vmem:[%s2409_s0 + $0x1e8] sm:$0xff]  ;;  %v82_v44 = vld [vmem:[%s2409_s0 + $0x1f0] sm:$0xff]  ;;  %v83_v45 = vld [vmem:[%s2409_s0 + $0x1f8] sm:$0xff]  ;;  %v1220_v17 = vsub.f32 %v78_v36, %v1013_v11  ;;  %v1223_v18 = vsub.f32 %v79_v37, %v1013_v11  ;;  %v1238_v23 = vsub.f32 %v80_v42, %v1013_v11 }
   0xd   :  { %v84_v50 = vld [vmem:[%s2409_s0 + $0x200] sm:$0xff]  ;;  %v85_v51 = vld [vmem:[%s2409_s0 + $0x208] sm:$0xff]  ;;  %v86_v52 = vld [vmem:[%s2409_s0 + $0x210] sm:$0xff]  ;;  %2485 = vst [vmem:[#allocation2_spill] sm:$0xff] %v1196_v8  ;;  %v1241_v26 = vsub.f32 %v81_v43, %v1013_v11  ;;  %v1244_v27 = vsub.f32 %v82_v44, %v1013_v11  ;;  %v1247_v28 = vsub.f32 %v83_v45, %v1013_v11 }
   0xe   :  { %v87_v53 = vld [vmem:[%s2409_s0 + $0x218] sm:$0xff]  ;;  %v88_v58 = vld [vmem:[%s2409_s0 + $0x220] sm:$0xff]  ;;  %v89_v59 = vld [vmem:[%s2409_s0 + $0x228] sm:$0xff]  ;;  %2486 = vst [vmem:[#allocation3_spill] sm:$0xff] %v1199_v9  ;;  %v1262_v37 = vsub.f32 %v84_v50, %v1013_v11  ;;  %v1265_v42 = vsub.f32 %v85_v51, %v1013_v11  ;;  %v1268_v43 = vsub.f32 %v86_v52, %v1013_v11 }
   0xf   :  { %v90_v60 = vld [vmem:[%s2409_s0 + $0x230] sm:$0xff]  ;;  %v91_v61 = vld [vmem:[%s2409_s0 + $0x238] sm:$0xff]  ;;  %v92_v2 = vld [vmem:[%s2409_s0 + $0x240] sm:$0xff]  ;;  %2487 = vst [vmem:[#allocation4_spill] sm:$0xff] %v1214_v15  ;;  %v1271_v44 = vsub.f32 %v87_v53, %v1013_v11  ;;  %v1286_v52 = vsub.f32 %v88_v58, %v1013_v11  ;;  %v1289_v53 = vsub.f32 %v89_v59, %v1013_v11 }
  0x10   :  { %v93_v3 = vld [vmem:[%s2409_s0 + $0x248] sm:$0xff]  ;;  %v94_v4 = vld [vmem:[%s2409_s0 + $0x250] sm:$0xff]  ;;  %v95_v5 = vld [vmem:[%s2409_s0 + $0x258] sm:$0xff]  ;;  %2488 = vst [vmem:[#allocation5_spill] sm:$0xff] %v1217_v16 }
  0x11   :  { %v96_v10 = vld [vmem:[%s2409_s0 + $0x260] sm:$0xff]  ;;  %v97_v12 = vld [vmem:[%s2409_s0 + $0x268] sm:$0xff]  ;;  %v98_v13 = vld [vmem:[%s2409_s0 + $0x270] sm:$0xff]  ;;  %2489 = vst [vmem:[#allocation6_spill] sm:$0xff] %v1220_v17 }
  0x12   :  { %v99_v14 = vld [vmem:[%s2409_s0 + $0x278] sm:$0xff]  ;;  %2490 = vst [vmem:[#allocation7_spill] sm:$0xff] %v1223_v18  ;;  %v100_v19 = vld [vmem:[%s2409_s0 + $0x280] sm:$0xff]  ;;  %v101_v20 = vld [vmem:[%s2409_s0 + $0x288] sm:$0xff]  ;;  %v552_v18 = vmul.f32 %v1070_v30, %v1070_v30 }
  0x13   :  { %v102_v21 = vld [vmem:[%s2409_s0 + $0x290] sm:$0xff]  ;;  %v103_v22 = vld [vmem:[%s2409_s0 + $0x298] sm:$0xff]  ;;  %2491 = vst [vmem:[#allocation8_spill] sm:$0xff] %v1238_v23  ;;  %2492 = vst [vmem:[#allocation9_spill] sm:$0xff] %v1241_v26 }
  0x14   :  { %2493 = vst [vmem:[#allocation10_spill] sm:$0xff] %v1244_v27  ;;  %2494 = vst [vmem:[#allocation11_spill] sm:$0xff] %v1247_v28  ;;  %v104_v29 = vld [vmem:[%s2409_s0 + $0x2a0] sm:$0xff]  ;;  %v105_v34 = vld [vmem:[%s2409_s0 + $0x2a8] sm:$0xff] }
  0x15   :  { %v106_v35 = vld [vmem:[%s2409_s0 + $0x2b0] sm:$0xff]  ;;  %v107_v36 = vld [vmem:[%s2409_s0 + $0x2b8] sm:$0xff]  ;;  %2495 = vst [vmem:[#allocation12_spill] sm:$0xff] %v1262_v37  ;;  %2496 = vst [vmem:[#allocation13_spill] sm:$0xff] %v1265_v42 }
  0x16   :  { %2497 = vst [vmem:[#allocation14_spill] sm:$0xff] %v1268_v43  ;;  %2498 = vst [vmem:[#allocation15_spill] sm:$0xff] %v1271_v44  ;;  %v108_v45 = vld [vmem:[%s2409_s0 + $0x2c0] sm:$0xff]  ;;  %v109_v28 = vld [vmem:[%s2409_s0 + $0x2c8] sm:$0xff]  ;;  %v1292_v44 = vsub.f32 %v90_v60, %v1013_v11  ;;  %v1295_v43 = vsub.f32 %v91_v61, %v1013_v11  ;;  %v1310_v60 = vsub.f32 %v92_v2, %v1013_v11 }
  0x17   :  { %v110_v50 = vld [vmem:[%s2409_s0 + $0x2d0] sm:$0xff]  ;;  %v111_v51 = vld [vmem:[%s2409_s0 + $0x2d8] sm:$0xff]  ;;  %2499 = vst [vmem:[#allocation16_spill] sm:$0xff] %v1286_v52  ;;  %2500 = vst [vmem:[#allocation17_spill] sm:$0xff] %v1289_v53  ;;  %v1313_v61 = vsub.f32 %v93_v3, %v1013_v11 }
  0x18   :  { %2501 = vst [vmem:[#allocation18_spill] sm:$0xff] %v1292_v44  ;;  %2502 = vst [vmem:[#allocation19_spill] sm:$0xff] %v1295_v43  ;;  %v112_v42 = vld [vmem:[%s2409_s0 + $0x2e0] sm:$0xff]  ;;  %v113_v37 = vld [vmem:[%s2409_s0 + $0x2e8] sm:$0xff]  ;;  %v1316_v43 = vsub.f32 %v94_v4, %v1013_v11  ;;  %v1319_v44 = vsub.f32 %v95_v5, %v1013_v11  ;;  %v1334_v4 = vsub.f32 %v96_v10, %v1013_v11 }
  0x19   :  { %v114_v58 = vld [vmem:[%s2409_s0 + $0x2f0] sm:$0xff]  ;;  %v115_v59 = vld [vmem:[%s2409_s0 + $0x2f8] sm:$0xff]  ;;  %2503 = vst [vmem:[#allocation20_spill] sm:$0xff] %v1310_v60  ;;  %2504 = vst [vmem:[#allocation21_spill] sm:$0xff] %v1313_v61  ;;  %v1337_v5 = vsub.f32 %v97_v12, %v1013_v11 }
  0x1a   :  { %2505 = vst [vmem:[#allocation22_spill] sm:$0xff] %v1316_v43  ;;  %2506 = vst [vmem:[#allocation23_spill] sm:$0xff] %v1319_v44  ;;  %v116_v53 = vld [vmem:[%s2409_s0 + $0x300] sm:$0xff]  ;;  %v117_v52 = vld [vmem:[%s2409_s0 + $0x308] sm:$0xff]  ;;  %v1340_v44 = vsub.f32 %v98_v13, %v1013_v11  ;;  %v1343_v43 = vsub.f32 %v99_v14, %v1013_v11  ;;  %v1358_v13 = vsub.f32 %v100_v19, %v1013_v11 }
  0x1b   :  { %v118_v2 = vld [vmem:[%s2409_s0 + $0x310] sm:$0xff]  ;;  %v119_v3 = vld [vmem:[%s2409_s0 + $0x318] sm:$0xff]  ;;  %2507 = vst [vmem:[#allocation24_spill] sm:$0xff] %v1334_v4  ;;  %2508 = vst [vmem:[#allocation25_spill] sm:$0xff] %v1337_v5  ;;  %v1361_v14 = vsub.f32 %v101_v20, %v1013_v11  ;;  %v1379_v20 = vsub.f32 %v104_v29, %v1013_v11 }
  0x1c   :  { %2509 = vst [vmem:[#allocation26_spill] sm:$0xff] %v1340_v44  ;;  %2510 = vst [vmem:[#allocation27_spill] sm:$0xff] %v1343_v43  ;;  %v120_v61 = vld [vmem:[%s2409_s0 + $0x320] sm:$0xff]  ;;  %v121_v60 = vld [vmem:[%s2409_s0 + $0x328] sm:$0xff]  ;;  %v1364_v43 = vsub.f32 %v102_v21, %v1013_v11  ;;  %v1367_v44 = vsub.f32 %v103_v22, %v1013_v11  ;;  %v1382_v21 = vsub.f32 %v105_v34, %v1013_v11 }
  0x1d   :  { %v122_v10 = vld [vmem:[%s2409_s0 + $0x330] sm:$0xff]  ;;  %v123_v12 = vld [vmem:[%s2409_s0 + $0x338] sm:$0xff]  ;;  %2511 = vst [vmem:[#allocation28_spill] sm:$0xff] %v1358_v13  ;;  %2512 = vst [vmem:[#allocation29_spill] sm:$0xff] %v1361_v14  ;;  %v1385_v22 = vsub.f32 %v106_v35, %v1013_v11  ;;  %v1400_v34 = vsub.f32 %v108_v45, %v1013_v11  ;;  %v1403_v35 = vsub.f32 %v109_v28, %v1013_v11 }
  0x1e   :  { %2513 = vst [vmem:[#allocation30_spill] sm:$0xff] %v1364_v43  ;;  %2514 = vst [vmem:[#allocation31_spill] sm:$0xff] %v1367_v44  ;;  %v124_v5 = vld [vmem:[%s2409_s0 + $0x340] sm:$0xff]  ;;  %v125_v4 = vld [vmem:[%s2409_s0 + $0x348] sm:$0xff]  ;;  %v1388_v44 = vsub.f32 %v107_v36, %v1013_v11  ;;  %v1406_v36 = vsub.f32 %v110_v50, %v1013_v11  ;;  %v1421_v28 = vsub.f32 %v112_v42, %v1013_v11 }
  0x1f   :  { %v126_v19 = vld [vmem:[%s2409_s0 + $0x350] sm:$0xff]  ;;  %2515 = vst [vmem:[#allocation32_spill] sm:$0xff] %v1379_v20  ;;  %2516 = vst [vmem:[#allocation33_spill] sm:$0xff] %v1382_v21  ;;  %v127_v43 = vld [vmem:[%s2409_s0 + $0x358] sm:$0xff]  ;;  %v1424_v50 = vsub.f32 %v113_v37, %v1013_v11  ;;  %v1442_v37 = vsub.f32 %v116_v53, %v1013_v11 }
  0x20   :  { %2517 = vst [vmem:[#allocation34_spill] sm:$0xff] %v1385_v22  ;;  %2518 = vst [vmem:[#allocation35_spill] sm:$0xff] %v1388_v44  ;;  %v128_v14 = vld [vmem:[%s2409_s0 + $0x360] sm:$0xff]  ;;  %v129_v29 = vld [vmem:[%s2409_s0 + $0x368] sm:$0xff]  ;;  %v1409_v44 = vsub.f32 %v111_v51, %v1013_v11  ;;  %v1427_v51 = vsub.f32 %v114_v58, %v1013_v11  ;;  %v1445_v58 = vsub.f32 %v117_v52, %v1013_v11 }
  0x21   :  { %2519 = vst [vmem:[#allocation36_spill] sm:$0xff] %v1400_v34  ;;  %2520 = vst [vmem:[#allocation37_spill] sm:$0xff] %v1403_v35  ;;  %v130_v22 = vld [vmem:[%s2409_s0 + $0x370] sm:$0xff]  ;;  %v131_v21 = vld [vmem:[%s2409_s0 + $0x378] sm:$0xff]  ;;  %v1463_v52 = vsub.f32 %v120_v61, %v1013_v11 }
  0x22   :  { %2521 = vst [vmem:[#allocation38_spill] sm:$0xff] %v1406_v36  ;;  %2522 = vst [vmem:[#allocation39_spill] sm:$0xff] %v1409_v44  ;;  %v132_v45 = vld [vmem:[%s2409_s0 + $0x380] sm:$0xff]  ;;  %v1430_v44 = vsub.f32 %v115_v59, %v1013_v11  ;;  %v133_v36 = vld [vmem:[%s2409_s0 + $0x388] sm:$0xff]  ;;  %v1448_v59 = vsub.f32 %v118_v2, %v1013_v11  ;;  %v1466_v2 = vsub.f32 %v121_v60, %v1013_v11 }
  0x23   :  { %2523 = vst [vmem:[#allocation40_spill] sm:$0xff] %v1421_v28  ;;  %2524 = vst [vmem:[#allocation41_spill] sm:$0xff] %v1424_v50  ;;  %v134_v35 = vld [vmem:[%s2409_s0 + $0x390] sm:$0xff]  ;;  %v135_v42 = vld [vmem:[%s2409_s0 + $0x398] sm:$0xff]  ;;  %v1484_v60 = vsub.f32 %v124_v5, %v1013_v11 }
  0x24   :  { %2525 = vst [vmem:[#allocation42_spill] sm:$0xff] %v1427_v51  ;;  %2526 = vst [vmem:[#allocation43_spill] sm:$0xff] %v1430_v44  ;;  %v1451_v44 = vsub.f32 %v119_v3, %v1013_v11  ;;  %v136_v51 = vld [vmem:[%s2409_s0 + $0x3a0] sm:$0xff]  ;;  %v137_v50 = vld [vmem:[%s2409_s0 + $0x3a8] sm:$0xff]  ;;  %v1469_v3 = vsub.f32 %v122_v10, %v1013_v11  ;;  %v1487_v10 = vsub.f32 %v125_v4, %v1013_v11 }
  0x25   :  { %2527 = vst [vmem:[#allocation44_spill] sm:$0xff] %v1442_v37  ;;  %2528 = vst [vmem:[#allocation45_spill] sm:$0xff] %v1445_v58  ;;  %v138_v53 = vld [vmem:[%s2409_s0 + $0x3b0] sm:$0xff]  ;;  %v140_v58 = vld [vmem:[%s2409_s0 + $0x3c0] sm:$0xff]  ;;  %v1505_v4 = vsub.f32 %v128_v14, %v1013_v11 }
  0x26   :  { %2529 = vst [vmem:[#allocation46_spill] sm:$0xff] %v1448_v59  ;;  %2530 = vst [vmem:[#allocation47_spill] sm:$0xff] %v1451_v44  ;;  %v1472_v44 = vsub.f32 %v123_v12, %v1013_v11  ;;  %v139_v59 = vld [vmem:[%s2409_s0 + $0x3b8] sm:$0xff]  ;;  %v141_v61 = vld [vmem:[%s2409_s0 + $0x3c8] sm:$0xff]  ;;  %v1490_v12 = vsub.f32 %v126_v19, %v1013_v11  ;;  %v1508_v19 = vsub.f32 %v129_v29, %v1013_v11 }
  0x27   :  { %2531 = vst [vmem:[#allocation48_spill] sm:$0xff] %v1463_v52  ;;  %2532 = vst [vmem:[#allocation49_spill] sm:$0xff] %v1466_v2  ;;  %v143_v2 = vld [vmem:[%s2409_s0 + $0x3d8] sm:$0xff]  ;;  %v144_v5 = vld [vmem:[%s2409_s0 + $0x3e0] sm:$0xff]  ;;  %v1526_v29 = vsub.f32 %v132_v45, %v1013_v11  ;;  %v1547_v45 = vsub.f32 %v138_v53, %v1013_v11 }
  0x28   :  { %2533 = vst [vmem:[#allocation50_spill] sm:$0xff] %v1469_v3  ;;  %2534 = vst [vmem:[#allocation51_spill] sm:$0xff] %v1472_v44  ;;  %v1493_v44 = vsub.f32 %v127_v43, %v1013_v11  ;;  %v142_v3 = vld [vmem:[%s2409_s0 + $0x3d0] sm:$0xff]  ;;  %v1511_v43 = vsub.f32 %v130_v22, %v1013_v11  ;;  %v147_v14 = vld [vmem:[%s2409_s0 + $0x3f8] sm:$0xff]  ;;  %v1529_v22 = vsub.f32 %v133_v36, %v1013_v11 }
  0x29   :  { %2535 = vst [vmem:[#allocation52_spill] sm:$0xff] %v1484_v60  ;;  %2536 = vst [vmem:[#allocation53_spill] sm:$0xff] %v1487_v10  ;;  %v146_v10 = vld [vmem:[%s2409_s0 + $0x3f0] sm:$0xff]  ;;  %v1550_v36 = vsub.f32 %v139_v59, %v1013_v11  ;;  %v1568_v53 = vsub.f32 %v144_v5, %v1013_v11  ;;  %v288_v5 = vsel %vm284_vm1, %v1070_v30, 0.0  ;;  %v49_v15 = vld [vmem:[%s2409_s0 + $0xe8] sm:$0xff] }
  0x2a   :  { %2537 = vst [vmem:[#allocation54_spill] sm:$0xff] %v1490_v12  ;;  %2538 = vst [vmem:[#allocation55_spill] sm:$0xff] %v1493_v44  ;;  %v1514_v44 = vsub.f32 %v131_v21, %v1013_v11  ;;  %v145_v12 = vld [vmem:[%s2409_s0 + $0x3e8] sm:$0xff]  ;;  %v1532_v21 = vsub.f32 %v134_v35, %v1013_v11  ;;  %v1553_v35 = vsub.f32 %v140_v58, %v1013_v11 }
  0x2b   :  { %2539 = vst [vmem:[#allocation56_spill] sm:$0xff] %v1505_v4  ;;  %2540 = vst [vmem:[#allocation57_spill] sm:$0xff] %v1508_v19  ;;  %v1541_v19 = vsub.f32 %v136_v51, %v1013_v11  ;;  %v1544_v4 = vsub.f32 %v137_v50, %v1013_v11  ;;  %v1562_v51 = vsub.f32 %v143_v2, %v1013_v11  ;;  %v24_v50 = vld [vmem:[%s2409_s0 + $0x20] sm:$0xff]  ;;  %v285_v2 = vsel %vm284_vm1, %v1052_v24, 0.0 }
  0x2c   :  { %2541 = vst [vmem:[#allocation58_spill] sm:$0xff] %v1511_v43  ;;  %2542 = vst [vmem:[#allocation59_spill] sm:$0xff] %v1514_v44  ;;  %v1535_v44 = vsub.f32 %v135_v42, %v1013_v11  ;;  %v23_v43 = vld [vmem:[%s2409_s0 + $0x18] sm:$0xff]  ;;  %v1556_v42 = vsub.f32 %v141_v61, %v1013_v11  ;;  %v1571_v59 = vsub.f32 %v145_v12, %v1013_v11 }
  0x2d   :  { %2543 = vst [vmem:[#allocation60_spill] sm:$0xff] %v1526_v29  ;;  %2544 = vst [vmem:[#allocation61_spill] sm:$0xff] %v1529_v22  ;;  %v1574_v58 = vsub.f32 %v146_v10, %v1013_v11  ;;  %v1577_v61 = vsub.f32 %v147_v14, %v1013_v11  ;;  %v25_v10 = vld [vmem:[%s2409_s0 + $0x28] sm:$0xff]  ;;  %v1592_v14 = vsub.f32 %v24_v50, %v1013_v11 }
  0x2e   :  { %2545 = vst [vmem:[#allocation62_spill] sm:$0xff] %v1532_v21  ;;  %2546 = vst [vmem:[#allocation63_spill] sm:$0xff] %v1535_v44  ;;  %v1559_v44 = vsub.f32 %v142_v3, %v1013_v11  ;;  %v1580_v3 = vsub.f32 %v23_v43, %v1013_v11 }
  0x2f   :  { %2547 = vst [vmem:[#allocation64_spill] sm:$0xff] %v1541_v19  ;;  %2548 = vst [vmem:[#allocation65_spill] sm:$0xff] %v1544_v4 }
  0x30   :  { %2549 = vst [vmem:[#allocation66_spill] sm:$0xff] %v1547_v45  ;;  %2550 = vst [vmem:[#allocation67_spill] sm:$0xff] %v1550_v36  ;;  %v290_v43 = vsel %vm284_vm1, %v1580_v3, 0.0  ;;  %v553_v17 = vmul.f32 %v1580_v3, %v1580_v3  ;;  %v681_v3 = vsel %vm284_vm1, %v552_v18, 0.0  ;;  %v50_v18 = vld [vmem:[%s2409_s0 + $0xf0] sm:$0xff] }
  0x31   :  { %2551 = vst [vmem:[#allocation68_spill] sm:$0xff] %v1553_v35  ;;  %2552 = vst [vmem:[#allocation69_spill] sm:$0xff] %v1556_v42 }
  0x32   :  { %2553 = vst [vmem:[#allocation70_spill] sm:$0xff] %v1559_v44  ;;  %2554 = vst [vmem:[#allocation71_spill] sm:$0xff] %v1562_v51  ;;  %v286_v51 = vsel %vm284_vm1, %v1055_v25, 0.0 }
  0x33   :  { %2555 = vst [vmem:[#allocation72_spill] sm:$0xff] %v1568_v53  ;;  %2556 = vst [vmem:[#allocation73_spill] sm:$0xff] %v1571_v59  ;;  %v287_v12 = vadd.f32 %v286_v51, %v285_v2  ;;  %v1600_v59 = vsub.f32 %v25_v10, %v1013_v11  ;;  %v292_v53 = vsel %vm284_vm1, %v1592_v14, 0.0  ;;  %v27_v51 = vld [vmem:[%s2409_s0 + $0x38] sm:$0xff] }
  0x34   :  { %2557 = vst [vmem:[#allocation74_spill] sm:$0xff] %v1574_v58  ;;  %2558 = vst [vmem:[#allocation75_spill] sm:$0xff] %v1577_v61  ;;  %v26_v61 = vld [vmem:[%s2409_s0 + $0x30] sm:$0xff] }
  0x35   :  { %v289_v58 = vadd.f32 %v288_v5, %v287_v12  ;;  %v1608_v2 = vsub.f32 %v26_v61, %v1013_v11  ;;  %v294_v44 = vsel %vm284_vm1, %v1600_v59, 0.0  ;;  %v28_v5 = vld [vmem:[%s2409_s0 + $0x40] sm:$0xff]  ;;  %v1616_v12 = vsub.f32 %v27_v51, %v1013_v11 }
  0x37   :  { %v291_v50 = vadd.f32 %v290_v43, %v289_v58  ;;  %v296_v42 = vsel %vm284_vm1, %v1608_v2, 0.0  ;;  %v29_v58 = vld [vmem:[%s2409_s0 + $0x48] sm:$0xff]  ;;  %v1624_v43 = vsub.f32 %v28_v5, %v1013_v11  ;;  %v298_v35 = vsel %vm284_vm1, %v1616_v12, 0.0 }
  0x39   :  { %v293_v10 = vadd.f32 %v292_v53, %v291_v50  ;;  %v30_v53 = vld [vmem:[%s2409_s0 + $0x50] sm:$0xff]  ;;  %v1632_v50 = vsub.f32 %v29_v58, %v1013_v11  ;;  %v300_v36 = vsel %vm284_vm1, %v1624_v43, 0.0 }
  0x3b   :  { %v295_v61 = vadd.f32 %v294_v44, %v293_v10  ;;  %v31_v44 = vld [vmem:[%s2409_s0 + $0x58] sm:$0xff]  ;;  %v1640_v10 = vsub.f32 %v30_v53, %v1013_v11  ;;  %v302_v45 = vsel %vm284_vm1, %v1632_v50, 0.0 }
  0x3d   :  { %v297_v51 = vadd.f32 %v296_v42, %v295_v61  ;;  %v32_v42 = vld [vmem:[%s2409_s0 + $0x60] sm:$0xff]  ;;  %v1648_v61 = vsub.f32 %v31_v44, %v1013_v11  ;;  %v304_v4 = vsel %vm284_vm1, %v1640_v10, 0.0 }
  0x3f   :  { %v299_v5 = vadd.f32 %v298_v35, %v297_v51  ;;  %v33_v35 = vld [vmem:[%s2409_s0 + $0x68] sm:$0xff]  ;;  %v1656_v51 = vsub.f32 %v32_v42, %v1013_v11  ;;  %v306_v19 = vsel %vm284_vm1, %v1648_v61, 0.0 }
  0x41   :  { %v301_v58 = vadd.f32 %v300_v36, %v299_v5  ;;  %v34_v36 = vld [vmem:[%s2409_s0 + $0x70] sm:$0xff]  ;;  %v1664_v5 = vsub.f32 %v33_v35, %v1013_v11  ;;  %v308_v21 = vsel %vm284_vm1, %v1656_v51, 0.0 }
  0x43   :  { %v303_v53 = vadd.f32 %v302_v45, %v301_v58  ;;  %v35_v45 = vld [vmem:[%s2409_s0 + $0x78] sm:$0xff]  ;;  %v1672_v58 = vsub.f32 %v34_v36, %v1013_v11  ;;  %v310_v22 = vsel %vm284_vm1, %v1664_v5, 0.0 }
  0x45   :  { %v305_v44 = vadd.f32 %v304_v4, %v303_v53  ;;  %v36_v4 = vld [vmem:[%s2409_s0 + $0x80] sm:$0xff]  ;;  %v1680_v53 = vsub.f32 %v35_v45, %v1013_v11  ;;  %v312_v29 = vsel %vm284_vm1, %v1672_v58, 0.0 }
  0x47   :  { %v307_v42 = vadd.f32 %v306_v19, %v305_v44  ;;  %v37_v19 = vld [vmem:[%s2409_s0 + $0x88] sm:$0xff]  ;;  %v1688_v44 = vsub.f32 %v36_v4, %v1013_v11  ;;  %v314_v60 = vsel %vm284_vm1, %v1680_v53, 0.0 }
  0x49   :  { %v309_v35 = vadd.f32 %v308_v21, %v307_v42  ;;  %v38_v21 = vld [vmem:[%s2409_s0 + $0x90] sm:$0xff]  ;;  %v1696_v42 = vsub.f32 %v37_v19, %v1013_v11  ;;  %v316_v52 = vsel %vm284_vm1, %v1688_v44, 0.0 }
  0x4b   :  { %v311_v36 = vadd.f32 %v310_v22, %v309_v35  ;;  %v39_v22 = vld [vmem:[%s2409_s0 + $0x98] sm:$0xff]  ;;  %v1704_v35 = vsub.f32 %v38_v21, %v1013_v11  ;;  %v318_v37 = vsel %vm284_vm1, %v1696_v42, 0.0 }
  0x4d   :  { %v313_v45 = vadd.f32 %v312_v29, %v311_v36  ;;  %v40_v29 = vld [vmem:[%s2409_s0 + $0xa0] sm:$0xff]  ;;  %v1712_v36 = vsub.f32 %v39_v22, %v1013_v11  ;;  %v320_v28 = vsel %vm284_vm1, %v1704_v35, 0.0 }
  0x4f   :  { %v315_v4 = vadd.f32 %v314_v60, %v313_v45  ;;  %v41_v60 = vld [vmem:[%s2409_s0 + $0xa8] sm:$0xff]  ;;  %v1720_v45 = vsub.f32 %v40_v29, %v1013_v11  ;;  %v322_v34 = vsel %vm284_vm1, %v1712_v36, 0.0 }
  0x51   :  { %v317_v19 = vadd.f32 %v316_v52, %v315_v4  ;;  %v42_v52 = vld [vmem:[%s2409_s0 + $0xb0] sm:$0xff]  ;;  %v1728_v4 = vsub.f32 %v41_v60, %v1013_v11  ;;  %v324_v20 = vsel %vm284_vm1, %v1720_v45, 0.0 }
  0x53   :  { %v319_v21 = vadd.f32 %v318_v37, %v317_v19  ;;  %v43_v37 = vld [vmem:[%s2409_s0 + $0xb8] sm:$0xff]  ;;  %v1736_v19 = vsub.f32 %v42_v52, %v1013_v11  ;;  %v326_v13 = vsel %vm284_vm1, %v1728_v4, 0.0 }
  0x54   :  { %v1747_v27 = vsub.f32 %v43_v37, %v1013_v11  ;;  %v47_v37 = vld [vmem:[%s2409_s0 + $0xd8] sm:$0xff] }
  0x55   :  { %v321_v22 = vadd.f32 %v320_v28, %v319_v21  ;;  %v44_v28 = vld [vmem:[%s2409_s0 + $0xc0] sm:$0xff]  ;;  %v45_v21 = vld [vmem:[%s2409_s0 + $0xc8] sm:$0xff]  ;;  %v1784_v16 = vsub.f32 %v47_v37, %v1013_v11 }
  0x56   :  { %v1755_v26 = vsub.f32 %v44_v28, %v1013_v11  ;;  %v551_v28 = vmul.f32 %v1055_v25, %v1055_v25 }
  0x57   :  { %v323_v29 = vadd.f32 %v322_v34, %v321_v22  ;;  %v328_v34 = vsel %vm284_vm1, %v1736_v19, 0.0  ;;  %v46_v22 = vld [vmem:[%s2409_s0 + $0xd0] sm:$0xff] }
  0x59   :  { %v325_v60 = vadd.f32 %v324_v20, %v323_v29  ;;  %v330_v20 = vsel %vm284_vm1, %v1747_v27, 0.0  ;;  %v1760_v29 = vsub.f32 %v45_v21, %v1013_v11  ;;  %v1774_v21 = vsub.f32 %v46_v22, %v1013_v11 }
  0x5b   :  { %v327_v52 = vadd.f32 %v326_v13, %v325_v60  ;;  %v332_v13 = vsel %vm284_vm1, %v1755_v26, 0.0  ;;  %v550_v60 = vmul.f32 %v1052_v24, %v1052_v24  ;;  %v48_v24 = vld [vmem:[%s2409_s0 + $0xe0] sm:$0xff]  ;;  %v336_v30 = vsel %vm284_vm1, %v1774_v21, 0.0 }
  0x5d   :  { %v329_v23 = vadd.f32 %v328_v34, %v327_v52  ;;  %v334_v52 = vsel %vm284_vm1, %v1760_v29, 0.0  ;;  %v678_v22 = vsel %vm284_vm1, %v550_v60, 0.0  ;;  %v683_v60 = vsel %vm284_vm1, %v553_v17, 0.0  ;;  %v51_v17 = vld [vmem:[%s2409_s0 + $0xf8] sm:$0xff] }
  0x5f   :  { %v331_v34 = vadd.f32 %v330_v20, %v329_v23  ;;  %v554_v23 = vmul.f32 %v1592_v14, %v1592_v14  ;;  %v679_v20 = vsel %vm284_vm1, %v551_v28, 0.0  ;;  %v555_v14 = vmul.f32 %v1600_v59, %v1600_v59 }
  0x60   :  { %v680_v37 = vadd.f32 %v679_v20, %v678_v22 }
  0x61   :  { %v333_v25 = vadd.f32 %v332_v13, %v331_v34  ;;  %v1797_v13 = vsub.f32 %v48_v24, %v1013_v11  ;;  %v338_v34 = vsel %vm284_vm1, %v1784_v16, 0.0  ;;  %v685_v22 = vsel %vm284_vm1, %v554_v23, 0.0 }
  0x62   :  { %v682_v8 = vadd.f32 %v681_v3, %v680_v37  ;;  %v687_v3 = vsel %vm284_vm1, %v555_v14, 0.0 }
  0x63   :  { %v335_v9 = vadd.f32 %v334_v52, %v333_v25  ;;  %v1808_v52 = vsub.f32 %v49_v15, %v1013_v11  ;;  %v340_v24 = vsel %vm284_vm1, %v1797_v13, 0.0  ;;  %v556_v25 = vmul.f32 %v1608_v2, %v1608_v2  ;;  %v52_v2 = vld [vmem:[%s2409_s0 + $0x100] sm:$0xff] }
  0x64   :  { %v684_v20 = vadd.f32 %v683_v60, %v682_v8  ;;  %v558_v60 = vmul.f32 %v1624_v43, %v1624_v43  ;;  %v1838_v14 = vsub.f32 %v52_v2, %v1013_v11  ;;  %v350_v2 = vsel %vm284_vm1, %v1073_v31, 0.0 }
  0x65   :  { %v337_v28 = vadd.f32 %v336_v30, %v335_v9  ;;  %v1819_v9 = vsub.f32 %v50_v18, %v1013_v11  ;;  %v342_v15 = vsel %vm284_vm1, %v1808_v52, 0.0  ;;  %v557_v30 = vmul.f32 %v1616_v12, %v1616_v12 }
  0x66   :  { %v686_v37 = vadd.f32 %v685_v22, %v684_v20  ;;  %v689_v18 = vsel %vm284_vm1, %v556_v25, 0.0  ;;  %v559_v22 = vmul.f32 %v1632_v50, %v1632_v50  ;;  %v348_v43 = vsel %vm284_vm1, %v1838_v14, 0.0 }
  0x67   :  { %v339_v59 = vadd.f32 %v338_v34, %v337_v28  ;;  %v1830_v34 = vsub.f32 %v51_v17, %v1013_v11  ;;  %v344_v8 = vsel %vm284_vm1, %v1819_v9, 0.0  ;;  %v691_v17 = vsel %vm284_vm1, %v557_v30, 0.0 }
  0x68   :  { %v688_v28 = vadd.f32 %v687_v3, %v686_v37  ;;  %v560_v25 = vmul.f32 %v1640_v10, %v1640_v10  ;;  %v561_v50 = vmul.f32 %v1648_v61, %v1648_v61  ;;  %v695_v30 = vsel %vm284_vm1, %v559_v22, 0.0 }
  0x69   :  { %v341_v23 = vadd.f32 %v340_v24, %v339_v59  ;;  %v346_v24 = vsel %vm284_vm1, %v1830_v34, 0.0  ;;  %v562_v10 = vmul.f32 %v1656_v51, %v1656_v51  ;;  %v563_v61 = vmul.f32 %v1664_v5, %v1664_v5 }
  0x6a   :  { %v690_v20 = vadd.f32 %v689_v18, %v688_v28  ;;  %v354_v28 = vsel %vm284_vm1, %v1079_v33, 0.0  ;;  %v564_v51 = vmul.f32 %v1672_v58, %v1672_v58  ;;  %v565_v5 = vmul.f32 %v1680_v53, %v1680_v53 }
  0x6b   :  { %v343_v12 = vadd.f32 %v342_v15, %v341_v23  ;;  %v693_v15 = vsel %vm284_vm1, %v558_v60, 0.0  ;;  %v697_v60 = vsel %vm284_vm1, %v560_v25, 0.0  ;;  %v566_v58 = vmul.f32 %v1688_v44, %v1688_v44 }
  0x6c   :  { %v692_v3 = vadd.f32 %v691_v17, %v690_v20  ;;  %v701_v20 = vsel %vm284_vm1, %v562_v10, 0.0  ;;  %v567_v53 = vmul.f32 %v1696_v42, %v1696_v42  ;;  %v707_v10 = vsel %vm284_vm1, %v565_v5, 0.0 }
  0x6d   :  { %v345_v59 = vadd.f32 %v344_v8, %v343_v12  ;;  %v352_v8 = vsel %vm284_vm1, %v1076_v32, 0.0  ;;  %v568_v44 = vmul.f32 %v1704_v35, %v1704_v35  ;;  %v569_v42 = vmul.f32 %v1712_v36, %v1712_v36 }
  0x6e   :  { %v694_v37 = vadd.f32 %v693_v15, %v692_v3  ;;  %v358_v15 = vsel %vm284_vm1, %v1097_v39, 0.0  ;;  %v570_v35 = vmul.f32 %v1720_v45, %v1720_v45  ;;  %v370_v5 = vsel %vm284_vm1, %v1127_v49, 0.0 }
  0x6f   :  { %v347_v11 = vadd.f32 %v346_v24, %v345_v59  ;;  %v699_v24 = vsel %vm284_vm1, %v561_v50, 0.0  ;;  %v356_v59 = vsel %vm284_vm1, %v1094_v38, 0.0  ;;  %v360_v50 = vsel %vm284_vm1, %v1100_v40, 0.0 }
  0x70   :  { %v696_v12 = vadd.f32 %v695_v30, %v694_v37  ;;  %v705_v30 = vsel %vm284_vm1, %v564_v51, 0.0  ;;  %v571_v36 = vmul.f32 %v1728_v4, %v1728_v4  ;;  %v572_v45 = vmul.f32 %v1736_v19, %v1736_v19 }
  0x71   :  { %v349_v23 = vadd.f32 %v348_v43, %v347_v11  ;;  %v703_v11 = vsel %vm284_vm1, %v563_v61, 0.0  ;;  %v573_v4 = vmul.f32 %v1747_v27, %v1747_v27  ;;  %v574_v19 = vmul.f32 %v1755_v26, %v1755_v26 }
  0x72   :  { %v698_v17 = vadd.f32 %v697_v60, %v696_v12  ;;  %v364_v12 = vsel %vm284_vm1, %v1118_v46, 0.0  ;;  %v575_v27 = vmul.f32 %v1760_v29, %v1760_v29  ;;  %v576_v26 = vmul.f32 %v1774_v21, %v1774_v21 }
  0x73   :  { %v351_v18 = vadd.f32 %v350_v2, %v349_v23  ;;  %v577_v29 = vmul.f32 %v1784_v16, %v1784_v16  ;;  %v578_v21 = vmul.f32 %v1797_v13, %v1797_v13  ;;  %v579_v16 = vmul.f32 %v1808_v52, %v1808_v52 }
  0x74   :  { %v700_v25 = vadd.f32 %v699_v24, %v698_v17  ;;  %v711_v17 = vsel %vm284_vm1, %v567_v53, 0.0  ;;  %v580_v13 = vmul.f32 %v1819_v9, %v1819_v9  ;;  %v581_v52 = vmul.f32 %v1830_v34, %v1830_v34 }
  0x75   :  { %v353_v22 = vadd.f32 %v352_v8, %v351_v18  ;;  %v362_v8 = vsel %vm284_vm1, %v1103_v41, 0.0  ;;  %v582_v9 = vmul.f32 %v1838_v14, %v1838_v14  ;;  %v583_v34 = vmul.f32 %v1073_v31, %v1073_v31 }
  0x76   :  { %v702_v2 = vadd.f32 %v701_v20, %v700_v25  ;;  %v368_v20 = vsel %vm284_vm1, %v1124_v48, 0.0  ;;  %v584_v14 = vmul.f32 %v1076_v32, %v1076_v32  ;;  %v585_v31 = vmul.f32 %v1079_v33, %v1079_v33 }
  0x77   :  { %v355_v43 = vadd.f32 %v354_v28, %v353_v22  ;;  %v709_v28 = vsel %vm284_vm1, %v566_v58, 0.0  ;;  %v366_v22 = vsel %vm284_vm1, %v1121_v47, 0.0  ;;  %v717_v58 = vsel %vm284_vm1, %v570_v35, 0.0 }
  0x78   :  { %v704_v37 = vadd.f32 %v703_v11, %v702_v2  ;;  %v715_v11 = vsel %vm284_vm1, %v569_v42, 0.0  ;;  %v380_v42 = vsel %vm284_vm1, %v1166_v62, 0.0  ;;  %v727_v35 = vsel %vm284_vm1, %v575_v27, 0.0 }
  0x79   :  { %v357_v3 = vadd.f32 %v356_v59, %v355_v43  ;;  %v713_v43 = vsel %vm284_vm1, %v568_v44, 0.0  ;;  %v586_v32 = vmul.f32 %v1094_v38, %v1094_v38  ;;  %v587_v33 = vmul.f32 %v1097_v39, %v1097_v39 }
  0x7a   :  { %v706_v18 = vadd.f32 %v705_v30, %v704_v37  ;;  %v374_v37 = vsel %vm284_vm1, %v1145_v55, 0.0  ;;  %v588_v38 = vmul.f32 %v1100_v40, %v1100_v40  ;;  %v589_v39 = vmul.f32 %v1103_v41, %v1103_v41 }
  0x7b   :  { %v359_v23 = vadd.f32 %v358_v15, %v357_v3  ;;  %v590_v40 = vmul.f32 %v1118_v46, %v1118_v46  ;;  %v591_v41 = vmul.f32 %v1121_v47, %v1121_v47  ;;  %v592_v46 = vmul.f32 %v1124_v48, %v1124_v48 }
  0x7c   :  { %v708_v24 = vadd.f32 %v707_v10, %v706_v18  ;;  %v721_v18 = vsel %vm284_vm1, %v572_v45, 0.0  ;;  %v593_v47 = vmul.f32 %v1127_v49, %v1127_v49  ;;  %v594_v48 = vmul.f32 %v1142_v54, %v1142_v54 }
  0x7d   :  { %v361_v60 = vadd.f32 %v360_v50, %v359_v23  ;;  %v372_v50 = vsel %vm284_vm1, %v1142_v54, 0.0  ;;  %v595_v49 = vmul.f32 %v1145_v55, %v1145_v55  ;;  %v596_v54 = vmul.f32 %v1148_v56, %v1148_v56 }
  0x7e   :  { %v710_v51 = vadd.f32 %v709_v28, %v708_v24  ;;  %v378_v28 = vsel %vm284_vm1, %v1151_v57, 0.0 }
  0x7f   :  { %v363_v61 = vadd.f32 %v362_v8, %v361_v60  ;;  %v719_v8 = vsel %vm284_vm1, %v571_v36, 0.0  ;;  %v376_v60 = vsel %vm284_vm1, %v1148_v56, 0.0 }
  0x80   :  { %v712_v15 = vadd.f32 %v711_v17, %v710_v51  ;;  %v725_v17 = vsel %vm284_vm1, %v574_v19, 0.0 }
  0x81   :  { %v365_v59 = vadd.f32 %v364_v12, %v363_v61  ;;  %v723_v61 = vsel %vm284_vm1, %v573_v4, 0.0  ;;  %v390_v4 = vsel %vm284_vm1, %v1193_v7, 0.0 }
  0x82   :  { %v714_v2 = vadd.f32 %v713_v43, %v712_v15  ;;  %v384_v15 = vsel %vm284_vm1, %v1172_v0, 0.0 }
  0x83   :  { %v367_v25 = vadd.f32 %v366_v22, %v365_v59 }
  0x84   :  { %v716_v23 = vadd.f32 %v715_v11, %v714_v2  ;;  %v731_v2 = vsel %vm284_vm1, %v577_v29, 0.0 }
  0x85   :  { %v369_v3 = vadd.f32 %v368_v20, %v367_v25  ;;  %v382_v20 = vsel %vm284_vm1, %v1169_v63, 0.0 }
  0x86   :  { %v718_v10 = vadd.f32 %v717_v58, %v716_v23  ;;  %v388_v58 = vsel %vm284_vm1, %v1190_v6, 0.0 }
  0x87   :  { %v371_v30 = vadd.f32 %v370_v5, %v369_v3  ;;  %v729_v5 = vsel %vm284_vm1, %v576_v26, 0.0  ;;  %v386_v3 = vsel %vm284_vm1, %v1175_v1, 0.0 }
  0x88   :  { %v720_v44 = vadd.f32 %v719_v8, %v718_v10  ;;  %v735_v8 = vsel %vm284_vm1, %v579_v16, 0.0 }
  0x89   :  { %v373_v53 = vadd.f32 %v372_v50, %v371_v30  ;;  %v733_v30 = vsel %vm284_vm1, %v578_v21, 0.0 }
  0x8a   :  { %v722_v22 = vadd.f32 %v721_v18, %v720_v44  ;;  %v737_v18 = vsel %vm284_vm1, %v580_v13, 0.0 }
  0x8b   :  { %v375_v12 = vadd.f32 %v374_v37, %v373_v53 }
  0x8c   :  { %v724_v51 = vadd.f32 %v723_v61, %v722_v22  ;;  %v739_v61 = vsel %vm284_vm1, %v581_v52, 0.0 }
  0x8d   :  { %v377_v24 = vadd.f32 %v376_v60, %v375_v12  ;;  %v2559_v60 = vld [vmem:[#allocation2_spill] sm:$0xff] }
  0x8e   :  { %v726_v25 = vadd.f32 %v725_v17, %v724_v51  ;;  %v392_v19 = vsel %vm284_vm1, %v2559_v60, 0.0  ;;  %v741_v17 = vsel %vm284_vm1, %v582_v9, 0.0 }
  0x8f   :  { %v379_v59 = vadd.f32 %v378_v28, %v377_v24  ;;  %v2560_v28 = vld [vmem:[#allocation3_spill] sm:$0xff] }
  0x90   :  { %v728_v11 = vadd.f32 %v727_v35, %v726_v25  ;;  %v394_v27 = vsel %vm284_vm1, %v2560_v28, 0.0  ;;  %v743_v35 = vsel %vm284_vm1, %v583_v34, 0.0 }
  0x91   :  { %v381_v43 = vadd.f32 %v380_v42, %v379_v59  ;;  %v2561_v42 = vld [vmem:[#allocation4_spill] sm:$0xff] }
  0x92   :  { %v730_v45 = vadd.f32 %v729_v5, %v728_v11  ;;  %v396_v26 = vsel %vm284_vm1, %v2561_v42, 0.0  ;;  %v745_v5 = vsel %vm284_vm1, %v584_v14, 0.0 }
  0x93   :  { %v383_v36 = vadd.f32 %v382_v20, %v381_v43  ;;  %v2562_v20 = vld [vmem:[#allocation5_spill] sm:$0xff] }
  0x94   :  { %v732_v37 = vadd.f32 %v731_v2, %v730_v45  ;;  %v398_v29 = vsel %vm284_vm1, %v2562_v20, 0.0  ;;  %v747_v2 = vsel %vm284_vm1, %v585_v31, 0.0 }
  0x95   :  { %v385_v50 = vadd.f32 %v384_v15, %v383_v36  ;;  %v2563_v15 = vld [vmem:[#allocation6_spill] sm:$0xff] }
  0x96   :  { %v734_v10 = vadd.f32 %v733_v30, %v732_v37  ;;  %v400_v21 = vsel %vm284_vm1, %v2563_v15, 0.0  ;;  %v749_v30 = vsel %vm284_vm1, %v586_v32, 0.0 }
  0x97   :  { %v387_v23 = vadd.f32 %v386_v3, %v385_v50  ;;  %v2564_v3 = vld [vmem:[#allocation7_spill] sm:$0xff] }
  0x98   :  { %v736_v44 = vadd.f32 %v735_v8, %v734_v10  ;;  %v402_v16 = vsel %vm284_vm1, %v2564_v3, 0.0  ;;  %v751_v8 = vsel %vm284_vm1, %v587_v33, 0.0 }
  0x99   :  { %v389_v53 = vadd.f32 %v388_v58, %v387_v23  ;;  %v2565_v58 = vld [vmem:[#allocation8_spill] sm:$0xff] }
  0x9a   :  { %v738_v22 = vadd.f32 %v737_v18, %v736_v44  ;;  %v404_v13 = vsel %vm284_vm1, %v2565_v58, 0.0  ;;  %v753_v18 = vsel %vm284_vm1, %v588_v38, 0.0 }
  0x9b   :  { %v391_v12 = vadd.f32 %v390_v4, %v389_v53  ;;  %v2566_v4 = vld [vmem:[#allocation9_spill] sm:$0xff] }
  0x9c   :  { %v740_v51 = vadd.f32 %v739_v61, %v738_v22  ;;  %v406_v52 = vsel %vm284_vm1, %v2566_v4, 0.0  ;;  %v755_v61 = vsel %vm284_vm1, %v589_v39, 0.0 }
  0x9d   :  { %v393_v24 = vadd.f32 %v392_v19, %v391_v12  ;;  %v2567_v19 = vld [vmem:[#allocation10_spill] sm:$0xff] }
  0x9e   :  { %v742_v25 = vadd.f32 %v741_v17, %v740_v51  ;;  %v408_v9 = vsel %vm284_vm1, %v2567_v19, 0.0  ;;  %v757_v17 = vsel %vm284_vm1, %v590_v40, 0.0 }
  0x9f   :  { %v395_v59 = vadd.f32 %v394_v27, %v393_v24  ;;  %v2568_v27 = vld [vmem:[#allocation11_spill] sm:$0xff] }
  0xa0   :  { %v744_v11 = vadd.f32 %v743_v35, %v742_v25  ;;  %v410_v34 = vsel %vm284_vm1, %v2568_v27, 0.0  ;;  %v759_v35 = vsel %vm284_vm1, %v591_v41, 0.0 }
  0xa1   :  { %v397_v43 = vadd.f32 %v396_v26, %v395_v59  ;;  %v2569_v26 = vld [vmem:[#allocation12_spill] sm:$0xff] }
  0xa2   :  { %v746_v45 = vadd.f32 %v745_v5, %v744_v11  ;;  %v412_v14 = vsel %vm284_vm1, %v2569_v26, 0.0  ;;  %v761_v5 = vsel %vm284_vm1, %v592_v46, 0.0 }
  0xa3   :  { %v399_v36 = vadd.f32 %v398_v29, %v397_v43  ;;  %v2570_v29 = vld [vmem:[#allocation13_spill] sm:$0xff] }
  0xa4   :  { %v748_v37 = vadd.f32 %v747_v2, %v746_v45  ;;  %v414_v31 = vsel %vm284_vm1, %v2570_v29, 0.0  ;;  %v763_v2 = vsel %vm284_vm1, %v593_v47, 0.0 }
  0xa5   :  { %v401_v50 = vadd.f32 %v400_v21, %v399_v36  ;;  %v2571_v21 = vld [vmem:[#allocation14_spill] sm:$0xff] }
  0xa6   :  { %v750_v10 = vadd.f32 %v749_v30, %v748_v37  ;;  %v416_v32 = vsel %vm284_vm1, %v2571_v21, 0.0  ;;  %v765_v30 = vsel %vm284_vm1, %v594_v48, 0.0 }
  0xa7   :  { %v403_v23 = vadd.f32 %v402_v16, %v401_v50  ;;  %v2572_v16 = vld [vmem:[#allocation15_spill] sm:$0xff] }
  0xa8   :  { %v752_v44 = vadd.f32 %v751_v8, %v750_v10  ;;  %v418_v33 = vsel %vm284_vm1, %v2572_v16, 0.0  ;;  %v767_v8 = vsel %vm284_vm1, %v595_v49, 0.0 }
  0xa9   :  { %v405_v53 = vadd.f32 %v404_v13, %v403_v23  ;;  %v2573_v13 = vld [vmem:[#allocation16_spill] sm:$0xff] }
  0xaa   :  { %v754_v22 = vadd.f32 %v753_v18, %v752_v44  ;;  %v420_v38 = vsel %vm284_vm1, %v2573_v13, 0.0  ;;  %v769_v18 = vsel %vm284_vm1, %v596_v54, 0.0 }
  0xab   :  { %v407_v12 = vadd.f32 %v406_v52, %v405_v53  ;;  %v2574_v52 = vld [vmem:[#allocation17_spill] sm:$0xff]  ;;  %v597_v53 = vmul.f32 %v1151_v57, %v1151_v57 }
  0xac   :  { %v756_v51 = vadd.f32 %v755_v61, %v754_v22  ;;  %v422_v39 = vsel %vm284_vm1, %v2574_v52, 0.0 }
  0xad   :  { %v409_v24 = vadd.f32 %v408_v9, %v407_v12  ;;  %v2575_v9 = vld [vmem:[#allocation18_spill] sm:$0xff]  ;;  %v598_v12 = vmul.f32 %v1166_v62, %v1166_v62  ;;  %v771_v57 = vsel %vm284_vm1, %v597_v53, 0.0 }
  0xae   :  { %v758_v25 = vadd.f32 %v757_v17, %v756_v51  ;;  %v424_v40 = vsel %vm284_vm1, %v2575_v9, 0.0  ;;  %v2578_v51 = vld [vmem:[#allocation21_spill] sm:$0xff] }
  0xaf   :  { %v411_v59 = vadd.f32 %v410_v34, %v409_v24  ;;  %v2576_v34 = vld [vmem:[#allocation19_spill] sm:$0xff]  ;;  %v599_v24 = vmul.f32 %v1169_v63, %v1169_v63  ;;  %v773_v62 = vsel %vm284_vm1, %v598_v12, 0.0  ;;  %v601_v63 = vmul.f32 %v1175_v1, %v1175_v1 }
  0xb0   :  { %v760_v11 = vadd.f32 %v759_v35, %v758_v25  ;;  %v426_v41 = vsel %vm284_vm1, %v2576_v34, 0.0  ;;  %v2579_v25 = vld [vmem:[#allocation22_spill] sm:$0xff]  ;;  %v603_v1 = vmul.f32 %v1193_v7, %v1193_v7  ;;  %v605_v7 = vmul.f32 %v2560_v28, %v2560_v28 }
  0xb1   :  { %v413_v43 = vadd.f32 %v412_v14, %v411_v59  ;;  %v2577_v14 = vld [vmem:[#allocation20_spill] sm:$0xff]  ;;  %v600_v59 = vmul.f32 %v1172_v0, %v1172_v0  ;;  %v602_v0 = vmul.f32 %v1190_v6, %v1190_v6  ;;  %v604_v6 = vmul.f32 %v2559_v60, %v2559_v60 }
  0xb2   :  { %v762_v45 = vadd.f32 %v761_v5, %v760_v11  ;;  %v428_v46 = vsel %vm284_vm1, %v2577_v14, 0.0  ;;  %v2580_v11 = vld [vmem:[#allocation23_spill] sm:$0xff]  ;;  %v783_v53 = vsel %vm284_vm1, %v603_v1, 0.0  ;;  %v606_v60 = vmul.f32 %v2561_v42, %v2561_v42 }
  0xb3   :  { %v415_v36 = vadd.f32 %v414_v31, %v413_v43  ;;  %v430_v31 = vsel %vm284_vm1, %v2578_v51, 0.0  ;;  %v775_v43 = vsel %vm284_vm1, %v599_v24, 0.0  ;;  %v785_v12 = vsel %vm284_vm1, %v604_v6, 0.0 }
  0xb4   :  { %v764_v37 = vadd.f32 %v763_v2, %v762_v45  ;;  %v2581_v45 = vld [vmem:[#allocation24_spill] sm:$0xff]  ;;  %v607_v28 = vmul.f32 %v2562_v20, %v2562_v20  ;;  %v608_v42 = vmul.f32 %v2563_v15, %v2563_v15  ;;  %v609_v20 = vmul.f32 %v2564_v3, %v2564_v3 }
  0xb5   :  { %v417_v50 = vadd.f32 %v416_v32, %v415_v36  ;;  %v432_v32 = vsel %vm284_vm1, %v2579_v25, 0.0  ;;  %v777_v36 = vsel %vm284_vm1, %v600_v59, 0.0  ;;  %v610_v15 = vmul.f32 %v2565_v58, %v2565_v58 }
  0xb6   :  { %v766_v10 = vadd.f32 %v765_v30, %v764_v37  ;;  %v2582_v37 = vld [vmem:[#allocation25_spill] sm:$0xff]  ;;  %v611_v3 = vmul.f32 %v2566_v4, %v2566_v4  ;;  %v612_v58 = vmul.f32 %v2567_v19, %v2567_v19  ;;  %v613_v4 = vmul.f32 %v2568_v27, %v2568_v27 }
  0xb7   :  { %v419_v23 = vadd.f32 %v418_v33, %v417_v50  ;;  %v434_v33 = vsel %vm284_vm1, %v2580_v11, 0.0  ;;  %v779_v50 = vsel %vm284_vm1, %v601_v63, 0.0  ;;  %v614_v19 = vmul.f32 %v2569_v26, %v2569_v26 }
  0xb8   :  { %v768_v44 = vadd.f32 %v767_v8, %v766_v10  ;;  %v2583_v10 = vld [vmem:[#allocation26_spill] sm:$0xff]  ;;  %v615_v27 = vmul.f32 %v2570_v29, %v2570_v29  ;;  %v616_v26 = vmul.f32 %v2571_v21, %v2571_v21  ;;  %v617_v29 = vmul.f32 %v2572_v16, %v2572_v16 }
  0xb9   :  { %v421_v55 = vadd.f32 %v420_v38, %v419_v23  ;;  %v436_v38 = vsel %vm284_vm1, %v2581_v45, 0.0  ;;  %v781_v23 = vsel %vm284_vm1, %v602_v0, 0.0  ;;  %v618_v21 = vmul.f32 %v2573_v13, %v2573_v13 }
  0xba   :  { %v770_v22 = vadd.f32 %v769_v18, %v768_v44  ;;  %v2584_v44 = vld [vmem:[#allocation27_spill] sm:$0xff]  ;;  %v619_v16 = vmul.f32 %v2574_v52, %v2574_v52  ;;  %v620_v13 = vmul.f32 %v2575_v9, %v2575_v9  ;;  %v621_v52 = vmul.f32 %v2576_v34, %v2576_v34 }
  0xbb   :  { %v423_v56 = vadd.f32 %v422_v39, %v421_v55  ;;  %v438_v39 = vsel %vm284_vm1, %v2582_v37, 0.0  ;;  %v622_v9 = vmul.f32 %v2577_v14, %v2577_v14  ;;  %v623_v34 = vmul.f32 %v2578_v51, %v2578_v51 }
  0xbc   :  { %v772_v47 = vadd.f32 %v771_v57, %v770_v22  ;;  %v787_v22 = vsel %vm284_vm1, %v605_v7, 0.0  ;;  %v2585_v57 = vld [vmem:[#allocation28_spill] sm:$0xff]  ;;  %v624_v14 = vmul.f32 %v2579_v25, %v2579_v25  ;;  %v625_v51 = vmul.f32 %v2580_v11, %v2580_v11 }
  0xbd   :  { %v425_v61 = vadd.f32 %v424_v40, %v423_v56  ;;  %v440_v40 = vsel %vm284_vm1, %v2583_v10, 0.0  ;;  %v626_v25 = vmul.f32 %v2581_v45, %v2581_v45  ;;  %v627_v11 = vmul.f32 %v2582_v37, %v2582_v37 }
  0xbe   :  { %v774_v48 = vadd.f32 %v773_v62, %v772_v47  ;;  %v789_v62 = vsel %vm284_vm1, %v606_v60, 0.0  ;;  %v628_v45 = vmul.f32 %v2583_v10, %v2583_v10  ;;  %v629_v37 = vmul.f32 %v2584_v44, %v2584_v44 }
  0xbf   :  { %v427_v17 = vadd.f32 %v426_v41, %v425_v61  ;;  %v442_v41 = vsel %vm284_vm1, %v2584_v44, 0.0  ;;  %v630_v10 = vmul.f32 %v2585_v57, %v2585_v57 }
  0xc0   :  { %v776_v49 = vadd.f32 %v775_v43, %v774_v48  ;;  %v791_v43 = vsel %vm284_vm1, %v607_v28, 0.0 }
  0xc1   :  { %v429_v35 = vadd.f32 %v428_v46, %v427_v17  ;;  %v444_v46 = vsel %vm284_vm1, %v2585_v57, 0.0 }
  0xc2   :  { %v778_v54 = vadd.f32 %v777_v36, %v776_v49  ;;  %v793_v36 = vsel %vm284_vm1, %v608_v42, 0.0 }
  0xc3   :  { %v431_v5 = vadd.f32 %v430_v31, %v429_v35  ;;  %v2586_v31 = vld [vmem:[#allocation29_spill] sm:$0xff] }
  0xc4   :  { %v780_v8 = vadd.f32 %v779_v50, %v778_v54  ;;  %v446_v47 = vsel %vm284_vm1, %v2586_v31, 0.0  ;;  %v795_v50 = vsel %vm284_vm1, %v609_v20, 0.0  ;;  %v631_v44 = vmul.f32 %v2586_v31, %v2586_v31 }
  0xc5   :  { %v433_v2 = vadd.f32 %v432_v32, %v431_v5  ;;  %v2587_v32 = vld [vmem:[#allocation30_spill] sm:$0xff] }
  0xc6   :  { %v782_v18 = vadd.f32 %v781_v23, %v780_v8  ;;  %v448_v48 = vsel %vm284_vm1, %v2587_v32, 0.0  ;;  %v797_v23 = vsel %vm284_vm1, %v610_v15, 0.0  ;;  %v632_v57 = vmul.f32 %v2587_v32, %v2587_v32 }
  0xc7   :  { %v435_v30 = vadd.f32 %v434_v33, %v433_v2  ;;  %v2588_v33 = vld [vmem:[#allocation31_spill] sm:$0xff] }
  0xc8   :  { %v784_v61 = vadd.f32 %v783_v53, %v782_v18  ;;  %v450_v49 = vsel %vm284_vm1, %v2588_v33, 0.0  ;;  %v799_v53 = vsel %vm284_vm1, %v611_v3, 0.0  ;;  %v633_v31 = vmul.f32 %v2588_v33, %v2588_v33 }
  0xc9   :  { %v437_v55 = vadd.f32 %v436_v38, %v435_v30  ;;  %v2589_v38 = vld [vmem:[#allocation32_spill] sm:$0xff] }
  0xca   :  { %v786_v17 = vadd.f32 %v785_v12, %v784_v61  ;;  %v452_v54 = vsel %vm284_vm1, %v2589_v38, 0.0  ;;  %v801_v12 = vsel %vm284_vm1, %v612_v58, 0.0  ;;  %v634_v32 = vmul.f32 %v2589_v38, %v2589_v38 }
  0xcb   :  { %v439_v56 = vadd.f32 %v438_v39, %v437_v55  ;;  %v2590_v39 = vld [vmem:[#allocation33_spill] sm:$0xff] }
  0xcc   :  { %v788_v35 = vadd.f32 %v787_v22, %v786_v17  ;;  %v454_v8 = vsel %vm284_vm1, %v2590_v39, 0.0  ;;  %v803_v22 = vsel %vm284_vm1, %v613_v4, 0.0  ;;  %v635_v33 = vmul.f32 %v2590_v39, %v2590_v39 }
  0xcd   :  { %v441_v24 = vadd.f32 %v440_v40, %v439_v56  ;;  %v2591_v40 = vld [vmem:[#allocation34_spill] sm:$0xff] }
  0xce   :  { %v790_v5 = vadd.f32 %v789_v62, %v788_v35  ;;  %v456_v18 = vsel %vm284_vm1, %v2591_v40, 0.0  ;;  %v805_v62 = vsel %vm284_vm1, %v614_v19, 0.0  ;;  %v636_v38 = vmul.f32 %v2591_v40, %v2591_v40 }
  0xcf   :  { %v443_v59 = vadd.f32 %v442_v41, %v441_v24  ;;  %v2592_v41 = vld [vmem:[#allocation35_spill] sm:$0xff] }
  0xd0   :  { %v792_v2 = vadd.f32 %v791_v43, %v790_v5  ;;  %v458_v61 = vsel %vm284_vm1, %v2592_v41, 0.0  ;;  %v807_v43 = vsel %vm284_vm1, %v615_v27, 0.0  ;;  %v637_v39 = vmul.f32 %v2592_v41, %v2592_v41 }
  0xd1   :  { %v445_v63 = vadd.f32 %v444_v46, %v443_v59  ;;  %v2593_v46 = vld [vmem:[#allocation36_spill] sm:$0xff] }
  0xd2   :  { %v794_v30 = vadd.f32 %v793_v36, %v792_v2  ;;  %v460_v17 = vsel %vm284_vm1, %v2593_v46, 0.0  ;;  %v809_v36 = vsel %vm284_vm1, %v616_v26, 0.0  ;;  %v638_v40 = vmul.f32 %v2593_v46, %v2593_v46 }
  0xd3   :  { %v447_v0 = vadd.f32 %v446_v47, %v445_v63  ;;  %v2594_v47 = vld [vmem:[#allocation37_spill] sm:$0xff] }
  0xd4   :  { %v796_v55 = vadd.f32 %v795_v50, %v794_v30  ;;  %v462_v35 = vsel %vm284_vm1, %v2594_v47, 0.0  ;;  %v811_v50 = vsel %vm284_vm1, %v617_v29, 0.0  ;;  %v639_v41 = vmul.f32 %v2594_v47, %v2594_v47 }
  0xd5   :  { %v449_v1 = vadd.f32 %v448_v48, %v447_v0  ;;  %v2595_v48 = vld [vmem:[#allocation38_spill] sm:$0xff] }
  0xd6   :  { %v798_v56 = vadd.f32 %v797_v23, %v796_v55  ;;  %v464_v5 = vsel %vm284_vm1, %v2595_v48, 0.0  ;;  %v813_v23 = vsel %vm284_vm1, %v618_v21, 0.0  ;;  %v640_v46 = vmul.f32 %v2595_v48, %v2595_v48 }
  0xd7   :  { %v451_v6 = vadd.f32 %v450_v49, %v449_v1  ;;  %v2596_v49 = vld [vmem:[#allocation39_spill] sm:$0xff] }
  0xd8   :  { %v800_v24 = vadd.f32 %v799_v53, %v798_v56  ;;  %v466_v2 = vsel %vm284_vm1, %v2596_v49, 0.0  ;;  %v815_v53 = vsel %vm284_vm1, %v619_v16, 0.0  ;;  %v641_v47 = vmul.f32 %v2596_v49, %v2596_v49 }
  0xd9   :  { %v453_v7 = vadd.f32 %v452_v54, %v451_v6  ;;  %v2597_v54 = vld [vmem:[#allocation40_spill] sm:$0xff] }
  0xda   :  { %v802_v59 = vadd.f32 %v801_v12, %v800_v24  ;;  %v468_v30 = vsel %vm284_vm1, %v2597_v54, 0.0  ;;  %v817_v12 = vsel %vm284_vm1, %v620_v13, 0.0  ;;  %v642_v48 = vmul.f32 %v2597_v54, %v2597_v54 }
  0xdb   :  { %v455_v60 = vadd.f32 %v454_v8, %v453_v7  ;;  %v2598_v8 = vld [vmem:[#allocation41_spill] sm:$0xff] }
  0xdc   :  { %v804_v63 = vadd.f32 %v803_v22, %v802_v59  ;;  %v470_v55 = vsel %vm284_vm1, %v2598_v8, 0.0  ;;  %v819_v22 = vsel %vm284_vm1, %v621_v52, 0.0  ;;  %v643_v49 = vmul.f32 %v2598_v8, %v2598_v8 }
  0xdd   :  { %v457_v28 = vadd.f32 %v456_v18, %v455_v60  ;;  %v2599_v18 = vld [vmem:[#allocation42_spill] sm:$0xff] }
  0xde   :  { %v806_v0 = vadd.f32 %v805_v62, %v804_v63  ;;  %v472_v56 = vsel %vm284_vm1, %v2599_v18, 0.0  ;;  %v821_v62 = vsel %vm284_vm1, %v622_v9, 0.0  ;;  %v644_v54 = vmul.f32 %v2599_v18, %v2599_v18 }
  0xdf   :  { %v459_v42 = vadd.f32 %v458_v61, %v457_v28  ;;  %v2600_v61 = vld [vmem:[#allocation43_spill] sm:$0xff] }
  0xe0   :  { %v808_v1 = vadd.f32 %v807_v43, %v806_v0  ;;  %v474_v24 = vsel %vm284_vm1, %v2600_v61, 0.0  ;;  %v823_v43 = vsel %vm284_vm1, %v623_v34, 0.0  ;;  %v645_v8 = vmul.f32 %v2600_v61, %v2600_v61 }
  0xe1   :  { %v461_v20 = vadd.f32 %v460_v17, %v459_v42  ;;  %v2601_v17 = vld [vmem:[#allocation44_spill] sm:$0xff] }
  0xe2   :  { %v810_v6 = vadd.f32 %v809_v36, %v808_v1  ;;  %v476_v59 = vsel %vm284_vm1, %v2601_v17, 0.0  ;;  %v825_v36 = vsel %vm284_vm1, %v624_v14, 0.0  ;;  %v646_v18 = vmul.f32 %v2601_v17, %v2601_v17 }
  0xe3   :  { %v463_v15 = vadd.f32 %v462_v35, %v461_v20  ;;  %v2602_v35 = vld [vmem:[#allocation45_spill] sm:$0xff] }
  0xe4   :  { %v812_v7 = vadd.f32 %v811_v50, %v810_v6  ;;  %v478_v63 = vsel %vm284_vm1, %v2602_v35, 0.0  ;;  %v827_v50 = vsel %vm284_vm1, %v625_v51, 0.0  ;;  %v647_v61 = vmul.f32 %v2602_v35, %v2602_v35 }
  0xe5   :  { %v465_v3 = vadd.f32 %v464_v5, %v463_v15  ;;  %v2603_v5 = vld [vmem:[#allocation46_spill] sm:$0xff] }
  0xe6   :  { %v814_v60 = vadd.f32 %v813_v23, %v812_v7  ;;  %v480_v0 = vsel %vm284_vm1, %v2603_v5, 0.0  ;;  %v829_v23 = vsel %vm284_vm1, %v626_v25, 0.0  ;;  %v648_v17 = vmul.f32 %v2603_v5, %v2603_v5 }
  0xe7   :  { %v467_v58 = vadd.f32 %v466_v2, %v465_v3  ;;  %v2604_v2 = vld [vmem:[#allocation47_spill] sm:$0xff] }
  0xe8   :  { %v816_v28 = vadd.f32 %v815_v53, %v814_v60  ;;  %v482_v1 = vsel %vm284_vm1, %v2604_v2, 0.0  ;;  %v831_v53 = vsel %vm284_vm1, %v627_v11, 0.0  ;;  %v649_v35 = vmul.f32 %v2604_v2, %v2604_v2 }
  0xe9   :  { %v469_v4 = vadd.f32 %v468_v30, %v467_v58  ;;  %v2605_v30 = vld [vmem:[#allocation48_spill] sm:$0xff] }
  0xea   :  { %v818_v42 = vadd.f32 %v817_v12, %v816_v28  ;;  %v484_v6 = vsel %vm284_vm1, %v2605_v30, 0.0  ;;  %v833_v12 = vsel %vm284_vm1, %v628_v45, 0.0  ;;  %v650_v5 = vmul.f32 %v2605_v30, %v2605_v30 }
  0xeb   :  { %v471_v19 = vadd.f32 %v470_v55, %v469_v4  ;;  %v2606_v55 = vld [vmem:[#allocation49_spill] sm:$0xff] }
  0xec   :  { %v820_v20 = vadd.f32 %v819_v22, %v818_v42  ;;  %v486_v7 = vsel %vm284_vm1, %v2606_v55, 0.0  ;;  %v835_v22 = vsel %vm284_vm1, %v629_v37, 0.0  ;;  %v651_v2 = vmul.f32 %v2606_v55, %v2606_v55 }
  0xed   :  { %v473_v27 = vadd.f32 %v472_v56, %v471_v19  ;;  %v2607_v56 = vld [vmem:[#allocation50_spill] sm:$0xff] }
  0xee   :  { %v822_v15 = vadd.f32 %v821_v62, %v820_v20  ;;  %v488_v60 = vsel %vm284_vm1, %v2607_v56, 0.0  ;;  %v837_v62 = vsel %vm284_vm1, %v630_v10, 0.0  ;;  %v652_v30 = vmul.f32 %v2607_v56, %v2607_v56 }
  0xef   :  { %v475_v26 = vadd.f32 %v474_v24, %v473_v27  ;;  %v2608_v24 = vld [vmem:[#allocation51_spill] sm:$0xff] }
  0xf0   :  { %v824_v3 = vadd.f32 %v823_v43, %v822_v15  ;;  %v490_v28 = vsel %vm284_vm1, %v2608_v24, 0.0  ;;  %v839_v43 = vsel %vm284_vm1, %v631_v44, 0.0  ;;  %v653_v55 = vmul.f32 %v2608_v24, %v2608_v24 }
  0xf1   :  { %v477_v29 = vadd.f32 %v476_v59, %v475_v26  ;;  %v2609_v59 = vld [vmem:[#allocation52_spill] sm:$0xff] }
  0xf2   :  { %v826_v58 = vadd.f32 %v825_v36, %v824_v3  ;;  %v492_v42 = vsel %vm284_vm1, %v2609_v59, 0.0  ;;  %v841_v36 = vsel %vm284_vm1, %v632_v57, 0.0  ;;  %v654_v56 = vmul.f32 %v2609_v59, %v2609_v59 }
  0xf3   :  { %v479_v21 = vadd.f32 %v478_v63, %v477_v29  ;;  %v2610_v63 = vld [vmem:[#allocation53_spill] sm:$0xff] }
  0xf4   :  { %v828_v4 = vadd.f32 %v827_v50, %v826_v58  ;;  %v494_v20 = vsel %vm284_vm1, %v2610_v63, 0.0  ;;  %v843_v50 = vsel %vm284_vm1, %v633_v31, 0.0  ;;  %v655_v24 = vmul.f32 %v2610_v63, %v2610_v63 }
  0xf5   :  { %v481_v16 = vadd.f32 %v480_v0, %v479_v21  ;;  %v2611_v0 = vld [vmem:[#allocation54_spill] sm:$0xff] }
  0xf6   :  { %v830_v19 = vadd.f32 %v829_v23, %v828_v4  ;;  %v496_v15 = vsel %vm284_vm1, %v2611_v0, 0.0  ;;  %v845_v23 = vsel %vm284_vm1, %v634_v32, 0.0 }
  0xf7   :  { %v483_v13 = vadd.f32 %v482_v1, %v481_v16  ;;  %v2612_v1 = vld [vmem:[#allocation55_spill] sm:$0xff] }
  0xf8   :  { %v832_v27 = vadd.f32 %v831_v53, %v830_v19  ;;  %v498_v3 = vsel %vm284_vm1, %v2612_v1, 0.0  ;;  %v847_v53 = vsel %vm284_vm1, %v635_v33, 0.0 }
  0xf9   :  { %v485_v52 = vadd.f32 %v484_v6, %v483_v13  ;;  %v2613_v6 = vld [vmem:[#allocation56_spill] sm:$0xff] }
  0xfa   :  { %v834_v26 = vadd.f32 %v833_v12, %v832_v27  ;;  %v500_v58 = vsel %vm284_vm1, %v2613_v6, 0.0  ;;  %v849_v12 = vsel %vm284_vm1, %v636_v38, 0.0  ;;  %v658_v63 = vmul.f32 %v2613_v6, %v2613_v6 }
  0xfb   :  { %v487_v9 = vadd.f32 %v486_v7, %v485_v52  ;;  %v2614_v7 = vld [vmem:[#allocation57_spill] sm:$0xff] }
  0xfc   :  { %v836_v29 = vadd.f32 %v835_v22, %v834_v26  ;;  %v502_v4 = vsel %vm284_vm1, %v2614_v7, 0.0  ;;  %v851_v22 = vsel %vm284_vm1, %v637_v39, 0.0 }
  0xfd   :  { %v489_v34 = vadd.f32 %v488_v60, %v487_v9  ;;  %v2615_v60 = vld [vmem:[#allocation58_spill] sm:$0xff] }
  0xfe   :  { %v838_v21 = vadd.f32 %v837_v62, %v836_v29  ;;  %v504_v19 = vsel %vm284_vm1, %v2615_v60, 0.0  ;;  %v853_v62 = vsel %vm284_vm1, %v638_v40, 0.0 }
  0xff   :  { %v491_v14 = vadd.f32 %v490_v28, %v489_v34  ;;  %v2616_v28 = vld [vmem:[#allocation59_spill] sm:$0xff] }
 0x100   :  { %v840_v16 = vadd.f32 %v839_v43, %v838_v21  ;;  %v506_v27 = vsel %vm284_vm1, %v2616_v28, 0.0  ;;  %v855_v43 = vsel %vm284_vm1, %v639_v41, 0.0  ;;  %v661_v6 = vmul.f32 %v2616_v28, %v2616_v28 }
 0x101   :  { %v493_v51 = vadd.f32 %v492_v42, %v491_v14  ;;  %v2617_v42 = vld [vmem:[#allocation60_spill] sm:$0xff] }
 0x102   :  { %v842_v13 = vadd.f32 %v841_v36, %v840_v16  ;;  %v508_v26 = vsel %vm284_vm1, %v2617_v42, 0.0  ;;  %v857_v36 = vsel %vm284_vm1, %v640_v46, 0.0  ;;  %v899_v28 = vsel %vm284_vm1, %v661_v6, 0.0 }
 0x103   :  { %v495_v25 = vadd.f32 %v494_v20, %v493_v51  ;;  %v2618_v20 = vld [vmem:[#allocation61_spill] sm:$0xff] }
 0x104   :  { %v844_v52 = vadd.f32 %v843_v50, %v842_v13  ;;  %v510_v29 = vsel %vm284_vm1, %v2618_v20, 0.0  ;;  %v859_v50 = vsel %vm284_vm1, %v641_v47, 0.0 }
 0x105   :  { %v497_v11 = vadd.f32 %v496_v15, %v495_v25  ;;  %v2619_v15 = vld [vmem:[#allocation62_spill] sm:$0xff] }
 0x106   :  { %v846_v9 = vadd.f32 %v845_v23, %v844_v52  ;;  %v512_v21 = vsel %vm284_vm1, %v2619_v15, 0.0  ;;  %v861_v23 = vsel %vm284_vm1, %v642_v48, 0.0 }
 0x107   :  { %v499_v45 = vadd.f32 %v498_v3, %v497_v11  ;;  %v2620_v3 = vld [vmem:[#allocation63_spill] sm:$0xff] }
 0x108   :  { %v848_v34 = vadd.f32 %v847_v53, %v846_v9  ;;  %v514_v16 = vsel %vm284_vm1, %v2620_v3, 0.0  ;;  %v863_v53 = vsel %vm284_vm1, %v643_v49, 0.0 }
 0x109   :  { %v501_v37 = vadd.f32 %v500_v58, %v499_v45  ;;  %v2621_v58 = vld [vmem:[#allocation64_spill] sm:$0xff] }
 0x10a   :  { %v850_v14 = vadd.f32 %v849_v12, %v848_v34  ;;  %v516_v13 = vsel %vm284_vm1, %v2621_v58, 0.0  ;;  %v865_v12 = vsel %vm284_vm1, %v644_v54, 0.0 }
 0x10b   :  { %v503_v10 = vadd.f32 %v502_v4, %v501_v37  ;;  %v2622_v4 = vld [vmem:[#allocation65_spill] sm:$0xff] }
 0x10c   :  { %v852_v51 = vadd.f32 %v851_v22, %v850_v14  ;;  %v518_v52 = vsel %vm284_vm1, %v2622_v4, 0.0  ;;  %v867_v22 = vsel %vm284_vm1, %v645_v8, 0.0 }
 0x10d   :  { %v505_v44 = vadd.f32 %v504_v19, %v503_v10  ;;  %v2623_v19 = vld [vmem:[#allocation66_spill] sm:$0xff] }
 0x10e   :  { %v854_v25 = vadd.f32 %v853_v62, %v852_v51  ;;  %v520_v9 = vsel %vm284_vm1, %v2623_v19, 0.0  ;;  %v869_v62 = vsel %vm284_vm1, %v646_v18, 0.0 }
 0x10f   :  { %v507_v57 = vadd.f32 %v506_v27, %v505_v44  ;;  %v2624_v27 = vld [vmem:[#allocation67_spill] sm:$0xff] }
 0x110   :  { %v856_v11 = vadd.f32 %v855_v43, %v854_v25  ;;  %v522_v34 = vsel %vm284_vm1, %v2624_v27, 0.0  ;;  %v871_v43 = vsel %vm284_vm1, %v647_v61, 0.0 }
 0x111   :  { %v509_v31 = vadd.f32 %v508_v26, %v507_v57  ;;  %v2625_v26 = vld [vmem:[#allocation68_spill] sm:$0xff] }
 0x112   :  { %v858_v45 = vadd.f32 %v857_v36, %v856_v11  ;;  %v524_v14 = vsel %vm284_vm1, %v2625_v26, 0.0  ;;  %v873_v36 = vsel %vm284_vm1, %v648_v17, 0.0  ;;  %v885_v17 = vsel %vm284_vm1, %v654_v56, 0.0 }
 0x113   :  { %v511_v32 = vadd.f32 %v510_v29, %v509_v31  ;;  %v2626_v29 = vld [vmem:[#allocation69_spill] sm:$0xff]  ;;  %v667_v56 = vmul.f32 %v2622_v4, %v2622_v4 }
 0x114   :  { %v860_v37 = vadd.f32 %v859_v50, %v858_v45  ;;  %v526_v51 = vsel %vm284_vm1, %v2626_v29, 0.0  ;;  %v875_v50 = vsel %vm284_vm1, %v649_v35, 0.0 }
 0x115   :  { %v513_v33 = vadd.f32 %v512_v21, %v511_v32  ;;  %v2627_v21 = vld [vmem:[#allocation70_spill] sm:$0xff] }
 0x116   :  { %v862_v10 = vadd.f32 %v861_v23, %v860_v37  ;;  %v528_v25 = vsel %vm284_vm1, %v2627_v21, 0.0  ;;  %v877_v23 = vsel %vm284_vm1, %v650_v5, 0.0 }
 0x117   :  { %v515_v38 = vadd.f32 %v514_v16, %v513_v33  ;;  %v2628_v16 = vld [vmem:[#allocation71_spill] sm:$0xff] }
 0x118   :  { %v864_v44 = vadd.f32 %v863_v53, %v862_v10  ;;  %v530_v11 = vsel %vm284_vm1, %v2628_v16, 0.0  ;;  %v879_v53 = vsel %vm284_vm1, %v651_v2, 0.0 }
 0x119   :  { %v517_v39 = vadd.f32 %v516_v13, %v515_v38  ;;  %v2629_v13 = vld [vmem:[#allocation72_spill] sm:$0xff] }
 0x11a   :  { %v866_v57 = vadd.f32 %v865_v12, %v864_v44  ;;  %v532_v45 = vsel %vm284_vm1, %v2629_v13, 0.0  ;;  %v881_v12 = vsel %vm284_vm1, %v652_v30, 0.0 }
 0x11b   :  { %v519_v40 = vadd.f32 %v518_v52, %v517_v39  ;;  %v2630_v52 = vld [vmem:[#allocation73_spill] sm:$0xff] }
 0x11c   :  { %v868_v31 = vadd.f32 %v867_v22, %v866_v57  ;;  %v534_v37 = vsel %vm284_vm1, %v2630_v52, 0.0  ;;  %v883_v22 = vsel %vm284_vm1, %v653_v55, 0.0  ;;  %v665_v55 = vmul.f32 %v2620_v3, %v2620_v3 }
 0x11d   :  { %v521_v41 = vadd.f32 %v520_v9, %v519_v40  ;;  %v2631_v9 = vld [vmem:[#allocation74_spill] sm:$0xff] }
 0x11e   :  { %v870_v32 = vadd.f32 %v869_v62, %v868_v31  ;;  %v536_v10 = vsel %vm284_vm1, %v2631_v9, 0.0  ;;  %v887_v31 = vsel %vm284_vm1, %v655_v24, 0.0 }
 0x11f   :  { %v523_v46 = vadd.f32 %v522_v34, %v521_v41  ;;  %v2632_v34 = vld [vmem:[#allocation75_spill] sm:$0xff] }
 0x120   :  { %v872_v33 = vadd.f32 %v871_v43, %v870_v32  ;;  %v538_v44 = vsel %vm284_vm1, %v2632_v34, 0.0 }
 0x121   :  { %v525_v47 = vadd.f32 %v524_v14, %v523_v46  ;;  %v656_v46 = vmul.f32 %v2611_v0, %v2611_v0  ;;  %v659_v0 = vmul.f32 %v2614_v7, %v2614_v7  ;;  %v283_v7 = vld [vmem:[%s2407_s2] sm:$0x1] }
 0x122   :  { %v874_v38 = vadd.f32 %v873_v36, %v872_v33 }
 0x123   :  { %v527_v48 = vadd.f32 %v526_v51, %v525_v47  ;;  %v657_v51 = vmul.f32 %v2612_v1, %v2612_v1  ;;  %v889_v43 = vsel %vm284_vm1, %v656_v46, 0.0  ;;  %v660_v1 = vmul.f32 %v2615_v60, %v2615_v60 }
 0x124   :  { %v876_v39 = vadd.f32 %v875_v50, %v874_v38  ;;  %v895_v2 = vsel %vm284_vm1, %v659_v0, 0.0  ;;  %v662_v38 = vmul.f32 %v2617_v42, %v2617_v42 }
 0x125   :  { %v529_v49 = vadd.f32 %v528_v25, %v527_v48  ;;  %v891_v48 = vsel %vm284_vm1, %v657_v51, 0.0  ;;  %v897_v60 = vsel %vm284_vm1, %v660_v1, 0.0 }
 0x126   :  { %v878_v40 = vadd.f32 %v877_v23, %v876_v39  ;;  %v663_v23 = vmul.f32 %v2618_v20, %v2618_v20  ;;  %v664_v39 = vmul.f32 %v2619_v15, %v2619_v15  ;;  %v901_v42 = vsel %vm284_vm1, %v662_v38, 0.0 }
 0x127   :  { %v531_v54 = vadd.f32 %v530_v11, %v529_v49  ;;  %v893_v11 = vsel %vm284_vm1, %v658_v63, 0.0  ;;  %v907_v15 = vsel %vm284_vm1, %v665_v55, 0.0 }
 0x128   :  { %v880_v41 = vadd.f32 %v879_v53, %v878_v40  ;;  %v903_v53 = vsel %vm284_vm1, %v663_v23, 0.0  ;;  %v905_v40 = vsel %vm284_vm1, %v664_v39, 0.0 }
 0x129   :  { %v533_v8 = vadd.f32 %v532_v45, %v531_v54 }
 0x12a   :  { %v882_v14 = vadd.f32 %v881_v12, %v880_v41 }
 0x12b   :  { %v535_v18 = vadd.f32 %v534_v37, %v533_v8 }
 0x12c   :  { %v884_v59 = vadd.f32 %v883_v22, %v882_v14  ;;  %v670_v22 = vmul.f32 %v2625_v26, %v2625_v26 }
 0x12d   :  { %v537_v61 = vadd.f32 %v536_v10, %v535_v18  ;;  %v666_v10 = vmul.f32 %v2621_v58, %v2621_v58  ;;  %v911_v58 = vsel %vm284_vm1, %v667_v56, 0.0 }
 0x12e   :  { %v886_v47 = vadd.f32 %v885_v17, %v884_v59  ;;  %v672_v17 = vmul.f32 %v2627_v21, %v2627_v21 }
 0x12f   :  { %v539_v57 = vadd.f32 %v538_v44, %v537_v61  ;;  %v668_v44 = vmul.f32 %v2623_v19, %v2623_v19  ;;  %v909_v3 = vsel %vm284_vm1, %v666_v10, 0.0  ;;  %v669_v61 = vmul.f32 %v2624_v27, %v2624_v27 }
 0x130   :  { %v888_v25 = vadd.f32 %v887_v31, %v886_v47  ;;  %v917_v27 = vsel %vm284_vm1, %v670_v22, 0.0  ;;  %v674_v31 = vmul.f32 %v2629_v13, %v2629_v13 }
 0x131   :  { %v540_v62 = vrot.slane %v539_v57, 4  ;;  %v913_v4 = vsel %vm284_vm1, %v668_v44, 0.0  ;;  %v915_v19 = vsel %vm284_vm1, %v669_v61, 0.0 }
 0x132   :  { %v890_v5 = vadd.f32 %v889_v43, %v888_v25  ;;  %v676_v43 = vmul.f32 %v2631_v9, %v2631_v9 }
 0x133   :  { %v541_v35 = vadd.f32 %v540_v62, %v539_v57  ;;  %v671_v57 = vmul.f32 %v2626_v29, %v2626_v29  ;;  %v673_v62 = vmul.f32 %v2628_v16, %v2628_v16  ;;  %v921_v29 = vsel %vm284_vm1, %v672_v17, 0.0 }
 0x134   :  { %v892_v33 = vadd.f32 %v891_v48, %v890_v5  ;;  %v925_v16 = vsel %vm284_vm1, %v674_v31, 0.0  ;;  %v929_v48 = vsel %vm284_vm1, %v676_v43, 0.0 }
 0x135   :  { %v542_v32 = vrot.slane %v541_v35, 2  ;;  %v919_v26 = vsel %vm284_vm1, %v671_v57, 0.0  ;;  %v923_v21 = vsel %vm284_vm1, %v673_v62, 0.0 }
 0x136   :  { %v894_v50 = vadd.f32 %v893_v11, %v892_v33 }
 0x137   :  { %v543_v36 = vadd.f32 %v542_v32, %v541_v35  ;;  %v675_v35 = vmul.f32 %v2630_v52, %v2630_v52  ;;  %v677_v32 = vmul.f32 %v2632_v34, %v2632_v34 }
 0x138   :  { %v896_v54 = vadd.f32 %v895_v2, %v894_v50  ;;  %v549_v2 = vld [vmem:[%s2408_s3] sm:$0x1] }
 0x139   :  { %v544_v49 = vrot.slane %v543_v36, 1  ;;  %v927_v13 = vsel %vm284_vm1, %v675_v35, 0.0  ;;  %v931_v52 = vsel %vm284_vm1, %v677_v32, 0.0 }
 0x13a   :  { %v898_v37 = vadd.f32 %v897_v60, %v896_v54 }
 0x13b   :  { %v545_v45 = vadd.f32 %v544_v49, %v543_v36 }
 0x13c   :  { %v900_v8 = vadd.f32 %v899_v28, %v898_v37 }
 0x13d   :  { %v546_v30 = vadd.f32 %v545_v45, %v283_v7 }
 0x13e   :  { %v902_v20 = vadd.f32 %v901_v42, %v900_v8 }
 0x13f   :  { %548 = vst.msk [vmem:[%s2407_s2] sm:$0x1] %vm17_vm0, %v546_v30 }
 0x140   :  { %v904_v18 = vadd.f32 %v903_v53, %v902_v20 }
 0x142   :  { %v906_v12 = vadd.f32 %v905_v40, %v904_v18 }
 0x144   :  { %v908_v41 = vadd.f32 %v907_v15, %v906_v12 }
 0x146   :  { %v910_v24 = vadd.f32 %v909_v3, %v908_v41 }
 0x148   :  { %v912_v14 = vadd.f32 %v911_v58, %v910_v24 }
 0x14a   :  { %v914_v46 = vadd.f32 %v913_v4, %v912_v14 }
 0x14c   :  { %v916_v59 = vadd.f32 %v915_v19, %v914_v46 }
 0x14e   :  { %v918_v51 = vadd.f32 %v917_v27, %v916_v59 }
 0x150   :  { %v920_v47 = vadd.f32 %v919_v26, %v918_v51 }
 0x152   :  { %v922_v63 = vadd.f32 %v921_v29, %v920_v47 }
 0x154   :  { %v924_v25 = vadd.f32 %v923_v21, %v922_v63 }
 0x156   :  { %v926_v0 = vadd.f32 %v925_v16, %v924_v25 }
 0x158   :  { %v928_v5 = vadd.f32 %v927_v13, %v926_v0 }
 0x15a   :  { %v930_v36 = vadd.f32 %v929_v48, %v928_v5 }
 0x15c   :  { %v932_v1 = vadd.f32 %v931_v52, %v930_v36 }
 0x15e   :  { %v933_v11 = vrot.slane %v932_v1, 4 }
 0x160   :  { %v934_v33 = vadd.f32 %v933_v11, %v932_v1 }
 0x162   :  { %v935_v49 = vrot.slane %v934_v33, 2 }
 0x164   :  { %v936_v9 = vadd.f32 %v935_v49, %v934_v33 }
 0x166   :  { %v937_v6 = vrot.slane %v936_v9, 1 }
 0x168   :  { %v938_v34 = vadd.f32 %v937_v6, %v936_v9 }
 0x16a   :  { %v939_v7 = vadd.f32 %v938_v34, %v549_v2 }
 0x16c   :  { %940 = vst.msk [vmem:[%s2408_s3] sm:$0x1] %vm17_vm0, %v939_v7 }

// kernel: bnhn_conv3d_transpose.5
= control target key start
LH: loop header
LB: loop body
LE: loop exit
PB: predicated region body
PF: predicated region fallthrough
CT: control target
= control target key end

     0   :  { %s5491_s14 = smov 0   ;;  %s5493_s15 = smov 0   ;;  %s8580_s0 = inlined_call_operand.<no memory space> [shape: f32[1], index: 0, kind: input, shape index: {}]   ;;  %s8581_s1 = inlined_call_operand.vmem [shape: f32[2,8,2432], index: 1, kind: input, shape index: {}]   ;;  %s8582_s2 = inlined_call_operand.vmem [shape: f32[32,216], index: 2, kind: input, shape index: {}]   ;;  %s8583_s3 = inlined_call_operand.vmem [shape: f32[2,8,2048], index: 3, kind: output, shape index: {}]  }
   0x1   :  { %8 = sst [smem:[#allocation6]] %s8580_s0  ;;  %s5495_s16 = smov 0  }
   0x2 LB: > { %s26_s0 = sadd.s32 1, %s5436_s15  ;;  %p3854_p0 = scmp.ge.s32.totalorder %s5440_s16, 1  ;;  %s5440_s16 = sphi %s5495_s16, %s14_s16   ;;  %s5436_s15 = sphi %s5493_s15, %s9225_s15   ;;  %s5432_s14 = sphi %s5491_s14, %s9224_s14  }
   0x3   : > { %p28_p1 = scmp.ge.s32.totalorder %s26_s0, 2  ;;  %p118_p2 = scmp.lt.s32.totalorder %s5440_s16, 3 }
   0x5   : > { %s9227_s0 = smov (%p28_p1, %s26_s0), 0  ;;  %p119_p3 = pnand %p3854_p0, %p118_p2 }
   0x7   : > { %122 = sbr.rel (%p119_p3) target bundleno = 951 (0x3b7), region = 28 }
   0xe   : > { %p140_p4 = scmp.lt.s32.totalorder %s5432_s14, 1  ;;  %s3918_s17 = smul.u32 152, %s5432_s14 }
  0x10   : > { %s9229_s14 = smov (!%p140_p4, %s5432_s14), 1  ;;  %s171_s20 = scalar_lea.vmem %s8581_s1, %s3918_s17 }
  0x11   : > { %s3917_s21 = sshll.u32 %s9229_s14, 7  ;;  %v5512_v0 = vld [vmem:[%s171_s20] sm:$0xff]  ;;  %v5514_v1 = vld [vmem:[%s171_s20 + $0x8] sm:$0xff]  ;;  %v5516_v2 = vld [vmem:[%s171_s20 + $0x10] sm:$0xff] }
  0x12   : > { %s5521_s24 = scalar_lea.vmem %s8583_s3, %s3917_s21  ;;  %v5523_v3 = vld [vmem:[%s171_s20 + $0x18] sm:$0xff]  ;;  %v5525_v4 = vld [vmem:[%s171_s20 + $0x20] sm:$0xff]  ;;  %v5527_v5 = vld [vmem:[%s171_s20 + $0x28] sm:$0xff] }
  0x13   : > { %v5529_v6 = vld [vmem:[%s171_s20 + $0x30] sm:$0xff]  ;;  %v5531_v7 = vld [vmem:[%s171_s20 + $0x38] sm:$0xff]  ;;  %v5533_v8 = vld [vmem:[%s171_s20 + $0x40] sm:$0xff] }
  0x14   : > { %8770 = vst [vmem:[#allocation10_spill] sm:$0xff] %v5533_v8  ;;  %v5535_v9 = vld [vmem:[%s171_s20 + $0x48] sm:$0xff]  ;;  %v5537_v10 = vld [vmem:[%s171_s20 + $0x50] sm:$0xff]  ;;  %v5539_v11 = vld [vmem:[%s171_s20 + $0x58] sm:$0xff] }
  0x15   : > { %8771 = vst [vmem:[#allocation11_spill] sm:$0xff] %v5535_v9  ;;  %8772 = vst [vmem:[#allocation12_spill] sm:$0xff] %v5537_v10  ;;  %v5541_v12 = vld [vmem:[%s171_s20 + $0x60] sm:$0xff]  ;;  %v5543_v13 = vld [vmem:[%s171_s20 + $0x68] sm:$0xff] }
  0x16   : > { %8773 = vst [vmem:[#allocation13_spill] sm:$0xff] %v5539_v11  ;;  %8774 = vst [vmem:[#allocation14_spill] sm:$0xff] %v5541_v12  ;;  %v5545_v14 = vld [vmem:[%s171_s20 + $0x70] sm:$0xff]  ;;  %v5547_v15 = vld [vmem:[%s171_s20 + $0x78] sm:$0xff] }
  0x17   : > { %8775 = vst [vmem:[#allocation15_spill] sm:$0xff] %v5543_v13  ;;  %8776 = vst [vmem:[#allocation16_spill] sm:$0xff] %v5545_v14  ;;  %v5549_v16 = vld [vmem:[%s171_s20 + $0x80] sm:$0xff]  ;;  %v5551_v17 = vld [vmem:[%s171_s20 + $0x88] sm:$0xff] }
  0x18   : > { %8777 = vst [vmem:[#allocation17_spill] sm:$0xff] %v5547_v15  ;;  %8778 = vst [vmem:[#allocation18_spill] sm:$0xff] %v5549_v16  ;;  %v5553_v18 = vld [vmem:[%s171_s20 + $0x90] sm:$0xff] }
  0x19   : > { %8779 = vst [vmem:[#allocation19_spill] sm:$0xff] %v5551_v17  ;;  %8780 = vst [vmem:[#allocation20_spill] sm:$0xff] %v5553_v18 }
  0x1a   : > { %253 = vsyncadd [#allocation5], 2432  ;;  %v5557_v19 = vpack.i.bf16 %v5527_v5, %v5525_v4  ;;  %v5561_v20 = vpack.i.bf16 %v5514_v1, %v5512_v0 }
  0x1b   : > { %5428 = dma.done.wait [#allocation5], 2432 }
  0x1c   : > { %5429 = vsyncadd [#allocation5], 4294964864  ;;  %s5442_s25 = smov 127   ;;  %v5567_v21 = vpack.i.bf16 %v5531_v7, %v5529_v6  ;;  %v5571_v22 = vpack.i.bf16 %v5523_v3, %v5516_v2  ;;  %v5577_v23 = vpack.i.bf16 %v5539_v11, %v5537_v10  ;;  %v5581_v24 = vpack.i.bf16 %v5535_v9, %v5533_v8  ;;  %s5443_s26 = smov 126  }
  0x1d   : > { %4398 = vrot.lane.b32.xlu1 %v5557_v19, %s5442_s25  ;;  %4388 = vrot.lane.b32.xlu0 %v5561_v20, %s5442_s25  ;;  %v5587_v25 = vpack.i.bf16 %v5547_v15, %v5545_v14  ;;  %v5591_v26 = vpack.i.bf16 %v5543_v13, %v5541_v12  ;;  %s5444_s27 = smov 116   ;;  %s5445_s28 = smov 115   ;;  %v8584_v27 = vlaneseq  ;;  %vm2576_vm8 = vcmask 719872  }
  0x1e   : > { %s5446_s29 = smov 114   ;;  %s5447_s30 = smov 104  }
  0x1f   : > { %s5448_s4 = smov 103   ;;  %v5646_v28 = vand.u32 127, %v8584_v27  ;;  %s5449_s5 = smov 102  }
  0x20   : > { %s5450_s6 = smov 112   ;;  %s5451_s7 = smov 111  }
  0x21   : > { %4403 = vrot.lane.b32.xlu1 %v5567_v21, %s5442_s25  ;;  %4393 = vrot.lane.b32.xlu0 %v5571_v22, %s5442_s25  ;;  %vm428_vm0 = vcmp.lt.s32.totalorder %v5646_v28, 127  ;;  %vm495_vm1 = vcmp.lt.s32.totalorder %v5646_v28, 126  ;;  %vm562_vm2 = vcmp.lt.s32.totalorder %v5646_v28, 116  ;;  %s5452_s8 = smov 110   ;;  %vm629_vm3 = vcmp.lt.s32.totalorder %v5646_v28, 115  ;;  %s5453_s9 = smov 100  }
  0x22   : > { %s5454_s10 = smov 99   ;;  %vm696_vm4 = vcmp.lt.s32.totalorder %v5646_v28, 114  ;;  %s5455_s11 = smov 98   ;;  %vm763_vm5 = vcmp.lt.s32.totalorder %v5646_v28, 104  ;;  %vm830_vm6 = vcmp.lt.s32.totalorder %v5646_v28, 103  ;;  %vm897_vm7 = vcmp.lt.s32.totalorder %v5646_v28, 102 }
  0x23   : > { %s5456_s12 = smov 88   ;;  %s5457_s13 = smov 87   ;;  %vm964_vm9 = vcmp.lt.s32.totalorder %v5646_v28, 112  ;;  %vm1031_vm10 = vcmp.lt.s32.totalorder %v5646_v28, 111  ;;  %vm1098_vm11 = vcmp.lt.s32.totalorder %v5646_v28, 110  ;;  %vm1165_vm12 = vcmp.lt.s32.totalorder %v5646_v28, 100 }
  0x24   : > { %s5458_s14 = smov 86   ;;  %s5459_s17 = smov 96   ;;  %vm1232_vm13 = vcmp.lt.s32.totalorder %v5646_v28, 99  ;;  %vm1299_vm14 = vcmp.lt.s32.totalorder %v5646_v28, 98  ;;  %vm1366_vm15 = vcmp.lt.s32.totalorder %v5646_v28, 88 }
  0x25   : > { %4413 = vrot.lane.b32.xlu1 %v5577_v23, %s5442_s25  ;;  %4408 = vrot.lane.b32.xlu0 %v5581_v24, %s5442_s25  ;;  %s5460_s18 = smov 95   ;;  %s5461_s19 = smov 94  }
  0x26   : > { %s5462_s20 = smov 84   ;;  %s5463_s21 = smov 83  }
  0x27   : > { %s5464_s22 = smov 82   ;;  %s5465_s23 = smov 72  }
  0x29   : > { %4423 = vrot.lane.b32.xlu1 %v5587_v25, %s5442_s25  ;;  %4418 = vrot.lane.b32.xlu0 %v5591_v26, %s5442_s25 }
  0x2d   : > { %4428 = vrot.lane.b32.xlu1 %v5561_v20, %s5443_s26  ;;  %424 = vrot.lane.b32.xlu0 %v5549_v16, %s5442_s25  ;;  %s5466_s25 = smov 71  }
  0x31   : > { %4438 = vrot.lane.b32.xlu1 %v5557_v19, %s5443_s26  ;;  %4433 = vrot.lane.b32.xlu0 %v5571_v22, %s5443_s26 }
  0x35   : > { %4448 = vrot.lane.b32.xlu1 %v5581_v24, %s5443_s26  ;;  %4443 = vrot.lane.b32.xlu0 %v5567_v21, %s5443_s26 }
  0x39   : > { %4458 = vrot.lane.b32.xlu1 %v5591_v26, %s5443_s26  ;;  %4453 = vrot.lane.b32.xlu0 %v5577_v23, %s5443_s26 }
  0x3d   : > { %493 = vrot.lane.b32.xlu1 %v5549_v16, %s5443_s26  ;;  %4463 = vrot.lane.b32.xlu0 %v5587_v25, %s5443_s26 }
  0x41   : > { %4473 = vrot.lane.b32.xlu1 %v5571_v22, %s5444_s27  ;;  %4468 = vrot.lane.b32.xlu0 %v5561_v20, %s5444_s27 }
  0x45   : > { %4483 = vrot.lane.b32.xlu1 %v5567_v21, %s5444_s27  ;;  %4478 = vrot.lane.b32.xlu0 %v5557_v19, %s5444_s27 }
  0x49   : > { %4493 = vrot.lane.b32.xlu1 %v5577_v23, %s5444_s27  ;;  %4488 = vrot.lane.b32.xlu0 %v5581_v24, %s5444_s27 }
  0x4d   : > { %4503 = vrot.lane.b32.xlu1 %v5587_v25, %s5444_s27  ;;  %4498 = vrot.lane.b32.xlu0 %v5591_v26, %s5444_s27 }
  0x51   : > { %4508 = vrot.lane.b32.xlu1 %v5561_v20, %s5445_s28  ;;  %560 = vrot.lane.b32.xlu0 %v5549_v16, %s5444_s27 }
  0x55   : > { %4518 = vrot.lane.b32.xlu1 %v5557_v19, %s5445_s28  ;;  %4513 = vrot.lane.b32.xlu0 %v5571_v22, %s5445_s28 }
  0x59   : > { %4528 = vrot.lane.b32.xlu1 %v5581_v24, %s5445_s28  ;;  %4523 = vrot.lane.b32.xlu0 %v5567_v21, %s5445_s28 }
  0x5d   : > { %4538 = vrot.lane.b32.xlu1 %v5591_v26, %s5445_s28  ;;  %4533 = vrot.lane.b32.xlu0 %v5577_v23, %s5445_s28 }
  0x61   : > { %627 = vrot.lane.b32.xlu1 %v5549_v16, %s5445_s28  ;;  %4543 = vrot.lane.b32.xlu0 %v5587_v25, %s5445_s28  ;;  %s5467_s28 = smov 70  }
  0x65   : > { %4553 = vrot.lane.b32.xlu1 %v5571_v22, %s5446_s29  ;;  %4548 = vrot.lane.b32.xlu0 %v5561_v20, %s5446_s29 }
  0x69   : > { %4563 = vrot.lane.b32.xlu1 %v5567_v21, %s5446_s29  ;;  %4558 = vrot.lane.b32.xlu0 %v5557_v19, %s5446_s29 }
  0x6d   : > { %4573 = vrot.lane.b32.xlu1 %v5577_v23, %s5446_s29  ;;  %4568 = vrot.lane.b32.xlu0 %v5581_v24, %s5446_s29 }
  0x71   : > { %4583 = vrot.lane.b32.xlu1 %v5587_v25, %s5446_s29  ;;  %4578 = vrot.lane.b32.xlu0 %v5591_v26, %s5446_s29 }
  0x75   : > { %4588 = vrot.lane.b32.xlu1 %v5561_v20, %s5447_s30  ;;  %694 = vrot.lane.b32.xlu0 %v5549_v16, %s5446_s29 }
  0x79   : > { %4598 = vrot.lane.b32.xlu1 %v5557_v19, %s5447_s30  ;;  %4593 = vrot.lane.b32.xlu0 %v5571_v22, %s5447_s30 }
  0x7d   : > { %4608 = vrot.lane.b32.xlu1 %v5581_v24, %s5447_s30  ;;  %4603 = vrot.lane.b32.xlu0 %v5567_v21, %s5447_s30 }
  0x81   : > { %4618 = vrot.lane.b32.xlu1 %v5591_v26, %s5447_s30  ;;  %4613 = vrot.lane.b32.xlu0 %v5577_v23, %s5447_s30 }
  0x85   : > { %761 = vrot.lane.b32.xlu1 %v5549_v16, %s5447_s30  ;;  %4623 = vrot.lane.b32.xlu0 %v5587_v25, %s5447_s30 }
  0x89   : > { %4633 = vrot.lane.b32.xlu1 %v5571_v22, %s5448_s4  ;;  %4628 = vrot.lane.b32.xlu0 %v5561_v20, %s5448_s4 }
  0x8d   : > { %4643 = vrot.lane.b32.xlu1 %v5567_v21, %s5448_s4  ;;  %4638 = vrot.lane.b32.xlu0 %v5557_v19, %s5448_s4 }
  0x8f   : > { %v5652_v29 = vpop.permute.xlu1 %4398  ;;  %v4389_v30 = vpop.permute.xlu0 %4388 }
  0x90   : > { %v8589_v31 = vunpack.i.h.bf16 %v5652_v29  ;;  %v4400_v32 = vunpack.i.l.bf16 %v5652_v29  ;;  %v4391_v33 = vunpack.i.h.bf16 %v4389_v30  ;;  %v4390_v34 = vunpack.i.l.bf16 %v4389_v30 }
  0x91   : > { %4653 = vrot.lane.b32.xlu1 %v5577_v23, %s5448_s4  ;;  %4648 = vrot.lane.b32.xlu0 %v5581_v24, %s5448_s4 }
  0x92   : > { %v5665_v35 = vsel %vm428_vm0, %v4400_v32, %v8589_v31  ;;  %v444_v42 = vsel %vm428_vm0, %v4390_v34, %v4391_v33  ;;  %v5760_v34 = vpack.i.bf16 %v5516_v2, %v5514_v1  ;;  %v5819_v31 = vpack.i.bf16 %v5545_v14, %v5543_v13 }
  0x93   : > { %8781 = vst [vmem:[#allocation21_spill] sm:$0xff] %v5665_v35  ;;  %v5667_v36 = vpop.permute.xlu1 %4403  ;;  %v4394_v37 = vpop.permute.xlu0 %4393  ;;  %v3923_v51 = vpack.c.bf16 %v444_v42, %v5512_v0  ;;  %v5784_v42 = vpack.i.bf16 %v5529_v6, %v5527_v5 }
  0x94   : > { %v4396_v38 = vunpack.i.h.bf16 %v4394_v37  ;;  %v4395_v39 = vunpack.i.l.bf16 %v4394_v37 }
  0x95   : > { %4663 = vrot.lane.b32.xlu1 %v5587_v25, %s5448_s4  ;;  %4658 = vrot.lane.b32.xlu0 %v5591_v26, %s5448_s4 }
  0x96   : > { %v443_v40 = vsel %vm428_vm0, %v4391_v33, %v4395_v39  ;;  %v441_v41 = vsel %vm428_vm0, %v4396_v38, %v4400_v32  ;;  %v442_v43 = vsel %vm428_vm0, %v4395_v39, %v4396_v38  ;;  %v5756_v33 = vpack.i.bf16 %v5525_v4, %v5523_v3 }
  0x97   : > { %v5681_v44 = vpop.permute.xlu1 %4413  ;;  %v5683_v45 = vpop.permute.xlu0 %4408  ;;  %v3921_v46 = vpack.c.bf16 %v443_v40, %v5514_v1  ;;  %v3973_v47 = vpack.c.bf16 %v441_v41, %v5523_v3  ;;  %v3975_v48 = vpack.c.bf16 %v442_v43, %v5516_v2  ;;  %v5780_v41 = vpack.i.bf16 %v5533_v8, %v5531_v7 }
  0x98   : > { %8782 = vst [vmem:[#allocation22_spill] sm:$0xff] %v5681_v44  ;;  %v8587_v49 = vunpack.i.h.bf16 %v5683_v45  ;;  %v8588_v50 = vunpack.i.l.bf16 %v5683_v45 }
  0x99   : > { %4668 = vrot.lane.b32.xlu1 %v5561_v20, %s5449_s5  ;;  %828 = vrot.lane.b32.xlu0 %v5549_v16, %s5448_s4 }
  0x9a   : > { %3922 = vmatprep.subr.bf16.mxu0 %v3921_v46  ;;  %3974 = vmatprep.subr.bf16.mxu1 %v3973_v47  ;;  %v5705_v54 = vsel %vm428_vm0, %v8588_v50, %v8587_v49  ;;  %v5815_v50 = vpack.i.bf16 %v5549_v16, %v5547_v15 }
  0x9b   : > { %3924 = vmatpush1.bf16.msra.mxu0 %v3923_v51  ;;  %3976 = vmatpush1.bf16.msra.mxu1 %v3975_v48  ;;  %v5695_v52 = vpop.permute.xlu1 %4423  ;;  %v5697_v53 = vpop.permute.xlu0 %4418  ;;  %8785 = vst [vmem:[#allocation25_spill] sm:$0xff] %v5705_v54  ;;  %v5800_v48 = vpack.i.bf16 %v5541_v12, %v5539_v11  ;;  %v5804_v51 = vpack.i.bf16 %v5537_v10, %v5535_v9 }
  0x9c   : > { %8783 = vst [vmem:[#allocation23_spill] sm:$0xff] %v5695_v52  ;;  %8784 = vst [vmem:[#allocation24_spill] sm:$0xff] %v5697_v53  ;;  %v8585_v55 = vunpack.i.h.bf16 %v5697_v53  ;;  %v8586_v56 = vunpack.i.l.bf16 %v5697_v53 }
  0x9d   : > { %4678 = vrot.lane.b32.xlu1 %v5557_v19, %s5449_s5  ;;  %4673 = vrot.lane.b32.xlu0 %v5571_v22, %s5449_s5  ;;  %8791 = vst [vmem:[#allocation31_spill] sm:$0xff] %v5815_v50 }
  0x9e   : > { %v5719_v57 = vsel %vm428_vm0, %v8586_v56, %v8585_v55 }
  0x9f   : > { %8786 = vst [vmem:[#allocation26_spill] sm:$0xff] %v5719_v57  ;;  %v4429_v58 = vpop.permute.xlu1 %4428  ;;  %v5721_v59 = vpop.permute.xlu0 %424 }
  0xa0   : > { %8787 = vst [vmem:[#allocation27_spill] sm:$0xff] %v5721_v59  ;;  %v4431_v27 = vunpack.i.h.bf16 %v4429_v58  ;;  %v4430_v55 = vunpack.i.l.bf16 %v4429_v58 }
  0xa1   : > { %4688 = vrot.lane.b32.xlu1 %v5581_v24, %s5449_s5  ;;  %4683 = vrot.lane.b32.xlu0 %v5567_v21, %s5449_s5 }
  0xa3   : > { %v5727_v60 = vpop.permute.xlu1 %4438  ;;  %v5729_v61 = vpop.permute.xlu0 %4433 }
  0xa4   : > { %v8593_v62 = vunpack.i.h.bf16 %v5727_v60  ;;  %v4440_v63 = vunpack.i.l.bf16 %v5727_v60  ;;  %v4435_v56 = vunpack.i.l.bf16 %v5729_v61  ;;  %v4436_v49 = vunpack.i.h.bf16 %v5729_v61 }
  0xa5   : > { %4698 = vrot.lane.b32.xlu1 %v5591_v26, %s5449_s5  ;;  %4693 = vrot.lane.b32.xlu0 %v5577_v23, %s5449_s5 }
  0xa6   : > { %v5742_v0 = vsel %vm495_vm1, %v4440_v63, %v8593_v62  ;;  %v510_v15 = vsel %vm495_vm1, %v4431_v27, %v4435_v56  ;;  %v508_v54 = vsel %vm495_vm1, %v4436_v49, %v4440_v63 }
  0xa7   : > { %8788 = vst [vmem:[#allocation28_spill] sm:$0xff] %v5742_v0  ;;  %v5744_v20 = vpop.permute.xlu1 %4448  ;;  %v5746_v21 = vpop.permute.xlu0 %4443 }
  0xa8   : > { %v8592_v30 = vunpack.i.h.bf16 %v5744_v20  ;;  %v4450_v32 = vunpack.i.l.bf16 %v5744_v20  ;;  %v4446_v58 = vunpack.i.h.bf16 %v5746_v21 }
  0xa9   : > { %895 = vrot.lane.b32.xlu1 %v5549_v16, %s5449_s5  ;;  %4703 = vrot.lane.b32.xlu0 %v5587_v25, %s5449_s5 }
  0xaa   : > { %v5766_v37 = vsel %vm495_vm1, %v4450_v32, %v8592_v30 }
  0xab   : > { %8789 = vst [vmem:[#allocation29_spill] sm:$0xff] %v5766_v37  ;;  %v5768_v38 = vpop.permute.xlu1 %4458  ;;  %v5770_v39 = vpop.permute.xlu0 %4453 }
  0xac   : > { %v8590_v25 = vunpack.i.h.bf16 %v5768_v38  ;;  %v8591_v40 = vunpack.i.l.bf16 %v5768_v38  ;;  %v4455_v61 = vunpack.i.l.bf16 %v5770_v39 }
  0xad   : > { %4713 = vrot.lane.b32.xlu1 %v5756_v33, %s5450_s6  ;;  %4708 = vrot.lane.b32.xlu0 %v5760_v34, %s5450_s6 }
  0xae   : > { %v5792_v43 = vsel %vm495_vm1, %v8591_v40, %v8590_v25  ;;  %v4445_v25 = vunpack.i.l.bf16 %v5746_v21  ;;  %v511_v21 = vsel %vm495_vm1, %v4430_v55, %v4431_v27  ;;  %v509_v27 = vsel %vm495_vm1, %v4435_v56, %v4436_v49 }
  0xaf   : > { %8790 = vst [vmem:[#allocation30_spill] sm:$0xff] %v5792_v43  ;;  %v5794_v46 = vpop.permute.xlu1 %493  ;;  %v5796_v47 = vpop.permute.xlu0 %4463 }
  0xb0   : > { %v5841_v53 = vsel %vm495_vm1, %v4445_v25, %v4446_v58 }
  0xb1   : > { %4723 = vrot.lane.b32.xlu1 %v5780_v41, %s5450_s6  ;;  %4718 = vrot.lane.b32.xlu0 %v5784_v42, %s5450_s6  ;;  %8792 = vst [vmem:[#allocation32_spill] sm:$0xff] %v5841_v53 }
  0xb3   : > { %v4474_v40 = vpop.permute.xlu1 %4473  ;;  %v4469_v30 = vpop.permute.xlu0 %4468 }
  0xb4   : > { %v4475_v62 = vunpack.i.l.bf16 %v4474_v40  ;;  %v4471_v57 = vunpack.i.h.bf16 %v4469_v30  ;;  %v4470_v59 = vunpack.i.l.bf16 %v4469_v30  ;;  %v4476_v16 = vunpack.i.h.bf16 %v4474_v40 }
  0xb5   : > { %4733 = vrot.lane.b32.xlu1 %v5800_v48, %s5450_s6  ;;  %4728 = vrot.lane.b32.xlu0 %v5804_v51, %s5450_s6 }
  0xb6   : > { %v577_v30 = vsel %vm562_vm2, %v4471_v57, %v4475_v62  ;;  %v578_v52 = vsel %vm562_vm2, %v4470_v59, %v4471_v57  ;;  %v8793_v57 = vunpack.i.h.bf16 %v5770_v39 }
  0xb7   : > { %v4484_v44 = vpop.permute.xlu1 %4483  ;;  %v4479_v18 = vpop.permute.xlu0 %4478  ;;  %v3925_v13 = vpack.c.bf16 %v577_v30, %v510_v15  ;;  %v3927_v11 = vpack.c.bf16 %v578_v52, %v511_v21  ;;  %v8795_v15 = vunpack.i.h.bf16 %v5727_v60  ;;  %v576_v60 = vsel %vm562_vm2, %v4475_v62, %v4476_v16 }
  0xb8   : > { %v4486_v55 = vunpack.i.h.bf16 %v4484_v44  ;;  %v4485_v40 = vunpack.i.l.bf16 %v4484_v44  ;;  %v4481_v12 = vunpack.i.h.bf16 %v4479_v18  ;;  %v4480_v35 = vunpack.i.l.bf16 %v4479_v18 }
  0xb9   : > { %v5849_v59 = vsel %vm495_vm1, %v4455_v61, %v8793_v57  ;;  %4743 = vrot.lane.b32.xlu1 %v5815_v50, %s5450_s6  ;;  %4738 = vrot.lane.b32.xlu0 %v5819_v31, %s5450_s6  ;;  %v5859_v49 = vsel %vm495_vm1, %v8795_v15, %v4445_v25  ;;  %v5863_v18 = vsel %vm495_vm1, %v4446_v58, %v4450_v32 }
  0xba   : > { %8794 = vst [vmem:[#allocation33_spill] sm:$0xff] %v5849_v59  ;;  %v5867_v44 = vsel %vm562_vm2, %v4485_v40, %v4486_v55  ;;  %v5871_v52 = vsel %vm562_vm2, %v4480_v35, %v4481_v12  ;;  %3926 = vmatprep.subr.bf16.mxu0 %v3925_v13  ;;  %v575_v56 = vsel %vm562_vm2, %v4476_v16, %v4480_v35  ;;  %v4466_v16 = vunpack.i.h.bf16 %v5796_v47 }
  0xbb   : > { %8796 = vst [vmem:[#allocation34_spill] sm:$0xff] %v5867_v44  ;;  %3928 = vmatpush1.bf16.msra.mxu0 %v3927_v11  ;;  %v4494_v63 = vpop.permute.xlu1 %4493  ;;  %v4489_v25 = vpop.permute.xlu0 %4488  ;;  %v3977_v32 = vpack.c.bf16 %v575_v56, %v508_v54  ;;  %v5879_v58 = vsel %vm562_vm2, %v4481_v12, %v4485_v40  ;;  %v3979_v11 = vpack.c.bf16 %v576_v60, %v509_v27  ;;  %v8797_v54 = vunpack.i.h.bf16 %v5744_v20 }
  0xbc   : > { %v4496_v30 = vunpack.i.h.bf16 %v4494_v63  ;;  %v4495_v57 = vunpack.i.l.bf16 %v4494_v63  ;;  %v4491_v35 = vunpack.i.h.bf16 %v4489_v25  ;;  %v4490_v15 = vunpack.i.l.bf16 %v4489_v25 }
  0xbd   : > { %4748 = vrot.lane.b32.xlu1 %v5760_v34, %s5451_s7  ;;  %962 = vrot.lane.b32.xlu0 %v5551_v17, %s5450_s6  ;;  %v5896_v62 = vsel %vm495_vm1, %v8797_v54, %v4455_v61  ;;  %v4465_v40 = vunpack.i.l.bf16 %v5796_v47 }
  0xbe   : > { %8798 = vst [vmem:[#allocation35_spill] sm:$0xff] %v5896_v62  ;;  %v5901_v56 = vsel %vm562_vm2, %v4495_v57, %v4496_v30  ;;  %v5905_v34 = vsel %vm562_vm2, %v4490_v15, %v4491_v35  ;;  %3978 = vmatprep.subr.bf16.mxu1 %v3977_v32  ;;  %v5909_v27 = vsel %vm562_vm2, %v4486_v55, %v4490_v15 }
  0xbf   : > { %8799 = vst [vmem:[#allocation36_spill] sm:$0xff] %v5901_v56  ;;  %8800 = vst [vmem:[#allocation37_spill] sm:$0xff] %v5905_v34  ;;  %3980 = vmatpush1.bf16.msra.mxu1 %v3979_v11  ;;  %v4504_v20 = vpop.permute.xlu1 %4503  ;;  %v4499_v60 = vpop.permute.xlu0 %4498  ;;  %v5915_v47 = vsel %vm562_vm2, %v4491_v35, %v4495_v57  ;;  %v8802_v35 = vunpack.i.l.bf16 %v5768_v38  ;;  %v8803_v11 = vunpack.i.h.bf16 %v5770_v39 }
  0xc0   : > { %8801 = vst [vmem:[#allocation38_spill] sm:$0xff] %v5915_v47  ;;  %v4506_v32 = vunpack.i.h.bf16 %v4504_v20  ;;  %v4505_v54 = vunpack.i.l.bf16 %v4504_v20  ;;  %v4501_v55 = vunpack.i.h.bf16 %v4499_v60  ;;  %v4500_v15 = vunpack.i.l.bf16 %v4499_v60 }
  0xc1   : > { %4758 = vrot.lane.b32.xlu1 %v5784_v42, %s5451_s7  ;;  %4753 = vrot.lane.b32.xlu0 %v5756_v33, %s5451_s7  ;;  %v5933_v25 = vsel %vm495_vm1, %v8803_v11, %v8802_v35  ;;  %v5937_v20 = vsel %vm495_vm1, %v4465_v40, %v4466_v16  ;;  %v8812_v11 = vunpack.i.h.bf16 %v5768_v38 }
  0xc2   : > { %8804 = vst [vmem:[#allocation39_spill] sm:$0xff] %v5933_v25  ;;  %8805 = vst [vmem:[#allocation40_spill] sm:$0xff] %v5937_v20  ;;  %v5941_v60 = vsel %vm562_vm2, %v4505_v54, %v4506_v32  ;;  %v5945_v63 = vsel %vm562_vm2, %v4500_v15, %v4501_v55  ;;  %v5949_v57 = vsel %vm562_vm2, %v4496_v30, %v4500_v15 }
  0xc3   : > { %8806 = vst [vmem:[#allocation41_spill] sm:$0xff] %v5941_v60  ;;  %8807 = vst [vmem:[#allocation42_spill] sm:$0xff] %v5945_v63  ;;  %v5951_v39 = vpop.permute.xlu1 %4508  ;;  %v561_v35 = vpop.permute.xlu0 %560  ;;  %v5957_v13 = vsel %vm562_vm2, %v4501_v55, %v4505_v54  ;;  %v5966_v30 = vsel %vm495_vm1, %v4466_v16, %v5794_v46  ;;  %v5976_v54 = vsel %vm495_vm1, %v8812_v11, %v4465_v40  ;;  %vm8742_vm1 = vcmp.lt.s32.totalorder %v5646_v28, 87 }
  0xc4   : > { %8808 = vst [vmem:[#allocation43_spill] sm:$0xff] %v5949_v57  ;;  %8809 = vst [vmem:[#allocation44_spill] sm:$0xff] %v5957_v13  ;;  %v5970_v15 = vsel %vm562_vm2, %v4506_v32, %v561_v35  ;;  %v5986_v46 = vpack.i.bf16 %v5529_v6, %v5514_v1  ;;  %vm8741_vm2 = vcmp.lt.s32.totalorder %v5646_v28, 86 }
  0xc5   : > { %8810 = vst [vmem:[#allocation45_spill] sm:$0xff] %v5966_v30  ;;  %8811 = vst [vmem:[#allocation46_spill] sm:$0xff] %v5970_v15  ;;  %4768 = vrot.lane.b32.xlu1 %v5557_v19, %s5452_s8  ;;  %4763 = vrot.lane.b32.xlu0 %v5571_v22, %s5452_s8  ;;  %v4511_v30 = vunpack.i.h.bf16 %v5951_v39  ;;  %v4510_v15 = vunpack.i.l.bf16 %v5951_v39 }
  0xc6   : > { %8813 = vst [vmem:[#allocation47_spill] sm:$0xff] %v5976_v54 }
  0xc7   : > { %v4519_v16 = vpop.permute.xlu1 %4518  ;;  %v4514_v40 = vpop.permute.xlu0 %4513 }
  0xc8   : > { %v4521_v32 = vunpack.i.h.bf16 %v4519_v16  ;;  %v4520_v35 = vunpack.i.l.bf16 %v4519_v16  ;;  %v4515_v54 = vunpack.i.l.bf16 %v4514_v40 }
  0xc9   : > { %4778 = vrot.lane.b32.xlu1 %v5571_v22, %s5453_s9  ;;  %4773 = vrot.lane.b32.xlu0 %v5986_v46, %s5452_s8 }
  0xca   : > { %v5997_v1 = vsel %vm629_vm3, %v4520_v35, %v4521_v32  ;;  %v644_v39 = vsel %vm629_vm3, %v4511_v30, %v4515_v54 }
  0xcb   : > { %8814 = vst [vmem:[#allocation48_spill] sm:$0xff] %v5997_v1  ;;  %v5999_v11 = vpop.permute.xlu1 %4528  ;;  %v4524_v61 = vpop.permute.xlu0 %4523 }
  0xcc   : > { %v8610_v21 = vunpack.i.h.bf16 %v5999_v11  ;;  %v4530_v16 = vunpack.i.l.bf16 %v5999_v11  ;;  %v4525_v13 = vunpack.i.l.bf16 %v4524_v61 }
  0xcd   : > { %4788 = vrot.lane.b32.xlu1 %v5571_v22, %s5454_s10  ;;  %4783 = vrot.lane.b32.xlu0 %v5557_v19, %s5453_s9 }
  0xce   : > { %v6011_v55 = vsel %vm629_vm3, %v4530_v16, %v8610_v21 }
  0xcf   : > { %8815 = vst [vmem:[#allocation49_spill] sm:$0xff] %v6011_v55  ;;  %v6013_v38 = vpop.permute.xlu1 %4538  ;;  %v6015_v12 = vpop.permute.xlu0 %4533 }
  0xd0   : > { %v8616_v20 = vunpack.i.h.bf16 %v6013_v38  ;;  %v8617_v60 = vunpack.i.l.bf16 %v6013_v38 }
  0xd1   : > { %4798 = vrot.lane.b32.xlu1 %v5986_v46, %s5453_s9  ;;  %4793 = vrot.lane.b32.xlu0 %v5557_v19, %s5454_s10 }
  0xd2   : > { %v6029_v21 = vsel %vm629_vm3, %v8617_v60, %v8616_v20  ;;  %v4516_v20 = vunpack.i.h.bf16 %v4514_v40  ;;  %v4526_v60 = vunpack.i.h.bf16 %v4524_v61  ;;  %v645_v40 = vsel %vm629_vm3, %v4510_v15, %v4511_v30 }
  0xd3   : > { %8816 = vst [vmem:[#allocation50_spill] sm:$0xff] %v6029_v21  ;;  %v6031_v43 = vpop.permute.xlu1 %627  ;;  %v6033_v63 = vpop.permute.xlu0 %4543  ;;  %v6064_v15 = vsel %vm629_vm3, %v4521_v32, %v4525_v13 }
  0xd4   : > { %v643_v62 = vsel %vm629_vm3, %v4515_v54, %v4516_v20  ;;  %v6060_v47 = vsel %vm629_vm3, %v4525_v13, %v4526_v60  ;;  %v6076_v13 = vsel %vm629_vm3, %v4526_v60, %v4530_v16 }
  0xd5   : > { %4808 = vrot.lane.b32.xlu1 %v5571_v22, %s5455_s11  ;;  %4803 = vrot.lane.b32.xlu0 %v5986_v46, %s5454_s10  ;;  %8817 = vst [vmem:[#allocation51_spill] sm:$0xff] %v6060_v47  ;;  %8818 = vst [vmem:[#allocation52_spill] sm:$0xff] %v6076_v13 }
  0xd7   : > { %v4554_v59 = vpop.permute.xlu1 %4553  ;;  %v4549_v56 = vpop.permute.xlu0 %4548 }
  0xd8   : > { %v4555_v37 = vunpack.i.l.bf16 %v4554_v59  ;;  %v4551_v34 = vunpack.i.h.bf16 %v4549_v56  ;;  %v4550_v25 = vunpack.i.l.bf16 %v4549_v56  ;;  %v4556_v57 = vunpack.i.h.bf16 %v4554_v59 }
  0xd9   : > { %4818 = vrot.lane.b32.xlu1 %v5571_v22, %s5456_s12  ;;  %4813 = vrot.lane.b32.xlu0 %v5557_v19, %s5455_s11  ;;  %v642_v59 = vsel %vm629_vm3, %v4516_v20, %v4520_v35  ;;  %v4536_v35 = vunpack.i.h.bf16 %v6015_v12  ;;  %v4535_v20 = vunpack.i.l.bf16 %v6015_v12 }
  0xda   : > { %v711_v61 = vsel %vm696_vm4, %v4551_v34, %v4555_v37  ;;  %v712_v56 = vsel %vm696_vm4, %v4550_v25, %v4551_v34  ;;  %v710_v54 = vsel %vm696_vm4, %v4555_v37, %v4556_v57 }
  0xdb   : > { %v4564_v50 = vpop.permute.xlu1 %4563  ;;  %v4559_v17 = vpop.permute.xlu0 %4558  ;;  %v3929_v53 = vpack.c.bf16 %v711_v61, %v644_v39  ;;  %v3931_v30 = vpack.c.bf16 %v712_v56, %v645_v40 }
  0xdc   : > { %v4566_v44 = vunpack.i.h.bf16 %v4564_v50  ;;  %v4565_v34 = vunpack.i.l.bf16 %v4564_v50  ;;  %v4561_v25 = vunpack.i.h.bf16 %v4559_v17  ;;  %v4560_v0 = vunpack.i.l.bf16 %v4559_v17 }
  0xdd   : > { %4828 = vrot.lane.b32.xlu1 %v5986_v46, %s5455_s11  ;;  %4823 = vrot.lane.b32.xlu0 %v5557_v19, %s5456_s12 }
  0xde   : > { %v6080_v17 = vsel %vm696_vm4, %v4565_v34, %v4566_v44  ;;  %v6084_v50 = vsel %vm696_vm4, %v4560_v0, %v4561_v25  ;;  %3930 = vmatprep.subr.bf16.mxu0 %v3929_v53  ;;  %v709_v12 = vsel %vm696_vm4, %v4556_v57, %v4560_v0  ;;  %v6090_v32 = vsel %vm696_vm4, %v4561_v25, %v4565_v34 }
  0xdf   : > { %8819 = vst [vmem:[#allocation53_spill] sm:$0xff] %v6080_v17  ;;  %8820 = vst [vmem:[#allocation54_spill] sm:$0xff] %v6084_v50  ;;  %3932 = vmatpush1.bf16.msra.mxu0 %v3931_v30  ;;  %v4574_v37 = vpop.permute.xlu1 %4573  ;;  %v4569_v60 = vpop.permute.xlu0 %4568  ;;  %v3981_v16 = vpack.c.bf16 %v709_v12, %v642_v59  ;;  %v6100_v34 = vsel %vm629_vm3, %v4535_v20, %v4536_v35  ;;  %v4546_v30 = vunpack.i.h.bf16 %v6033_v63  ;;  %v4545_v59 = vunpack.i.l.bf16 %v6033_v63 }
  0xe0   : > { %v4576_v61 = vunpack.i.h.bf16 %v4574_v37  ;;  %v4575_v56 = vunpack.i.l.bf16 %v4574_v37  ;;  %v4571_v0 = vunpack.i.h.bf16 %v4569_v60  ;;  %v4570_v57 = vunpack.i.l.bf16 %v4569_v60  ;;  %8821 = vst [vmem:[#allocation55_spill] sm:$0xff] %v6100_v34 }
  0xe1   : > { %4838 = vrot.lane.b32.xlu1 %v5571_v22, %s5457_s13  ;;  %4833 = vrot.lane.b32.xlu0 %v5986_v46, %s5456_s12  ;;  %v3983_v25 = vpack.c.bf16 %v710_v54, %v643_v62  ;;  %v8825_v60 = vunpack.i.h.bf16 %v5999_v11 }
  0xe2   : > { %v6110_v12 = vsel %vm696_vm4, %v4575_v56, %v4576_v61  ;;  %v6114_v37 = vsel %vm696_vm4, %v4570_v57, %v4571_v0  ;;  %3982 = vmatprep.subr.bf16.mxu1 %v3981_v16  ;;  %v6118_v63 = vsel %vm696_vm4, %v4566_v44, %v4570_v57  ;;  %v6130_v39 = vsel %vm696_vm4, %v4571_v0, %v4575_v56 }
  0xe3   : > { %8822 = vst [vmem:[#allocation56_spill] sm:$0xff] %v6110_v12  ;;  %8823 = vst [vmem:[#allocation57_spill] sm:$0xff] %v6114_v37  ;;  %v6124_v53 = vsel %vm629_vm3, %v8825_v60, %v4535_v20  ;;  %3984 = vmatpush1.bf16.msra.mxu1 %v3983_v25  ;;  %v4584_v62 = vpop.permute.xlu1 %4583  ;;  %v4579_v54 = vpop.permute.xlu0 %4578  ;;  %v6138_v25 = vsel %vm629_vm3, %v4545_v59, %v4546_v30  ;;  %v8829_v0 = vunpack.i.l.bf16 %v6013_v38  ;;  %v8834_v44 = vunpack.i.h.bf16 %v6013_v38 }
  0xe4   : > { %8824 = vst [vmem:[#allocation58_spill] sm:$0xff] %v6118_v63  ;;  %8826 = vst [vmem:[#allocation59_spill] sm:$0xff] %v6124_v53  ;;  %v4586_v16 = vunpack.i.h.bf16 %v4584_v62  ;;  %v4585_v57 = vunpack.i.l.bf16 %v4584_v62  ;;  %v4581_v20 = vunpack.i.h.bf16 %v4579_v54  ;;  %v4580_v60 = vunpack.i.l.bf16 %v4579_v54 }
  0xe5   : > { %8827 = vst [vmem:[#allocation60_spill] sm:$0xff] %v6130_v39  ;;  %8828 = vst [vmem:[#allocation61_spill] sm:$0xff] %v6138_v25  ;;  %4848 = vrot.lane.b32.xlu1 %v5571_v22, %s5458_s14  ;;  %4843 = vrot.lane.b32.xlu0 %v5557_v19, %s5457_s13  ;;  %v6150_v62 = vsel %vm629_vm3, %v4536_v35, %v8829_v0  ;;  %v6168_v56 = vsel %vm629_vm3, %v8834_v44, %v4545_v59 }
  0xe6   : > { %8830 = vst [vmem:[#allocation62_spill] sm:$0xff] %v6150_v62  ;;  %v6154_v54 = vsel %vm696_vm4, %v4585_v57, %v4586_v16  ;;  %v6158_v11 = vsel %vm696_vm4, %v4580_v60, %v4581_v20  ;;  %v6162_v22 = vsel %vm696_vm4, %v4576_v61, %v4580_v60  ;;  %8835 = vst [vmem:[#allocation66_spill] sm:$0xff] %v6168_v56 }
  0xe7   : > { %8831 = vst [vmem:[#allocation63_spill] sm:$0xff] %v6154_v54  ;;  %8832 = vst [vmem:[#allocation64_spill] sm:$0xff] %v6158_v11  ;;  %v4589_v35 = vpop.permute.xlu1 %4588  ;;  %v695_v0 = vpop.permute.xlu0 %694  ;;  %v6174_v34 = vsel %vm696_vm4, %v4581_v20, %v4585_v57  ;;  %v6183_v38 = vsel %vm629_vm3, %v4546_v30, %v6031_v43  ;;  %vm8739_vm3 = vcmp.lt.s32.totalorder %v5646_v28, 96 }
  0xe8   : > { %8833 = vst [vmem:[#allocation65_spill] sm:$0xff] %v6162_v22  ;;  %8836 = vst [vmem:[#allocation67_spill] sm:$0xff] %v6174_v34  ;;  %v6187_v59 = vsel %vm696_vm4, %v4586_v16, %v695_v0  ;;  %v4591_v11 = vunpack.i.h.bf16 %v4589_v35  ;;  %vm8738_vm4 = vcmp.lt.s32.totalorder %v5646_v28, 95 }
  0xe9   : > { %8837 = vst [vmem:[#allocation68_spill] sm:$0xff] %v6183_v38  ;;  %8838 = vst [vmem:[#allocation69_spill] sm:$0xff] %v6187_v59  ;;  %4858 = vrot.lane.b32.xlu1 %v5986_v46, %s5457_s13  ;;  %4853 = vrot.lane.b32.xlu0 %v5557_v19, %s5458_s14  ;;  %v4590_v38 = vunpack.i.l.bf16 %v4589_v35 }
  0xeb   : > { %v4599_v20 = vpop.permute.xlu1 %4598  ;;  %v4594_v60 = vpop.permute.xlu0 %4593 }
  0xec   : > { %v4601_v43 = vunpack.i.h.bf16 %v4599_v20  ;;  %v4600_v30 = vunpack.i.l.bf16 %v4599_v20  ;;  %v4595_v59 = vunpack.i.l.bf16 %v4594_v60  ;;  %v4596_v56 = vunpack.i.h.bf16 %v4594_v60 }
  0xed   : > { %4868 = vrot.lane.b32.xlu1 %v5756_v33, %s5459_s17  ;;  %4863 = vrot.lane.b32.xlu0 %v5986_v46, %s5458_s14  ;;  %v6216_v46 = vpack.i.bf16 %v5531_v7, %v5516_v2  ;;  %v779_v60 = vsel %vm763_vm5, %v4590_v38, %v4591_v11 }
  0xee   : > { %v6204_v16 = vsel %vm763_vm5, %v4600_v30, %v4601_v43  ;;  %v778_v35 = vsel %vm763_vm5, %v4591_v11, %v4595_v59  ;;  %v777_v39 = vsel %vm763_vm5, %v4595_v59, %v4596_v56 }
  0xef   : > { %8839 = vst [vmem:[#allocation70_spill] sm:$0xff] %v6204_v16  ;;  %v6206_v0 = vpop.permute.xlu1 %4608  ;;  %v4604_v19 = vpop.permute.xlu0 %4603 }
  0xf0   : > { %v8637_v61 = vunpack.i.h.bf16 %v6206_v0  ;;  %v4610_v20 = vunpack.i.l.bf16 %v6206_v0  ;;  %v4606_v34 = vunpack.i.h.bf16 %v4604_v19 }
  0xf1   : > { %4878 = vrot.lane.b32.xlu1 %v5756_v33, %s5460_s18  ;;  %4873 = vrot.lane.b32.xlu0 %v5784_v42, %s5459_s17 }
  0xf2   : > { %v6222_v12 = vsel %vm763_vm5, %v4610_v20, %v8637_v61 }
  0xf3   : > { %8840 = vst [vmem:[#allocation71_spill] sm:$0xff] %v6222_v12  ;;  %v6224_v57 = vpop.permute.xlu1 %4618  ;;  %v6226_v44 = vpop.permute.xlu0 %4613 }
  0xf4   : > { %v8645_v40 = vunpack.i.h.bf16 %v6224_v57  ;;  %v8646_v25 = vunpack.i.l.bf16 %v6224_v57 }
  0xf5   : > { %4888 = vrot.lane.b32.xlu1 %v6216_v46, %s5459_s17  ;;  %4883 = vrot.lane.b32.xlu0 %v5784_v42, %s5460_s18 }
  0xf6   : > { %v6240_v61 = vsel %vm763_vm5, %v8646_v25, %v8645_v40  ;;  %v4605_v40 = vunpack.i.l.bf16 %v4604_v19 }
  0xf7   : > { %8841 = vst [vmem:[#allocation72_spill] sm:$0xff] %v6240_v61  ;;  %v6242_v54 = vpop.permute.xlu1 %761  ;;  %v6244_v21 = vpop.permute.xlu0 %4623 }
  0xf8   : > { %v6269_v47 = vsel %vm763_vm5, %v4605_v40, %v4606_v34  ;;  %v6273_v38 = vsel %vm763_vm5, %v4601_v43, %v4605_v40  ;;  %v6285_v40 = vsel %vm763_vm5, %v4606_v34, %v4610_v20 }
  0xf9   : > { %4898 = vrot.lane.b32.xlu1 %v5756_v33, %s5461_s19  ;;  %4893 = vrot.lane.b32.xlu0 %v6216_v46, %s5460_s18  ;;  %8842 = vst [vmem:[#allocation73_spill] sm:$0xff] %v6269_v47  ;;  %8843 = vst [vmem:[#allocation74_spill] sm:$0xff] %v6285_v40 }
  0xfb   : > { %v4634_v25 = vpop.permute.xlu1 %4633  ;;  %v4629_v55 = vpop.permute.xlu0 %4628 }
  0xfc   : > { %v4635_v37 = vunpack.i.l.bf16 %v4634_v25  ;;  %v4631_v62 = vunpack.i.h.bf16 %v4629_v55  ;;  %v4630_v22 = vunpack.i.l.bf16 %v4629_v55  ;;  %v4636_v53 = vunpack.i.h.bf16 %v4634_v25 }
  0xfd   : > { %4908 = vrot.lane.b32.xlu1 %v5756_v33, %s5462_s20  ;;  %4903 = vrot.lane.b32.xlu0 %v5784_v42, %s5461_s19  ;;  %v776_v25 = vsel %vm763_vm5, %v4596_v56, %v4600_v30  ;;  %v4616_v30 = vunpack.i.h.bf16 %v6226_v44  ;;  %v4615_v56 = vunpack.i.l.bf16 %v6226_v44 }
  0xfe   : > { %v845_v19 = vsel %vm830_vm6, %v4631_v62, %v4635_v37  ;;  %v846_v55 = vsel %vm830_vm6, %v4630_v22, %v4631_v62  ;;  %v844_v59 = vsel %vm830_vm6, %v4635_v37, %v4636_v53 }
  0xff   : > { %v4644_v17 = vpop.permute.xlu1 %4643  ;;  %v4639_v1 = vpop.permute.xlu0 %4638  ;;  %v3933_v50 = vpack.c.bf16 %v845_v19, %v778_v35  ;;  %v3935_v11 = vpack.c.bf16 %v846_v55, %v779_v60 }
 0x100   : > { %v4646_v13 = vunpack.i.h.bf16 %v4644_v17  ;;  %v4645_v62 = vunpack.i.l.bf16 %v4644_v17  ;;  %v4641_v22 = vunpack.i.h.bf16 %v4639_v1  ;;  %v4640_v63 = vunpack.i.l.bf16 %v4639_v1 }
 0x101   : > { %4918 = vrot.lane.b32.xlu1 %v6216_v46, %s5461_s19  ;;  %4913 = vrot.lane.b32.xlu0 %v5784_v42, %s5462_s20 }
 0x102   : > { %v6289_v1 = vsel %vm830_vm6, %v4645_v62, %v4646_v13  ;;  %v6293_v17 = vsel %vm830_vm6, %v4640_v63, %v4641_v22  ;;  %3934 = vmatprep.subr.bf16.mxu0 %v3933_v50  ;;  %v843_v44 = vsel %vm830_vm6, %v4636_v53, %v4640_v63  ;;  %v6299_v43 = vsel %vm830_vm6, %v4641_v22, %v4645_v62 }
 0x103   : > { %8844 = vst [vmem:[#allocation75_spill] sm:$0xff] %v6289_v1  ;;  %8845 = vst [vmem:[#allocation76_spill] sm:$0xff] %v6293_v17  ;;  %3936 = vmatpush1.bf16.msra.mxu0 %v3935_v11  ;;  %v4654_v37 = vpop.permute.xlu1 %4653  ;;  %v4649_v34 = vpop.permute.xlu0 %4648  ;;  %v3985_v20 = vpack.c.bf16 %v843_v44, %v776_v25  ;;  %v6309_v62 = vsel %vm763_vm5, %v4615_v56, %v4616_v30  ;;  %v4626_v11 = vunpack.i.h.bf16 %v6244_v21  ;;  %v8847_v22 = vunpack.i.h.bf16 %v6206_v0 }
 0x104   : > { %v4656_v19 = vunpack.i.h.bf16 %v4654_v37  ;;  %v4655_v55 = vunpack.i.l.bf16 %v4654_v37  ;;  %v4651_v53 = vunpack.i.h.bf16 %v4649_v34  ;;  %v4650_v63 = vunpack.i.l.bf16 %v4649_v34  ;;  %8846 = vst [vmem:[#allocation77_spill] sm:$0xff] %v6309_v62 }
 0x105   : > { %4928 = vrot.lane.b32.xlu1 %v5756_v33, %s5463_s21  ;;  %4923 = vrot.lane.b32.xlu0 %v6216_v46, %s5462_s20  ;;  %v3987_v25 = vpack.c.bf16 %v844_v59, %v777_v39  ;;  %v6320_v44 = vsel %vm763_vm5, %v8847_v22, %v4615_v56  ;;  %v4625_v37 = vunpack.i.l.bf16 %v6244_v21 }
 0x106   : > { %8848 = vst [vmem:[#allocation78_spill] sm:$0xff] %v6320_v44  ;;  %v6325_v34 = vsel %vm830_vm6, %v4655_v55, %v4656_v19  ;;  %v6329_v50 = vsel %vm830_vm6, %v4650_v63, %v4651_v53  ;;  %3986 = vmatprep.subr.bf16.mxu1 %v3985_v20  ;;  %v6333_v39 = vsel %vm830_vm6, %v4646_v13, %v4650_v63 }
 0x107   : > { %8849 = vst [vmem:[#allocation79_spill] sm:$0xff] %v6325_v34  ;;  %8850 = vst [vmem:[#allocation80_spill] sm:$0xff] %v6329_v50  ;;  %3988 = vmatpush1.bf16.msra.mxu1 %v3987_v25  ;;  %v4664_v0 = vpop.permute.xlu1 %4663  ;;  %v4659_v59 = vpop.permute.xlu0 %4658  ;;  %v6339_v21 = vsel %vm830_vm6, %v4651_v53, %v4655_v55  ;;  %v8853_v53 = vunpack.i.l.bf16 %v6224_v57 }
 0x108   : > { %8851 = vst [vmem:[#allocation81_spill] sm:$0xff] %v6333_v39  ;;  %8852 = vst [vmem:[#allocation82_spill] sm:$0xff] %v6339_v21  ;;  %v4666_v60 = vunpack.i.h.bf16 %v4664_v0  ;;  %v4665_v35 = vunpack.i.l.bf16 %v4664_v0  ;;  %v4661_v13 = vunpack.i.h.bf16 %v4659_v59  ;;  %v4660_v63 = vunpack.i.l.bf16 %v4659_v59 }
 0x109   : > { %4938 = vrot.lane.b32.xlu1 %v5756_v33, %s5464_s22  ;;  %4933 = vrot.lane.b32.xlu0 %v5784_v42, %s5463_s21  ;;  %v6355_v25 = vsel %vm763_vm5, %v4616_v30, %v8853_v53  ;;  %v6359_v0 = vsel %vm763_vm5, %v4625_v37, %v4626_v11  ;;  %v8862_v53 = vunpack.i.h.bf16 %v6224_v57 }
 0x10a   : > { %8854 = vst [vmem:[#allocation83_spill] sm:$0xff] %v6355_v25  ;;  %8855 = vst [vmem:[#allocation84_spill] sm:$0xff] %v6359_v0  ;;  %v6363_v59 = vsel %vm830_vm6, %v4665_v35, %v4666_v60  ;;  %v6367_v20 = vsel %vm830_vm6, %v4660_v63, %v4661_v13  ;;  %v6371_v22 = vsel %vm830_vm6, %v4656_v19, %v4660_v63 }
 0x10b   : > { %8856 = vst [vmem:[#allocation85_spill] sm:$0xff] %v6363_v59  ;;  %8857 = vst [vmem:[#allocation86_spill] sm:$0xff] %v6367_v20  ;;  %v6373_v55 = vpop.permute.xlu1 %4668  ;;  %v829_v30 = vpop.permute.xlu0 %828  ;;  %v6379_v56 = vsel %vm830_vm6, %v4661_v13, %v4665_v35  ;;  %v6388_v19 = vsel %vm763_vm5, %v4626_v11, %v6242_v54  ;;  %v6398_v35 = vsel %vm763_vm5, %v8862_v53, %v4625_v37  ;;  %vm8747_vm5 = vcmp.lt.s32.totalorder %v5646_v28, 94 }
 0x10c   : > { %8858 = vst [vmem:[#allocation87_spill] sm:$0xff] %v6371_v22  ;;  %8859 = vst [vmem:[#allocation88_spill] sm:$0xff] %v6379_v56  ;;  %v6392_v63 = vsel %vm830_vm6, %v4666_v60, %v829_v30  ;;  %vm8722_vm6 = vcmp.lt.s32.totalorder %v5646_v28, 84 }
 0x10d   : > { %8860 = vst [vmem:[#allocation89_spill] sm:$0xff] %v6388_v19  ;;  %8861 = vst [vmem:[#allocation90_spill] sm:$0xff] %v6392_v63  ;;  %4948 = vrot.lane.b32.xlu1 %v6216_v46, %s5463_s21  ;;  %4943 = vrot.lane.b32.xlu0 %v5784_v42, %s5464_s22  ;;  %v4670_v63 = vunpack.i.l.bf16 %v6373_v55 }
 0x10e   : > { %8863 = vst [vmem:[#allocation91_spill] sm:$0xff] %v6398_v35 }
 0x10f   : > { %v6408_v60 = vpop.permute.xlu1 %4678  ;;  %v4674_v11 = vpop.permute.xlu0 %4673 }
 0x110   : > { %v8661_v57 = vunpack.i.h.bf16 %v6408_v60  ;;  %v4680_v37 = vunpack.i.l.bf16 %v6408_v60  ;;  %v4675_v35 = vunpack.i.l.bf16 %v4674_v11 }
 0x111   : > { %4958 = vrot.lane.b32.xlu1 %v5756_v33, %s5465_s23  ;;  %4953 = vrot.lane.b32.xlu0 %v6216_v46, %s5464_s22 }
 0x112   : > { %v6421_v30 = vsel %vm897_vm7, %v4680_v37, %v8661_v57 }
 0x113   : > { %v6423_v53 = vpop.permute.xlu1 %4688  ;;  %v4684_v34 = vpop.permute.xlu0 %4683 }
 0x114   : > { %v8665_v62 = vunpack.i.h.bf16 %v6423_v53  ;;  %v4690_v13 = vunpack.i.l.bf16 %v6423_v53  ;;  %v4685_v56 = vunpack.i.l.bf16 %v4684_v34 }
 0x115   : > { %4968 = vrot.lane.b32.xlu1 %v5756_v33, %s5466_s25  ;;  %4963 = vrot.lane.b32.xlu0 %v5784_v42, %s5465_s23 }
 0x116   : > { %v6435_v54 = vsel %vm897_vm7, %v4690_v13, %v8665_v62  ;;  %v2137_v62 = vld [vmem:[%s8582_s2 + $0x8] sm:$0xff] }
 0x117   : > { %8864 = vst [vmem:[#allocation92_spill] sm:$0xff] %v6435_v54  ;;  %v6437_v57 = vpop.permute.xlu1 %4698  ;;  %v6439_v0 = vpop.permute.xlu0 %4693  ;;  %3879 = vmatprep.mubr.msk.f32.mxu0 %vm2576_vm8, %v2137_v62  ;;  %3883 = vmatprep.mubr.msk.f32.mxu1 %vm2576_vm8, %v2137_v62 }
 0x118   : > { %v8670_v59 = vunpack.i.h.bf16 %v6437_v57  ;;  %v8671_v61 = vunpack.i.l.bf16 %v6437_v57  ;;  %v4695_v44 = vunpack.i.l.bf16 %v6439_v0 }
 0x119   : > { %4978 = vrot.lane.b32.xlu1 %v6216_v46, %s5465_s23  ;;  %4973 = vrot.lane.b32.xlu0 %v5784_v42, %s5466_s25  ;;  %v4671_v42 = vunpack.i.h.bf16 %v6373_v55 }
 0x11a   : > { %v6453_v33 = vsel %vm897_vm7, %v8671_v61, %v8670_v59  ;;  %v4676_v59 = vunpack.i.h.bf16 %v4674_v11  ;;  %v4686_v61 = vunpack.i.h.bf16 %v4684_v34 }
 0x11b   : > { %8865 = vst [vmem:[#allocation93_spill] sm:$0xff] %v6453_v33  ;;  %v6458_v20 = vpop.permute.xlu1 %895  ;;  %v6460_v19 = vpop.permute.xlu0 %4703 }
 0x11c   : > { %v910_v55 = vsel %vm897_vm7, %v4676_v59, %v4680_v37  ;;  %v6489_v21 = vsel %vm897_vm7, %v4685_v56, %v4686_v61  ;;  %v8868_v37 = vunpack.i.h.bf16 %v6408_v60 }
 0x11d   : > { %2071 = vrot.lane.b32.xlu1 %v5523_v3, %s5467_s28  ;;  %4983 = vrot.lane.b32.xlu0 %v6216_v46, %s5466_s25  ;;  %v912_v3 = vsel %vm897_vm7, %v4671_v42, %v4675_v35  ;;  %v913_v46 = vsel %vm897_vm7, %v4670_v63, %v4671_v42 }
 0x11f   : > { %v4714_v12 = vpop.permute.xlu1 %4713  ;;  %v4709_v50 = vpop.permute.xlu0 %4708 }
 0x120   : > { %v4715_v62 = vunpack.i.l.bf16 %v4714_v12  ;;  %v4711_v25 = vunpack.i.h.bf16 %v4709_v50  ;;  %v4710_v22 = vunpack.i.l.bf16 %v4709_v50  ;;  %v4716_v34 = vunpack.i.h.bf16 %v4714_v12 }
 0x121   : > { %2075 = vrot.lane.b32.xlu1 %v5527_v5, %s5467_s28  ;;  %2073 = vrot.lane.b32.xlu0 %v5525_v4, %s5467_s28  ;;  %v911_v12 = vsel %vm897_vm7, %v4675_v35, %v4676_v59  ;;  %v6507_v59 = vsel %vm897_vm7, %v8868_v37, %v4685_v56  ;;  %v8871_v37 = vunpack.i.h.bf16 %v6423_v53  ;;  %v8876_v53 = vunpack.i.h.bf16 %v6439_v0 }
 0x122   : > { %v979_v50 = vsel %vm964_vm9, %v4711_v25, %v4715_v62  ;;  %v980_v11 = vsel %vm964_vm9, %v4710_v22, %v4711_v25  ;;  %v8866_v22 = vunpack.i.h.bf16 %v6439_v0  ;;  %v978_v56 = vsel %vm964_vm9, %v4715_v62, %v4716_v34 }
 0x123   : > { %v4724_v47 = vpop.permute.xlu1 %4723  ;;  %v4719_v1 = vpop.permute.xlu0 %4718  ;;  %v3937_v16 = vpack.c.bf16 %v979_v50, %v912_v3  ;;  %v3939_v17 = vpack.c.bf16 %v980_v11, %v913_v46  ;;  %v4706_v62 = vunpack.i.h.bf16 %v6460_v19 }
 0x124   : > { %v4726_v63 = vunpack.i.h.bf16 %v4724_v47  ;;  %v4725_v42 = vunpack.i.l.bf16 %v4724_v47  ;;  %v4721_v40 = vunpack.i.h.bf16 %v4719_v1  ;;  %v4720_v39 = vunpack.i.l.bf16 %v4719_v1 }
 0x125   : > { %v6497_v25 = vsel %vm897_vm7, %v4695_v44, %v8866_v22  ;;  %2069 = vrot.lane.b32.xlu1 %v5516_v2, %s5467_s28  ;;  %2077 = vrot.lane.b32.xlu0 %v5529_v6, %s5467_s28  ;;  %v6511_v47 = vsel %vm897_vm7, %v4686_v61, %v4690_v13 }
 0x126   : > { %8867 = vst [vmem:[#allocation94_spill] sm:$0xff] %v6497_v25  ;;  %v6515_v1 = vsel %vm964_vm9, %v4725_v42, %v4726_v63  ;;  %v6519_v2 = vsel %vm964_vm9, %v4720_v39, %v4721_v40  ;;  %3938 = vmatprep.subr.bf16.mxu0 %v3937_v16  ;;  %v977_v35 = vsel %vm964_vm9, %v4716_v34, %v4720_v39 }
 0x127   : > { %3940 = vmatpush1.bf16.msra.mxu0 %v3939_v17  ;;  %v4734_v60 = vpop.permute.xlu1 %4733  ;;  %v4729_v3 = vpop.permute.xlu0 %4728  ;;  %v3989_v61 = vpack.c.bf16 %v977_v35, %v910_v55  ;;  %v6527_v13 = vsel %vm964_vm9, %v4721_v40, %v4725_v42  ;;  %v4705_v17 = vunpack.i.l.bf16 %v6460_v19  ;;  %v3991_v40 = vpack.c.bf16 %v978_v56, %v911_v12 }
 0x128   : > { %v4736_v50 = vunpack.i.h.bf16 %v4734_v60  ;;  %v4735_v11 = vunpack.i.l.bf16 %v4734_v60  ;;  %v4731_v39 = vunpack.i.h.bf16 %v4729_v3  ;;  %v4730_v22 = vunpack.i.l.bf16 %v4729_v3 }
 0x129   : > { %4993 = vrot.lane.b32.xlu1 %v5804_v51, %s5451_s7  ;;  %4988 = vrot.lane.b32.xlu0 %v5780_v41, %s5451_s7  ;;  %v6557_v12 = vsel %vm897_vm7, %v8871_v37, %v4695_v44 }
 0x12a   : > { %v6543_v34 = vsel %vm964_vm9, %v4735_v11, %v4736_v50  ;;  %v6547_v42 = vsel %vm964_vm9, %v4730_v22, %v4731_v39  ;;  %3990 = vmatprep.subr.bf16.mxu1 %v3989_v61  ;;  %v6551_v19 = vsel %vm964_vm9, %v4726_v63, %v4730_v22  ;;  %8872 = vst [vmem:[#allocation97_spill] sm:$0xff] %v6557_v12 }
 0x12b   : > { %8869 = vst [vmem:[#allocation95_spill] sm:$0xff] %v6543_v34  ;;  %8870 = vst [vmem:[#allocation96_spill] sm:$0xff] %v6547_v42  ;;  %3992 = vmatpush1.bf16.msra.mxu1 %v3991_v40  ;;  %v4744_v35 = vpop.permute.xlu1 %4743  ;;  %v4739_v56 = vpop.permute.xlu0 %4738  ;;  %v6563_v3 = vsel %vm964_vm9, %v4731_v39, %v4735_v11  ;;  %v6571_v40 = vsel %vm897_vm7, %v4705_v17, %v4706_v62  ;;  %v8875_v39 = vunpack.i.l.bf16 %v6437_v57  ;;  %v8881_v11 = vunpack.i.h.bf16 %v6437_v57 }
 0x12c   : > { %8873 = vst [vmem:[#allocation98_spill] sm:$0xff] %v6563_v3  ;;  %v4746_v61 = vunpack.i.h.bf16 %v4744_v35  ;;  %v4745_v22 = vunpack.i.l.bf16 %v4744_v35  ;;  %v4741_v44 = vunpack.i.h.bf16 %v4739_v56  ;;  %v4740_v37 = vunpack.i.l.bf16 %v4739_v56  ;;  %8874 = vst [vmem:[#allocation99_spill] sm:$0xff] %v6571_v40 }
 0x12d   : > { %5003 = vrot.lane.b32.xlu1 %v5804_v51, %s5452_s8  ;;  %4998 = vrot.lane.b32.xlu0 %v5780_v41, %s5452_s8  ;;  %v6585_v35 = vsel %vm897_vm7, %v8876_v53, %v8875_v39  ;;  %v6603_v0 = vsel %vm897_vm7, %v8881_v11, %v4705_v17  ;;  %v6618_v57 = vsel %vm897_vm7, %v4706_v62, %v6458_v20  ;;  %vm8723_vm7 = vcmp.lt.s32.totalorder %v5646_v28, 83 }
 0x12e   : > { %8877 = vst [vmem:[#allocation100_spill] sm:$0xff] %v6585_v35  ;;  %v6589_v56 = vsel %vm964_vm9, %v4745_v22, %v4746_v61  ;;  %v6593_v63 = vsel %vm964_vm9, %v4740_v37, %v4741_v44  ;;  %v6597_v16 = vsel %vm964_vm9, %v4736_v50, %v4740_v37  ;;  %8882 = vst [vmem:[#allocation104_spill] sm:$0xff] %v6603_v0 }
 0x12f   : > { %8878 = vst [vmem:[#allocation101_spill] sm:$0xff] %v6589_v56  ;;  %8879 = vst [vmem:[#allocation102_spill] sm:$0xff] %v6593_v63  ;;  %v4749_v53 = vpop.permute.xlu1 %4748  ;;  %v963_v39 = vpop.permute.xlu0 %962  ;;  %v6609_v60 = vsel %vm964_vm9, %v4741_v44, %v4745_v22 }
 0x130   : > { %8880 = vst [vmem:[#allocation103_spill] sm:$0xff] %v6597_v16  ;;  %8883 = vst [vmem:[#allocation105_spill] sm:$0xff] %v6609_v60  ;;  %v6622_v17 = vsel %vm964_vm9, %v4746_v61, %v963_v39  ;;  %v4751_v39 = vunpack.i.h.bf16 %v4749_v53  ;;  %v4750_v56 = vunpack.i.l.bf16 %v4749_v53  ;;  %vm8726_vm9 = vcmp.lt.s32.totalorder %v5646_v28, 82 }
 0x131   : > { %8884 = vst [vmem:[#allocation106_spill] sm:$0xff] %v6618_v57  ;;  %8885 = vst [vmem:[#allocation107_spill] sm:$0xff] %v6622_v17  ;;  %5013 = vrot.lane.b32.xlu1 %v5804_v51, %s5453_s9  ;;  %5008 = vrot.lane.b32.xlu0 %v5780_v41, %s5453_s9 }
 0x133   : > { %v6632_v44 = vpop.permute.xlu1 %4758  ;;  %v4754_v20 = vpop.permute.xlu0 %4753 }
 0x134   : > { %v4760_v62 = vunpack.i.l.bf16 %v6632_v44  ;;  %v4756_v11 = vunpack.i.h.bf16 %v4754_v20  ;;  %v4755_v61 = vunpack.i.l.bf16 %v4754_v20  ;;  %v8886_v42 = vunpack.i.h.bf16 %v6632_v44 }
 0x135   : > { %5023 = vrot.lane.b32.xlu1 %v5804_v51, %s5454_s10  ;;  %5018 = vrot.lane.b32.xlu0 %v5780_v41, %s5454_s10 }
 0x136   : > { %v1046_v33 = vsel %vm1031_vm10, %v4751_v39, %v4755_v61  ;;  %v1044_v63 = vsel %vm1031_vm10, %v4756_v11, %v4760_v62  ;;  %v1045_v53 = vsel %vm1031_vm10, %v4755_v61, %v4756_v11  ;;  %v6666_v35 = vsel %vm1031_vm10, %v4760_v62, %v8886_v42 }
 0x137   : > { %v4769_v50 = vpop.permute.xlu1 %4768  ;;  %v4764_v55 = vpop.permute.xlu0 %4763 }
 0x138   : > { %v4771_v22 = vunpack.i.h.bf16 %v4769_v50  ;;  %v4770_v37 = vunpack.i.l.bf16 %v4769_v50  ;;  %v4766_v46 = vunpack.i.h.bf16 %v4764_v55  ;;  %v4765_v40 = vunpack.i.l.bf16 %v4764_v55 }
 0x139   : > { %5033 = vrot.lane.b32.xlu1 %v5804_v51, %s5455_s11  ;;  %5028 = vrot.lane.b32.xlu0 %v5780_v41, %s5455_s11 }
 0x13a   : > { %v1113_v50 = vsel %vm1098_vm11, %v4765_v40, %v4766_v46  ;;  %v1111_v55 = vsel %vm1098_vm11, %v4770_v37, %v4771_v22  ;;  %v1112_v20 = vsel %vm1098_vm11, %v4766_v46, %v4770_v37 }
 0x13b   : > { %v4779_v57 = vpop.permute.xlu1 %4778  ;;  %v6658_v17 = vpop.permute.xlu0 %4773  ;;  %v3941_v0 = vpack.c.bf16 %v1113_v50, %v1046_v33  ;;  %v3993_v60 = vpack.c.bf16 %v1111_v55, %v1044_v63  ;;  %v3995_v25 = vpack.c.bf16 %v1112_v20, %v1045_v53  ;;  %v1047_v33 = vsel %vm1031_vm10, %v4750_v56, %v4751_v39 }
 0x13c   : > { %v8700_v34 = vunpack.i.h.bf16 %v6658_v17  ;;  %v4775_v54 = vunpack.i.l.bf16 %v6658_v17  ;;  %v4781_v46 = vunpack.i.h.bf16 %v4779_v57  ;;  %v4780_v63 = vunpack.i.l.bf16 %v4779_v57 }
 0x13d   : > { %5043 = vrot.lane.b32.xlu1 %v5804_v51, %s5456_s12  ;;  %5038 = vrot.lane.b32.xlu0 %v5780_v41, %s5456_s12 }
 0x13e   : > { %v6678_v37 = vsel %vm1098_vm11, %v4771_v22, %v8700_v34  ;;  %3942 = vmatprep.subr.bf16.mxu0 %v3941_v0  ;;  %3994 = vmatprep.subr.bf16.mxu1 %v3993_v60  ;;  %v1114_v42 = vsel %vm1098_vm11, %v4775_v54, %v4765_v40  ;;  %v1180_v60 = vsel %vm1165_vm12, %v4780_v63, %v4781_v46 }
 0x13f   : > { %3996 = vmatpush1.bf16.msra.mxu1 %v3995_v25  ;;  %v4789_v62 = vpop.permute.xlu1 %4788  ;;  %v4784_v11 = vpop.permute.xlu0 %4783  ;;  %v3943_v61 = vpack.c.bf16 %v1114_v42, %v1047_v33 }
 0x140   : > { %v4791_v57 = vunpack.i.h.bf16 %v4789_v62  ;;  %v4790_v39 = vunpack.i.l.bf16 %v4789_v62  ;;  %v4786_v54 = vunpack.i.h.bf16 %v4784_v11  ;;  %v4785_v25 = vunpack.i.l.bf16 %v4784_v11 }
 0x141   : > { %5053 = vrot.lane.b32.xlu1 %v5804_v51, %s5457_s13  ;;  %5048 = vrot.lane.b32.xlu0 %v5780_v41, %s5457_s13 }
 0x142   : > { %3944 = vmatpush1.bf16.msra.mxu0 %v3943_v61  ;;  %v1247_v40 = vsel %vm1232_vm13, %v4790_v39, %v4791_v57  ;;  %v1178_v42 = vsel %vm1165_vm12, %v4785_v25, %v4786_v54  ;;  %v1179_v11 = vsel %vm1165_vm12, %v4781_v46, %v4785_v25 }
 0x143   : > { %v6694_v0 = vpop.permute.xlu1 %4798  ;;  %v4794_v22 = vpop.permute.xlu0 %4793  ;;  %v3945_v20 = vpack.c.bf16 %v1247_v40, %v1180_v60 }
 0x144   : > { %v4796_v50 = vunpack.i.h.bf16 %v4794_v22  ;;  %v4795_v55 = vunpack.i.l.bf16 %v4794_v22  ;;  %v8698_v53 = vunpack.i.h.bf16 %v6694_v0  ;;  %v4800_v33 = vunpack.i.l.bf16 %v6694_v0 }
 0x145   : > { %5063 = vrot.lane.b32.xlu1 %v5804_v51, %s5458_s14  ;;  %5058 = vrot.lane.b32.xlu0 %v5780_v41, %s5458_s14 }
 0x146   : > { %3946 = vmatprep.subr.bf16.mxu0 %v3945_v20  ;;  %v1245_v62 = vsel %vm1232_vm13, %v4795_v55, %v4796_v50  ;;  %v1246_v61 = vsel %vm1232_vm13, %v4791_v57, %v4795_v55  ;;  %v6718_v56 = vsel %vm1165_vm12, %v4786_v54, %v8698_v53  ;;  %v1181_v46 = vsel %vm1165_vm12, %v4800_v33, %v4780_v63 }
 0x147   : > { %v4809_v60 = vpop.permute.xlu1 %4808  ;;  %v6710_v40 = vpop.permute.xlu0 %4803  ;;  %v3997_v51 = vpack.c.bf16 %v1245_v62, %v1178_v42  ;;  %v3999_v22 = vpack.c.bf16 %v1246_v61, %v1179_v11  ;;  %8887 = vst [vmem:[#allocation108_spill] sm:$0xff] %v6718_v56 }
 0x148   : > { %v8699_v41 = vunpack.i.h.bf16 %v6710_v40  ;;  %v4805_v20 = vunpack.i.l.bf16 %v6710_v40  ;;  %v4811_v57 = vunpack.i.h.bf16 %v4809_v60  ;;  %v4810_v25 = vunpack.i.l.bf16 %v4809_v60 }
 0x149   : > { %5073 = vrot.lane.b32.xlu1 %v5577_v23, %s5459_s17  ;;  %5068 = vrot.lane.b32.xlu0 %v5581_v24, %s5459_s17 }
 0x14a   : > { %v6730_v55 = vsel %vm1232_vm13, %v4796_v50, %v8699_v41  ;;  %3998 = vmatprep.subr.bf16.mxu1 %v3997_v51  ;;  %v1248_v54 = vsel %vm1232_vm13, %v4805_v20, %v4790_v39  ;;  %v1314_v60 = vsel %vm1299_vm14, %v4810_v25, %v4811_v57 }
 0x14b   : > { %8888 = vst [vmem:[#allocation109_spill] sm:$0xff] %v6730_v55  ;;  %4000 = vmatpush1.bf16.msra.mxu1 %v3999_v22  ;;  %v4819_v42 = vpop.permute.xlu1 %4818  ;;  %v4814_v62 = vpop.permute.xlu0 %4813  ;;  %v3947_v11 = vpack.c.bf16 %v1248_v54, %v1181_v46 }
 0x14c   : > { %v4821_v33 = vunpack.i.h.bf16 %v4819_v42  ;;  %v4820_v61 = vunpack.i.l.bf16 %v4819_v42  ;;  %v4816_v39 = vunpack.i.h.bf16 %v4814_v62  ;;  %v4815_v50 = vunpack.i.l.bf16 %v4814_v62 }
 0x14d   : > { %5083 = vrot.lane.b32.xlu1 %v5577_v23, %s5460_s18  ;;  %5078 = vrot.lane.b32.xlu0 %v5581_v24, %s5460_s18 }
 0x14e   : > { %3948 = vmatpush1.bf16.msra.mxu0 %v3947_v11  ;;  %v1381_v51 = vsel %vm1366_vm15, %v4820_v61, %v4821_v33  ;;  %v1312_v62 = vsel %vm1299_vm14, %v4815_v50, %v4816_v39 }
 0x14f   : > { %v6746_v22 = vpop.permute.xlu1 %4828  ;;  %v4824_v20 = vpop.permute.xlu0 %4823  ;;  %v3949_v46 = vpack.c.bf16 %v1381_v51, %v1314_v60  ;;  %v1313_v60 = vsel %vm1299_vm14, %v4811_v57, %v4815_v50 }
 0x150   : > { %v4826_v54 = vunpack.i.h.bf16 %v4824_v20  ;;  %v4825_v42 = vunpack.i.l.bf16 %v4824_v20  ;;  %v4830_v53 = vunpack.i.l.bf16 %v6746_v22  ;;  %v8889_v12 = vunpack.i.h.bf16 %v6746_v22 }
 0x151   : > { %5093 = vrot.lane.b32.xlu1 %v5577_v23, %s5461_s19  ;;  %5088 = vrot.lane.b32.xlu0 %v5581_v24, %s5461_s19 }
 0x152   : > { %3950 = vmatprep.subr.bf16.mxu0 %v3949_v46  ;;  %v1379_v11 = vsel %vm1366_vm15, %v4825_v42, %v4826_v54  ;;  %v1380_v51 = vsel %vm1366_vm15, %v4821_v33, %v4825_v42  ;;  %v6770_v3 = vsel %vm1299_vm14, %v4816_v39, %v8889_v12  ;;  %v1315_v57 = vsel %vm1299_vm14, %v4830_v53, %v4810_v25 }
 0x153   : > { %v4839_v20 = vpop.permute.xlu1 %4838  ;;  %v6762_v41 = vpop.permute.xlu0 %4833  ;;  %v4001_v34 = vpack.c.bf16 %v1379_v11, %v1312_v62  ;;  %v4003_v63 = vpack.c.bf16 %v1380_v51, %v1313_v60  ;;  %8890 = vst [vmem:[#allocation110_spill] sm:$0xff] %v6770_v3 }
 0x154   : > { %v8704_v16 = vunpack.i.h.bf16 %v6762_v41  ;;  %v4835_v46 = vunpack.i.l.bf16 %v6762_v41  ;;  %v4841_v33 = vunpack.i.h.bf16 %v4839_v20  ;;  %v4840_v50 = vunpack.i.l.bf16 %v4839_v20 }
 0x155   : > { %5103 = vrot.lane.b32.xlu1 %v5577_v23, %s5462_s20  ;;  %5098 = vrot.lane.b32.xlu0 %v5581_v24, %s5462_s20 }
 0x156   : > { %v6782_v42 = vsel %vm1366_vm15, %v4826_v54, %v8704_v16  ;;  %4002 = vmatprep.subr.bf16.mxu1 %v4001_v34  ;;  %v1382_v12 = vsel %vm1366_vm15, %v4835_v46, %v4820_v61  ;;  %v1448_v61 = vsel %vm8742_vm1, %v4840_v50, %v4841_v33 }
 0x157   : > { %8891 = vst [vmem:[#allocation111_spill] sm:$0xff] %v6782_v42  ;;  %4004 = vmatpush1.bf16.msra.mxu1 %v4003_v63  ;;  %v4849_v39 = vpop.permute.xlu1 %4848  ;;  %v4844_v62 = vpop.permute.xlu0 %4843  ;;  %v3951_v11 = vpack.c.bf16 %v1382_v12, %v1315_v57 }
 0x158   : > { %v4851_v25 = vunpack.i.h.bf16 %v4849_v39  ;;  %v4850_v60 = vunpack.i.l.bf16 %v4849_v39  ;;  %v4846_v34 = vunpack.i.h.bf16 %v4844_v62  ;;  %v4845_v63 = vunpack.i.l.bf16 %v4844_v62 }
 0x159   : > { %5113 = vrot.lane.b32.xlu1 %v5577_v23, %s5463_s21  ;;  %5108 = vrot.lane.b32.xlu0 %v5581_v24, %s5463_s21 }
 0x15a   : > { %3952 = vmatpush1.bf16.msra.mxu0 %v3951_v11  ;;  %v1515_v54 = vsel %vm8741_vm2, %v4850_v60, %v4851_v25  ;;  %v1446_v62 = vsel %vm8742_vm1, %v4845_v63, %v4846_v34 }
 0x15b   : > { %v6798_v51 = vpop.permute.xlu1 %4858  ;;  %v4854_v20 = vpop.permute.xlu0 %4853  ;;  %v3953_v46 = vpack.c.bf16 %v1515_v54, %v1448_v61  ;;  %v1447_v61 = vsel %vm8742_vm1, %v4841_v33, %v4845_v63 }
 0x15c   : > { %v4856_v57 = vunpack.i.h.bf16 %v4854_v20  ;;  %v4855_v12 = vunpack.i.l.bf16 %v4854_v20  ;;  %v4860_v53 = vunpack.i.l.bf16 %v6798_v51  ;;  %v8892_v56 = vunpack.i.h.bf16 %v6798_v51 }
 0x15d   : > { %5123 = vrot.lane.b32.xlu1 %v5577_v23, %s5464_s22  ;;  %5118 = vrot.lane.b32.xlu0 %v5581_v24, %s5464_s22 }
 0x15e   : > { %3954 = vmatprep.subr.bf16.mxu0 %v3953_v46  ;;  %v1513_v11 = vsel %vm8741_vm2, %v4855_v12, %v4856_v57  ;;  %v1514_v54 = vsel %vm8741_vm2, %v4851_v25, %v4855_v12  ;;  %v6822_v55 = vsel %vm8742_vm1, %v4846_v34, %v8892_v56  ;;  %v1449_v33 = vsel %vm8742_vm1, %v4860_v53, %v4840_v50 }
 0x15f   : > { %v4869_v20 = vpop.permute.xlu1 %4868  ;;  %v6814_v16 = vpop.permute.xlu0 %4863  ;;  %v4005_v39 = vpack.c.bf16 %v1513_v11, %v1446_v62  ;;  %v4007_v3 = vpack.c.bf16 %v1514_v54, %v1447_v61  ;;  %8893 = vst [vmem:[#allocation112_spill] sm:$0xff] %v6822_v55 }
 0x160   : > { %v8709_v42 = vunpack.i.h.bf16 %v6814_v16  ;;  %v4865_v46 = vunpack.i.l.bf16 %v6814_v16  ;;  %v4871_v25 = vunpack.i.h.bf16 %v4869_v20  ;;  %v4870_v63 = vunpack.i.l.bf16 %v4869_v20 }
 0x161   : > { %5133 = vrot.lane.b32.xlu1 %v5577_v23, %s5465_s23  ;;  %5128 = vrot.lane.b32.xlu0 %v5581_v24, %s5465_s23 }
 0x162   : > { %v6834_v12 = vsel %vm8741_vm2, %v4856_v57, %v8709_v42  ;;  %4006 = vmatprep.subr.bf16.mxu1 %v4005_v39  ;;  %v1516_v56 = vsel %vm8741_vm2, %v4865_v46, %v4850_v60  ;;  %v1582_v57 = vsel %vm8739_vm3, %v4870_v63, %v4871_v25 }
 0x163   : > { %4008 = vmatpush1.bf16.msra.mxu1 %v4007_v3  ;;  %v4879_v34 = vpop.permute.xlu1 %4878  ;;  %v4874_v62 = vpop.permute.xlu0 %4873  ;;  %v3955_v11 = vpack.c.bf16 %v1516_v56, %v1449_v33 }
 0x164   : > { %v4881_v53 = vunpack.i.h.bf16 %v4879_v34  ;;  %v4880_v61 = vunpack.i.l.bf16 %v4879_v34  ;;  %v4876_v60 = vunpack.i.h.bf16 %v4874_v62  ;;  %v4875_v3 = vunpack.i.l.bf16 %v4874_v62 }
 0x165   : > { %5143 = vrot.lane.b32.xlu1 %v5577_v23, %s5466_s25  ;;  %5138 = vrot.lane.b32.xlu0 %v5581_v24, %s5466_s25 }
 0x166   : > { %3956 = vmatpush1.bf16.msra.mxu0 %v3955_v11  ;;  %v1649_v39 = vsel %vm8738_vm4, %v4880_v61, %v4881_v53  ;;  %v1580_v24 = vsel %vm8739_vm3, %v4875_v3, %v4876_v60  ;;  %v1581_v11 = vsel %vm8739_vm3, %v4871_v25, %v4875_v3 }
 0x167   : > { %v6850_v54 = vpop.permute.xlu1 %4888  ;;  %v4884_v20 = vpop.permute.xlu0 %4883  ;;  %v3957_v46 = vpack.c.bf16 %v1649_v39, %v1582_v57 }
 0x168   : > { %v4886_v33 = vunpack.i.h.bf16 %v4884_v20  ;;  %v4885_v56 = vunpack.i.l.bf16 %v4884_v20  ;;  %v4890_v34 = vunpack.i.l.bf16 %v6850_v54 }
 0x169   : > { %2081 = vrot.lane.b32.xlu1 %v5533_v8, %s5467_s28  ;;  %2079 = vrot.lane.b32.xlu0 %v5531_v7, %s5467_s28  ;;  %v8894_v8 = vunpack.i.h.bf16 %v6850_v54 }
 0x16a   : > { %3958 = vmatprep.subr.bf16.mxu0 %v3957_v46  ;;  %v1647_v62 = vsel %vm8738_vm4, %v4885_v56, %v4886_v33  ;;  %v1648_v57 = vsel %vm8738_vm4, %v4881_v53, %v4885_v56  ;;  %v1583_v25 = vsel %vm8739_vm3, %v4890_v34, %v4870_v63 }
 0x16b   : > { %v4899_v39 = vpop.permute.xlu1 %4898  ;;  %v6866_v20 = vpop.permute.xlu0 %4893  ;;  %v4009_v50 = vpack.c.bf16 %v1647_v62, %v1580_v24  ;;  %v4011_v42 = vpack.c.bf16 %v1648_v57, %v1581_v11  ;;  %v6874_v55 = vsel %vm8739_vm3, %v4876_v60, %v8894_v8 }
 0x16c   : > { %v8712_v23 = vunpack.i.h.bf16 %v6866_v20  ;;  %v4895_v46 = vunpack.i.l.bf16 %v6866_v20  ;;  %8895 = vst [vmem:[#allocation113_spill] sm:$0xff] %v6874_v55  ;;  %v4901_v53 = vunpack.i.h.bf16 %v4899_v39  ;;  %v4900_v3 = vunpack.i.l.bf16 %v4899_v39 }
 0x16d   : > { %2085 = vrot.lane.b32.xlu1 %v5537_v10, %s5467_s28  ;;  %2083 = vrot.lane.b32.xlu0 %v5535_v9, %s5467_s28 }
 0x16e   : > { %v6886_v56 = vsel %vm8738_vm4, %v4886_v33, %v8712_v23  ;;  %4010 = vmatprep.subr.bf16.mxu1 %v4009_v50  ;;  %v1650_v8 = vsel %vm8738_vm4, %v4895_v46, %v4880_v61  ;;  %v1716_v61 = vsel %vm8747_vm5, %v4900_v3, %v4901_v53 }
 0x16f   : > { %8896 = vst [vmem:[#allocation114_spill] sm:$0xff] %v6886_v56  ;;  %4012 = vmatpush1.bf16.msra.mxu1 %v4011_v42  ;;  %v4909_v60 = vpop.permute.xlu1 %4908  ;;  %v4904_v24 = vpop.permute.xlu0 %4903  ;;  %v3959_v62 = vpack.c.bf16 %v1650_v8, %v1583_v25 }
 0x170   : > { %v4911_v34 = vunpack.i.h.bf16 %v4909_v60  ;;  %v4910_v11 = vunpack.i.l.bf16 %v4909_v60  ;;  %v4906_v50 = vunpack.i.h.bf16 %v4904_v24  ;;  %v4905_v42 = vunpack.i.l.bf16 %v4904_v24 }
 0x171   : > { %5153 = vrot.lane.b32.xlu1 %v5819_v31, %s5451_s7  ;;  %5148 = vrot.lane.b32.xlu0 %v5800_v48, %s5451_s7 }
 0x172   : > { %3960 = vmatpush1.bf16.msra.mxu0 %v3959_v62  ;;  %v1783_v33 = vsel %vm8722_vm6, %v4910_v11, %v4911_v34  ;;  %v1714_v24 = vsel %vm8747_vm5, %v4905_v42, %v4906_v50 }
 0x173   : > { %v6902_v57 = vpop.permute.xlu1 %4918  ;;  %v4914_v39 = vpop.permute.xlu0 %4913  ;;  %v3961_v46 = vpack.c.bf16 %v1783_v33, %v1716_v61  ;;  %v1715_v61 = vsel %vm8747_vm5, %v4901_v53, %v4905_v42 }
 0x174   : > { %8897 = vst [vmem:[#allocation115_spill] sm:$0xff] %v6902_v57  ;;  %v4916_v25 = vunpack.i.h.bf16 %v4914_v39  ;;  %v4915_v8 = vunpack.i.l.bf16 %v4914_v39  ;;  %v4920_v63 = vunpack.i.l.bf16 %v6902_v57  ;;  %v8899_v55 = vunpack.i.h.bf16 %v6902_v57 }
 0x175   : > { %5163 = vrot.lane.b32.xlu1 %v5819_v31, %s5452_s8  ;;  %5158 = vrot.lane.b32.xlu0 %v5800_v48, %s5452_s8 }
 0x176   : > { %3962 = vmatprep.subr.bf16.mxu0 %v3961_v46  ;;  %v1781_v62 = vsel %vm8722_vm6, %v4915_v8, %v4916_v25  ;;  %v1782_v33 = vsel %vm8722_vm6, %v4911_v34, %v4915_v8  ;;  %v6926_v56 = vsel %vm8747_vm5, %v4906_v50, %v8899_v55  ;;  %v1717_v53 = vsel %vm8747_vm5, %v4920_v63, %v4900_v3 }
 0x177   : > { %v4929_v39 = vpop.permute.xlu1 %4928  ;;  %v6918_v23 = vpop.permute.xlu0 %4923  ;;  %v4013_v60 = vpack.c.bf16 %v1781_v62, %v1714_v24  ;;  %v4015_v10 = vpack.c.bf16 %v1782_v33, %v1715_v61  ;;  %8900 = vst [vmem:[#allocation117_spill] sm:$0xff] %v6926_v56 }
 0x178   : > { %8898 = vst [vmem:[#allocation116_spill] sm:$0xff] %v6918_v23  ;;  %v8717_v9 = vunpack.i.h.bf16 %v6918_v23  ;;  %v4925_v46 = vunpack.i.l.bf16 %v6918_v23  ;;  %v4931_v34 = vunpack.i.h.bf16 %v4929_v39  ;;  %v4930_v42 = vunpack.i.l.bf16 %v4929_v39 }
 0x179   : > { %5173 = vrot.lane.b32.xlu1 %v5819_v31, %s5453_s9  ;;  %5168 = vrot.lane.b32.xlu0 %v5800_v48, %s5453_s9 }
 0x17a   : > { %v6938_v8 = vsel %vm8722_vm6, %v4916_v25, %v8717_v9  ;;  %4014 = vmatprep.subr.bf16.mxu1 %v4013_v60  ;;  %v1784_v55 = vsel %vm8722_vm6, %v4925_v46, %v4910_v11  ;;  %v1850_v25 = vsel %vm8723_vm7, %v4930_v42, %v4931_v34  ;;  %vm1969_vm6 = vcmp.lt.s32.totalorder %v5646_v28, 72 }
 0x17b   : > { %8901 = vst [vmem:[#allocation118_spill] sm:$0xff] %v6938_v8  ;;  %4016 = vmatpush1.bf16.msra.mxu1 %v4015_v10  ;;  %v4939_v50 = vpop.permute.xlu1 %4938  ;;  %v4934_v24 = vpop.permute.xlu0 %4933  ;;  %v3963_v62 = vpack.c.bf16 %v1784_v55, %v1717_v53 }
 0x17c   : > { %v4941_v63 = vunpack.i.h.bf16 %v4939_v50  ;;  %v4940_v61 = vunpack.i.l.bf16 %v4939_v50  ;;  %v4936_v11 = vunpack.i.h.bf16 %v4934_v24  ;;  %v4935_v10 = vunpack.i.l.bf16 %v4934_v24 }
 0x17d   : > { %5183 = vrot.lane.b32.xlu1 %v5819_v31, %s5454_s10  ;;  %5178 = vrot.lane.b32.xlu0 %v5800_v48, %s5454_s10 }
 0x17e   : > { %3964 = vmatpush1.bf16.msra.mxu0 %v3963_v62  ;;  %v1917_v60 = vsel %vm8726_vm9, %v4940_v61, %v4941_v63  ;;  %v1848_v24 = vsel %vm8723_vm7, %v4935_v10, %v4936_v11 }
 0x17f   : > { %v6954_v33 = vpop.permute.xlu1 %4948  ;;  %v4944_v39 = vpop.permute.xlu0 %4943  ;;  %v3965_v46 = vpack.c.bf16 %v1917_v60, %v1850_v25  ;;  %v1849_v25 = vsel %vm8723_vm7, %v4931_v34, %v4935_v10 }
 0x180   : > { %v4946_v53 = vunpack.i.h.bf16 %v4944_v39  ;;  %v4945_v55 = vunpack.i.l.bf16 %v4944_v39  ;;  %v4950_v3 = vunpack.i.l.bf16 %v6954_v33  ;;  %v8902_v23 = vunpack.i.h.bf16 %v6954_v33 }
 0x181   : > { %5193 = vrot.lane.b32.xlu1 %v5819_v31, %s5455_s11  ;;  %5188 = vrot.lane.b32.xlu0 %v5800_v48, %s5455_s11 }
 0x182   : > { %3966 = vmatprep.subr.bf16.mxu0 %v3965_v46  ;;  %v1915_v62 = vsel %vm8726_vm9, %v4945_v55, %v4946_v53  ;;  %v1916_v60 = vsel %vm8726_vm9, %v4941_v63, %v4945_v55  ;;  %v6978_v57 = vsel %vm8723_vm7, %v4936_v11, %v8902_v23  ;;  %v1851_v34 = vsel %vm8723_vm7, %v4950_v3, %v4930_v42 }
 0x183   : > { %v4959_v39 = vpop.permute.xlu1 %4958  ;;  %v6970_v9 = vpop.permute.xlu0 %4953  ;;  %v4017_v50 = vpack.c.bf16 %v1915_v62, %v1848_v24  ;;  %v4019_v56 = vpack.c.bf16 %v1916_v60, %v1849_v25  ;;  %8903 = vst [vmem:[#allocation119_spill] sm:$0xff] %v6978_v57  ;;  %vm2036_vm7 = vcmp.lt.s32.totalorder %v5646_v28, 71 }
 0x184   : > { %v8724_v8 = vunpack.i.h.bf16 %v6970_v9  ;;  %v4955_v46 = vunpack.i.l.bf16 %v6970_v9  ;;  %v4961_v63 = vunpack.i.h.bf16 %v4959_v39  ;;  %v4960_v10 = vunpack.i.l.bf16 %v4959_v39 }
 0x185   : > { %5203 = vrot.lane.b32.xlu1 %v5819_v31, %s5456_s12  ;;  %5198 = vrot.lane.b32.xlu0 %v5800_v48, %s5456_s12 }
 0x186   : > { %v6990_v55 = vsel %vm8726_vm9, %v4946_v53, %v8724_v8  ;;  %4018 = vmatprep.subr.bf16.mxu1 %v4017_v50  ;;  %v1918_v23 = vsel %vm8726_vm9, %v4955_v46, %v4940_v61  ;;  %vm2103_vm9 = vcmp.lt.s32.totalorder %v5646_v28, 70 }
 0x187   : > { %4020 = vmatpush1.bf16.msra.mxu1 %v4019_v56  ;;  %v4969_v11 = vpop.permute.xlu1 %4968  ;;  %v4964_v24 = vpop.permute.xlu0 %4963  ;;  %v3967_v62 = vpack.c.bf16 %v1918_v23, %v1851_v34  ;;  %v1984_v56 = vsel %vm1969_vm6, %v4960_v10, %v4961_v63 }
 0x188   : > { %v4971_v3 = vunpack.i.h.bf16 %v4969_v11  ;;  %v4970_v25 = vunpack.i.l.bf16 %v4969_v11  ;;  %v4966_v60 = vunpack.i.h.bf16 %v4964_v24  ;;  %v4965_v53 = vunpack.i.l.bf16 %v4964_v24 }
 0x189   : > { %5213 = vrot.lane.b32.xlu1 %v5819_v31, %s5457_s13  ;;  %5208 = vrot.lane.b32.xlu0 %v5800_v48, %s5457_s13 }
 0x18a   : > { %3968 = vmatpush1.bf16.msra.mxu0 %v3967_v62  ;;  %v2051_v61 = vsel %vm2036_vm7, %v4970_v25, %v4971_v3  ;;  %v1982_v11 = vsel %vm1969_vm6, %v4965_v53, %v4966_v60  ;;  %v1983_v24 = vsel %vm1969_vm6, %v4961_v63, %v4965_v53  ;;  %v4405_v53 = vunpack.i.l.bf16 %v5667_v36 }
 0x18b   : > { %v7006_v50 = vpop.permute.xlu1 %4978  ;;  %v4974_v39 = vpop.permute.xlu0 %4973  ;;  %v3969_v46 = vpack.c.bf16 %v2051_v61, %v1984_v56 }
 0x18c   : > { %v4976_v34 = vunpack.i.h.bf16 %v4974_v39  ;;  %v4975_v23 = vunpack.i.l.bf16 %v4974_v39  ;;  %v8727_v62 = vunpack.i.h.bf16 %v7006_v50  ;;  %v4980_v42 = vunpack.i.l.bf16 %v7006_v50 }
 0x18d   : > { %5223 = vrot.lane.b32.xlu1 %v5819_v31, %s5458_s14  ;;  %5218 = vrot.lane.b32.xlu0 %v5800_v48, %s5458_s14 }
 0x18e   : > { %3970 = vmatprep.subr.bf16.mxu0 %v3969_v46  ;;  %v2049_v56 = vsel %vm2036_vm7, %v4975_v23, %v4976_v34  ;;  %v2050_v31 = vsel %vm2036_vm7, %v4971_v3, %v4975_v23  ;;  %v7036_v3 = vsel %vm1969_vm6, %v4966_v60, %v8727_v62  ;;  %v1985_v23 = vsel %vm1969_vm6, %v4980_v42, %v4960_v10 }
 0x18f   : > { %v2072_v61 = vpop.permute.xlu1 %2071  ;;  %v7022_v39 = vpop.permute.xlu0 %4983  ;;  %v4021_v48 = vpack.c.bf16 %v2049_v56, %v1982_v11  ;;  %v4023_v8 = vpack.c.bf16 %v2050_v31, %v1983_v24  ;;  %v8932_v60 = vunpack.i.h.bf16 %v6658_v17 }
 0x190   : > { %v8730_v57 = vunpack.i.h.bf16 %v7022_v39  ;;  %v4985_v63 = vunpack.i.l.bf16 %v7022_v39 }
 0x191   : > { %1557 = vrot.lane.b32.xlu1 %v5545_v14, %s5459_s17  ;;  %5228 = vrot.lane.b32.xlu0 %v5591_v26, %s5459_s17 }
 0x192   : > { %v7042_v46 = vsel %vm2036_vm7, %v4976_v34, %v8730_v57  ;;  %4022 = vmatprep.subr.bf16.mxu1 %v4021_v48  ;;  %v2052_v11 = vsel %vm2036_vm7, %v4985_v63, %v4970_v25  ;;  %v4406_v34 = vunpack.i.h.bf16 %v5667_v36  ;;  %v8905_v48 = vunpack.i.l.bf16 %v5683_v45 }
 0x193   : > { %4024 = vmatpush1.bf16.msra.mxu1 %v4023_v8  ;;  %v2076_v24 = vpop.permute.xlu1 %2075  ;;  %v2074_v56 = vpop.permute.xlu0 %2073  ;;  %v3971_v31 = vpack.c.bf16 %v2052_v11, %v1985_v23  ;;  %v8904_v8 = vunpack.i.h.bf16 %v5652_v29 }
 0x194   : > { %v2118_v62 = vsel %vm2103_vm9, %v2072_v61, %v2074_v56  ;;  %v437_v36 = vsel %vm428_vm0, %v4406_v34, %v8905_v48  ;;  %v2117_v11 = vsel %vm2103_vm9, %v2074_v56, %v2076_v24  ;;  %v8908_v48 = vpack.c.bf16 %v5909_v27, %v5863_v18 }
 0x195   : > { %1624 = vrot.lane.b32.xlu1 %v5545_v14, %s5460_s18  ;;  %5233 = vrot.lane.b32.xlu0 %v5591_v26, %s5460_s18  ;;  %v439_v10 = vsel %vm428_vm0, %v8904_v8, %v4405_v53  ;;  %v8911_v27 = vpack.c.bf16 %v6090_v32, %v6064_v15  ;;  %v8916_v32 = vld [vmem:[#allocation58_spill] sm:$0xff] }
 0x196   : > { %3972 = vmatpush1.bf16.msra.mxu0 %v3971_v31  ;;  %v4025_v29 = vpack.c.bf16 %v439_v10, %v5527_v5  ;;  %v4077_v31 = vpack.c.bf16 %v437_v36, %v5531_v7  ;;  %v8906_v10 = vld [vmem:[#allocation21_spill] sm:$0xff]  ;;  %v8909_v36 = vld [vmem:[#allocation28_spill] sm:$0xff] }
 0x197   : > { %2641 = vmatprep.subr.mxu0 %v2118_v62  ;;  %v2070_v42 = vpop.permute.xlu1 %2069  ;;  %v7061_v25 = vpop.permute.xlu0 %2077  ;;  %v7080_v62 = vld [vmem:[%s8582_s2] sm:$0xff]  ;;  %v7099_v7 = vld [vmem:[%s8582_s2 + $0x18] sm:$0xff] }
 0x198   : > { %v2119_v63 = vsel %vm2103_vm9, %v2070_v42, %v2072_v61  ;;  %v2116_v23 = vsel %vm2103_vm9, %v2076_v24, %v7061_v25  ;;  %v438_v61 = vsel %vm428_vm0, %v4405_v53, %v4406_v34  ;;  %v4027_v42 = vpack.c.bf16 %v8906_v10, %v5525_v4  ;;  %v8917_v10 = vld [vmem:[#allocation52_spill] sm:$0xff] }
 0x199   : > { %1691 = vrot.lane.b32.xlu1 %v5545_v14, %s5461_s19  ;;  %5238 = vrot.lane.b32.xlu0 %v5591_v26, %s5461_s19  ;;  %v4079_v53 = vpack.c.bf16 %v438_v61, %v5529_v6  ;;  %v8907_v24 = vpack.c.bf16 %v5879_v58, %v5859_v49 }
 0x19a   : > { %2642 = vmatpush1.msra.mxu0 %v2119_v63  ;;  %2730 = vmatprep.subr.mxu1 %v2116_v23  ;;  %v8910_v63 = vpack.c.bf16 %v5871_v52, %v8909_v36  ;;  %v7127_v23 = vld [vmem:[%s8582_s2 + $0x10] sm:$0xff]  ;;  %v8912_v52 = vld [vmem:[#allocation34_spill] sm:$0xff] }
 0x19b   : > { %2731 = vmatpush1.msra.mxu1 %v2117_v11  ;;  %4026 = vmatprep.subr.bf16.mxu0 %v4025_v29  ;;  %v7087_v8 = vpop.permute.xlu1 %4993  ;;  %v7089_v5 = vpop.permute.xlu0 %4988  ;;  %v8913_v29 = vld [vmem:[#allocation32_spill] sm:$0xff] }
 0x19c   : > { %2654 = vmatmul.mubr.f32.vlgmr.msra.gmra.mrb[0].mxu0 %v7080_v62  ;;  %4078 = vmatprep.subr.bf16.mxu1 %v4077_v31  ;;  %v8728_v56 = vunpack.i.h.bf16 %v7087_v8  ;;  %v8731_v34 = vunpack.i.l.bf16 %v7087_v8  ;;  %v8914_v61 = vpack.c.bf16 %v8912_v52, %v8913_v29  ;;  %v4991_v52 = vunpack.i.h.bf16 %v7089_v5 }
 0x19d   : > { %4028 = vmatpush1.bf16.msra.mxu0 %v4027_v42  ;;  %2743 = vmatmul.mubr.f32.vlgmr.msra.gmra.mrb[0].mxu1 %v7080_v62  ;;  %v8918_v42 = vpack.c.bf16 %v8916_v32, %v8917_v10  ;;  %v4990_v29 = vunpack.i.l.bf16 %v7089_v5  ;;  %v8923_v32 = vld [vmem:[#allocation53_spill] sm:$0xff]  ;;  %v8924_v10 = vld [vmem:[#allocation51_spill] sm:$0xff] }
 0x19e   : > { %4030 = vmatprep.subr.bf16.mxu0 %v8907_v24  ;;  %4080 = vmatpush1.bf16.msra.mxu1 %v4079_v53  ;;  %v7155_v15 = vsel %vm1031_vm10, %v8731_v34, %v8728_v56  ;;  %v8919_v24 = vld [vmem:[#allocation54_spill] sm:$0xff] }
 0x19f   : > { %1758 = vrot.lane.b32.xlu1 %v5545_v14, %s5462_s20  ;;  %5243 = vrot.lane.b32.xlu0 %v5591_v26, %s5462_s20  ;;  %v7108_v4 = vpop.permute.xlu1 %5003  ;;  %v4999_v6 = vpop.permute.xlu0 %4998  ;;  %8915 = vst [vmem:[#allocation21_spill] sm:$0xff] %v7155_v15  ;;  %v8930_v56 = vld [vmem:[#allocation70_spill] sm:$0xff] }
 0x1a0   : > { %4082 = vmatprep.subr.bf16.mxu1 %v8908_v48  ;;  %v8729_v49 = vunpack.i.h.bf16 %v7108_v4  ;;  %v5005_v58 = vunpack.i.l.bf16 %v7108_v4  ;;  %3880 = vmatprep.mubr.msk.f32.mxu0 %vm2576_vm8, %v7099_v7  ;;  %v5000_v53 = vunpack.i.l.bf16 %v4999_v6  ;;  %v8920_v48 = vld [vmem:[#allocation48_spill] sm:$0xff] }
 0x1a1   : > { %4032 = vmatpush1.bf16.msra.mxu0 %v8910_v63  ;;  %3884 = vmatprep.mubr.msk.f32.mxu1 %vm2576_vm8, %v7099_v7  ;;  %v8921_v36 = vpack.c.bf16 %v8919_v24, %v8920_v48  ;;  %v7168_v63 = vld [vmem:[%s8582_s2 + $0x28] sm:$0xff]  ;;  %v5001_v24 = vunpack.i.h.bf16 %v4999_v6 }
 0x1a2   : > { %v7133_v18 = vsel %vm1098_vm11, %v5005_v58, %v8729_v49  ;;  %4034 = vmatprep.subr.bf16.mxu0 %v8911_v27  ;;  %4084 = vmatpush1.bf16.msra.mxu1 %v8914_v61  ;;  %v8922_v61 = vpack.c.bf16 %v6299_v43, %v6273_v38  ;;  %v8926_v38 = vld [vmem:[#allocation81_spill] sm:$0xff]  ;;  %v8927_v43 = vld [vmem:[#allocation74_spill] sm:$0xff]  ;;  %v1109_v57 = vsel %vm1098_vm11, %v8932_v60, %v5000_v53 }
 0x1a3   : > { %1825 = vrot.lane.b32.xlu1 %v5545_v14, %s5463_s21  ;;  %5248 = vrot.lane.b32.xlu0 %v5591_v26, %s5463_s21  ;;  %v7145_v11 = vpop.permute.xlu1 %5013  ;;  %v7147_v31 = vpop.permute.xlu0 %5008  ;;  %v1108_v48 = vsel %vm1098_vm11, %v5000_v53, %v5001_v24 }
 0x1a4   : > { %4086 = vmatprep.subr.bf16.mxu1 %v8918_v42  ;;  %2660 = vmatmul.mubr.f32.gmra.mrb[2].mxu0 %v7127_v23  ;;  %v8925_v42 = vpack.c.bf16 %v8923_v32, %v8924_v10  ;;  %v5015_v27 = vunpack.i.l.bf16 %v7145_v11  ;;  %v5011_v15 = vunpack.i.h.bf16 %v7147_v31 }
 0x1a5   : > { %4036 = vmatpush1.bf16.msra.mxu0 %v8921_v36  ;;  %2749 = vmatmul.mubr.f32.gmra.mrb[2].mxu1 %v7127_v23 }
 0x1a6   : > { %4038 = vmatprep.subr.bf16.mxu0 %v8922_v61  ;;  %4088 = vmatpush1.bf16.msra.mxu1 %v8925_v42  ;;  %v8928_v61 = vpack.c.bf16 %v8926_v38, %v8927_v43  ;;  %v8929_v42 = vld [vmem:[#allocation76_spill] sm:$0xff]  ;;  %v7207_v38 = vld [vmem:[%s8582_s2 + $0x20] sm:$0xff]  ;;  %v1041_v43 = vsel %vm1031_vm10, %v4990_v29, %v4991_v52 }
 0x1a7   : > { %1892 = vrot.lane.b32.xlu1 %v5545_v14, %s5464_s22  ;;  %5253 = vrot.lane.b32.xlu0 %v5591_v26, %s5464_s22  ;;  %v7185_v36 = vpop.permute.xlu1 %5023  ;;  %v5019_v5 = vpop.permute.xlu0 %5018  ;;  %v8931_v49 = vpack.c.bf16 %v8929_v42, %v8930_v56  ;;  %v8933_v56 = vpack.c.bf16 %v6527_v13, %v6507_v59  ;;  %v8935_v42 = vld [vmem:[#allocation73_spill] sm:$0xff]  ;;  %v8937_v59 = vunpack.i.h.bf16 %v6632_v44 }
 0x1a8   : > { %4090 = vmatprep.subr.bf16.mxu1 %v8928_v61  ;;  %v8733_v32 = vunpack.i.h.bf16 %v7185_v36  ;;  %v5025_v6 = vunpack.i.l.bf16 %v7185_v36  ;;  %v5020_v10 = vunpack.i.l.bf16 %v5019_v5  ;;  %3881 = vmatprep.mubr.msk.f32.mxu0 %vm2576_vm8, %v7168_v63  ;;  %v5010_v61 = vunpack.i.l.bf16 %v7147_v31 }
 0x1a9   : > { %4040 = vmatpush1.bf16.msra.mxu0 %v8931_v49  ;;  %3885 = vmatprep.mubr.msk.f32.mxu1 %vm2576_vm8, %v7168_v63  ;;  %v5021_v60 = vunpack.i.h.bf16 %v5019_v5  ;;  %v8934_v49 = vld [vmem:[#allocation75_spill] sm:$0xff]  ;;  %v1042_v13 = vsel %vm1031_vm10, %v8937_v59, %v4990_v29  ;;  %v8938_v31 = vunpack.i.h.bf16 %v7145_v11  ;;  %v8942_v59 = vunpack.i.l.bf16 %v7087_v8 }
 0x1aa   : > { %v7216_v17 = vsel %vm1232_vm13, %v5025_v6, %v8733_v32  ;;  %4042 = vmatprep.subr.bf16.mxu0 %v8933_v56  ;;  %v8936_v34 = vpack.c.bf16 %v8934_v49, %v8935_v42  ;;  %v8939_v56 = vpack.c.bf16 %v6551_v19, %v6511_v47  ;;  %v4045_v49 = vpack.c.bf16 %v1109_v57, %v1042_v13  ;;  %v7268_v19 = vld [vmem:[%s8582_s2 + $0x38] sm:$0xff] }
 0x1ab   : > { %1959 = vrot.lane.b32.xlu1 %v5545_v14, %s5465_s23  ;;  %5258 = vrot.lane.b32.xlu0 %v5591_v26, %s5465_s23  ;;  %v7231_v5 = vpop.permute.xlu1 %5033  ;;  %v7233_v32 = vpop.permute.xlu0 %5028  ;;  %v7245_v53 = vsel %vm1165_vm12, %v5015_v27, %v8938_v31  ;;  %v8940_v42 = vunpack.i.h.bf16 %v6710_v40  ;;  %v1040_v47 = vsel %vm1031_vm10, %v4991_v52, %v8942_v59  ;;  %v8944_v52 = vunpack.i.h.bf16 %v6694_v0 }
 0x1ac   : > { %4092 = vmatpush1.bf16.msra.mxu1 %v8936_v34  ;;  %v1107_v34 = vsel %vm1098_vm11, %v5001_v24, %v5005_v58  ;;  %2666 = vmatmul.mubr.f32.gmra.mrb[4].mxu0 %v7207_v38  ;;  %v8744_v58 = vunpack.i.h.bf16 %v7231_v5  ;;  %v5035_v29 = vunpack.i.l.bf16 %v7231_v5  ;;  %v8941_v24 = vpack.c.bf16 %v6519_v2, %v6421_v30 }
 0x1ad   : > { %4094 = vmatprep.subr.bf16.mxu1 %v8939_v56  ;;  %v1243_v44 = vsel %vm1232_vm13, %v8940_v42, %v5020_v10  ;;  %2755 = vmatmul.mubr.f32.gmra.mrb[4].mxu1 %v7207_v38  ;;  %v5030_v57 = vunpack.i.l.bf16 %v7233_v32  ;;  %v8943_v30 = vpack.c.bf16 %v6515_v1, %v6489_v21  ;;  %v4097_v2 = vpack.c.bf16 %v1107_v34, %v1040_v47 }
 0x1ae   : > { %4044 = vmatpush1.bf16.msra.mxu0 %v8941_v24  ;;  %v1176_v13 = vsel %vm1165_vm12, %v8944_v52, %v5010_v61  ;;  %v1241_v31 = vsel %vm1232_vm13, %v5021_v60, %v5025_v6  ;;  %v4099_v1 = vpack.c.bf16 %v1108_v48, %v1041_v43  ;;  %v1174_v0 = vsel %vm1165_vm12, %v5011_v15, %v5015_v27  ;;  %v8949_v52 = vld [vmem:[#allocation13_spill] sm:$0xff] }
 0x1af   : > { %4046 = vmatprep.subr.bf16.mxu0 %v4045_v49  ;;  %2026 = vrot.lane.b32.xlu1 %v5545_v14, %s5466_s25  ;;  %v7286_v56 = vpop.permute.xlu1 %5043  ;;  %v5039_v49 = vpop.permute.xlu0 %5038  ;;  %v4049_v21 = vpack.c.bf16 %v1243_v44, %v1176_v13  ;;  %v7300_v48 = vsel %vm1299_vm14, %v5035_v29, %v8744_v58  ;;  %v5031_v27 = vunpack.i.h.bf16 %v7233_v32  ;;  %v8945_v43 = vpack.c.bf16 %v6678_v37, %v6666_v35 }
 0x1b0   : > { %4096 = vmatpush1.bf16.msra.mxu1 %v8943_v30  ;;  %5263 = vrot.lane.b32.xlu0 %v5591_v26, %s5466_s25  ;;  %v8745_v34 = vunpack.i.h.bf16 %v7286_v56  ;;  %v5045_v42 = vunpack.i.l.bf16 %v7286_v56  ;;  %v5041_v6 = vunpack.i.h.bf16 %v5039_v49  ;;  %v5040_v24 = vunpack.i.l.bf16 %v5039_v49 }
 0x1b1   : > { %4098 = vmatprep.subr.bf16.mxu1 %v4097_v2  ;;  %3882 = vmatprep.mubr.msk.f32.mxu0 %vm2576_vm8, %v7268_v19  ;;  %v1242_v26 = vsel %vm1232_vm13, %v5020_v10, %v5021_v60  ;;  %v4101_v44 = vpack.c.bf16 %v1241_v31, %v1174_v0  ;;  %v7311_v10 = vld [vmem:[%s8582_s2 + $0x30] sm:$0xff]  ;;  %v8946_v35 = vunpack.i.h.bf16 %v6746_v22  ;;  %v8947_v32 = vunpack.i.h.bf16 %v6762_v41  ;;  %v8948_v2 = vld [vmem:[#allocation14_spill] sm:$0xff] }
 0x1b2   : > { %4048 = vmatpush1.bf16.msra.mxu0 %v8945_v43  ;;  %3886 = vmatprep.mubr.msk.f32.mxu1 %vm2576_vm8, %v7268_v19  ;;  %v7317_v60 = vsel %vm1366_vm15, %v5045_v42, %v8745_v34  ;;  %v1175_v47 = vsel %vm1165_vm12, %v5010_v61, %v5011_v15  ;;  %v1376_v41 = vsel %vm1366_vm15, %v5040_v24, %v5041_v6  ;;  %v8951_v0 = vld [vmem:[#allocation108_spill] sm:$0xff] }
 0x1b3   : > { %4050 = vmatprep.subr.bf16.mxu0 %v4049_v21  ;;  %v1310_v37 = vsel %vm1299_vm14, %v8946_v35, %v5030_v57  ;;  %v1377_v59 = vsel %vm1366_vm15, %v8947_v32, %v5040_v24  ;;  %2089 = vrot.lane.b32.xlu1 %v8948_v2, %s5467_s28  ;;  %v7335_v22 = vpop.permute.xlu1 %5053  ;;  %v5049_v13 = vpop.permute.xlu0 %5048  ;;  %v4103_v61 = vpack.c.bf16 %v1242_v26, %v1175_v47 }
 0x1b4   : > { %4100 = vmatpush1.bf16.msra.mxu1 %v4099_v1  ;;  %2087 = vrot.lane.b32.xlu0 %v8949_v52, %s5467_s28  ;;  %v4053_v31 = vpack.c.bf16 %v1377_v59, %v1310_v37  ;;  %v8737_v49 = vunpack.i.h.bf16 %v7335_v22  ;;  %v5055_v15 = vunpack.i.l.bf16 %v7335_v22  ;;  %v5050_v21 = vunpack.i.l.bf16 %v5049_v13  ;;  %v8950_v1 = vld [vmem:[#allocation109_spill] sm:$0xff] }
 0x1b5   : > { %4102 = vmatprep.subr.bf16.mxu1 %v4101_v44  ;;  %2672 = vmatmul.mubr.f32.gmra.mrb[6].mxu0 %v7311_v10  ;;  %v8952_v43 = vpack.c.bf16 %v8950_v1, %v8951_v0  ;;  %v1308_v35 = vsel %vm1299_vm14, %v5031_v27, %v5035_v29  ;;  %v1375_v37 = vsel %vm1366_vm15, %v5041_v6, %v5045_v42  ;;  %v5051_v59 = vunpack.i.h.bf16 %v5049_v13  ;;  %v8953_v29 = vld [vmem:[#allocation15_spill] sm:$0xff] }
 0x1b6   : > { %2761 = vmatmul.mubr.f32.gmra.mrb[6].mxu1 %v7311_v10  ;;  %v1309_v24 = vsel %vm1299_vm14, %v5030_v57, %v5031_v27  ;;  %v7356_v26 = vsel %vm8742_vm1, %v5055_v15, %v8737_v49  ;;  %v4105_v44 = vpack.c.bf16 %v1375_v37, %v1308_v35  ;;  %v7369_v13 = vld [vmem:[%s8582_s2 + $0x8] sm:$0xff]  ;;  %v8957_v0 = vunpack.i.h.bf16 %v6798_v51 }
 0x1b7   : > { %4052 = vmatpush1.bf16.msra.mxu0 %v8952_v43  ;;  %v4107_v32 = vpack.c.bf16 %v1376_v41, %v1309_v24  ;;  %2093 = vrot.lane.b32.xlu1 %v5545_v14, %s5467_s28  ;;  %v7362_v42 = vpop.permute.xlu1 %5063  ;;  %v5059_v57 = vpop.permute.xlu0 %5058  ;;  %v8955_v41 = vld [vmem:[#allocation110_spill] sm:$0xff]  ;;  %v8958_v24 = vunpack.i.h.bf16 %v6814_v16  ;;  %v1443_v16 = vsel %vm8742_vm1, %v5050_v21, %v5051_v59 }
 0x1b8   : > { %4104 = vmatpush1.bf16.msra.mxu1 %v4103_v61  ;;  %4054 = vmatprep.subr.bf16.mxu0 %v4053_v31  ;;  %v8734_v6 = vunpack.i.h.bf16 %v7362_v42  ;;  %v5065_v27 = vunpack.i.l.bf16 %v7362_v42  ;;  %v5061_v47 = vunpack.i.h.bf16 %v5059_v57  ;;  %v5060_v61 = vunpack.i.l.bf16 %v5059_v57  ;;  %v8954_v31 = vld [vmem:[#allocation111_spill] sm:$0xff] }
 0x1b9   : > { %2091 = vrot.lane.b32.xlu0 %v8953_v29, %s5467_s28  ;;  %4106 = vmatprep.subr.bf16.mxu1 %v4105_v44  ;;  %v8956_v1 = vpack.c.bf16 %v8954_v31, %v8955_v41  ;;  %v1444_v43 = vsel %vm8742_vm1, %v8957_v0, %v5050_v21  ;;  %v8959_v31 = vld [vmem:[#allocation19_spill] sm:$0xff] }
 0x1ba   : > { %3887 = vmatprep.mubr.msk.f32.mxu0 %vm2576_vm8, %v7369_v13  ;;  %3891 = vmatprep.mubr.msk.f32.mxu1 %vm2576_vm8, %v7369_v13  ;;  %v7386_v35 = vsel %vm8741_vm2, %v5065_v27, %v8734_v6  ;;  %v1510_v37 = vsel %vm8741_vm2, %v5060_v61, %v5061_v47  ;;  %v1511_v51 = vsel %vm8741_vm2, %v8958_v24, %v5060_v61  ;;  %v8960_v41 = vld [vmem:[#allocation31_spill] sm:$0xff] }
 0x1bb   : > { %4056 = vmatpush1.bf16.msra.mxu0 %v8956_v1  ;;  %v1509_v44 = vsel %vm8741_vm2, %v5061_v47, %v5065_v27  ;;  %1029 = vrot.lane.b32.xlu1 %v8959_v31, %s5451_s7  ;;  %v7402_v1 = vpop.permute.xlu1 %5073  ;;  %v4057_v0 = vpack.c.bf16 %v1511_v51, %v1444_v43  ;;  %v1442_v47 = vsel %vm8742_vm1, %v5051_v59, %v5055_v15  ;;  %v8961_v43 = vld [vmem:[#allocation112_spill] sm:$0xff] }
 0x1bc   : > { %4108 = vmatpush1.bf16.msra.mxu1 %v4107_v32  ;;  %v5069_v32 = vpop.permute.xlu0 %5068  ;;  %v8736_v61 = vunpack.i.h.bf16 %v7402_v1  ;;  %v5075_v27 = vunpack.i.l.bf16 %v7402_v1  ;;  %v4111_v24 = vpack.c.bf16 %v1510_v37, %v1443_v16  ;;  %v4109_v30 = vpack.c.bf16 %v1509_v44, %v1442_v47 }
 0x1bd   : > { %5268 = vrot.lane.b32.xlu0 %v8960_v41, %s5451_s7  ;;  %v5070_v57 = vunpack.i.l.bf16 %v5069_v32  ;;  %4058 = vmatprep.subr.bf16.mxu0 %v4057_v0  ;;  %v8962_v21 = vpack.c.bf16 %v6834_v12, %v8961_v43  ;;  %v5071_v51 = vunpack.i.h.bf16 %v5069_v32  ;;  %v8963_v12 = vunpack.i.h.bf16 %v6850_v54 }
 0x1be   : > { %v7414_v6 = vsel %vm8739_vm3, %v5075_v27, %v8736_v61  ;;  %4110 = vmatprep.subr.bf16.mxu1 %v4109_v30  ;;  %v8964_v43 = vunpack.i.h.bf16 %v6866_v20 }
 0x1bf   : > { %4060 = vmatpush1.bf16.msra.mxu0 %v8962_v21  ;;  %1096 = vrot.lane.b32.xlu1 %v8959_v31, %s5452_s8  ;;  %v7423_v15 = vpop.permute.xlu1 %5083  ;;  %v1578_v32 = vsel %vm8739_vm3, %v8963_v12, %v5070_v57  ;;  %v1577_v20 = vsel %vm8739_vm3, %v5070_v57, %v5071_v51 }
 0x1c0   : > { %v5079_v59 = vpop.permute.xlu0 %5078  ;;  %v8735_v37 = vunpack.i.h.bf16 %v7423_v15  ;;  %v5085_v44 = vunpack.i.l.bf16 %v7423_v15  ;;  %4112 = vmatpush1.bf16.msra.mxu1 %v4111_v24 }
 0x1c1   : > { %5273 = vrot.lane.b32.xlu0 %v8960_v41, %s5452_s8  ;;  %v5081_v0 = vunpack.i.h.bf16 %v5079_v59  ;;  %v5080_v16 = vunpack.i.l.bf16 %v5079_v59 }
 0x1c2   : > { %v7435_v47 = vsel %vm8738_vm4, %v5085_v44, %v8735_v37 }
 0x1c3   : > { %v1644_v30 = vsel %vm8738_vm4, %v5080_v16, %v5081_v0  ;;  %v1645_v21 = vsel %vm8738_vm4, %v8964_v43, %v5080_v16  ;;  %v1643_v54 = vsel %vm8738_vm4, %v5081_v0, %v5085_v44  ;;  %1163 = vrot.lane.b32.xlu1 %v8959_v31, %s5453_s9  ;;  %v7451_v59 = vpop.permute.xlu1 %5093  ;;  %v1576_v0 = vsel %vm8739_vm3, %v5071_v51, %v5075_v27 }
 0x1c4   : > { %v5089_v12 = vpop.permute.xlu0 %5088  ;;  %v4061_v37 = vpack.c.bf16 %v1645_v21, %v1578_v32  ;;  %v8740_v16 = vunpack.i.h.bf16 %v7451_v59  ;;  %v5095_v44 = vunpack.i.l.bf16 %v7451_v59  ;;  %v4115_v43 = vpack.c.bf16 %v1644_v30, %v1577_v20  ;;  %v8965_v32 = vld [vmem:[#allocation114_spill] sm:$0xff]  ;;  %v8966_v21 = vld [vmem:[#allocation113_spill] sm:$0xff] }
 0x1c5   : > { %5278 = vrot.lane.b32.xlu0 %v8960_v41, %s5453_s9  ;;  %v5090_v24 = vunpack.i.l.bf16 %v5089_v12  ;;  %v4113_v61 = vpack.c.bf16 %v1643_v54, %v1576_v0  ;;  %v8967_v57 = vpack.c.bf16 %v8965_v32, %v8966_v21  ;;  %v5091_v40 = vunpack.i.h.bf16 %v5089_v12  ;;  %v8968_v0 = vld [vmem:[#allocation115_spill] sm:$0xff] }
 0x1c6   : > { %4062 = vmatprep.subr.bf16.mxu0 %v4061_v37  ;;  %v7463_v49 = vsel %vm8747_vm5, %v5095_v44, %v8740_v16  ;;  %v8969_v32 = vunpack.i.h.bf16 %v8968_v0  ;;  %vm8970_vm4 = vcmp.lt.s32.totalorder %v5646_v28, 84 }
 0x1c7   : > { %4064 = vmatpush1.bf16.msra.mxu0 %v8967_v57  ;;  %1230 = vrot.lane.b32.xlu1 %v8959_v31, %s5454_s10  ;;  %v7472_v27 = vpop.permute.xlu1 %5103  ;;  %vm8971_vm3 = vmmov %vm8970_vm4  ;;  %v8972_v57 = vld [vmem:[#allocation116_spill] sm:$0xff] }
 0x1c8   : > { %v5099_v51 = vpop.permute.xlu0 %5098  ;;  %4114 = vmatprep.subr.bf16.mxu1 %v4113_v61  ;;  %v8743_v37 = vunpack.i.h.bf16 %v7472_v27  ;;  %v5105_v30 = vunpack.i.l.bf16 %v7472_v27  ;;  %v1712_v12 = vsel %vm8747_vm5, %v8969_v32, %v5090_v24  ;;  %v8973_v16 = vunpack.i.h.bf16 %v8972_v57  ;;  %vm8974_vm2 = vmmov %vm8971_vm3 }
 0x1c9   : > { %5283 = vrot.lane.b32.xlu0 %v8960_v41, %s5454_s10  ;;  %v5101_v54 = vunpack.i.h.bf16 %v5099_v51  ;;  %v5100_v20 = vunpack.i.l.bf16 %v5099_v51  ;;  %4116 = vmatpush1.bf16.msra.mxu1 %v4115_v43  ;;  %vm8975_vm1 = vmmov %vm8974_vm2  ;;  %v1711_v57 = vsel %vm8747_vm5, %v5090_v24, %v5091_v40 }
 0x1ca   : > { %v7484_v21 = vsel %vm8970_vm4, %v5105_v30, %v8743_v37 }
 0x1cb   : > { %v1778_v61 = vsel %vm8971_vm3, %v5100_v20, %v5101_v54  ;;  %v1779_v51 = vsel %vm8974_vm2, %v8973_v16, %v5100_v20  ;;  %v1777_v43 = vsel %vm8975_vm1, %v5101_v54, %v5105_v30  ;;  %1297 = vrot.lane.b32.xlu1 %v8959_v31, %s5455_s11  ;;  %v7500_v32 = vpop.permute.xlu1 %5113  ;;  %v1710_v54 = vsel %vm8747_vm5, %v5091_v40, %v5095_v44 }
 0x1cc   : > { %v5109_v37 = vpop.permute.xlu0 %5108  ;;  %v4065_v58 = vpack.c.bf16 %v1779_v51, %v1712_v12  ;;  %v8749_v16 = vunpack.i.h.bf16 %v7500_v32  ;;  %v5115_v30 = vunpack.i.l.bf16 %v7500_v32  ;;  %v4119_v20 = vpack.c.bf16 %v1778_v61, %v1711_v57  ;;  %v8978_v12 = vld [vmem:[#allocation118_spill] sm:$0xff]  ;;  %v8979_v51 = vld [vmem:[#allocation117_spill] sm:$0xff] }
 0x1cd   : > { %5288 = vrot.lane.b32.xlu0 %v8960_v41, %s5455_s11  ;;  %v5110_v0 = vunpack.i.l.bf16 %v5109_v37  ;;  %v4117_v34 = vpack.c.bf16 %v1777_v43, %v1710_v54  ;;  %vm8976_vm1 = vcmp.lt.s32.totalorder %v5646_v28, 83  ;;  %v8980_v24 = vpack.c.bf16 %v8978_v12, %v8979_v51 }
 0x1ce   : > { %4066 = vmatprep.subr.bf16.mxu0 %v4065_v58  ;;  %v7512_v14 = vsel %vm8976_vm1, %v5115_v30, %v8749_v16  ;;  %v5111_v2 = vunpack.i.h.bf16 %v5109_v37  ;;  %v8981_v54 = vunpack.i.h.bf16 %v6954_v33  ;;  %vm8982_vm2 = vmmov %vm8976_vm1  ;;  %vm8983_vm3 = vcmp.lt.s32.totalorder %v5646_v28, 82 }
 0x1cf   : > { %8977 = vst [vmem:[#allocation28_spill] sm:$0xff] %v7512_v14  ;;  %4068 = vmatpush1.bf16.msra.mxu0 %v8980_v24  ;;  %1364 = vrot.lane.b32.xlu1 %v8959_v31, %s5456_s12  ;;  %v7521_v40 = vpop.permute.xlu1 %5123  ;;  %vm8984_vm4 = vmmov %vm8983_vm3  ;;  %v8985_v51 = vunpack.i.h.bf16 %v6970_v9 }
 0x1d0   : > { %v5119_v58 = vpop.permute.xlu0 %5118  ;;  %4118 = vmatprep.subr.bf16.mxu1 %v4117_v34  ;;  %v8748_v44 = vunpack.i.h.bf16 %v7521_v40  ;;  %v5125_v61 = vunpack.i.l.bf16 %v7521_v40  ;;  %v1846_v37 = vsel %vm8982_vm2, %v8981_v54, %v5110_v0  ;;  %vm8986_vm1 = vmmov %vm8983_vm3  ;;  %v1845_v9 = vsel %vm8982_vm2, %v5110_v0, %v5111_v2  ;;  %v8990_v0 = vld [vmem:[#allocation119_spill] sm:$0xff] }
 0x1d1   : > { %5293 = vrot.lane.b32.xlu0 %v8960_v41, %s5456_s12  ;;  %v5121_v43 = vunpack.i.h.bf16 %v5119_v58  ;;  %v5120_v57 = vunpack.i.l.bf16 %v5119_v58  ;;  %4120 = vmatpush1.bf16.msra.mxu1 %v4119_v20  ;;  %vm8987_vm5 = vmmov %vm8986_vm1 }
 0x1d2   : > { %v7533_v12 = vsel %vm8983_vm3, %v5125_v61, %v8748_v44  ;;  %vm9074_vm3 = vcmp.lt.s32.totalorder %v5646_v28, 87 }
 0x1d3   : > { %v1912_v34 = vsel %vm8984_vm4, %v5120_v57, %v5121_v43  ;;  %v1913_v24 = vsel %vm8986_vm1, %v8985_v51, %v5120_v57  ;;  %v1911_v33 = vsel %vm8987_vm5, %v5121_v43, %v5125_v61  ;;  %1431 = vrot.lane.b32.xlu1 %v8959_v31, %s5457_s13  ;;  %v7549_v58 = vpop.permute.xlu1 %5133  ;;  %vm8989_vm5 = vmmov %vm8982_vm2  ;;  %vm9078_vm4 = vcmp.lt.s32.totalorder %v5646_v28, 86 }
 0x1d4   : > { %8988 = vst [vmem:[#allocation34_spill] sm:$0xff] %v7549_v58  ;;  %v5129_v54 = vpop.permute.xlu0 %5128  ;;  %v4069_v44 = vpack.c.bf16 %v1913_v24, %v1846_v37  ;;  %v8750_v57 = vunpack.i.h.bf16 %v7549_v58  ;;  %v5135_v61 = vunpack.i.l.bf16 %v7549_v58  ;;  %v1844_v43 = vsel %vm8989_vm5, %v5111_v2, %v5115_v30  ;;  %vm9080_vm1 = vmmov %vm9074_vm3 }
 0x1d5   : > { %5298 = vrot.lane.b32.xlu0 %v8960_v41, %s5457_s13  ;;  %v4123_v51 = vpack.c.bf16 %v1912_v34, %v1845_v9  ;;  %v5131_v20 = vunpack.i.h.bf16 %v5129_v54  ;;  %v5130_v16 = vunpack.i.l.bf16 %v5129_v54  ;;  %v4121_v29 = vpack.c.bf16 %v1911_v33, %v1844_v43  ;;  %vm9082_vm2 = vmmov %vm9078_vm4 }
 0x1d6   : > { %4070 = vmatprep.subr.bf16.mxu0 %v4069_v44  ;;  %v7561_v37 = vsel %vm1969_vm6, %v5135_v61, %v8750_v57  ;;  %v8991_v24 = vpack.c.bf16 %v6990_v55, %v8990_v0  ;;  %v8993_v44 = vld [vmem:[#allocation20_spill] sm:$0xff]  ;;  %v8994_v0 = vunpack.i.h.bf16 %v7006_v50  ;;  %vm9083_vm5 = vmmov %vm9082_vm2 }
 0x1d7   : > { %1498 = vrot.lane.b32.xlu1 %v8959_v31, %s5458_s14  ;;  %v7570_v2 = vpop.permute.xlu1 %5143  ;;  %v7574_v34 = vpack.i.bf16 %v8993_v44, %v8959_v31  ;;  %4122 = vmatprep.subr.bf16.mxu1 %v4121_v29  ;;  %v1979_v43 = vsel %vm1969_vm6, %v5130_v16, %v5131_v20 }
 0x1d8   : > { %4072 = vmatpush1.bf16.msra.mxu0 %v8991_v24  ;;  %8992 = vst [vmem:[#allocation32_spill] sm:$0xff] %v7570_v2  ;;  %v5139_v30 = vpop.permute.xlu0 %5138  ;;  %v8752_v33 = vunpack.i.h.bf16 %v7570_v2  ;;  %v5145_v54 = vunpack.i.l.bf16 %v7570_v2  ;;  %4124 = vmatpush1.bf16.msra.mxu1 %v4123_v51  ;;  %v1980_v24 = vsel %vm1969_vm6, %v8994_v0, %v5130_v16  ;;  %v8996_v2 = vld [vmem:[#allocation22_spill] sm:$0xff]  ;;  %v9034_v16 = vld [vmem:[#allocation55_spill] sm:$0xff] }
 0x1d9   : > { %5303 = vrot.lane.b32.xlu0 %v8960_v41, %s5458_s14  ;;  %v5141_v55 = vunpack.i.h.bf16 %v5139_v30  ;;  %v5140_v9 = vunpack.i.l.bf16 %v5139_v30  ;;  %v8995_v30 = vunpack.i.h.bf16 %v7022_v39  ;;  %v1978_v39 = vsel %vm1969_vm6, %v5131_v20, %v5135_v61 }
 0x1da   : > { %v7588_v29 = vsel %vm2036_vm7, %v5145_v54, %v8752_v33 }
 0x1db   : > { %v2046_v57 = vsel %vm2036_vm7, %v5140_v9, %v5141_v55  ;;  %v2047_v58 = vsel %vm2036_vm7, %v8995_v30, %v5140_v9  ;;  %v2045_v50 = vsel %vm2036_vm7, %v5141_v55, %v5145_v54  ;;  %5313 = vrot.lane.b32.xlu1 %v7574_v34, %s5459_s17  ;;  %v2082_v51 = vpop.permute.xlu1 %2081  ;;  %v4415_v9 = vunpack.i.l.bf16 %v8996_v2 }
 0x1dc   : > { %v2080_v0 = vpop.permute.xlu0 %2079  ;;  %v4073_v33 = vpack.c.bf16 %v2047_v58, %v1980_v24  ;;  %v4127_v30 = vpack.c.bf16 %v2046_v57, %v1979_v43  ;;  %v4125_v14 = vpack.c.bf16 %v2045_v50, %v1978_v39  ;;  %v4416_v54 = vunpack.i.h.bf16 %v8996_v2  ;;  %v9004_v39 = vld [vmem:[#allocation10_spill] sm:$0xff] }
 0x1dd   : > { %5308 = vrot.lane.b32.xlu0 %v8960_v41, %s5459_s17  ;;  %v8997_v55 = vpack.c.bf16 %v7042_v46, %v7036_v3  ;;  %v2114_v57 = vsel %vm2103_vm9, %v2080_v0, %v2082_v51  ;;  %v8999_v3 = vunpack.i.h.bf16 %v5683_v45  ;;  %v2115_v61 = vsel %vm2103_vm9, %v7061_v25, %v2080_v0 }
 0x1de   : > { %4074 = vmatprep.subr.bf16.mxu0 %v4073_v33  ;;  %4126 = vmatprep.subr.bf16.mxu1 %v4125_v14  ;;  %v9000_v33 = vld [vmem:[#allocation24_spill] sm:$0xff]  ;;  %v434_v45 = vsel %vm428_vm0, %v4415_v9, %v4416_v54 }
 0x1df   : > { %4076 = vmatpush1.bf16.msra.mxu0 %v8997_v55  ;;  %5323 = vrot.lane.b32.xlu1 %v7574_v34, %s5460_s18  ;;  %v7615_v58 = vpop.permute.xlu1 %2085  ;;  %v435_v46 = vsel %vm428_vm0, %v8999_v3, %v4415_v9  ;;  %v9001_v43 = vunpack.i.l.bf16 %v9000_v33 }
 0x1e0   : > { %8998 = vst [vmem:[#allocation58_spill] sm:$0xff] %v7615_v58  ;;  %v2084_v20 = vpop.permute.xlu0 %2083  ;;  %4128 = vmatpush1.bf16.msra.mxu1 %v4127_v30  ;;  %2819 = vmatprep.subr.mxu0 %v2114_v57  ;;  %v9005_v30 = vld [vmem:[#allocation25_spill] sm:$0xff]  ;;  %v9006_v57 = vld [vmem:[#allocation12_spill] sm:$0xff] }
 0x1e1   : > { %5318 = vrot.lane.b32.xlu0 %v8960_v41, %s5460_s18  ;;  %v2112_v14 = vsel %vm2103_vm9, %v2084_v20, %v7615_v58  ;;  %v2113_v2 = vsel %vm2103_vm9, %v2082_v51, %v2084_v20  ;;  %v433_v24 = vsel %vm428_vm0, %v4416_v54, %v9001_v43  ;;  %v9003_v51 = vld [vmem:[#allocation11_spill] sm:$0xff]  ;;  %v4131_v55 = vpack.c.bf16 %v9005_v30, %v9004_v39 }
 0x1e2   : > { %2908 = vmatprep.subr.mxu1 %v2112_v14  ;;  %v4129_v0 = vpack.c.bf16 %v435_v46, %v9003_v51  ;;  %v4181_v54 = vpack.c.bf16 %v433_v24, %v8949_v52  ;;  %v4183_v14 = vpack.c.bf16 %v434_v45, %v9006_v57  ;;  %v9009_v46 = vld [vmem:[#allocation38_spill] sm:$0xff]  ;;  %v9012_v45 = vld [vmem:[#allocation43_spill] sm:$0xff] }
 0x1e3   : > { %2820 = vmatpush1.msra.mxu0 %v2115_v61  ;;  %5333 = vrot.lane.b32.xlu1 %v7574_v34, %s5461_s19  ;;  %v7641_v25 = vpop.permute.xlu1 %5153  ;;  %v9010_v61 = vld [vmem:[#allocation35_spill] sm:$0xff] }
 0x1e4   : > { %9002 = vst [vmem:[#allocation52_spill] sm:$0xff] %v7641_v25  ;;  %v7643_v50 = vpop.permute.xlu0 %5148  ;;  %2909 = vmatpush1.msra.mxu1 %v2113_v2  ;;  %v8757_v20 = vunpack.i.h.bf16 %v7641_v25  ;;  %v8760_v9 = vunpack.i.l.bf16 %v7641_v25  ;;  %2832 = vmatmul.mubr.f32.vlgmr.msra.gmra.mrb[8].mxu0 %v7080_v62  ;;  %v9011_v2 = vpack.c.bf16 %v9009_v46, %v9010_v61  ;;  %v9013_v51 = vld [vmem:[#allocation39_spill] sm:$0xff]  ;;  %v9019_v46 = vld [vmem:[#allocation36_spill] sm:$0xff]  ;;  %v9020_v61 = vld [vmem:[#allocation33_spill] sm:$0xff] }
 0x1e5   : > { %5328 = vrot.lane.b32.xlu0 %v8960_v41, %s5461_s19  ;;  %2921 = vmatmul.mubr.f32.vlgmr.msra.gmra.mrb[8].mxu1 %v7080_v62 }
 0x1e6   : > { %4130 = vmatprep.subr.bf16.mxu0 %v4129_v0  ;;  %v7660_v3 = vsel %vm1031_vm10, %v8760_v9, %v8757_v20  ;;  %4182 = vmatprep.subr.bf16.mxu1 %v4181_v54  ;;  %v9014_v0 = vpack.c.bf16 %v9012_v45, %v9013_v51  ;;  %v9017_v54 = vld [vmem:[#allocation29_spill] sm:$0xff]  ;;  %v9033_v20 = vld [vmem:[#allocation56_spill] sm:$0xff] }
 0x1e7   : > { %9007 = vst [vmem:[#allocation54_spill] sm:$0xff] %v7660_v3  ;;  %4132 = vmatpush1.bf16.msra.mxu0 %v4131_v55  ;;  %4184 = vmatpush1.bf16.msra.mxu1 %v4183_v14  ;;  %v7664_v52 = vpop.permute.xlu1 %5163  ;;  %v9016_v55 = vld [vmem:[#allocation37_spill] sm:$0xff] }
 0x1e8   : > { %5343 = vrot.lane.b32.xlu1 %v7574_v34, %s5462_s20  ;;  %9008 = vst [vmem:[#allocation48_spill] sm:$0xff] %v7664_v52  ;;  %v5159_v62 = vpop.permute.xlu0 %5158  ;;  %4134 = vmatprep.subr.bf16.mxu0 %v9011_v2  ;;  %v8756_v43 = vunpack.i.h.bf16 %v7664_v52  ;;  %v5165_v24 = vunpack.i.l.bf16 %v7664_v52  ;;  %v9018_v57 = vpack.c.bf16 %v9016_v55, %v9017_v54  ;;  %v9021_v2 = vpack.c.bf16 %v9019_v46, %v9020_v61  ;;  %v9025_v54 = vld [vmem:[#allocation65_spill] sm:$0xff] }
 0x1e9   : > { %5338 = vrot.lane.b32.xlu0 %v8960_v41, %s5462_s20  ;;  %4186 = vmatprep.subr.bf16.mxu1 %v9014_v0  ;;  %v9023_v0 = vld [vmem:[#allocation59_spill] sm:$0xff] }
 0x1ea   : > { %3888 = vmatprep.mubr.msk.f32.mxu0 %vm2576_vm8, %v7099_v7  ;;  %3892 = vmatprep.mubr.msk.f32.mxu1 %vm2576_vm8, %v7099_v7  ;;  %v7684_v39 = vsel %vm1098_vm11, %v5165_v24, %v8756_v43  ;;  %v5160_v43 = vunpack.i.l.bf16 %v5159_v62 }
 0x1eb   : > { %9015 = vst [vmem:[#allocation53_spill] sm:$0xff] %v7684_v39  ;;  %2838 = vmatmul.mubr.f32.gmra.mrb[10].mxu0 %v7127_v23  ;;  %2927 = vmatmul.mubr.f32.gmra.mrb[10].mxu1 %v7127_v23  ;;  %v7693_v14 = vpop.permute.xlu1 %5173  ;;  %v9022_v23 = vld [vmem:[#allocation60_spill] sm:$0xff] }
 0x1ec   : > { %4136 = vmatpush1.bf16.msra.mxu0 %v9018_v57  ;;  %v7695_v7 = vpop.permute.xlu0 %5168  ;;  %4188 = vmatpush1.bf16.msra.mxu1 %v9021_v2  ;;  %v8755_v45 = vunpack.i.h.bf16 %v7693_v14  ;;  %v8758_v51 = vunpack.i.l.bf16 %v7693_v14  ;;  %v9024_v55 = vpack.c.bf16 %v9022_v23, %v9023_v0  ;;  %v9026_v57 = vld [vmem:[#allocation62_spill] sm:$0xff]  ;;  %v9031_v23 = vld [vmem:[#allocation49_spill] sm:$0xff] }
 0x1ed   : > { %5353 = vrot.lane.b32.xlu1 %v7574_v34, %s5463_s21  ;;  %5348 = vrot.lane.b32.xlu0 %v8960_v41, %s5463_s21  ;;  %v9027_v30 = vpack.c.bf16 %v9025_v54, %v9026_v57  ;;  %v5151_v57 = vunpack.i.h.bf16 %v7643_v50 }
 0x1ee   : > { %4138 = vmatprep.subr.bf16.mxu0 %v9024_v55  ;;  %3889 = vmatprep.mubr.msk.f32.mxu0 %vm2576_vm8, %v7168_v63  ;;  %v7720_v46 = vsel %vm1165_vm12, %v8758_v51, %v8755_v45  ;;  %v5161_v45 = vunpack.i.h.bf16 %v5159_v62  ;;  %v9035_v51 = vpack.c.bf16 %v9033_v20, %v9034_v16  ;;  %v9040_v62 = vld [vmem:[#allocation87_spill] sm:$0xff]  ;;  %v9044_v20 = vld [vmem:[#allocation80_spill] sm:$0xff] }
 0x1ef   : > { %4190 = vmatprep.subr.bf16.mxu1 %v9027_v30  ;;  %9028 = vst [vmem:[#allocation51_spill] sm:$0xff] %v7720_v46  ;;  %3893 = vmatprep.mubr.msk.f32.mxu1 %vm2576_vm8, %v7168_v63  ;;  %v7725_v61 = vpop.permute.xlu1 %5183  ;;  %v9030_v30 = vld [vmem:[#allocation57_spill] sm:$0xff]  ;;  %v5150_v63 = vunpack.i.l.bf16 %v7643_v50  ;;  %v9047_v46 = vld [vmem:[#allocation79_spill] sm:$0xff] }
 0x1f0   : > { %2844 = vmatmul.mubr.f32.gmra.mrb[12].mxu0 %v7207_v38  ;;  %9029 = vst [vmem:[#allocation81_spill] sm:$0xff] %v7725_v61  ;;  %v7727_v2 = vpop.permute.xlu0 %5178  ;;  %2933 = vmatmul.mubr.f32.gmra.mrb[12].mxu1 %v7207_v38  ;;  %v9032_v0 = vpack.c.bf16 %v9030_v30, %v9031_v23  ;;  %v8759_v55 = vunpack.i.h.bf16 %v7725_v61  ;;  %v5185_v54 = vunpack.i.l.bf16 %v7725_v61  ;;  %v9036_v38 = vld [vmem:[#allocation82_spill] sm:$0xff]  ;;  %v9058_v61 = vld [vmem:[#allocation100_spill] sm:$0xff] }
 0x1f1   : > { %4192 = vmatpush1.bf16.msra.mxu1 %v9035_v51  ;;  %5363 = vrot.lane.b32.xlu1 %v7574_v34, %s5464_s22  ;;  %v9037_v30 = vld [vmem:[#allocation78_spill] sm:$0xff] }
 0x1f2   : > { %4140 = vmatpush1.bf16.msra.mxu0 %v9032_v0  ;;  %5358 = vrot.lane.b32.xlu0 %v8960_v41, %s5464_s22  ;;  %v9038_v23 = vpack.c.bf16 %v9036_v38, %v9037_v30  ;;  %v7751_v50 = vsel %vm1232_vm13, %v5185_v54, %v8759_v55  ;;  %v9041_v0 = vld [vmem:[#allocation83_spill] sm:$0xff]  ;;  %v9048_v30 = vld [vmem:[#allocation77_spill] sm:$0xff] }
 0x1f3   : > { %9039 = vst [vmem:[#allocation74_spill] sm:$0xff] %v7751_v50  ;;  %v9042_v16 = vpack.c.bf16 %v9040_v62, %v9041_v0  ;;  %3890 = vmatprep.mubr.msk.f32.mxu0 %vm2576_vm8, %v7268_v19  ;;  %v7760_v51 = vpop.permute.xlu1 %5193  ;;  %3894 = vmatprep.mubr.msk.f32.mxu1 %vm2576_vm8, %v7268_v19  ;;  %v1037_v62 = vsel %vm1031_vm10, %v5150_v63, %v5151_v57  ;;  %v9045_v55 = vld [vmem:[#allocation71_spill] sm:$0xff]  ;;  %v5181_v19 = vunpack.i.h.bf16 %v7727_v2 }
 0x1f4   : > { %4142 = vmatprep.subr.bf16.mxu0 %v9038_v23  ;;  %9043 = vst [vmem:[#allocation76_spill] sm:$0xff] %v7760_v51  ;;  %v7762_v38 = vpop.permute.xlu0 %5188  ;;  %2850 = vmatmul.mubr.f32.gmra.mrb[14].mxu0 %v7311_v10  ;;  %v5195_v23 = vunpack.i.l.bf16 %v7760_v51  ;;  %v1104_v0 = vsel %vm1098_vm11, %v5160_v43, %v5161_v45  ;;  %v9046_v9 = vpack.c.bf16 %v9044_v20, %v9045_v55  ;;  %v9050_v3 = vunpack.i.h.bf16 %v7760_v51  ;;  %v9053_v20 = vld [vmem:[#allocation97_spill] sm:$0xff]  ;;  %v9057_v51 = vld [vmem:[#allocation103_spill] sm:$0xff] }
 0x1f5   : > { %4194 = vmatprep.subr.bf16.mxu1 %v9042_v16  ;;  %v5180_v16 = vunpack.i.l.bf16 %v7727_v2  ;;  %2939 = vmatmul.mubr.f32.gmra.mrb[14].mxu1 %v7311_v10  ;;  %v9049_v50 = vpack.c.bf16 %v9047_v46, %v9048_v30  ;;  %v9051_v10 = vunpack.i.h.bf16 %v7108_v4  ;;  %v1103_v2 = vsel %vm1098_vm11, %v5161_v45, %v5165_v24 }
 0x1f6   : > { %4144 = vmatpush1.bf16.msra.mxu0 %v9046_v9  ;;  %5373 = vrot.lane.b32.xlu1 %v7574_v34, %s5465_s23  ;;  %v7788_v39 = vsel %vm1299_vm14, %v5195_v23, %v9050_v3  ;;  %v5171_v46 = vunpack.i.h.bf16 %v7695_v7  ;;  %v5170_v55 = vunpack.i.l.bf16 %v7695_v7  ;;  %v9055_v3 = vunpack.i.h.bf16 %v7087_v8 }
 0x1f7   : > { %4196 = vmatpush1.bf16.msra.mxu1 %v9049_v50  ;;  %v1105_v9 = vsel %vm1098_vm11, %v9051_v10, %v5160_v43  ;;  %5368 = vrot.lane.b32.xlu0 %v8960_v41, %s5465_s23  ;;  %v9052_v50 = vld [vmem:[#allocation98_spill] sm:$0xff]  ;;  %v9056_v43 = vunpack.i.l.bf16 %v7641_v25  ;;  %v7811_v45 = vpop.permute.xlu1 %5203  ;;  %v4203_v10 = vpack.c.bf16 %v1104_v0, %v1037_v62  ;;  %v9059_v52 = vpack.c.bf16 %v9057_v51, %v9058_v61  ;;  %v9064_v0 = vld [vmem:[#allocation95_spill] sm:$0xff] }
 0x1f8   : > { %v9054_v30 = vpack.c.bf16 %v9052_v50, %v9053_v20  ;;  %v1038_v4 = vsel %vm1031_vm10, %v9055_v3, %v5150_v63  ;;  %v5199_v7 = vpop.permute.xlu0 %5198  ;;  %v5205_v8 = vunpack.i.l.bf16 %v7811_v45  ;;  %3895 = vmatprep.mubr.msk.f32.mxu0 %vm2576_vm8, %v7369_v13  ;;  %v9060_v63 = vld [vmem:[#allocation96_spill] sm:$0xff]  ;;  %v9063_v62 = vunpack.i.h.bf16 %v7185_v36  ;;  %3899 = vmatprep.mubr.msk.f32.mxu1 %vm2576_vm8, %v7369_v13  ;;  %v9065_v50 = vld [vmem:[#allocation94_spill] sm:$0xff] }
 0x1f9   : > { %v1036_v24 = vsel %vm1031_vm10, %v5151_v57, %v9056_v43  ;;  %4198 = vmatprep.subr.bf16.mxu1 %v9059_v52  ;;  %v5200_v20 = vunpack.i.l.bf16 %v5199_v7  ;;  %v4149_v57 = vpack.c.bf16 %v1105_v9, %v1038_v4  ;;  %v5201_v25 = vunpack.i.h.bf16 %v5199_v7 }
 0x1fa   : > { %4146 = vmatprep.subr.bf16.mxu0 %v9054_v30  ;;  %v9061_v30 = vld [vmem:[#allocation92_spill] sm:$0xff]  ;;  %v4201_v43 = vpack.c.bf16 %v1103_v2, %v1036_v24  ;;  %v1239_v52 = vsel %vm1232_vm13, %v9063_v62, %v5180_v16  ;;  %v5191_v61 = vunpack.i.h.bf16 %v7762_v38  ;;  %v5190_v51 = vunpack.i.l.bf16 %v7762_v38  ;;  %5383 = vrot.lane.b32.xlu1 %v7574_v34, %s5466_s25 }
 0x1fb   : > { %v9062_v3 = vpack.c.bf16 %v9060_v63, %v9061_v30  ;;  %v9066_v58 = vpack.c.bf16 %v9064_v0, %v9065_v50  ;;  %v9067_v9 = vunpack.i.h.bf16 %v7811_v45  ;;  %v1237_v13 = vsel %vm1232_vm13, %v5181_v19, %v5185_v54  ;;  %5378 = vrot.lane.b32.xlu0 %v8960_v41, %s5466_s25  ;;  %v7856_v24 = vpop.permute.xlu1 %5213 }
 0x1fc   : > { %v9069_v2 = vunpack.i.l.bf16 %v7693_v14  ;;  %v5209_v54 = vpop.permute.xlu0 %5208  ;;  %v1238_v41 = vsel %vm1232_vm13, %v5180_v16, %v5181_v19  ;;  %v5216_v7 = vunpack.i.h.bf16 %v7856_v24  ;;  %v5215_v50 = vunpack.i.l.bf16 %v7856_v24  ;;  %v9073_v19 = vld [vmem:[#allocation18_spill] sm:$0xff] }
 0x1fd   : > { %4148 = vmatpush1.bf16.msra.mxu0 %v9062_v3  ;;  %4200 = vmatpush1.bf16.msra.mxu1 %v9066_v58  ;;  %v7840_v36 = vsel %vm1366_vm15, %v5205_v8, %v9067_v9  ;;  %v9068_v58 = vunpack.i.h.bf16 %v7145_v11  ;;  %v9070_v11 = vunpack.i.h.bf16 %v7286_v56  ;;  %v1171_v30 = vsel %vm1165_vm12, %v5170_v55, %v5171_v46  ;;  %v9071_v3 = vld [vmem:[#allocation21_spill] sm:$0xff] }
 0x1fe   : > { %4150 = vmatprep.subr.bf16.mxu0 %v4149_v57  ;;  %v4263_v38 = vpack.c.bf16 %v7840_v36, %v7788_v39  ;;  %v1170_v4 = vsel %vm1165_vm12, %v5171_v46, %v9069_v2  ;;  %4202 = vmatprep.subr.bf16.mxu1 %v4201_v43  ;;  %v9072_v57 = vpack.c.bf16 %v7133_v18, %v9071_v3  ;;  %v5210_v46 = vunpack.i.l.bf16 %v5209_v54 }
 0x1ff   : > { %v1172_v34 = vsel %vm1165_vm12, %v9068_v58, %v5170_v55  ;;  %v1373_v63 = vsel %vm1366_vm15, %v9070_v11, %v5200_v20  ;;  %v4205_v0 = vpack.c.bf16 %v1237_v13, %v1170_v4  ;;  %v1371_v16 = vsel %vm1366_vm15, %v5201_v25, %v5205_v8  ;;  %2097 = vrot.lane.b32.xlu1 %v9073_v19, %s5467_s28  ;;  %v7889_v58 = vpop.permute.xlu1 %5223 }
 0x200   : > { %v4153_v62 = vpack.c.bf16 %v1239_v52, %v1172_v34  ;;  %v7879_v56 = vsel %vm9074_vm3, %v5215_v50, %v5216_v7  ;;  %v9075_v55 = vunpack.i.h.bf16 %v7231_v5  ;;  %v1304_v43 = vsel %vm1299_vm14, %v5191_v61, %v5195_v23  ;;  %v5219_v34 = vpop.permute.xlu0 %5218  ;;  %vm9084_vm3 = vmmov %vm9080_vm1 }
 0x201   : > { %4152 = vmatpush1.bf16.msra.mxu0 %v9072_v57  ;;  %4204 = vmatpush1.bf16.msra.mxu1 %v4203_v10  ;;  %v4207_v8 = vpack.c.bf16 %v1238_v41, %v1171_v30  ;;  %v9076_v10 = vld [vmem:[#allocation17_spill] sm:$0xff]  ;;  %v5211_v52 = vunpack.i.h.bf16 %v5209_v54  ;;  %v4209_v13 = vpack.c.bf16 %v1371_v16, %v1304_v43  ;;  %v5226_v5 = vunpack.i.h.bf16 %v7889_v58 }
 0x202   : > { %v1306_v18 = vsel %vm1299_vm14, %v9075_v55, %v5190_v51  ;;  %2095 = vrot.lane.b32.xlu0 %v9076_v10, %s5467_s28  ;;  %4154 = vmatprep.subr.bf16.mxu0 %v4153_v62  ;;  %v5225_v2 = vunpack.i.l.bf16 %v7889_v58  ;;  %v5221_v4 = vunpack.i.h.bf16 %v5219_v34  ;;  %v5220_v11 = vunpack.i.l.bf16 %v5219_v34 }
 0x203   : > { %v4157_v9 = vpack.c.bf16 %v1373_v63, %v1306_v18  ;;  %4206 = vmatprep.subr.bf16.mxu1 %v4205_v0  ;;  %v1305_v23 = vsel %vm1299_vm14, %v5190_v51, %v5191_v61  ;;  %v1372_v41 = vsel %vm1366_vm15, %v5200_v20, %v5201_v25  ;;  %v9077_v54 = vpack.c.bf16 %v7216_v17, %v7245_v53  ;;  %v7922_v20 = vpop.permute.xlu1 %1557 }
 0x204   : > { %2101 = vrot.lane.b32.xlu1 %v8993_v44, %s5467_s28  ;;  %v7906_v63 = vsel %vm9078_vm4, %v5225_v2, %v5226_v5  ;;  %v9079_v30 = vunpack.i.h.bf16 %v7335_v22  ;;  %v9081_v25 = vunpack.i.h.bf16 %v7362_v42  ;;  %v1506_v44 = vsel %vm9083_vm5, %v5220_v11, %v5221_v4  ;;  %v5229_v22 = vpop.permute.xlu0 %5228  ;;  %vm9085_vm4 = vmmov %vm9082_vm2 }
 0x205   : > { %4156 = vmatpush1.bf16.msra.mxu0 %v9077_v54  ;;  %4208 = vmatpush1.bf16.msra.mxu1 %v4207_v8  ;;  %v4267_v53 = vpack.c.bf16 %v7906_v63, %v7879_v56  ;;  %v4211_v3 = vpack.c.bf16 %v1372_v41, %v1305_v23  ;;  %v1438_v42 = vsel %vm9084_vm3, %v5211_v52, %v5215_v50  ;;  %v5231_v0 = vunpack.i.h.bf16 %v5229_v22 }
 0x206   : > { %v1440_v61 = vsel %vm9080_vm1, %v9079_v30, %v5210_v46  ;;  %v1507_v17 = vsel %vm9082_vm2, %v9081_v25, %v5220_v11  ;;  %2099 = vrot.lane.b32.xlu0 %v8959_v31, %s5467_s28  ;;  %4158 = vmatprep.subr.bf16.mxu0 %v4157_v9  ;;  %v1505_v57 = vsel %vm9085_vm4, %v5221_v4, %v5225_v2  ;;  %v5230_v16 = vunpack.i.l.bf16 %v5229_v22  ;;  %s3479_s28 = sld [smem:[#allocation6]] }
 0x207   : > { %v4161_v51 = vpack.c.bf16 %v1507_v17, %v1440_v61  ;;  %4210 = vmatprep.subr.bf16.mxu1 %v4209_v13  ;;  %v1439_v31 = vsel %vm9080_vm1, %v5210_v46, %v5211_v52  ;;  %v9086_v62 = vpack.c.bf16 %v7317_v60, %v7300_v48  ;;  %v4213_v19 = vpack.c.bf16 %v1505_v57, %v1438_v42  ;;  %v7933_v18 = vpop.permute.xlu1 %1624 }
 0x208   : > { %v4215_v55 = vpack.c.bf16 %v1506_v44, %v1439_v31  ;;  %v5234_v50 = vpop.permute.xlu0 %5233  ;;  %vm9087_vm2 = vcmp.lt.s32.totalorder %v5646_v28, 96  ;;  %v9088_v46 = vpack.c.bf16 %v7386_v35, %v7356_v26  ;;  %v9089_v48 = vunpack.i.h.bf16 %v7402_v1 }
 0x209   : > { %4160 = vmatpush1.bf16.msra.mxu0 %v9086_v62  ;;  %4212 = vmatpush1.bf16.msra.mxu1 %v4211_v3  ;;  %v5236_v43 = vunpack.i.h.bf16 %v5234_v50  ;;  %v5235_v8 = vunpack.i.l.bf16 %v5234_v50  ;;  %v1573_v9 = vsel %vm9087_vm2, %v5230_v16, %v5231_v0  ;;  %vm9090_vm5 = vmmov %vm9087_vm2  ;;  %vm9091_vm3 = vcmp.lt.s32.totalorder %v5646_v28, 95 }
 0x20a   : > { %4162 = vmatprep.subr.bf16.mxu0 %v4161_v51  ;;  %4214 = vmatprep.subr.bf16.mxu1 %v4213_v19  ;;  %v1574_v60 = vsel %vm9090_vm5, %v9089_v48, %v5230_v16  ;;  %v9092_v13 = vunpack.i.h.bf16 %v7423_v15  ;;  %vm9093_vm4 = vmmov %vm9091_vm3  ;;  %v9096_v15 = vpack.c.bf16 %v7435_v47, %v7414_v6  ;;  %vm9097_vm5 = vcmp.lt.s32.totalorder %v5646_v28, 94 }
 0x20b   : > { %v1640_v52 = vsel %vm9091_vm3, %v5235_v8, %v5236_v43  ;;  %vm9094_vm1 = vmmov %vm9087_vm2  ;;  %v7956_v1 = vpop.permute.xlu1 %1691  ;;  %v9098_v22 = vunpack.i.h.bf16 %v7451_v59  ;;  %v9101_v47 = vunpack.i.h.bf16 %v7472_v27  ;;  %v9105_v27 = vpack.c.bf16 %v7484_v21, %v7463_v49 }
 0x20c   : > { %v1641_v34 = vsel %vm9093_vm4, %v9092_v13, %v5235_v8  ;;  %v1572_v2 = vsel %vm9094_vm1, %v5231_v0, %v7922_v20  ;;  %vm9095_vm2 = vmmov %vm9091_vm3  ;;  %v4219_v35 = vpack.c.bf16 %v1640_v52, %v1573_v9  ;;  %v5239_v4 = vpop.permute.xlu0 %5238  ;;  %vm9100_vm4 = vcmp.lt.s32.totalorder %v5646_v28, 84  ;;  %s3480_s4 = ssub.f32 0.0, %s3479_s28 }
 0x20d   : > { %4164 = vmatpush1.bf16.msra.mxu0 %v9088_v46  ;;  %4216 = vmatpush1.bf16.msra.mxu1 %v4215_v55  ;;  %v1639_v26 = vsel %vm9095_vm2, %v5236_v43, %v7933_v18  ;;  %v4165_v11 = vpack.c.bf16 %v1641_v34, %v1574_v60  ;;  %v5241_v41 = vunpack.i.h.bf16 %v5239_v4  ;;  %v5240_v54 = vunpack.i.l.bf16 %v5239_v4  ;;  %vm9099_vm3 = vmmov %vm9097_vm5 }
 0x20e   : > { %v4217_v23 = vpack.c.bf16 %v1639_v26, %v1572_v2  ;;  %vm9102_vm1 = vmmov %vm9100_vm4  ;;  %v9107_v48 = vunpack.i.h.bf16 %v7500_v32  ;;  %v9110_v49 = vunpack.i.h.bf16 %v7521_v40  ;;  %v9114_v40 = vld [vmem:[#allocation28_spill] sm:$0xff] }
 0x20f   : > { %4166 = vmatprep.subr.bf16.mxu0 %v4165_v11  ;;  %v1707_v44 = vsel %vm9097_vm5, %v5240_v54, %v5241_v41  ;;  %v1708_v51 = vsel %vm9099_vm3, %v9098_v22, %v5240_v54  ;;  %vm9103_vm2 = vmmov %vm9099_vm3  ;;  %vm9106_vm3 = vcmp.lt.s32.totalorder %v5646_v28, 83 }
 0x210   : > { %4218 = vmatprep.subr.bf16.mxu1 %v4217_v23  ;;  %v1706_v42 = vsel %vm9103_vm2, %v5241_v41, %v7956_v1  ;;  %vm9104_vm5 = vmmov %vm9102_vm1 }
 0x211   : > { %4168 = vmatpush1.bf16.msra.mxu0 %v9096_v15  ;;  %4220 = vmatpush1.bf16.msra.mxu1 %v4219_v35  ;;  %v7961_v30 = vpop.permute.xlu1 %1758  ;;  %v5244_v61 = vpop.permute.xlu0 %5243  ;;  %v9115_v15 = vpack.c.bf16 %v7533_v12, %v9114_v40  ;;  %v9127_v40 = vld [vmem:[#allocation26_spill] sm:$0xff] }
 0x212   : > { %v5246_v25 = vunpack.i.h.bf16 %v5244_v61  ;;  %v5245_v17 = vunpack.i.l.bf16 %v5244_v61 }
 0x214   : > { %v1774_v6 = vsel %vm9100_vm4, %v5245_v17, %v5246_v25  ;;  %v1775_v3 = vsel %vm9102_vm1, %v9101_v47, %v5245_v17  ;;  %v1773_v57 = vsel %vm9104_vm5, %v5246_v25, %v7961_v30  ;;  %vm9108_vm4 = vmmov %vm9106_vm3  ;;  %vm9109_vm1 = vcmp.lt.s32.totalorder %v5646_v28, 82  ;;  %v9116_v17 = vld [vmem:[#allocation23_spill] sm:$0xff] }
 0x215   : > { %v4223_v59 = vpack.c.bf16 %v1774_v6, %v1707_v44  ;;  %v7981_v31 = vpop.permute.xlu1 %1825  ;;  %v5249_v62 = vpop.permute.xlu0 %5248  ;;  %v4169_v0 = vpack.c.bf16 %v1775_v3, %v1708_v51  ;;  %v4221_v16 = vpack.c.bf16 %v1773_v57, %v1706_v42  ;;  %vm9111_vm2 = vmmov %vm9109_vm1  ;;  %v4425_v44 = vunpack.i.l.bf16 %v9116_v17  ;;  %v9117_v51 = vld [vmem:[#allocation34_spill] sm:$0xff]  ;;  %v9119_v3 = vld [vmem:[#allocation32_spill] sm:$0xff] }
 0x216   : > { %v5251_v19 = vunpack.i.h.bf16 %v5249_v62  ;;  %v5250_v55 = vunpack.i.l.bf16 %v5249_v62  ;;  %vm9112_vm5 = vmmov %vm9106_vm3  ;;  %v9118_v6 = vunpack.i.h.bf16 %v9117_v51  ;;  %v9120_v42 = vunpack.i.h.bf16 %v9119_v3  ;;  %v9132_v51 = vld [vmem:[#allocation46_spill] sm:$0xff] }
 0x217   : > { %4170 = vmatprep.subr.bf16.mxu0 %v4169_v0  ;;  %4222 = vmatprep.subr.bf16.mxu1 %v4221_v16 }
 0x218   : > { %4172 = vmatpush1.bf16.msra.mxu0 %v9105_v27  ;;  %4224 = vmatpush1.bf16.msra.mxu1 %v4223_v59  ;;  %v1841_v46 = vsel %vm9106_vm3, %v5250_v55, %v5251_v19  ;;  %v1842_v60 = vsel %vm9108_vm4, %v9107_v48, %v5250_v55  ;;  %v1840_v13 = vsel %vm9112_vm5, %v5251_v19, %v7981_v31  ;;  %vm9113_vm3 = vmmov %vm9109_vm1  ;;  %vm9203_vm5 = vcmp.lt.s32.totalorder %v5646_v28, 95 }
 0x219   : > { %v7986_v50 = vpop.permute.xlu1 %1892  ;;  %v5254_v43 = vpop.permute.xlu0 %5253 }
 0x21a   : > { %v5256_v8 = vunpack.i.h.bf16 %v5254_v43  ;;  %v5255_v9 = vunpack.i.l.bf16 %v5254_v43  ;;  %v4426_v43 = vunpack.i.h.bf16 %v9116_v17  ;;  %v9129_v17 = vld [vmem:[#allocation44_spill] sm:$0xff] }
 0x21c   : > { %v1908_v52 = vsel %vm9109_vm1, %v5255_v9, %v5256_v8  ;;  %v1909_v21 = vsel %vm9111_vm2, %v9110_v49, %v5255_v9  ;;  %v1907_v34 = vsel %vm9113_vm3, %v5256_v8, %v7986_v50  ;;  %v9121_v8 = vld [vmem:[#allocation27_spill] sm:$0xff]  ;;  %vm9204_vm3 = vmmov %vm9203_vm5 }
 0x21d   : > { %v4227_v32 = vpack.c.bf16 %v1908_v52, %v1841_v46  ;;  %v8006_v2 = vpop.permute.xlu1 %1959  ;;  %v5259_v26 = vpop.permute.xlu0 %5258  ;;  %v4173_v35 = vpack.c.bf16 %v1909_v21, %v1842_v60  ;;  %v4225_v4 = vpack.c.bf16 %v1907_v34, %v1840_v13  ;;  %v429_v9 = vsel %vm428_vm0, %v4426_v43, %v9121_v8  ;;  %v9142_v8 = vld [vmem:[#allocation66_spill] sm:$0xff] }
 0x21e   : > { %v5261_v11 = vunpack.i.h.bf16 %v5259_v26  ;;  %v5260_v23 = vunpack.i.l.bf16 %v5259_v26  ;;  %v9122_v46 = vpack.c.bf16 %v7588_v29, %v7561_v37  ;;  %v9123_v60 = vunpack.i.h.bf16 %v9000_v33  ;;  %v9124_v33 = vld [vmem:[#allocation58_spill] sm:$0xff]  ;;  %v9125_v26 = vld [vmem:[#allocation15_spill] sm:$0xff] }
 0x21f   : > { %4174 = vmatprep.subr.bf16.mxu0 %v4173_v35  ;;  %4226 = vmatprep.subr.bf16.mxu1 %v4225_v4  ;;  %v430_v29 = vsel %vm428_vm0, %v4425_v44, %v4426_v43  ;;  %v4285_v34 = vpack.c.bf16 %v429_v9, %v9076_v10  ;;  %v9141_v43 = vld [vmem:[#allocation67_spill] sm:$0xff] }
 0x220   : > { %4176 = vmatpush1.bf16.msra.mxu0 %v9115_v15  ;;  %4228 = vmatpush1.bf16.msra.mxu1 %v4227_v32  ;;  %v1975_v22 = vsel %vm1969_vm6, %v5260_v23, %v5261_v11  ;;  %v1976_v47 = vsel %vm1969_vm6, %v9118_v6, %v5260_v23  ;;  %v1974_v59 = vsel %vm1969_vm6, %v5261_v11, %v8006_v2  ;;  %v9126_v23 = vld [vmem:[#allocation14_spill] sm:$0xff]  ;;  %v9133_v6 = vld [vmem:[#allocation45_spill] sm:$0xff] }
 0x221   : > { %v8011_v41 = vpop.permute.xlu1 %2026  ;;  %v431_v52 = vsel %vm428_vm0, %v9123_v60, %v4425_v44  ;;  %v4235_v15 = vpack.c.bf16 %v9127_v40, %v9126_v23  ;;  %v9130_v44 = vld [vmem:[#allocation47_spill] sm:$0xff]  ;;  %v9143_v9 = vpack.c.bf16 %v9141_v43, %v9142_v8  ;;  %v8130_v23 = vld [vmem:[%s8582_s2 + $0x20] sm:$0xff]  ;;  %v8150_v43 = vld [vmem:[%s8582_s2 + $0x38] sm:$0xff]  ;;  %vm9193_vm0 = vcmp.lt.s32.totalorder %v5646_v28, 87 }
 0x222   : > { %v5264_v54 = vpop.permute.xlu0 %5263  ;;  %v4233_v35 = vpack.c.bf16 %v431_v52, %v9125_v26  ;;  %v9147_v52 = vld [vmem:[#allocation52_spill] sm:$0xff] }
 0x223   : > { %v5266_v61 = vunpack.i.h.bf16 %v5264_v54  ;;  %v5265_v25 = vunpack.i.l.bf16 %v5264_v54  ;;  %v9128_v54 = vld [vmem:[#allocation16_spill] sm:$0xff] }
 0x224   : > { %v4287_v10 = vpack.c.bf16 %v430_v29, %v9128_v54  ;;  %v9152_v54 = vld [vmem:[#allocation50_spill] sm:$0xff] }
 0x225   : > { %v2042_v12 = vsel %vm2036_vm7, %v5265_v25, %v5266_v61  ;;  %v2043_v57 = vsel %vm2036_vm7, %v9120_v42, %v5265_v25  ;;  %v2041_v62 = vsel %vm2036_vm7, %v5266_v61, %v8011_v41  ;;  %v2090_v16 = vpop.permute.xlu1 %2089  ;;  %v8069_v61 = vld [vmem:[%s8582_s2] sm:$0xff]  ;;  %v8083_v42 = vld [vmem:[%s8582_s2 + $0x18] sm:$0xff] }
 0x226   : > { %v4231_v0 = vpack.c.bf16 %v2042_v12, %v1975_v22  ;;  %v2088_v19 = vpop.permute.xlu0 %2087  ;;  %v4177_v55 = vpack.c.bf16 %v2043_v57, %v1976_v47  ;;  %v4229_v27 = vpack.c.bf16 %v2041_v62, %v1974_v59  ;;  %v9131_v22 = vpack.c.bf16 %v9129_v17, %v9130_v44  ;;  %v8092_v59 = vld [vmem:[%s8582_s2 + $0x10] sm:$0xff]  ;;  %v9135_v62 = vld [vmem:[#allocation42_spill] sm:$0xff]  ;;  %v9154_v17 = vld [vmem:[#allocation63_spill] sm:$0xff] }
 0x227   : > { %v2110_v48 = vsel %vm2103_vm9, %v2088_v19, %v2090_v16  ;;  %v2111_v32 = vsel %vm2103_vm9, %v9124_v33, %v2088_v19  ;;  %v9134_v47 = vpack.c.bf16 %v9132_v51, %v9133_v6  ;;  %v9138_v19 = vld [vmem:[#allocation41_spill] sm:$0xff]  ;;  %v9157_v6 = vld [vmem:[#allocation88_spill] sm:$0xff] }
 0x228   : > { %4178 = vmatprep.subr.bf16.mxu0 %v4177_v55  ;;  %4230 = vmatprep.subr.bf16.mxu1 %v4229_v27  ;;  %v9139_v55 = vld [vmem:[#allocation40_spill] sm:$0xff]  ;;  %v9155_v44 = vld [vmem:[#allocation61_spill] sm:$0xff] }
 0x229   : > { %4180 = vmatpush1.bf16.msra.mxu0 %v9122_v46  ;;  %4232 = vmatpush1.bf16.msra.mxu1 %v4231_v0  ;;  %v8045_v49 = vpop.permute.xlu1 %2093  ;;  %v9136_v0 = vld [vmem:[#allocation30_spill] sm:$0xff]  ;;  %v9140_v27 = vpack.c.bf16 %v9138_v19, %v9139_v55  ;;  %v9144_v46 = vld [vmem:[#allocation69_spill] sm:$0xff] }
 0x22a   : > { %2997 = vmatprep.subr.mxu0 %v2110_v48  ;;  %v9145_v48 = vld [vmem:[#allocation68_spill] sm:$0xff] }
 0x22b   : > { %v2092_v21 = vpop.permute.xlu0 %2091  ;;  %v9146_v60 = vpack.c.bf16 %v9144_v46, %v9145_v48  ;;  %v9163_v48 = vld [vmem:[#allocation86_spill] sm:$0xff] }
 0x22c   : > { %v2109_v13 = vsel %vm2103_vm9, %v2090_v16, %v2092_v21  ;;  %v2108_v37 = vsel %vm2103_vm9, %v2092_v21, %v8045_v49  ;;  %v9137_v16 = vpack.c.bf16 %v9135_v62, %v9136_v0  ;;  %v9148_v21 = vunpack.i.h.bf16 %v9147_v52  ;;  %v9160_v0 = vld [vmem:[#allocation90_spill] sm:$0xff] }
 0x22d   : > { %3086 = vmatprep.subr.mxu1 %v2108_v37  ;;  %2998 = vmatpush1.msra.mxu0 %v2111_v32  ;;  %v8059_v4 = vpop.permute.xlu1 %1029  ;;  %v9149_v37 = vld [vmem:[#allocation48_spill] sm:$0xff] }
 0x22e   : > { %3087 = vmatpush1.msra.mxu1 %v2109_v13  ;;  %4234 = vmatprep.subr.bf16.mxu0 %v4233_v35  ;;  %v9150_v29 = vunpack.i.h.bf16 %v9149_v37  ;;  %v8121_v35 = vld [vmem:[%s8582_s2 + $0x28] sm:$0xff] }
 0x22f   : > { %v8061_v11 = vpop.permute.xlu0 %5268  ;;  %4286 = vmatprep.subr.bf16.mxu1 %v4285_v34  ;;  %3010 = vmatmul.mubr.f32.vlgmr.msra.gmra.mrb[16].mxu0 %v8069_v61 }
 0x230   : > { %3099 = vmatmul.mubr.f32.vlgmr.msra.gmra.mrb[16].mxu1 %v8069_v61  ;;  %4236 = vmatpush1.bf16.msra.mxu0 %v4235_v15  ;;  %v5270_v25 = vunpack.i.l.bf16 %v8061_v11  ;;  %v9151_v15 = vld [vmem:[#allocation64_spill] sm:$0xff]  ;;  %v5271_v55 = vunpack.i.h.bf16 %v8061_v11 }
 0x231   : > { %4288 = vmatpush1.bf16.msra.mxu1 %v4287_v10  ;;  %4238 = vmatprep.subr.bf16.mxu0 %v9131_v22  ;;  %v1097_v12 = vpop.permute.xlu1 %1096  ;;  %v9153_v10 = vpack.c.bf16 %v9151_v15, %v9152_v54  ;;  %v9156_v22 = vpack.c.bf16 %v9154_v17, %v9155_v44  ;;  %v9170_v15 = vld [vmem:[#allocation104_spill] sm:$0xff]  ;;  %v9173_v17 = vld [vmem:[#allocation106_spill] sm:$0xff] }
 0x232   : > { %4290 = vmatprep.subr.bf16.mxu1 %v9134_v47  ;;  %3896 = vmatprep.mubr.msk.f32.mxu0 %vm2576_vm8, %v8083_v42  ;;  %v1034_v13 = vsel %vm1031_vm10, %v9148_v21, %v5270_v25  ;;  %v9158_v47 = vld [vmem:[#allocation91_spill] sm:$0xff]  ;;  %v9166_v21 = vld [vmem:[#allocation85_spill] sm:$0xff] }
 0x233   : > { %v5274_v3 = vpop.permute.xlu0 %5273  ;;  %3900 = vmatprep.mubr.msk.f32.mxu1 %vm2576_vm8, %v8083_v42  ;;  %3016 = vmatmul.mubr.f32.gmra.mrb[18].mxu0 %v8092_v59  ;;  %v9159_v62 = vpack.c.bf16 %v9157_v6, %v9158_v47  ;;  %v9176_v47 = vld [vmem:[#allocation81_spill] sm:$0xff] }
 0x234   : > { %v5275_v57 = vunpack.i.l.bf16 %v5274_v3  ;;  %3105 = vmatmul.mubr.f32.gmra.mrb[18].mxu1 %v8092_v59  ;;  %4240 = vmatpush1.bf16.msra.mxu0 %v9137_v16  ;;  %v5276_v40 = vunpack.i.h.bf16 %v5274_v3  ;;  %v9161_v16 = vld [vmem:[#allocation89_spill] sm:$0xff] }
 0x235   : > { %4292 = vmatpush1.bf16.msra.mxu1 %v9140_v27  ;;  %4242 = vmatprep.subr.bf16.mxu0 %v9143_v9  ;;  %v1164_v33 = vpop.permute.xlu1 %1163  ;;  %v9162_v19 = vpack.c.bf16 %v9160_v0, %v9161_v16  ;;  %v8159_v9 = vld [vmem:[%s8582_s2 + $0x30] sm:$0xff] }
 0x236   : > { %4294 = vmatprep.subr.bf16.mxu1 %v9146_v60  ;;  %v1101_v34 = vsel %vm1098_vm11, %v9150_v29, %v5275_v57  ;;  %3897 = vmatprep.mubr.msk.f32.mxu0 %vm2576_vm8, %v8121_v35  ;;  %v9164_v60 = vld [vmem:[#allocation72_spill] sm:$0xff]  ;;  %v1099_v29 = vsel %vm1098_vm11, %v5276_v40, %v1097_v12 }
 0x237   : > { %v5279_v32 = vpop.permute.xlu0 %5278  ;;  %v4253_v26 = vpack.c.bf16 %v1101_v34, %v1034_v13  ;;  %3901 = vmatprep.mubr.msk.f32.mxu1 %vm2576_vm8, %v8121_v35  ;;  %3022 = vmatmul.mubr.f32.gmra.mrb[20].mxu0 %v8130_v23  ;;  %v9165_v52 = vpack.c.bf16 %v9163_v48, %v9164_v60  ;;  %v9167_v13 = vld [vmem:[#allocation84_spill] sm:$0xff]  ;;  %v9169_v34 = vld [vmem:[#allocation105_spill] sm:$0xff]  ;;  %v1100_v60 = vsel %vm1098_vm11, %v5275_v57, %v5276_v40  ;;  %vm9195_vm11 = vcmp.lt.s32.totalorder %v5646_v28, 86 }
 0x238   : > { %3111 = vmatmul.mubr.f32.gmra.mrb[20].mxu1 %v8130_v23  ;;  %4244 = vmatpush1.bf16.msra.mxu0 %v9153_v10  ;;  %v5280_v51 = vunpack.i.l.bf16 %v5279_v32  ;;  %v9168_v37 = vpack.c.bf16 %v9166_v21, %v9167_v13  ;;  %v9171_v54 = vpack.c.bf16 %v9169_v34, %v9170_v15  ;;  %v9172_v10 = vld [vmem:[#allocation107_spill] sm:$0xff]  ;;  %v5281_v16 = vunpack.i.h.bf16 %v5279_v32  ;;  %v9178_v21 = vld [vmem:[#allocation102_spill] sm:$0xff]  ;;  %v9179_v13 = vld [vmem:[#allocation93_spill] sm:$0xff] }
 0x239   : > { %4296 = vmatpush1.bf16.msra.mxu1 %v9156_v22  ;;  %4246 = vmatprep.subr.bf16.mxu0 %v9159_v62  ;;  %v1231_v3 = vpop.permute.xlu1 %1230  ;;  %v9174_v44 = vpack.c.bf16 %v9172_v10, %v9173_v17  ;;  %v9175_v22 = vunpack.i.h.bf16 %v7693_v14  ;;  %v9177_v62 = vunpack.i.h.bf16 %v9176_v47  ;;  %v5415_v14 = vld [vmem:[%s8582_s2 + $0x8] sm:$0xff]  ;;  %v9181_v34 = vld [vmem:[#allocation101_spill] sm:$0xff]  ;;  %v1033_v10 = vsel %vm1031_vm10, %v5270_v25, %v5271_v55  ;;  %v9185_v25 = vld [vmem:[#allocation54_spill] sm:$0xff] }
 0x23a   : > { %4298 = vmatprep.subr.bf16.mxu1 %v9162_v19  ;;  %3898 = vmatprep.mubr.msk.f32.mxu0 %vm2576_vm8, %v8150_v43  ;;  %v4307_v57 = vpack.c.bf16 %v1100_v60, %v1033_v10  ;;  %v1167_v11 = vsel %vm1165_vm12, %v5280_v51, %v5281_v16 }
 0x23b   : > { %v5284_v27 = vpop.permute.xlu0 %5283  ;;  %3902 = vmatprep.mubr.msk.f32.mxu1 %vm2576_vm8, %v8150_v43  ;;  %3028 = vmatmul.mubr.f32.gmra.mrb[22].mxu0 %v8159_v9  ;;  %v1168_v6 = vsel %vm1165_vm12, %v9175_v22, %v5280_v51 }
 0x23c   : > { %v5285_v8 = vunpack.i.l.bf16 %v5284_v27  ;;  %3117 = vmatmul.mubr.f32.gmra.mrb[22].mxu1 %v8159_v9  ;;  %v5286_v46 = vunpack.i.h.bf16 %v5284_v27  ;;  %4248 = vmatpush1.bf16.msra.mxu0 %v9165_v52  ;;  %v1032_v27 = vsel %vm1031_vm10, %v5271_v55, %v8059_v4  ;;  %v9182_v4 = vld [vmem:[#allocation99_spill] sm:$0xff]  ;;  %vm9194_vm10 = vmmov %vm9193_vm0 }
 0x23d   : > { %4300 = vmatpush1.bf16.msra.mxu1 %v9168_v37  ;;  %4250 = vmatprep.subr.bf16.mxu0 %v9171_v54  ;;  %v1298_v12 = vpop.permute.xlu1 %1297  ;;  %v4305_v52 = vpack.c.bf16 %v1099_v29, %v1032_v27  ;;  %v9180_v37 = vpack.c.bf16 %v9178_v21, %v9179_v13  ;;  %v9183_v15 = vpack.c.bf16 %v9181_v34, %v9182_v4 }
 0x23e   : > { %4302 = vmatprep.subr.bf16.mxu1 %v9174_v44  ;;  %v1235_v0 = vsel %vm1232_vm13, %v9177_v62, %v5285_v8  ;;  %3903 = vmatprep.mubr.msk.f32.mxu0 %vm2576_vm8, %v5415_v14  ;;  %v1233_v54 = vsel %vm1232_vm13, %v5286_v46, %v1231_v3  ;;  %v1166_v44 = vsel %vm1165_vm12, %v5281_v16, %v1164_v33  ;;  %v9184_v62 = vld [vmem:[#allocation53_spill] sm:$0xff]  ;;  %v9189_v33 = vunpack.i.h.bf16 %v7811_v45  ;;  %v9190_v45 = vld [vmem:[#allocation74_spill] sm:$0xff]  ;;  %vm9196_vm12 = vmmov %vm9195_vm11 }
 0x23f   : > { %v5289_v19 = vpop.permute.xlu0 %5288  ;;  %v4257_v48 = vpack.c.bf16 %v1235_v0, %v1168_v6  ;;  %3907 = vmatprep.mubr.msk.f32.mxu1 %vm2576_vm8, %v5415_v14  ;;  %v1234_v22 = vsel %vm1232_vm13, %v5285_v8, %v5286_v46  ;;  %v4309_v3 = vpack.c.bf16 %v1233_v54, %v1166_v44  ;;  %v9186_v55 = vpack.c.bf16 %v9184_v62, %v9185_v25  ;;  %vm9197_vm13 = vmmov %vm9193_vm0 }
 0x240   : > { %v5290_v32 = vunpack.i.l.bf16 %v5289_v19  ;;  %4252 = vmatpush1.bf16.msra.mxu0 %v9180_v37  ;;  %v5291_v17 = vunpack.i.h.bf16 %v5289_v19  ;;  %v4311_v16 = vpack.c.bf16 %v1234_v22, %v1167_v11  ;;  %v9191_v37 = vld [vmem:[#allocation51_spill] sm:$0xff] }
 0x241   : > { %4304 = vmatpush1.bf16.msra.mxu1 %v9183_v15  ;;  %4254 = vmatprep.subr.bf16.mxu0 %v4253_v26  ;;  %v1365_v40 = vpop.permute.xlu1 %1364  ;;  %v9187_v26 = vld [vmem:[#allocation76_spill] sm:$0xff]  ;;  %v9192_v34 = vpack.c.bf16 %v9190_v45, %v9191_v37 }
 0x242   : > { %4306 = vmatprep.subr.bf16.mxu1 %v4305_v52  ;;  %v9188_v0 = vunpack.i.h.bf16 %v9187_v26  ;;  %v1300_v51 = vsel %vm1299_vm14, %v5291_v17, %v1298_v12  ;;  %v1301_v12 = vsel %vm1299_vm14, %v5290_v32, %v5291_v17 }
 0x243   : > { %v5294_v29 = vpop.permute.xlu0 %5293 }
 0x244   : > { %v5296_v6 = vunpack.i.h.bf16 %v5294_v29  ;;  %v5295_v47 = vunpack.i.l.bf16 %v5294_v29  ;;  %4256 = vmatpush1.bf16.msra.mxu0 %v9186_v55  ;;  %v1302_v19 = vsel %vm1299_vm14, %v9188_v0, %v5290_v32  ;;  %vm9198_vm14 = vmmov %vm9195_vm11 }
 0x245   : > { %4308 = vmatpush1.bf16.msra.mxu1 %v4307_v57  ;;  %4258 = vmatprep.subr.bf16.mxu0 %v4257_v48  ;;  %v1432_v27 = vpop.permute.xlu1 %1431 }
 0x246   : > { %4310 = vmatprep.subr.bf16.mxu1 %v4309_v3  ;;  %v1369_v8 = vsel %vm1366_vm15, %v9189_v33, %v5295_v47  ;;  %v1367_v46 = vsel %vm1366_vm15, %v5296_v6, %v1365_v40  ;;  %v1368_v48 = vsel %vm1366_vm15, %v5295_v47, %v5296_v6  ;;  %vm9199_vm15 = vcmp.lt.s32.totalorder %v5646_v28, 96 }
 0x247   : > { %v5299_v14 = vpop.permute.xlu0 %5298  ;;  %v4261_v60 = vpack.c.bf16 %v1369_v8, %v1302_v19  ;;  %v4313_v52 = vpack.c.bf16 %v1367_v46, %v1300_v51  ;;  %v4315_v4 = vpack.c.bf16 %v1368_v48, %v1301_v12  ;;  %vm9200_vm4 = vmmov %vm9199_vm15 }
 0x248   : > { %v5301_v21 = vunpack.i.h.bf16 %v5299_v14  ;;  %v5300_v13 = vunpack.i.l.bf16 %v5299_v14  ;;  %4260 = vmatpush1.bf16.msra.mxu0 %v9192_v34  ;;  %vm9201_vm1 = vmmov %vm9200_vm4 }
 0x249   : > { %4312 = vmatpush1.bf16.msra.mxu1 %v4311_v16  ;;  %4262 = vmatprep.subr.bf16.mxu0 %v4261_v60  ;;  %v1499_v15 = vpop.permute.xlu1 %1498  ;;  %vm9202_vm2 = vmmov %vm9201_vm1 }
 0x24a   : > { %4314 = vmatprep.subr.bf16.mxu1 %v4313_v52  ;;  %v1435_v40 = vsel %vm9193_vm0, %v5300_v13, %v5301_v21  ;;  %v1436_v32 = vsel %vm9194_vm10, %v5216_v7, %v5300_v13  ;;  %v1434_v44 = vsel %vm9197_vm13, %v5301_v21, %v1432_v27  ;;  %vm9205_vm0 = vmmov %vm9204_vm3 }
 0x24b   : > { %v5304_v54 = vpop.permute.xlu0 %5303  ;;  %vm9206_vm10 = vmmov %vm9205_vm0 }
 0x24c   : > { %v5306_v10 = vunpack.i.h.bf16 %v5304_v54  ;;  %v5305_v57 = vunpack.i.l.bf16 %v5304_v54  ;;  %4264 = vmatpush1.bf16.msra.mxu0 %v4263_v38 }
 0x24d   : > { %4316 = vmatpush1.bf16.msra.mxu1 %v4315_v4  ;;  %v5314_v38 = vpop.permute.xlu1 %5313 }
 0x24e   : > { %v1502_v17 = vsel %vm9195_vm11, %v5305_v57, %v5306_v10  ;;  %v1503_v29 = vsel %vm9196_vm12, %v5226_v5, %v5305_v57  ;;  %v1501_v39 = vsel %vm9198_vm14, %v5306_v10, %v1499_v15  ;;  %v5316_v7 = vunpack.i.h.bf16 %v5314_v38 }
 0x24f   : > { %v4319_v36 = vpack.c.bf16 %v1502_v17, %v1435_v40  ;;  %v5309_v24 = vpop.permute.xlu0 %5308  ;;  %v4265_v22 = vpack.c.bf16 %v1503_v29, %v1436_v32  ;;  %v4317_v6 = vpack.c.bf16 %v1501_v39, %v1434_v44  ;;  %v5315_v47 = vunpack.i.l.bf16 %v5314_v38 }
 0x250   : > { %v5311_v3 = vunpack.i.h.bf16 %v5309_v24  ;;  %v5310_v11 = vunpack.i.l.bf16 %v5309_v24  ;;  %vm9207_vm11 = vcmp.lt.s32.totalorder %v5646_v28, 94 }
 0x251   : > { %4266 = vmatprep.subr.bf16.mxu0 %v4265_v22  ;;  %4318 = vmatprep.subr.bf16.mxu1 %v4317_v6  ;;  %v5324_v58 = vpop.permute.xlu1 %5323  ;;  %v1568_v56 = vsel %vm9202_vm2, %v5315_v47, %v5316_v7  ;;  %vm9208_vm12 = vmmov %vm9207_vm11 }
 0x252   : > { %4268 = vmatpush1.bf16.msra.mxu0 %v4267_v53  ;;  %4320 = vmatpush1.bf16.msra.mxu1 %v4319_v36  ;;  %v5326_v62 = vunpack.i.h.bf16 %v5324_v58  ;;  %v5325_v25 = vunpack.i.l.bf16 %v5324_v58  ;;  %v1569_v0 = vsel %vm9199_vm15, %v5311_v3, %v5315_v47  ;;  %v1571_v19 = vsel %vm9200_vm4, %v7922_v20, %v5310_v11  ;;  %vm9209_vm13 = vmmov %vm9207_vm11 }
 0x253   : > { %v5319_v5 = vpop.permute.xlu0 %5318  ;;  %v1570_v33 = vsel %vm9201_vm1, %v5310_v11, %v5311_v3  ;;  %vm9210_vm14 = vmmov %vm9207_vm11  ;;  %vm9211_vm15 = vcmp.lt.s32.totalorder %v5646_v28, 84 }
 0x254   : > { %v5321_v55 = vunpack.i.h.bf16 %v5319_v5  ;;  %v5320_v26 = vunpack.i.l.bf16 %v5319_v5  ;;  %v1635_v51 = vsel %vm9206_vm10, %v5325_v25, %v5326_v62  ;;  %vm9212_vm4 = vmmov %vm9211_vm15 }
 0x255   : > { %v5334_v16 = vpop.permute.xlu1 %5333  ;;  %v4321_v60 = vpack.c.bf16 %v1635_v51, %v1568_v56  ;;  %vm9213_vm1 = vmmov %vm9212_vm4 }
 0x256   : > { %v1636_v63 = vsel %vm9203_vm5, %v5321_v55, %v5325_v25  ;;  %v1638_v53 = vsel %vm9204_vm3, %v7933_v18, %v5320_v26  ;;  %v1637_v8 = vsel %vm9205_vm0, %v5320_v26, %v5321_v55  ;;  %v5335_v52 = vunpack.i.l.bf16 %v5334_v16  ;;  %vm9214_vm2 = vmmov %vm9213_vm1 }
 0x257   : > { %v4271_v20 = vpack.c.bf16 %v1638_v53, %v1571_v19  ;;  %v4323_v46 = vpack.c.bf16 %v1636_v63, %v1569_v0  ;;  %v5329_v27 = vpop.permute.xlu0 %5328  ;;  %v4269_v14 = vpack.c.bf16 %v1637_v8, %v1570_v33  ;;  %4322 = vmatprep.subr.bf16.mxu1 %v4321_v60  ;;  %v5336_v21 = vunpack.i.h.bf16 %v5334_v16 }
 0x258   : > { %v5331_v48 = vunpack.i.h.bf16 %v5329_v27  ;;  %v5330_v13 = vunpack.i.l.bf16 %v5329_v27  ;;  %vm9215_vm5 = vcmp.lt.s32.totalorder %v5646_v28, 83 }
 0x259   : > { %4270 = vmatprep.subr.bf16.mxu0 %v4269_v14  ;;  %4324 = vmatpush1.bf16.msra.mxu1 %v4323_v46  ;;  %v1702_v57 = vsel %vm9210_vm14, %v5335_v52, %v5336_v21  ;;  %vm9216_vm3 = vmmov %vm9215_vm5 }
 0x25a   : > { %4272 = vmatpush1.bf16.msra.mxu0 %v4271_v20  ;;  %v5344_v18 = vpop.permute.xlu1 %5343  ;;  %v1703_v12 = vsel %vm9207_vm11, %v5331_v48, %v5335_v52  ;;  %v1705_v54 = vsel %vm9208_vm12, %v7956_v1, %v5330_v13  ;;  %v1704_v10 = vsel %vm9209_vm13, %v5330_v13, %v5331_v48  ;;  %vm9217_vm0 = vmmov %vm9216_vm3  ;;  %vm9219_vm11 = vcmp.lt.s32.totalorder %v5646_v28, 82 }
 0x25b   : > { %v5346_v45 = vunpack.i.h.bf16 %v5344_v18  ;;  %v5345_v37 = vunpack.i.l.bf16 %v5344_v18  ;;  %v5339_v34 = vpop.permute.xlu0 %5338  ;;  %vm9218_vm10 = vmmov %vm9217_vm0 }
 0x25c   : > { %v5341_v4 = vunpack.i.h.bf16 %v5339_v34  ;;  %v5340_v15 = vunpack.i.l.bf16 %v5339_v34  ;;  %vm9220_vm12 = vmmov %vm9219_vm11 }
 0x25d   : > { %v1769_v40 = vsel %vm9211_vm15, %v5345_v37, %v5346_v45  ;;  %vm9221_vm13 = vmmov %vm9219_vm11 }
 0x25e   : > { %v1770_v32 = vsel %vm9212_vm4, %v5341_v4, %v5345_v37  ;;  %v1772_v17 = vsel %vm9213_vm1, %v7961_v30, %v5340_v15  ;;  %v1771_v29 = vsel %vm9214_vm2, %v5340_v15, %v5341_v4  ;;  %v4325_v1 = vpack.c.bf16 %v1769_v40, %v1702_v57  ;;  %vm9222_vm14 = vmmov %vm9219_vm11 }
 0x25f   : > { %v4275_v44 = vpack.c.bf16 %v1772_v17, %v1705_v54  ;;  %v4327_v39 = vpack.c.bf16 %v1770_v32, %v1703_v12  ;;  %v5354_v36 = vpop.permute.xlu1 %5353  ;;  %v4273_v38 = vpack.c.bf16 %v1771_v29, %v1704_v10  ;;  %v5349_v24 = vpop.permute.xlu0 %5348 }
 0x260   : > { %4326 = vmatprep.subr.bf16.mxu1 %v4325_v1  ;;  %v5356_v22 = vunpack.i.h.bf16 %v5354_v36  ;;  %v5355_v6 = vunpack.i.l.bf16 %v5354_v36  ;;  %v5351_v7 = vunpack.i.h.bf16 %v5349_v24  ;;  %v5350_v47 = vunpack.i.l.bf16 %v5349_v24 }
 0x261   : > { %4274 = vmatprep.subr.bf16.mxu0 %v4273_v38  ;;  %4328 = vmatpush1.bf16.msra.mxu1 %v4327_v39 }
 0x262   : > { %4276 = vmatpush1.bf16.msra.mxu0 %v4275_v44  ;;  %v1836_v25 = vsel %vm9215_vm5, %v5355_v6, %v5356_v22  ;;  %v1837_v55 = vsel %vm9216_vm3, %v5351_v7, %v5355_v6  ;;  %v1839_v26 = vsel %vm9217_vm0, %v7981_v31, %v5350_v47  ;;  %v1838_v0 = vsel %vm9218_vm10, %v5350_v47, %v5351_v7 }
 0x263   : > { %v5364_v3 = vpop.permute.xlu1 %5363 }
 0x264   : > { %v5366_v11 = vunpack.i.h.bf16 %v5364_v3  ;;  %v5365_v30 = vunpack.i.l.bf16 %v5364_v3  ;;  %v5359_v58 = vpop.permute.xlu0 %5358 }
 0x265   : > { %v5361_v5 = vunpack.i.h.bf16 %v5359_v58  ;;  %v5360_v62 = vunpack.i.l.bf16 %v5359_v58 }
 0x266   : > { %v1903_v19 = vsel %vm9219_vm11, %v5365_v30, %v5366_v11 }
 0x267   : > { %v1904_v33 = vsel %vm9220_vm12, %v5361_v5, %v5365_v30  ;;  %v1906_v56 = vsel %vm9221_vm13, %v7986_v50, %v5360_v62  ;;  %v1905_v63 = vsel %vm9222_vm14, %v5360_v62, %v5361_v5  ;;  %v4329_v53 = vpack.c.bf16 %v1903_v19, %v1836_v25 }
 0x268   : > { %v4279_v8 = vpack.c.bf16 %v1906_v56, %v1839_v26  ;;  %v4331_v51 = vpack.c.bf16 %v1904_v33, %v1837_v55  ;;  %v5374_v31 = vpop.permute.xlu1 %5373  ;;  %v4277_v20 = vpack.c.bf16 %v1905_v63, %v1838_v0 }
 0x269   : > { %v5369_v46 = vpop.permute.xlu0 %5368  ;;  %4330 = vmatprep.subr.bf16.mxu1 %v4329_v53  ;;  %v5376_v16 = vunpack.i.h.bf16 %v5374_v31  ;;  %v5375_v27 = vunpack.i.l.bf16 %v5374_v31 }
 0x26a   : > { %4278 = vmatprep.subr.bf16.mxu0 %v4277_v20  ;;  %4332 = vmatpush1.bf16.msra.mxu1 %v4331_v51  ;;  %v5371_v14 = vunpack.i.h.bf16 %v5369_v46  ;;  %v5370_v60 = vunpack.i.l.bf16 %v5369_v46 }
 0x26b   : > { %4280 = vmatpush1.bf16.msra.mxu0 %v4279_v8  ;;  %v1970_v45 = vsel %vm1969_vm6, %v5375_v27, %v5376_v16 }
 0x26c   : > { %v5384_v52 = vpop.permute.xlu1 %5383  ;;  %v1971_v37 = vsel %vm1969_vm6, %v5371_v14, %v5375_v27  ;;  %v1973_v34 = vsel %vm1969_vm6, %v8006_v2, %v5370_v60  ;;  %v1972_v12 = vsel %vm1969_vm6, %v5370_v60, %v5371_v14 }
 0x26d   : > { %v5386_v48 = vunpack.i.h.bf16 %v5384_v52  ;;  %v5385_v50 = vunpack.i.l.bf16 %v5384_v52  ;;  %v5379_v21 = vpop.permute.xlu0 %5378 }
 0x26e   : > { %v5381_v13 = vunpack.i.h.bf16 %v5379_v21  ;;  %v5380_v18 = vunpack.i.l.bf16 %v5379_v21 }
 0x26f   : > { %v2037_v4 = vsel %vm2036_vm7, %v5385_v50, %v5386_v48  ;;  %v8322_v15 = vpop.f32.mrb[0].mxu0 }
 0x270   : > { %v2038_v54 = vsel %vm2036_vm7, %v5381_v13, %v5385_v50  ;;  %v2040_v10 = vsel %vm2036_vm7, %v8011_v41, %v5380_v18  ;;  %v2039_v40 = vsel %vm2036_vm7, %v5380_v18, %v5381_v13  ;;  %v4333_v2 = vpack.c.bf16 %v2037_v4, %v1970_v45  ;;  %v8331_v32 = vpop.f32.mrb[0].mxu1  ;;  %v8333_v39 = vpop.f32.mrb[1].mxu0 }
 0x271   : > { %v2098_v57 = vpop.permute.xlu1 %2097  ;;  %v4283_v17 = vpack.c.bf16 %v2040_v10, %v1973_v34  ;;  %v4335_v29 = vpack.c.bf16 %v2038_v54, %v1971_v37  ;;  %v4281_v44 = vpack.c.bf16 %v2039_v40, %v1972_v12  ;;  %v8335_v36 = vpop.f32.mrb[1].mxu1  ;;  %v9223_v18 = vlaneseq }
 0x272   : > { %4334 = vmatprep.subr.bf16.mxu1 %v4333_v2 }
 0x273   : > { %4282 = vmatprep.subr.bf16.mxu0 %v4281_v44  ;;  %4336 = vmatpush1.bf16.msra.mxu1 %v4335_v29  ;;  %v3495_v45 = vshrl.u32 %v9223_v18, 7 }
 0x274   : > { %v2096_v1 = vpop.permute.xlu0 %2095  ;;  %4284 = vmatpush1.bf16.msra.mxu0 %v4283_v17 }
 0x275   : > { %v2106_v38 = vsel %vm2103_vm9, %v2096_v1, %v2098_v57  ;;  %v2107_v7 = vsel %vm2103_vm9, %v8045_v49, %v2096_v1  ;;  %v8399_v12 = vsub.s32 0, %v3495_v45  ;;  %v8401_v4 = vsub.s32 1, %v3495_v45 }
 0x276   : > { %v2102_v41 = vpop.permute.xlu1 %2101  ;;  %3175 = vmatprep.subr.mxu0 %v2106_v38  ;;  %v8403_v10 = vsub.s32 2, %v3495_v45  ;;  %v8407_v40 = vsub.s32 4, %v3495_v45  ;;  %v8409_v2 = vsub.s32 5, %v3495_v45  ;;  %v8411_v1 = vsub.s32 6, %v3495_v45 }
 0x277   : > { %v8346_v47 = vpop.f32.mrb[2].mxu0  ;;  %v8413_v44 = vsub.s32 7, %v3495_v45 }
 0x278   : > { %v2100_v24 = vpop.permute.xlu0 %2099  ;;  %3176 = vmatpush1.msra.mxu0 %v2107_v7  ;;  %v8348_v3 = vpop.f32.mrb[2].mxu1 }
 0x279   : > { %v2105_v22 = vsel %vm2103_vm9, %v2098_v57, %v2100_v24  ;;  %v2104_v6 = vsel %vm2103_vm9, %v2100_v24, %v2102_v41  ;;  %v8350_v11 = vpop.f32.mrb[3].mxu0  ;;  %3188 = vmatmul.mubr.f32.vlgmr.msra.gmra.mrb[24].mxu0 %v8069_v61  ;;  %v8354_v30 = vpop.f32.mrb[3].mxu1  ;;  %v8405_v57 = vsub.s32 3, %v3495_v45 }
 0x27a   : > { %3264 = vmatprep.subr.mxu1 %v2104_v6  ;;  %3904 = vmatprep.mubr.msk.f32.mxu0 %vm2576_vm8, %v8083_v42 }
 0x27b   : > { %3265 = vmatpush1.msra.mxu1 %v2105_v22 }
 0x27c   : > { %3277 = vmatmul.mubr.f32.vlgmr.msra.gmra.mrb[24].mxu1 %v8069_v61 }
 0x27d   : > { %3908 = vmatprep.mubr.msk.f32.mxu1 %vm2576_vm8, %v8083_v42  ;;  %3194 = vmatmul.mubr.f32.gmra.mrb[26].mxu0 %v8092_v59 }
 0x27e   : > { %3905 = vmatprep.mubr.msk.f32.mxu0 %vm2576_vm8, %v8121_v35 }
 0x27f   : > { %v8366_v28 = vpop.f32.mrb[4].mxu0 }
 0x280   : > { %3283 = vmatmul.mubr.f32.gmra.mrb[26].mxu1 %v8092_v59  ;;  %v8368_v49 = vpop.f32.mrb[4].mxu1  ;;  %v8370_v61 = vpop.f32.mrb[5].mxu0 }
 0x281   : > { %3909 = vmatprep.mubr.msk.f32.mxu1 %vm2576_vm8, %v8121_v35  ;;  %3200 = vmatmul.mubr.f32.gmra.mrb[28].mxu0 %v8130_v23  ;;  %v8374_v42 = vpop.f32.mrb[5].mxu1 }
 0x282   : > { %3906 = vmatprep.mubr.msk.f32.mxu0 %vm2576_vm8, %v8150_v43 }
 0x284   : > { %3289 = vmatmul.mubr.f32.gmra.mrb[28].mxu1 %v8130_v23 }
 0x285   : > { %3910 = vmatprep.mubr.msk.f32.mxu1 %vm2576_vm8, %v8150_v43  ;;  %3206 = vmatmul.mubr.f32.gmra.mrb[30].mxu0 %v8159_v9 }
 0x288   : > { %3295 = vmatmul.mubr.f32.gmra.mrb[30].mxu1 %v8159_v9  ;;  %v2673_v59 = vpop.f32.mrb[6].mxu0 }
 0x289   : > { %3349 = vst [vmem:[#allocation4 + $0x180] sm:$0xff] %v2673_v59  ;;  %v2762_v35 = vpop.f32.mrb[6].mxu1  ;;  %v2675_v58 = vpop.f32.mrb[7].mxu0 }
 0x28a   : > { %3351 = vst [vmem:[#allocation4 + $0x190] sm:$0xff] %v2762_v35  ;;  %3350 = vst [vmem:[#allocation4 + $0x188] sm:$0xff] %v2675_v58  ;;  %v2764_v5 = vpop.f32.mrb[7].mxu1 }
 0x28b   : > { %3352 = vst [vmem:[#allocation4 + $0x198] sm:$0xff] %v2764_v5 }
 0x292   : > { %v3430_v20 = vld [vmem:[#allocation4 + $0x182] ss:$8 sm:$0xf]  ;;  %v3414_v48 = vld [vmem:[#allocation4 + $0x180] ss:$8 sm:$0xf] }
 0x293   : > { %v3422_v50 = vld [vmem:[#allocation4 + $0x181] ss:$8 sm:$0xf] }
 0x2b7   : > { %v8382_v23 = vpop.f32.mrb[8].mxu0 }
 0x2b8   : > { %v8384_v62 = vpop.f32.mrb[8].mxu1  ;;  %v8386_v25 = vpop.f32.mrb[9].mxu0 }
 0x2b9   : > { %v8388_v55 = vpop.f32.mrb[9].mxu1 }
 0x2be   : > { %v2839_v43 = vpop.f32.mrb[10].mxu0  ;;  %v2928_v26 = vpop.f32.mrb[10].mxu1 }
 0x2bf   : > { %v2841_v0 = vpop.f32.mrb[11].mxu0  ;;  %v2930_v9 = vpop.f32.mrb[11].mxu1 }
 0x2c3   : > { %v8390_v19 = vpop.f32.mrb[12].mxu0  ;;  %v8392_v33 = vpop.f32.mrb[12].mxu1 }
 0x2c4   : > { %v8394_v56 = vpop.f32.mrb[13].mxu0  ;;  %v8396_v63 = vpop.f32.mrb[13].mxu1 }
 0x2c7   : > { %v2851_v53 = vpop.f32.mrb[14].mxu0 }
 0x2c8   : > { %3353 = vst [vmem:[#allocation4 + $0x1a0] sm:$0xff] %v2851_v53  ;;  %v2940_v8 = vpop.f32.mrb[14].mxu1  ;;  %v2853_v51 = vpop.f32.mrb[15].mxu0 }
 0x2c9   : > { %3355 = vst [vmem:[#allocation4 + $0x1b0] sm:$0xff] %v2940_v8  ;;  %3354 = vst [vmem:[#allocation4 + $0x1a8] sm:$0xff] %v2853_v51  ;;  %v2942_v31 = vpop.f32.mrb[15].mxu1 }
 0x2ca   : > { %3356 = vst [vmem:[#allocation4 + $0x1b8] sm:$0xff] %v2942_v31 }
 0x2d1   : > { %v3431_v46 = vld [vmem:[#allocation4 + $0x182] ss:$8 sm:$0xf0]  ;;  %v3415_v21 = vld [vmem:[#allocation4 + $0x180] ss:$8 sm:$0xf0] }
 0x2d2   : > { %v3432_v16 = vor.u32 %v3431_v46, %v3430_v20  ;;  %v3423_v13 = vld [vmem:[#allocation4 + $0x181] ss:$8 sm:$0xf0]  ;;  %v3416_v37 = vor.u32 %v3415_v21, %v3414_v48 }
 0x2d3   : > { %v3424_v34 = vor.u32 %v3423_v13, %v3422_v50 }
 0x2d4   : > { %v3437_v27 = vmul.f32 4.0, %v3432_v16 }
 0x2d6   : > { %v3439_v14 = vmax.f32 %v3437_v27, 1.0  ;;  %v3447_v60 = vmax.f32 %v3437_v27, 2.0 }
 0x2d8   : > { %5387 = vrcp.f32 %v3439_v14  ;;  %v3911_v52 = vadd.f32 -1.0, %v3447_v60 }
 0x2da   : > { %5389 = vrcp.f32 %v3911_v52 }
 0x2e2   : > { %v5388_v54 = vpop.eup %5387 }
 0x2e3   : > { %v3442_v17 = vmul.f32 %v5388_v54, %v3416_v37  ;;  %v3445_v29 = vmul.f32 %v5388_v54, %v3424_v34  ;;  %v8475_v54 = vstv %s3480_s4 }
 0x2e4   : > { %v5390_v41 = vpop.eup %5389 }
 0x2e5   : > { %v3452_v38 = vmul.f32 %v5390_v41, %v3447_v60  ;;  %v3455_v24 = vmul.f32 %v3442_v17, %v3442_v17  ;;  %v3497_v22 = vrot.slane %v3442_v17, %v8399_v12  ;;  %v3501_v6 = vrot.slane %v3442_v17, %v8401_v4 }
 0x2e6   : > { %v3505_v7 = vrot.slane %v3442_v17, %v8403_v10  ;;  %v3509_v59 = vrot.slane %v3442_v17, %v8405_v57  ;;  %v3513_v35 = vrot.slane %v3442_v17, %v8407_v40  ;;  %v3517_v58 = vrot.slane %v3442_v17, %v8409_v2 }
 0x2e7   : > { %v3457_v5 = vsub.f32 %v3445_v29, %v3455_v24  ;;  %v3521_v53 = vrot.slane %v3442_v17, %v8411_v1  ;;  %v3525_v8 = vrot.slane %v3442_v17, %v8413_v44  ;;  %v8424_v51 = vmul.f32 %v3497_v22, %v8346_v47 }
 0x2e8   : > { %v8427_v31 = vmul.f32 %v3501_v6, %v8350_v11  ;;  %v8430_v20 = vmul.f32 %v3505_v7, %v8348_v3  ;;  %v8433_v46 = vmul.f32 %v3509_v59, %v8354_v30  ;;  %v8435_v16 = vmul.f32 %v3513_v35, %v2839_v43 }
 0x2e9   : > { %v3459_v27 = vmax.f32 %v3457_v5, 0.0  ;;  %v8437_v14 = vmul.f32 %v3517_v58, %v2841_v0  ;;  %v8439_v60 = vmul.f32 %v3521_v53, %v2928_v26  ;;  %v8441_v52 = vmul.f32 %v3525_v8, %v2930_v9 }
 0x2ea   : > { %v3590_v47 = vsub.f32 %v8322_v15, %v8424_v51  ;;  %v3591_v11 = vsub.f32 %v8333_v39, %v8427_v31  ;;  %v3592_v3 = vsub.f32 %v8331_v32, %v8430_v20  ;;  %v3593_v30 = vsub.f32 %v8335_v36, %v8433_v46 }
 0x2eb   : > { %v3461_v43 = vmul.f32 %v3459_v27, %v3452_v38  ;;  %v3594_v0 = vsub.f32 %v8382_v23, %v8435_v16  ;;  %v3595_v26 = vsub.f32 %v8386_v25, %v8437_v14  ;;  %v3596_v9 = vsub.f32 %v8384_v62, %v8439_v60 }
 0x2ec   : > { %v3597_v15 = vsub.f32 %v8388_v55, %v8441_v52 }
 0x2ed   : > { %v3463_v39 = vadd.f32 1e-05, %v3461_v43 }
 0x2ef   : > { %5391 = vrsqrt.f32 %v3463_v39  ;;  %vm3467_vm8 = vcmp.eq.f32.partialorder %v3463_v39, inf  ;;  %v3470_v50 = vand.u32 2147483648, %v3463_v39  ;;  %vm3469_vm6 = vcmp.eq.f32.partialorder %v3463_v39, 0.0 }
 0x2f9   : > { %v5392_v48 = vpop.eup %5391 }
 0x2fa   : > { %v3466_v32 = vmul.f32 %v5392_v48, %v3463_v39 }
 0x2fc   : > { %v3468_v36 = vsel %vm3467_vm8, %v3463_v39, %v3466_v32 }
 0x2fd   : > { %v3471_v21 = vsel %vm3469_vm6, %v3470_v50, %v3468_v36 }
 0x2fe   : > { %5393 = vlog2.f32 %v3471_v21 }
 0x302   : > { %v8459_v23 = vpop.f32.mrb[16].mxu0 }
 0x303   : > { %v8461_v25 = vpop.f32.mrb[16].mxu1  ;;  %v8463_v13 = vpop.f32.mrb[17].mxu0 }
 0x304   : > { %v8465_v62 = vpop.f32.mrb[17].mxu1 }
 0x306   : > { %v8467_v55 = vpop.f32.mrb[18].mxu0 }
 0x307   : > { %v8469_v18 = vpop.f32.mrb[18].mxu1  ;;  %v8471_v45 = vpop.f32.mrb[19].mxu0 }
 0x308   : > { %v8473_v37 = vpop.f32.mrb[19].mxu1  ;;  %v5394_v34 = vpop.eup %5393 }
 0x309   : > { %v3482_v41 = vmul.f32 0.6931472, %v5394_v34 }
 0x30a   : > { %v8477_v17 = vpop.f32.mrb[20].mxu0 }
 0x30b   : > { %v8479_v29 = vpop.f32.mrb[20].mxu1  ;;  %v8481_v38 = vpop.f32.mrb[21].mxu0  ;;  %v3486_v22 = vmul.f32 %v8475_v54, %v3482_v41 }
 0x30c   : > { %v8483_v24 = vpop.f32.mrb[21].mxu1 }
 0x30d   : > { %v3488_v59 = vmul.f32 1.442695, %v3486_v22 }
 0x30e   : > { %v3029_v6 = vpop.f32.mrb[22].mxu0 }
 0x30f   : > { %v3118_v7 = vpop.f32.mrb[22].mxu1  ;;  %3357 = vst [vmem:[#allocation4 + $0x1c0] sm:$0xff] %v3029_v6  ;;  %v3031_v35 = vpop.f32.mrb[23].mxu0  ;;  %5395 = vpow2.f32 %v3488_v59 }
 0x310   : > { %3359 = vst [vmem:[#allocation4 + $0x1d0] sm:$0xff] %v3118_v7  ;;  %v3120_v58 = vpop.f32.mrb[23].mxu1  ;;  %3358 = vst [vmem:[#allocation4 + $0x1c8] sm:$0xff] %v3031_v35 }
 0x311   : > { %3360 = vst [vmem:[#allocation4 + $0x1d8] sm:$0xff] %v3120_v58 }
 0x318   : > { %v3434_v35 = vld [vmem:[#allocation4 + $0x1c2] ss:$8 sm:$0xf] }
 0x319   : > { %v5396_v5 = vpop.eup %5395 }
 0x31a   : > { %v3611_v53 = vrot.slane %v5396_v5, %v8399_v12  ;;  %v3615_v8 = vrot.slane %v5396_v5, %v8401_v4  ;;  %v3619_v51 = vrot.slane %v5396_v5, %v8403_v10  ;;  %v3623_v31 = vrot.slane %v5396_v5, %v8405_v57 }
 0x31b   : > { %v3627_v20 = vrot.slane %v5396_v5, %v8407_v40  ;;  %v3631_v46 = vrot.slane %v5396_v5, %v8409_v2  ;;  %v3635_v16 = vrot.slane %v5396_v5, %v8411_v1  ;;  %v3639_v27 = vrot.slane %v5396_v5, %v8413_v44 }
 0x31c   : > { %v3688_v14 = vmul.f32 %v3611_v53, %v3590_v47  ;;  %v3689_v60 = vmul.f32 %v3615_v8, %v3591_v11  ;;  %v3690_v52 = vmul.f32 %v3619_v51, %v3592_v3  ;;  %v3691_v43 = vmul.f32 %v3623_v31, %v3593_v30 }
 0x31d   : > { %v3692_v39 = vmul.f32 %v3627_v20, %v3594_v0  ;;  %v3693_v48 = vmul.f32 %v3631_v46, %v3595_v26  ;;  %v3694_v32 = vmul.f32 %v3635_v16, %v3596_v9  ;;  %v3695_v50 = vmul.f32 %v3639_v27, %v3597_v15  ;;  %v3418_v16 = vld [vmem:[#allocation4 + $0x1c0] ss:$8 sm:$0xf]  ;;  %v3426_v27 = vld [vmem:[#allocation4 + $0x1c1] ss:$8 sm:$0xf] }
 0x31e   : > { %v3704_v36 = vadd.f32 %v3688_v14, %v8366_v28  ;;  %v3705_v21 = vadd.f32 %v3689_v60, %v8370_v61  ;;  %v3706_v47 = vadd.f32 %v3690_v52, %v8368_v49  ;;  %v3707_v11 = vadd.f32 %v3691_v43, %v8374_v42 }
 0x31f   : > { %v3708_v3 = vadd.f32 %v3692_v39, %v8390_v19  ;;  %v3709_v30 = vadd.f32 %v3693_v48, %v8394_v56  ;;  %v3710_v0 = vadd.f32 %v3694_v32, %v8392_v33  ;;  %v3711_v26 = vadd.f32 %v3695_v50, %v8396_v63 }
 0x320   : > { %3720 = vst [vmem:[%s5521_s24] sm:$0xff] %v3704_v36  ;;  %3721 = vst [vmem:[%s5521_s24 + $0x8] sm:$0xff] %v3705_v21 }
 0x321   : > { %3722 = vst [vmem:[%s5521_s24 + $0x10] sm:$0xff] %v3706_v47  ;;  %3723 = vst [vmem:[%s5521_s24 + $0x18] sm:$0xff] %v3707_v11 }
 0x322   : > { %3724 = vst [vmem:[%s5521_s24 + $0x20] sm:$0xff] %v3708_v3  ;;  %3725 = vst [vmem:[%s5521_s24 + $0x28] sm:$0xff] %v3709_v30 }
 0x323   : > { %3726 = vst [vmem:[%s5521_s24 + $0x30] sm:$0xff] %v3710_v0  ;;  %3727 = vst [vmem:[%s5521_s24 + $0x38] sm:$0xff] %v3711_v26 }
 0x34c   : > { %v8510_v28 = vpop.f32.mrb[24].mxu0 }
 0x34d   : > { %v8514_v61 = vpop.f32.mrb[25].mxu0 }
 0x34f   : > { %v8512_v49 = vpop.f32.mrb[24].mxu1 }
 0x350   : > { %v8516_v42 = vpop.f32.mrb[25].mxu1  ;;  %v3195_v19 = vpop.f32.mrb[26].mxu0 }
 0x351   : > { %v3197_v56 = vpop.f32.mrb[27].mxu0 }
 0x353   : > { %v3284_v33 = vpop.f32.mrb[26].mxu1 }
 0x354   : > { %v3286_v63 = vpop.f32.mrb[27].mxu1  ;;  %v8518_v9 = vpop.f32.mrb[28].mxu0 }
 0x355   : > { %v8522_v34 = vpop.f32.mrb[29].mxu0 }
 0x357   : > { %v8520_v15 = vpop.f32.mrb[28].mxu1 }
 0x358   : > { %v8524_v41 = vpop.f32.mrb[29].mxu1  ;;  %v3207_v22 = vpop.f32.mrb[30].mxu0 }
 0x359   : > { %3361 = vst [vmem:[#allocation4 + $0x1e0] sm:$0xff] %v3207_v22  ;;  %v3209_v7 = vpop.f32.mrb[31].mxu0 }
 0x35a   : > { %3362 = vst [vmem:[#allocation4 + $0x1e8] sm:$0xff] %v3209_v7 }
 0x35b   : > { %v3296_v6 = vpop.f32.mrb[30].mxu1 }
 0x35c   : > { %3363 = vst [vmem:[#allocation4 + $0x1f0] sm:$0xff] %v3296_v6  ;;  %v3298_v59 = vpop.f32.mrb[31].mxu1 }
 0x35d   : > { %3364 = vst [vmem:[#allocation4 + $0x1f8] sm:$0xff] %v3298_v59 }
 0x364   : > { %v3435_v58 = vld [vmem:[#allocation4 + $0x1c2] ss:$8 sm:$0xf0]  ;;  %v3419_v20 = vld [vmem:[#allocation4 + $0x1c0] ss:$8 sm:$0xf0] }
 0x365   : > { %v3436_v5 = vor.u32 %v3435_v58, %v3434_v35  ;;  %v3427_v46 = vld [vmem:[#allocation4 + $0x1c1] ss:$8 sm:$0xf0]  ;;  %v3420_v14 = vor.u32 %v3419_v20, %v3418_v16 }
 0x366   : > { %v3428_v52 = vor.u32 %v3427_v46, %v3426_v27 }
 0x367   : > { %v3438_v53 = vmul.f32 4.0, %v3436_v5 }
 0x369   : > { %v3440_v8 = vmax.f32 %v3438_v53, 1.0  ;;  %v3448_v51 = vmax.f32 %v3438_v53, 2.0 }
 0x36b   : > { %5397 = vrcp.f32 %v3440_v8  ;;  %v3912_v31 = vadd.f32 -1.0, %v3448_v51 }
 0x36d   : > { %5399 = vrcp.f32 %v3912_v31 }
 0x375   : > { %v5398_v60 = vpop.eup %5397 }
 0x376   : > { %v3444_v43 = vmul.f32 %v5398_v60, %v3420_v14  ;;  %v3446_v48 = vmul.f32 %v5398_v60, %v3428_v52 }
 0x377   : > { %v5400_v39 = vpop.eup %5399 }
 0x378   : > { %v3454_v32 = vmul.f32 %v5400_v39, %v3448_v51  ;;  %v3456_v50 = vmul.f32 %v3444_v43, %v3444_v43  ;;  %v3529_v36 = vrot.slane %v3444_v43, %v8399_v12  ;;  %v3533_v21 = vrot.slane %v3444_v43, %v8401_v4 }
 0x379   : > { %v3537_v47 = vrot.slane %v3444_v43, %v8403_v10  ;;  %v3541_v11 = vrot.slane %v3444_v43, %v8405_v57  ;;  %v3545_v3 = vrot.slane %v3444_v43, %v8407_v40  ;;  %v3549_v30 = vrot.slane %v3444_v43, %v8409_v2 }
 0x37a   : > { %v3458_v0 = vsub.f32 %v3446_v48, %v3456_v50  ;;  %v3553_v26 = vrot.slane %v3444_v43, %v8411_v1  ;;  %v3557_v22 = vrot.slane %v3444_v43, %v8413_v44  ;;  %v3582_v6 = vmul.f32 %v3529_v36, %v8467_v55 }
 0x37b   : > { %v3583_v7 = vmul.f32 %v3533_v21, %v8471_v45  ;;  %v3584_v59 = vmul.f32 %v3537_v47, %v8469_v18  ;;  %v3585_v35 = vmul.f32 %v3541_v11, %v8473_v37  ;;  %v3586_v58 = vmul.f32 %v3545_v3, %v3195_v19 }
 0x37c   : > { %v3460_v5 = vmax.f32 %v3458_v0, 0.0  ;;  %v3587_v53 = vmul.f32 %v3549_v30, %v3197_v56  ;;  %v3588_v8 = vmul.f32 %v3553_v26, %v3284_v33  ;;  %v3589_v51 = vmul.f32 %v3557_v22, %v3286_v63 }
 0x37d   : > { %v3598_v31 = vsub.f32 %v8459_v23, %v3582_v6  ;;  %v3599_v20 = vsub.f32 %v8463_v13, %v3583_v7  ;;  %v3600_v46 = vsub.f32 %v8461_v25, %v3584_v59  ;;  %v3601_v16 = vsub.f32 %v8465_v62, %v3585_v35 }
 0x37e   : > { %v3462_v55 = vmul.f32 %v3460_v5, %v3454_v32  ;;  %v3602_v45 = vsub.f32 %v8510_v28, %v3586_v58  ;;  %v3603_v18 = vsub.f32 %v8514_v61, %v3587_v53  ;;  %v3604_v37 = vsub.f32 %v8512_v49, %v3588_v8 }
 0x37f   : > { %v3605_v19 = vsub.f32 %v8516_v42, %v3589_v51 }
 0x380   : > { %v3464_v56 = vadd.f32 1e-05, %v3462_v55 }
 0x382   : > { %5401 = vrsqrt.f32 %v3464_v56  ;;  %vm3474_vm7 = vcmp.eq.f32.partialorder %v3464_v56, inf  ;;  %v3477_v23 = vand.u32 2147483648, %v3464_v56  ;;  %vm3476_vm9 = vcmp.eq.f32.partialorder %v3464_v56, 0.0 }
 0x38c   : > { %v5402_v33 = vpop.eup %5401 }
 0x38d   : > { %v3473_v63 = vmul.f32 %v5402_v33, %v3464_v56 }
 0x38f   : > { %v3475_v13 = vsel %vm3474_vm7, %v3464_v56, %v3473_v63 }
 0x390   : > { %v3478_v25 = vsel %vm3476_vm9, %v3477_v23, %v3475_v13 }
 0x391   : > { %5403 = vlog2.f32 %v3478_v25 }
 0x39b   : > { %v5404_v62 = vpop.eup %5403 }
 0x39c   : > { %v3484_v27 = vmul.f32 0.6931472, %v5404_v62 }
 0x39e   : > { %v3487_v28 = vmul.f32 %v8475_v54, %v3484_v27 }
 0x3a0   : > { %v3490_v14 = vmul.f32 1.442695, %v3487_v28 }
 0x3a2   : > { %5405 = vpow2.f32 %v3490_v14 }
 0x3ac   : > { %v5406_v61 = vpop.eup %5405 }
 0x3ad   : > { %v3643_v49 = vrot.slane %v5406_v61, %v8399_v12  ;;  %v3647_v42 = vrot.slane %v5406_v61, %v8401_v4  ;;  %v3651_v60 = vrot.slane %v5406_v61, %v8403_v10  ;;  %v3655_v52 = vrot.slane %v5406_v61, %v8405_v57 }
 0x3ae   : > { %v3659_v43 = vrot.slane %v5406_v61, %v8407_v40  ;;  %v3663_v39 = vrot.slane %v5406_v61, %v8409_v2  ;;  %v3667_v48 = vrot.slane %v5406_v61, %v8411_v1  ;;  %v3671_v32 = vrot.slane %v5406_v61, %v8413_v44 }
 0x3af   : > { %v3696_v54 = vmul.f32 %v3643_v49, %v3598_v31  ;;  %v3697_v50 = vmul.f32 %v3647_v42, %v3599_v20  ;;  %v3698_v36 = vmul.f32 %v3651_v60, %v3600_v46  ;;  %v3699_v12 = vmul.f32 %v3655_v52, %v3601_v16 }
 0x3b0   : > { %v3700_v4 = vmul.f32 %v3659_v43, %v3602_v45  ;;  %v3701_v10 = vmul.f32 %v3663_v39, %v3603_v18  ;;  %v3702_v57 = vmul.f32 %v3667_v48, %v3604_v37  ;;  %v3703_v40 = vmul.f32 %v3671_v32, %v3605_v19 }
 0x3b1   : > { %v3712_v2 = vadd.f32 %v3696_v54, %v8477_v17  ;;  %v3713_v1 = vadd.f32 %v3697_v50, %v8481_v38  ;;  %v3714_v44 = vadd.f32 %v3698_v36, %v8479_v29  ;;  %v3715_v21 = vadd.f32 %v3699_v12, %v8483_v24 }
 0x3b2   : > { %v3716_v47 = vadd.f32 %v3700_v4, %v8518_v9  ;;  %v3717_v11 = vadd.f32 %v3701_v10, %v8522_v34  ;;  %v3718_v3 = vadd.f32 %v3702_v57, %v8520_v15  ;;  %v3719_v30 = vadd.f32 %v3703_v40, %v8524_v41 }
 0x3b3   : > { %3728 = vst [vmem:[%s5521_s24 + $0x40] sm:$0xff] %v3712_v2  ;;  %3729 = vst [vmem:[%s5521_s24 + $0x48] sm:$0xff] %v3713_v1 }
 0x3b4   : > { %3730 = vst [vmem:[%s5521_s24 + $0x50] sm:$0xff] %v3714_v44  ;;  %3731 = vst [vmem:[%s5521_s24 + $0x58] sm:$0xff] %v3715_v21 }
 0x3b5   : > { %3732 = vst [vmem:[%s5521_s24 + $0x60] sm:$0xff] %v3716_v47  ;;  %3733 = vst [vmem:[%s5521_s24 + $0x68] sm:$0xff] %v3717_v11 }
 0x3b6   : > { %3734 = vst [vmem:[%s5521_s24 + $0x70] sm:$0xff] %v3718_v3  ;;  %3735 = vst [vmem:[%s5521_s24 + $0x78] sm:$0xff] %v3719_v30 }
 0x3b7 PF: > { %s14_s16 = sadd.s32 1, %s5440_s16   ;;  %s9224_s14 = smov %s5436_s15 }
 0x3b8   : > { %p11_p5 = scmp.ge.s32.totalorder %s14_s16, 4   ;;  %s9225_s15 = smov %s9227_s0 }
 0x3ba   :  { %13 = sbr.rel (!%p11_p5) target bundleno = 2 (0x2), region = 162 }
 0x3c1   :  { %3766 = vsyncmov [#allocation5] }
 0x3c4   :  { %s3767_s5 = vpop.sfrf %3766 }
 0x3c5   :  { %p3915_p6 = scmp.ne.s32.totalorder %s3767_s5, 0 }
 0x3c7   :  { %3771 = shalt.err (%p3915_p6)  }
 0x3c8   :  { %3773 = vsyncmov [#allocation5 + $0x1] }
 0x3cb   :  { %s3774_s6 = vpop.sfrf %3773 }
 0x3cc   :  { %p3916_p7 = scmp.ne.s32.totalorder %s3774_s6, 0 }
 0x3ce   :  { %3778 = shalt.err (%p3916_p7)  }

</bundles_post_ra>
